<compile_context>
chip_gen: v7x
topology: tpu7x:2x2x1
jax: 0.10.0
libtpu: 0.0.40
codegen_flags: <defaults>
</compile_context>

<pallas_src>
import math
import random
import functools

import numpy as np
import jax
import jax.numpy as jnp
from jax.experimental import pallas as pl
from jax.experimental.pallas import tpu as pltpu


# ----------------------------- helpers -----------------------------

def _pick_batch_block(n_batch, seq, max_rows=512):
    """Largest whole-sequence row block (tb * seq rows) that stays <= max_rows
    and is sublane aligned; falls back to the full array (always legal)."""
    if n_batch * seq <= max_rows:
        return n_batch
    for tb in range(n_batch - 1, 0, -1):
        if n_batch % tb == 0 and tb * seq <= max_rows and (tb * seq) % 8 == 0:
            return tb
    return n_batch


# ----------------------------- fused transformer layer -----------------------------

def _fused_encoder_layer_kernel(
        x_ref, bias_ref,
        wqkv_ref, bqkv_ref, wo_ref, bo_ref,
        g1_ref, be1_ref, w1_ref, b1_ref, w2_ref, b2_ref,
        g2_ref, be2_ref,
        o_ref, *, num_heads, eps, in_scale):
    """One full post-norm TransformerEncoderLayer on a [RB, D] row block.

    Rows are (batch, seq)-ordered; attention stays within a sequence via the
    precomputed block-diagonal additive bias (0 inside, -1e30 across)."""
    RB, D = x_ref.shape
    H = num_heads
    dh = D // H

    x = x_ref[...].astype(jnp.float32)
    if in_scale != 1.0:
        x = x * in_scale                                  # folded sqrt(d_model)

    # fused QKV projection (bf16 operands, fp32 accumulation)
    qkv = jnp.dot(x.astype(jnp.bfloat16), wqkv_ref[...],
                  preferred_element_type=jnp.float32) + bqkv_ref[...]

    bias = bias_ref[...]                                  # [RB, RB]
    wo = wo_ref[...]                                      # [D, D] bf16
    inv_sqrt_dh = 1.0 / math.sqrt(dh)

    attn = None
    for h in range(H):
        q = qkv[:, h * dh:(h + 1) * dh] * inv_sqrt_dh
        k = qkv[:, D + h * dh:D + (h + 1) * dh]
        v = qkv[:, 2 * D + h * dh:2 * D + (h + 1) * dh]
        # scores: q @ k^T (tiny dh contraction, kept fp32) + block-diag mask
        s = jax.lax.dot_general(q, k, (((1,), (1,)), ((), ())),
                                preferred_element_type=jnp.float32) + bias
        m = jnp.max(s, axis=-1, keepdims=True)
        p = jnp.exp(s - m)
        p = p * pl.reciprocal(jnp.sum(p, axis=-1, keepdims=True), approx=True)
        oh = jnp.dot(p, v, preferred_element_type=jnp.float32)        # [RB, dh]
        # head-merge folded into the output projection: concat_h(oh) @ Wo
        contrib = jnp.dot(oh.astype(jnp.bfloat16), wo[h * dh:(h + 1) * dh, :],
                          preferred_element_type=jnp.float32)
        attn = contrib if attn is None else attn + contrib
    attn = attn + bo_ref[...]

    # residual + LayerNorm 1 (fused)
    h1 = x + attn
    mu = jnp.mean(h1, axis=-1, keepdims=True)
    var = jnp.mean(jnp.square(h1 - mu), axis=-1, keepdims=True)
    h1 = (h1 - mu) * jax.lax.rsqrt(var + eps) * g1_ref[...] + be1_ref[...]

    # FFN (bf16 operands, fp32 accumulation)
    f = jnp.dot(h1.astype(jnp.bfloat16), w1_ref[...],
                preferred_element_type=jnp.float32) + b1_ref[...]
    f = jnp.maximum(f, 0.0)
    f = jnp.dot(f.astype(jnp.bfloat16), w2_ref[...],
                preferred_element_type=jnp.float32) + b2_ref[...]

    # residual + LayerNorm 2 (fused)
    h2 = h1 + f
    mu = jnp.mean(h2, axis=-1, keepdims=True)
    var = jnp.mean(jnp.square(h2 - mu), axis=-1, keepdims=True)
    y = (h2 - mu) * jax.lax.rsqrt(var + eps) * g2_ref[...] + be2_ref[...]

    o_ref[...] = y.astype(o_ref.dtype)


def fused_encoder_layer(x_rows, p, *, seq, num_heads, in_scale):
    """x_rows: [n_batch * seq, D] fp32, (batch, seq)-ordered rows."""
    R, D = x_rows.shape
    n_batch = R // seq
    tb = _pick_batch_block(n_batch, seq)
    rb = tb * seq
    grid = (R // rb,)

    # block-diagonal additive attention bias, identical for every row block
    eye = np.kron(np.eye(tb, dtype=np.float32), np.ones((seq, seq), np.float32))
    attn_bias = jnp.asarray((eye - 1.0) * 1e30)

    weights = (p["wqkv"], p["bqkv"], p["wo"], p["bo"],
               p["ln1_g"], p["ln1_b"], p["w1"], p["b1"],
               p["w2"], p["b2"], p["ln2_g"], p["ln2_b"])
    w_specs = [pl.BlockSpec(w.shape, lambda i: (0, 0)) for w in weights]

    F = p["w1"].shape[1]
    flops = R * D * (8 * D + 4 * F + 4 * rb)
    w_bytes = sum(int(np.prod(w.shape)) * w.dtype.itemsize for w in weights)
    cost = pl.CostEstimate(flops=int(flops),
                           transcendentals=int(num_heads * R * rb),
                           bytes_accessed=int(8 * R * D + w_bytes + 4 * rb * rb))

    return pl.pallas_call(
        functools.partial(_fused_encoder_layer_kernel,
                          num_heads=num_heads, eps=1e-5, in_scale=in_scale),
        grid=grid,
        out_shape=jax.ShapeDtypeStruct((R, D), jnp.float32),
        in_specs=[pl.BlockSpec((rb, D), lambda i: (i, 0)),
                  pl.BlockSpec((rb, rb), lambda i: (0, 0))] + w_specs,
        out_specs=pl.BlockSpec((rb, D), lambda i: (i, 0)),
        compiler_params=pltpu.CompilerParams(dimension_semantics=("parallel",)),
        cost_estimate=cost,
    )(x_rows, attn_bias, *weights)


def transformer_layers(src, layers_params, num_heads, d_model):
    """TransformerLayers.forward: src [B, N, L, D] -> [B, N, L, D]."""
    B, N, L, D = src.shape
    x = src.reshape(B * N * L, D)
    for li, p in enumerate(layers_params):
        x = fused_encoder_layer(
            x, p, seq=L, num_heads=num_heads,
            in_scale=math.sqrt(d_model) if li == 0 else 1.0)
    return x.reshape(B, N, L, D)


# ----------------------------- patch embedding + positional add -----------------------------

def _patch_embed_kernel(x_ref, w_ref, b_ref, pos_ref, o_ref):
    y = jnp.dot(x_ref[...].astype(jnp.bfloat16), w_ref[...],
                preferred_element_type=jnp.float32)
    o_ref[...] = (y + b_ref[...] + pos_ref[...]).astype(o_ref.dtype)


def patch_embed_pos(xp_rows, w, b, pos_rows, batch):
    """xp_rows: [B*N*P, C*ps]; pos_rows: [N*P, D] (shared across batch)."""
    R, K = xp_rows.shape
    D = w.shape[1]
    rows_b = R // batch
    if batch > 1 and rows_b % 8 != 0:
        pos_full = jnp.broadcast_to(pos_rows[None], (batch, rows_b, D)).reshape(R, D)
        return pl.pallas_call(
            _patch_embed_kernel,
            out_shape=jax.ShapeDtypeStruct((R, D), jnp.float32),
            in_specs=[pl.BlockSpec(memory_space=pltpu.MemorySpace.VMEM)] * 4,
            out_specs=pl.BlockSpec(memory_space=pltpu.MemorySpace.VMEM),
        )(xp_rows, w, b, pos_full)
    return pl.pallas_call(
        _patch_embed_kernel,
        grid=(batch,),
        out_shape=jax.ShapeDtypeStruct((R, D), jnp.float32),
        in_specs=[pl.BlockSpec((rows_b, K), lambda i: (i, 0)),
                  pl.BlockSpec(w.shape, lambda i: (0, 0)),
                  pl.BlockSpec(b.shape, lambda i: (0, 0)),
                  pl.BlockSpec(pos_rows.shape, lambda i: (0, 0))],
        out_specs=pl.BlockSpec((rows_b, D), lambda i: (i, 0)),
        compiler_params=pltpu.CompilerParams(dimension_semantics=("parallel",)),
    )(xp_rows, w, b, pos_rows)


# ----------------------------- fused LayerNorm + Linear (+ optional add) -----------------------------

def _ln_linear_kernel(x_ref, g_ref, bln_ref, w_ref, wb_ref, *rest, eps):
    o_ref = rest[-1]
    x = x_ref[...].astype(jnp.float32)
    mu = jnp.mean(x, axis=-1, keepdims=True)
    var = jnp.mean(jnp.square(x - mu), axis=-1, keepdims=True)
    xn = (x - mu) * jax.lax.rsqrt(var + eps) * g_ref[...] + bln_ref[...]
    y = jnp.dot(xn.astype(jnp.bfloat16), w_ref[...],
                preferred_element_type=jnp.float32) + wb_ref[...]
    if len(rest) == 2:                                   # fused positional add
        y = y + rest[0][...]
    o_ref[...] = y.astype(o_ref.dtype)


def ln_linear_add(x_rows, g, bln, w, wb, add_rows, batch, eps=1e-5):
    """LayerNorm -> Linear -> + add_rows (add shared across the batch dim)."""
    R, D = x_rows.shape
    out_dim = w.shape[1]
    rows_b = R // batch
    kern = functools.partial(_ln_linear_kernel, eps=eps)
    if batch > 1 and rows_b % 8 != 0:
        add_full = jnp.broadcast_to(add_rows[None], (batch, rows_b, out_dim)).reshape(R, out_dim)
        return pl.pallas_call(
            kern,
            out_shape=jax.ShapeDtypeStruct((R, out_dim), jnp.float32),
            in_specs=[pl.BlockSpec(memory_space=pltpu.MemorySpace.VMEM)] * 6,
            out_specs=pl.BlockSpec(memory_space=pltpu.MemorySpace.VMEM),
        )(x_rows, g, bln, w, wb, add_full)
    return pl.pallas_call(
        kern,
        grid=(batch,),
        out_shape=jax.ShapeDtypeStruct((R, out_dim), jnp.float32),
        in_specs=[pl.BlockSpec((rows_b, D), lambda i: (i, 0)),
                  pl.BlockSpec(g.shape, lambda i: (0, 0)),
                  pl.BlockSpec(bln.shape, lambda i: (0, 0)),
                  pl.BlockSpec(w.shape, lambda i: (0, 0)),
                  pl.BlockSpec(wb.shape, lambda i: (0, 0)),
                  pl.BlockSpec(add_rows.shape, lambda i: (0, 0))],
        out_specs=pl.BlockSpec((rows_b, out_dim), lambda i: (i, 0)),
        compiler_params=pltpu.CompilerParams(dimension_semantics=("parallel",)),
    )(x_rows, g, bln, w, wb, add_rows)


def ln_linear(x_rows, g, bln, w, wb, eps=1e-5):
    """LayerNorm -> Linear over rows (decoder_norm + output_layer)."""
    R, D = x_rows.shape
    out_dim = w.shape[1]
    rb = _pick_batch_block(R, 1)
    kern = functools.partial(_ln_linear_kernel, eps=eps)
    return pl.pallas_call(
        kern,
        grid=(R // rb,),
        out_shape=jax.ShapeDtypeStruct((R, out_dim), jnp.float32),
        in_specs=[pl.BlockSpec((rb, D), lambda i: (i, 0)),
                  pl.BlockSpec(g.shape, lambda i: (0, 0)),
                  pl.BlockSpec(bln.shape, lambda i: (0, 0)),
                  pl.BlockSpec(w.shape, lambda i: (0, 0)),
                  pl.BlockSpec(wb.shape, lambda i: (0, 0))],
        out_specs=pl.BlockSpec((rb, out_dim), lambda i: (i, 0)),
        compiler_params=pltpu.CompilerParams(dimension_semantics=("parallel",)),
    )(x_rows, g, bln, w, wb)


# ----------------------------- parameter init (weights pre-transposed, bf16) -----------------------------

def _w(key, shape, scale=0.02):
    return jax.random.normal(key, shape, jnp.float32) * scale


def _wT(key, shape_torch, scale=0.02):
    """torch nn.Linear weight [out, in] -> pre-transposed bf16 [in, out]."""
    return _w(key, shape_torch, scale).T.astype(jnp.bfloat16)


def init_layer_params(key, d, ffn):
    ks = jax.random.split(key, 4)
    return dict(
        wqkv=_wT(ks[0], (3 * d, d)), bqkv=jnp.zeros((1, 3 * d), jnp.float32),
        wo=_wT(ks[1], (d, d)), bo=jnp.zeros((1, d), jnp.float32),
        w1=_wT(ks[2], (ffn, d)), b1=jnp.zeros((1, ffn), jnp.float32),
        w2=_wT(ks[3], (d, ffn)), b2=jnp.zeros((1, d), jnp.float32),
        ln1_g=jnp.ones((1, d), jnp.float32), ln1_b=jnp.zeros((1, d), jnp.float32),
        ln2_g=jnp.ones((1, d), jnp.float32), ln2_b=jnp.zeros((1, d), jnp.float32),
    )


def init_params(key, cfg, num_nodes, num_patches):
    D, ps, C = cfg["d_model"], cfg["patch_size"], cfg["feat_dims"][0]
    ffn = D * cfg["mlp_layer"]
    n_keys = 5 + cfg["encoder_layer"] + cfg["decoder_layer"]
    keys = list(jax.random.split(key, n_keys))
    it = iter(keys)
    params = dict(
        patch_w=_wT(next(it), (D, C * ps)),              # Conv2d(kernel=(ps,1)) == per-patch linear
        patch_b=jnp.zeros((1, D), jnp.float32),
        pos_emb=_w(next(it), (num_nodes, num_patches, D)),
        mask_token=_w(next(it), (1, 1, 1, D)),
        enc_norm_g=jnp.ones((1, D), jnp.float32), enc_norm_b=jnp.zeros((1, D), jnp.float32),
        e2d_w=_wT(next(it), (D, D)), e2d_b=jnp.zeros((1, D), jnp.float32),
        dec_norm_g=jnp.ones((1, D), jnp.float32), dec_norm_b=jnp.zeros((1, D), jnp.float32),
        out_w=_wT(next(it), (ps, D)), out_b=jnp.zeros((1, ps), jnp.float32),
    )
    params["encoder"] = [init_layer_params(next(it), D, ffn) for _ in range(cfg["encoder_layer"])]
    params["decoder"] = [init_layer_params(next(it), D, ffn) for _ in range(cfg["decoder_layer"])]
    return params


# ----------------------------- SFormer forward (pretrain) -----------------------------

def mask_generator(num_tokens, mask_ratio):
    mask = list(range(int(num_tokens)))
    random.shuffle(mask)
    mask_len = int(num_tokens * mask_ratio)
    masked = sorted(mask[:mask_len])
    unmasked = sorted(mask[mask_len:])
    return unmasked, masked


def sformer_forward(history_data, params, cfg, unmasked_idx, masked_idx):
    ps, D, H = cfg["patch_size"], cfg["d_model"], cfg["num_heads"]
    hd = jnp.transpose(history_data, (0, 2, 3, 1))            # [B, N, C, L]
    B, N, C, L = hd.shape
    P = L // ps
    U, M = len(unmasked_idx), len(masked_idx)
    u = jnp.asarray(unmasked_idx, jnp.int32)
    m = jnp.asarray(masked_idx, jnp.int32)

    # ---- fused patch embedding + bias + positional add ----
    xp = hd.reshape(B, N, C, P, ps)
    xp = jnp.transpose(xp, (0, 1, 3, 2, 4)).reshape(B * N * P, C * ps)
    pos_rows = params["pos_emb"][:N, :P].reshape(N * P, D)
    patches = patch_embed_pos(xp, params["patch_w"], params["patch_b"],
                              pos_rows, B).reshape(B, N, P, D)

    # ---- spatial masking + encoder (fused layers) ----
    enc_in = jnp.transpose(patches[:, u], (0, 2, 1, 3))        # [B, P, U, D]
    hidden = transformer_layers(enc_in, params["encoder"], H, D)

    # ---- bridge: encoder_norm + raw .view(B,U,P,D) + enc2dec + pos[unmasked] add ----
    # the torch .view does not move data, so the flat row order is unchanged
    pos_u_rows = params["pos_emb"][u].reshape(U * P, D)
    hs_unmasked = ln_linear_add(hidden.reshape(B * P * U, D),
                                params["enc_norm_g"], params["enc_norm_b"],
                                params["e2d_w"], params["e2d_b"],
                                pos_u_rows, B).reshape(B, U, P, D)

    hs_masked = params["pos_emb"][m][None] + params["mask_token"]   # [1, M, P, D]
    hs_masked = jnp.broadcast_to(hs_masked, (B, M, P, D))

    # ---- build full tensor: static gather instead of scatter ----
    cat = jnp.concatenate([hs_masked, hs_unmasked], axis=1)    # node order: masked + unmasked
    inv = np.argsort(np.asarray(list(masked_idx) + list(unmasked_idx)))
    full = jnp.take(cat, jnp.asarray(inv, jnp.int32), axis=1)  # [B, N, P, D]

    full = jnp.transpose(full, (0, 2, 1, 3))                   # [B, P, N, D]
    full = transformer_layers(full, params["decoder"], H, D)   # [B, P, N, D]

    # ---- fused decoder_norm + output_layer ----
    recon = ln_linear(full.reshape(B * P * N, D),
                      params["dec_norm_g"], params["dec_norm_b"],
                      params["out_w"], params["out_b"]).reshape(B, P, N, ps)
    recon = jnp.transpose(recon, (0, 2, 1, 3))                 # [B, N, P, ps]

    # ---- reconstructed masked tokens + labels ----
    rec_masked = recon[:, m].reshape(B, M, -1)
    lbl = jnp.transpose(hd, (0, 3, 1, 2))                      # [B, L, N, C]
    lbl = lbl.reshape(B, P, ps, N, C)
    lbl = jnp.transpose(lbl, (0, 1, 3, 4, 2))                  # unfold(1, ps, ps): [B, P, N, C, ps]
    lbl = jnp.transpose(lbl, (0, 2, 1, 3, 4))                  # [B, N, P, C, ps]
    if C == 1:
        lbl = lbl[..., 0, :]                                   # squeeze(-2)
    lbl_masked = lbl[:, m].reshape(B, M, -1)
    return rec_masked, lbl_masked


# ----------------------------- main -----------------------------

if __name__ == "__main__":
    cfg = dict(
        mode="pretrain", patch_size=4, feat_dims=[1], d_model=32, num_heads=4,
        mask_ratio=0.5, encoder_layer=2, decoder_layer=1, mlp_layer=2,
        spatial=True, dropout=0.1,
    )
    B, L_total, N, C = 2, 16, 8, 1
    P = L_total // cfg["patch_size"]

    key = jax.random.PRNGKey(0)
    k_in, k_p = jax.random.split(key)
    history_data = jax.random.normal(k_in, (B, L_total, N, C), jnp.float32)
    params = init_params(k_p, cfg, N, P)

    random.seed(0)
    unmasked_idx, masked_idx = mask_generator(N, cfg["mask_ratio"])

    fwd = jax.jit(functools.partial(sformer_forward, cfg=cfg,
                                    unmasked_idx=tuple(unmasked_idx),
                                    masked_idx=tuple(masked_idx)))
    rec_masked, lbl_masked = fwd(history_data, params)
    jax.block_until_ready((rec_masked, lbl_masked))

    assert rec_masked.shape == (B, len(masked_idx), P * cfg["patch_size"])
    assert lbl_masked.shape == (B, len(masked_idx), P * cfg["patch_size"])
    print("KERNEL_OK")
</pallas_src>

<mosaic_0001>
module attributes {stable_mosaic.version = 11 : i64} {
  func.func @_patch_embed_kernel(%arg0: i32, %arg1: memref<32x4xf32, #tpu.memory_space<vmem>>, %arg2: memref<4x32xbf16, #tpu.memory_space<vmem>>, %arg3: memref<1x32xf32, #tpu.memory_space<vmem>>, %arg4: memref<32x32xf32, #tpu.memory_space<vmem>>, %arg5: memref<32x32xf32, #tpu.memory_space<vmem>>) attributes {dimension_semantics = [#tpu.dimension_semantics<parallel>], iteration_bounds = array<i64: 2>, scalar_prefetch = 0 : i64, scratch_operands = 0 : i64, tpu.core_type = #tpu.core_type<tc>, window_params = [{transform_indices = @transform_0, window_bounds = array<i64: 32, 4>}, {pipeline_mode = #tpu.pipeline_mode<synchronous>, transform_indices = @transform_1, window_bounds = array<i64: 4, 32>}, {pipeline_mode = #tpu.pipeline_mode<synchronous>, transform_indices = @transform_2, window_bounds = array<i64: 1, 32>}, {pipeline_mode = #tpu.pipeline_mode<synchronous>, transform_indices = @transform_3, window_bounds = array<i64: 32, 32>}, {transform_indices = @transform_4, window_bounds = array<i64: 32, 32>}]} {
    %c0 = arith.constant 0 : index
    %c0_0 = arith.constant 0 : index
    %0 = vector.load %arg1[%c0, %c0_0] : memref<32x4xf32, #tpu.memory_space<vmem>>, vector<32x4xf32>
    %1 = arith.truncf %0 : vector<32x4xf32> to vector<32x4xbf16>
    %c0_1 = arith.constant 0 : index
    %c0_2 = arith.constant 0 : index
    %2 = vector.load %arg2[%c0_1, %c0_2] : memref<4x32xbf16, #tpu.memory_space<vmem>>, vector<4x32xbf16>
    %cst = arith.constant dense<0.000000e+00> : vector<32x32xf32>
    %3 = tpu.matmul %1, %2, %cst {dimension_numbers = #tpu.dot_dimension_numbers<[1], [0], [0], [1], [0, 0, 1, 1], [], []>} : vector<32x4xbf16>, vector<4x32xbf16>, vector<32x32xf32> -> vector<32x32xf32>
    %c0_3 = arith.constant 0 : index
    %c0_4 = arith.constant 0 : index
    %4 = vector.load %arg3[%c0_3, %c0_4] : memref<1x32xf32, #tpu.memory_space<vmem>>, vector<1x32xf32>
    %5 = vector.broadcast %4 : vector<1x32xf32> to vector<32x32xf32>
    %6 = arith.addf %3, %5 : vector<32x32xf32>
    %c0_5 = arith.constant 0 : index
    %c0_6 = arith.constant 0 : index
    %7 = vector.load %arg4[%c0_5, %c0_6] : memref<32x32xf32, #tpu.memory_space<vmem>>, vector<32x32xf32>
    %8 = arith.addf %6, %7 : vector<32x32xf32>
    %c0_7 = arith.constant 0 : index
    %c0_8 = arith.constant 0 : index
    %9 = vector.load %arg5[%c0_7, %c0_8] : memref<32x32xf32, #tpu.memory_space<vmem>>, vector<32x32xf32>
    tpu.vector_store %arg5[%c0_7, %c0_8], %8 {strides = array<i32>} : memref<32x32xf32, #tpu.memory_space<vmem>>, vector<32x32xf32>,
    return
  }
  func.func @transform_0(%arg0: i32) -> (i32, i32) {
    %c0_i32 = arith.constant 0 : i32
    %c0_i32_0 = arith.constant 0 : i32
    return %arg0, %c0_i32 : i32, i32
  }
  func.func @transform_1(%arg0: i32) -> (i32, i32) {
    %c0_i32 = arith.constant 0 : i32
    %c0_i32_0 = arith.constant 0 : i32
    %c0_i32_1 = arith.constant 0 : i32
    return %c0_i32, %c0_i32_0 : i32, i32
  }
  func.func @transform_2(%arg0: i32) -> (i32, i32) {
    %c0_i32 = arith.constant 0 : i32
    %c0_i32_0 = arith.constant 0 : i32
    %c0_i32_1 = arith.constant 0 : i32
    return %c0_i32, %c0_i32_0 : i32, i32
  }
  func.func @transform_3(%arg0: i32) -> (i32, i32) {
    %c0_i32 = arith.constant 0 : i32
    %c0_i32_0 = arith.constant 0 : i32
    %c0_i32_1 = arith.constant 0 : i32
    return %c0_i32, %c0_i32_0 : i32, i32
  }
  func.func @transform_4(%arg0: i32) -> (i32, i32) {
    %c0_i32 = arith.constant 0 : i32
    %c0_i32_0 = arith.constant 0 : i32
    return %arg0, %c0_i32 : i32, i32
  }
}

module attributes {stable_mosaic.version = 11 : i64} {
  func.func @_fused_encoder_layer_kernel(%arg0: i32, %arg1: memref<32x32xf32, #tpu.memory_space<vmem>>, %arg2: memref<32x32xf32, #tpu.memory_space<vmem>>, %arg3: memref<32x96xbf16, #tpu.memory_space<vmem>>, %arg4: memref<1x96xf32, #tpu.memory_space<vmem>>, %arg5: memref<32x32xbf16, #tpu.memory_space<vmem>>, %arg6: memref<1x32xf32, #tpu.memory_space<vmem>>, %arg7: memref<1x32xf32, #tpu.memory_space<vmem>>, %arg8: memref<1x32xf32, #tpu.memory_space<vmem>>, %arg9: memref<32x64xbf16, #tpu.memory_space<vmem>>, %arg10: memref<1x64xf32, #tpu.memory_space<vmem>>, %arg11: memref<64x32xbf16, #tpu.memory_space<vmem>>, %arg12: memref<1x32xf32, #tpu.memory_space<vmem>>, %arg13: memref<1x32xf32, #tpu.memory_space<vmem>>, %arg14: memref<1x32xf32, #tpu.memory_space<vmem>>, %arg15: memref<32x32xf32, #tpu.memory_space<vmem>>) attributes {dimension_semantics = [#tpu.dimension_semantics<parallel>], iteration_bounds = array<i64: 1>, scalar_prefetch = 0 : i64, scratch_operands = 0 : i64, tpu.core_type = #tpu.core_type<tc>, window_params = [{transform_indices = @transform_0, window_bounds = array<i64: 32, 32>}, {pipeline_mode = #tpu.pipeline_mode<synchronous>, transform_indices = @transform_1, window_bounds = array<i64: 32, 32>}, {pipeline_mode = #tpu.pipeline_mode<synchronous>, transform_indices = @transform_2, window_bounds = array<i64: 32, 96>}, {pipeline_mode = #tpu.pipeline_mode<synchronous>, transform_indices = @transform_3, window_bounds = array<i64: 1, 96>}, {pipeline_mode = #tpu.pipeline_mode<synchronous>, transform_indices = @transform_4, window_bounds = array<i64: 32, 32>}, {pipeline_mode = #tpu.pipeline_mode<synchronous>, transform_indices = @transform_5, window_bounds = array<i64: 1, 32>}, {pipeline_mode = #tpu.pipeline_mode<synchronous>, transform_indices = @transform_6, window_bounds = array<i64: 1, 32>}, {pipeline_mode = #tpu.pipeline_mode<synchronous>, transform_indices = @transform_7, window_bounds = array<i64: 1, 32>}, {pipeline_mode = #tpu.pipeline_mode<synchronous>, transform_indices = @transform_8, window_bounds = array<i64: 32, 64>}, {pipeline_mode = #tpu.pipeline_mode<synchronous>, transform_indices = @transform_9, window_bounds = array<i64: 1, 64>}, {pipeline_mode = #tpu.pipeline_mode<synchronous>, transform_indices = @transform_10, window_bounds = array<i64: 64, 32>}, {pipeline_mode = #tpu.pipeline_mode<synchronous>, transform_indices = @transform_11, window_bounds = array<i64: 1, 32>}, {pipeline_mode = #tpu.pipeline_mode<synchronous>, transform_indices = @transform_12, window_bounds = array<i64: 1, 32>}, {pipeline_mode = #tpu.pipeline_mode<synchronous>, transform_indices = @transform_13, window_bounds = array<i64: 1, 32>}, {transform_indices = @transform_14, window_bounds = array<i64: 32, 32>}]} {
    %c0 = arith.constant 0 : index
    %c0_0 = arith.constant 0 : index
    %0 = vector.load %arg1[%c0, %c0_0] : memref<32x32xf32, #tpu.memory_space<vmem>>, vector<32x32xf32>
    %cst = arith.constant 5.65685415 : f32
    %1 = vector.broadcast %cst : f32 to vector<32x32xf32>
    %2 = arith.mulf %0, %1 : vector<32x32xf32>
    %3 = arith.truncf %2 : vector<32x32xf32> to vector<32x32xbf16>
    %c0_1 = arith.constant 0 : index
    %c0_2 = arith.constant 0 : index
    %4 = vector.load %arg3[%c0_1, %c0_2] : memref<32x96xbf16, #tpu.memory_space<vmem>>, vector<32x96xbf16>
    %cst_3 = arith.constant dense<0.000000e+00> : vector<32x96xf32>
    %5 = tpu.matmul %3, %4, %cst_3 {dimension_numbers = #tpu.dot_dimension_numbers<[1], [0], [0], [1], [0, 0, 1, 1], [], []>} : vector<32x32xbf16>, vector<32x96xbf16>, vector<32x96xf32> -> vector<32x96xf32>
    %c0_4 = arith.constant 0 : index
    %c0_5 = arith.constant 0 : index
    %6 = vector.load %arg4[%c0_4, %c0_5] : memref<1x96xf32, #tpu.memory_space<vmem>>, vector<1x96xf32>
    %7 = vector.broadcast %6 : vector<1x96xf32> to vector<32x96xf32>
    %8 = arith.addf %5, %7 : vector<32x96xf32>
    %c0_6 = arith.constant 0 : index
    %c0_7 = arith.constant 0 : index
    %9 = vector.load %arg2[%c0_6, %c0_7] : memref<32x32xf32, #tpu.memory_space<vmem>>, vector<32x32xf32>
    %c0_8 = arith.constant 0 : index
    %c0_9 = arith.constant 0 : index
    %10 = vector.load %arg5[%c0_8, %c0_9] : memref<32x32xbf16, #tpu.memory_space<vmem>>, vector<32x32xbf16>
    %11 = vector.extract_strided_slice %8 {offsets = [0, 0], sizes = [32, 8], strides = [1, 1]} : vector<32x96xf32> to vector<32x8xf32>
    %cst_10 = arith.constant 0.353553385 : f32
    %12 = vector.broadcast %cst_10 : f32 to vector<32x8xf32>
    %13 = arith.mulf %11, %12 : vector<32x8xf32>
    %14 = vector.extract_strided_slice %8 {offsets = [0, 32], sizes = [32, 8], strides = [1, 1]} : vector<32x96xf32> to vector<32x8xf32>
    %15 = vector.extract_strided_slice %8 {offsets = [0, 64], sizes = [32, 8], strides = [1, 1]} : vector<32x96xf32> to vector<32x8xf32>
    %cst_11 = arith.constant dense<0.000000e+00> : vector<32x32xf32>
    %16 = tpu.matmul %13, %14, %cst_11 {dimension_numbers = #tpu.dot_dimension_numbers<[1], [1], [0], [0], [0, 0, 1, 0], [], []>} : vector<32x8xf32>, vector<32x8xf32>, vector<32x32xf32> -> vector<32x32xf32>
    %17 = arith.addf %16, %9 : vector<32x32xf32>
    %cst_12 = arith.constant dense<0xFF800000> : vector<32xf32>
    %18 = vector.multi_reduction <maximumf>, %17, %cst_12 [1] : vector<32x32xf32> to vector<32xf32>
    %19 = vector.shape_cast %18 : vector<32xf32> to vector<32x1xf32>
    %20 = vector.broadcast %19 : vector<32x1xf32> to vector<32x32xf32>
    %21 = arith.subf %17, %20 : vector<32x32xf32>
    %22 = math.exp %21 : vector<32x32xf32>
    %cst_13 = arith.constant dense<0.000000e+00> : vector<32xf32>
    %23 = vector.multi_reduction <add>, %22, %cst_13 [1] : vector<32x32xf32> to vector<32xf32>
    %24 = vector.shape_cast %23 : vector<32xf32> to vector<32x1xf32>
    %25 = tpu.reciprocal %24 {approx = true} : vector<32x1xf32> -> vector<32x1xf32>
    %26 = vector.broadcast %25 : vector<32x1xf32> to vector<32x32xf32>
    %27 = arith.mulf %22, %26 : vector<32x32xf32>
    %cst_14 = arith.constant dense<0.000000e+00> : vector<32x8xf32>
    %28 = tpu.matmul %27, %15, %cst_14 {dimension_numbers = #tpu.dot_dimension_numbers<[1], [0], [0], [1], [0, 0, 1, 1], [], []>} : vector<32x32xf32>, vector<32x8xf32>, vector<32x8xf32> -> vector<32x8xf32>
    %29 = arith.truncf %28 : vector<32x8xf32> to vector<32x8xbf16>
    %30 = vector.extract_strided_slice %10 {offsets = [0, 0], sizes = [8, 32], strides = [1, 1]} : vector<32x32xbf16> to vector<8x32xbf16>
    %cst_15 = arith.constant dense<0.000000e+00> : vector<32x32xf32>
    %31 = tpu.matmul %29, %30, %cst_15 {dimension_numbers = #tpu.dot_dimension_numbers<[1], [0], [0], [1], [0, 0, 1, 1], [], []>} : vector<32x8xbf16>, vector<8x32xbf16>, vector<32x32xf32> -> vector<32x32xf32>
    %32 = vector.extract_strided_slice %8 {offsets = [0, 8], sizes = [32, 8], strides = [1, 1]} : vector<32x96xf32> to vector<32x8xf32>
    %cst_16 = arith.constant 0.353553385 : f32
    %33 = vector.broadcast %cst_16 : f32 to vector<32x8xf32>
    %34 = arith.mulf %32, %33 : vector<32x8xf32>
    %35 = vector.extract_strided_slice %8 {offsets = [0, 40], sizes = [32, 8], strides = [1, 1]} : vector<32x96xf32> to vector<32x8xf32>
    %36 = vector.extract_strided_slice %8 {offsets = [0, 72], sizes = [32, 8], strides = [1, 1]} : vector<32x96xf32> to vector<32x8xf32>
    %cst_17 = arith.constant dense<0.000000e+00> : vector<32x32xf32>
    %37 = tpu.matmul %34, %35, %cst_17 {dimension_numbers = #tpu.dot_dimension_numbers<[1], [1], [0], [0], [0, 0, 1, 0], [], []>} : vector<32x8xf32>, vector<32x8xf32>, vector<32x32xf32> -> vector<32x32xf32>
    %38 = arith.addf %37, %9 : vector<32x32xf32>
    %cst_18 = arith.constant dense<0xFF800000> : vector<32xf32>
    %39 = vector.multi_reduction <maximumf>, %38, %cst_18 [1] : vector<32x32xf32> to vector<32xf32>
    %40 = vector.shape_cast %39 : vector<32xf32> to vector<32x1xf32>
    %41 = vector.broadcast %40 : vector<32x1xf32> to vector<32x32xf32>
    %42 = arith.subf %38, %41 : vector<32x32xf32>
    %43 = math.exp %42 : vector<32x32xf32>
    %cst_19 = arith.constant dense<0.000000e+00> : vector<32xf32>
    %44 = vector.multi_reduction <add>, %43, %cst_19 [1] : vector<32x32xf32> to vector<32xf32>
    %45 = vector.shape_cast %44 : vector<32xf32> to vector<32x1xf32>
    %46 = tpu.reciprocal %45 {approx = true} : vector<32x1xf32> -> vector<32x1xf32>
    %47 = vector.broadcast %46 : vector<32x1xf32> to vector<32x32xf32>
    %48 = arith.mulf %43, %47 : vector<32x32xf32>
    %cst_20 = arith.constant dense<0.000000e+00> : vector<32x8xf32>
    %49 = tpu.matmul %48, %36, %cst_20 {dimension_numbers = #tpu.dot_dimension_numbers<[1], [0], [0], [1], [0, 0, 1, 1], [], []>} : vector<32x32xf32>, vector<32x8xf32>, vector<32x8xf32> -> vector<32x8xf32>
    %50 = arith.truncf %49 : vector<32x8xf32> to vector<32x8xbf16>
    %51 = vector.extract_strided_slice %10 {offsets = [8, 0], sizes = [8, 32], strides = [1, 1]} : vector<32x32xbf16> to vector<8x32xbf16>
    %cst_21 = arith.constant dense<0.000000e+00> : vector<32x32xf32>
    %52 = tpu.matmul %50, %51, %cst_21 {dimension_numbers = #tpu.dot_dimension_numbers<[1], [0], [0], [1], [0, 0, 1, 1], [], []>} : vector<32x8xbf16>, vector<8x32xbf16>, vector<32x32xf32> -> vector<32x32xf32>
    %53 = arith.addf %31, %52 : vector<32x32xf32>
    %54 = vector.extract_strided_slice %8 {offsets = [0, 16], sizes = [32, 8], strides = [1, 1]} : vector<32x96xf32> to vector<32x8xf32>
    %cst_22 = arith.constant 0.353553385 : f32
    %55 = vector.broadcast %cst_22 : f32 to vector<32x8xf32>
    %56 = arith.mulf %54, %55 : vector<32x8xf32>
    %57 = vector.extract_strided_slice %8 {offsets = [0, 48], sizes = [32, 8], strides = [1, 1]} : vector<32x96xf32> to vector<32x8xf32>
    %58 = vector.extract_strided_slice %8 {offsets = [0, 80], sizes = [32, 8], strides = [1, 1]} : vector<32x96xf32> to vector<32x8xf32>
    %cst_23 = arith.constant dense<0.000000e+00> : vector<32x32xf32>
    %59 = tpu.matmul %56, %57, %cst_23 {dimension_numbers = #tpu.dot_dimension_numbers<[1], [1], [0], [0], [0, 0, 1, 0], [], []>} : vector<32x8xf32>, vector<32x8xf32>, vector<32x32xf32> -> vector<32x32xf32>
    %60 = arith.addf %59, %9 : vector<32x32xf32>
    %cst_24 = arith.constant dense<0xFF800000> : vector<32xf32>
    %61 = vector.multi_reduction <maximumf>, %60, %cst_24 [1] : vector<32x32xf32> to vector<32xf32>
    %62 = vector.shape_cast %61 : vector<32xf32> to vector<32x1xf32>
    %63 = vector.broadcast %62 : vector<32x1xf32> to vector<32x32xf32>
    %64 = arith.subf %60, %63 : vector<32x32xf32>
    %65 = math.exp %64 : vector<32x32xf32>
    %cst_25 = arith.constant dense<0.000000e+00> : vector<32xf32>
    %66 = vector.multi_reduction <add>, %65, %cst_25 [1] : vector<32x32xf32> to vector<32xf32>
    %67 = vector.shape_cast %66 : vector<32xf32> to vector<32x1xf32>
    %68 = tpu.reciprocal %67 {approx = true} : vector<32x1xf32> -> vector<32x1xf32>
    %69 = vector.broadcast %68 : vector<32x1xf32> to vector<32x32xf32>
    %70 = arith.mulf %65, %69 : vector<32x32xf32>
    %cst_26 = arith.constant dense<0.000000e+00> : vector<32x8xf32>
    %71 = tpu.matmul %70, %58, %cst_26 {dimension_numbers = #tpu.dot_dimension_numbers<[1], [0], [0], [1], [0, 0, 1, 1], [], []>} : vector<32x32xf32>, vector<32x8xf32>, vector<32x8xf32> -> vector<32x8xf32>
    %72 = arith.truncf %71 : vector<32x8xf32> to vector<32x8xbf16>
    %73 = vector.extract_strided_slice %10 {offsets = [16, 0], sizes = [8, 32], strides = [1, 1]} : vector<32x32xbf16> to vector<8x32xbf16>
    %cst_27 = arith.constant dense<0.000000e+00> : vector<32x32xf32>
    %74 = tpu.matmul %72, %73, %cst_27 {dimension_numbers = #tpu.dot_dimension_numbers<[1], [0], [0], [1], [0, 0, 1, 1], [], []>} : vector<32x8xbf16>, vector<8x32xbf16>, vector<32x32xf32> -> vector<32x32xf32>
    %75 = arith.addf %53, %74 : vector<32x32xf32>
    %76 = vector.extract_strided_slice %8 {offsets = [0, 24], sizes = [32, 8], strides = [1, 1]} : vector<32x96xf32> to vector<32x8xf32>
    %cst_28 = arith.constant 0.353553385 : f32
    %77 = vector.broadcast %cst_28 : f32 to vector<32x8xf32>
    %78 = arith.mulf %76, %77 : vector<32x8xf32>
    %79 = vector.extract_strided_slice %8 {offsets = [0, 56], sizes = [32, 8], strides = [1, 1]} : vector<32x96xf32> to vector<32x8xf32>
    %80 = vector.extract_strided_slice %8 {offsets = [0, 88], sizes = [32, 8], strides = [1, 1]} : vector<32x96xf32> to vector<32x8xf32>
    %cst_29 = arith.constant dense<0.000000e+00> : vector<32x32xf32>
    %81 = tpu.matmul %78, %79, %cst_29 {dimension_numbers = #tpu.dot_dimension_numbers<[1], [1], [0], [0], [0, 0, 1, 0], [], []>} : vector<32x8xf32>, vector<32x8xf32>, vector<32x32xf32> -> vector<32x32xf32>
    %82 = arith.addf %81, %9 : vector<32x32xf32>
    %cst_30 = arith.constant dense<0xFF800000> : vector<32xf32>
    %83 = vector.multi_reduction <maximumf>, %82, %cst_30 [1] : vector<32x32xf32> to vector<32xf32>
    %84 = vector.shape_cast %83 : vector<32xf32> to vector<32x1xf32>
    %85 = vector.broadcast %84 : vector<32x1xf32> to vector<32x32xf32>
    %86 = arith.subf %82, %85 : vector<32x32xf32>
    %87 = math.exp %86 : vector<32x32xf32>
    %cst_31 = arith.constant dense<0.000000e+00> : vector<32xf32>
    %88 = vector.multi_reduction <add>, %87, %cst_31 [1] : vector<32x32xf32> to vector<32xf32>
    %89 = vector.shape_cast %88 : vector<32xf32> to vector<32x1xf32>
    %90 = tpu.reciprocal %89 {approx = true} : vector<32x1xf32> -> vector<32x1xf32>
    %91 = vector.broadcast %90 : vector<32x1xf32> to vector<32x32xf32>
    %92 = arith.mulf %87, %91 : vector<32x32xf32>
    %cst_32 = arith.constant dense<0.000000e+00> : vector<32x8xf32>
    %93 = tpu.matmul %92, %80, %cst_32 {dimension_numbers = #tpu.dot_dimension_numbers<[1], [0], [0], [1], [0, 0, 1, 1], [], []>} : vector<32x32xf32>, vector<32x8xf32>, vector<32x8xf32> -> vector<32x8xf32>
    %94 = arith.truncf %93 : vector<32x8xf32> to vector<32x8xbf16>
    %95 = vector.extract_strided_slice %10 {offsets = [24, 0], sizes = [8, 32], strides = [1, 1]} : vector<32x32xbf16> to vector<8x32xbf16>
    %cst_33 = arith.constant dense<0.000000e+00> : vector<32x32xf32>
    %96 = tpu.matmul %94, %95, %cst_33 {dimension_numbers = #tpu.dot_dimension_numbers<[1], [0], [0], [1], [0, 0, 1, 1], [], []>} : vector<32x8xbf16>, vector<8x32xbf16>, vector<32x32xf32> -> vector<32x32xf32>
    %97 = arith.addf %75, %96 : vector<32x32xf32>
    %c0_34 = arith.constant 0 : index
    %c0_35 = arith.constant 0 : index
    %98 = vector.load %arg6[%c0_34, %c0_35] : memref<1x32xf32, #tpu.memory_space<vmem>>, vector<1x32xf32>
    %99 = vector.broadcast %98 : vector<1x32xf32> to vector<32x32xf32>
    %100 = arith.addf %97, %99 : vector<32x32xf32>
    %101 = arith.addf %2, %100 : vector<32x32xf32>
    %cst_36 = arith.constant dense<0.000000e+00> : vector<32xf32>
    %102 = vector.multi_reduction <add>, %101, %cst_36 [1] : vector<32x32xf32> to vector<32xf32>
    %103 = vector.shape_cast %102 : vector<32xf32> to vector<32x1xf32>
    %cst_37 = arith.constant 3.200000e+01 : f32
    %104 = vector.broadcast %cst_37 : f32 to vector<32x1xf32>
    %105 = arith.divf %103, %104 : vector<32x1xf32>
    %106 = vector.broadcast %105 : vector<32x1xf32> to vector<32x32xf32>
    %107 = arith.subf %101, %106 : vector<32x32xf32>
    %108 = arith.mulf %107, %107 : vector<32x32xf32>
    %cst_38 = arith.constant dense<0.000000e+00> : vector<32xf32>
    %109 = vector.multi_reduction <add>, %108, %cst_38 [1] : vector<32x32xf32> to vector<32xf32>
    %110 = vector.shape_cast %109 : vector<32xf32> to vector<32x1xf32>
    %cst_39 = arith.constant 3.200000e+01 : f32
    %111 = vector.broadcast %cst_39 : f32 to vector<32x1xf32>
    %112 = arith.divf %110, %111 : vector<32x1xf32>
    %113 = vector.broadcast %105 : vector<32x1xf32> to vector<32x32xf32>
    %114 = arith.subf %101, %113 : vector<32x32xf32>
    %cst_40 = arith.constant 9.99999974E-6 : f32
    %115 = vector.broadcast %cst_40 : f32 to vector<32x1xf32>
    %116 = arith.addf %112, %115 : vector<32x1xf32>
    %117 = math.rsqrt %116 : vector<32x1xf32>
    %118 = vector.broadcast %117 : vector<32x1xf32> to vector<32x32xf32>
    %119 = arith.mulf %114, %118 : vector<32x32xf32>
    %c0_41 = arith.constant 0 : index
    %c0_42 = arith.constant 0 : index
    %120 = vector.load %arg7[%c0_41, %c0_42] : memref<1x32xf32, #tpu.memory_space<vmem>>, vector<1x32xf32>
    %121 = vector.broadcast %120 : vector<1x32xf32> to vector<32x32xf32>
    %122 = arith.mulf %119, %121 : vector<32x32xf32>
    %c0_43 = arith.constant 0 : index
    %c0_44 = arith.constant 0 : index
    %123 = vector.load %arg8[%c0_43, %c0_44] : memref<1x32xf32, #tpu.memory_space<vmem>>, vector<1x32xf32>
    %124 = vector.broadcast %123 : vector<1x32xf32> to vector<32x32xf32>
    %125 = arith.addf %122, %124 : vector<32x32xf32>
    %126 = arith.truncf %125 : vector<32x32xf32> to vector<32x32xbf16>
    %c0_45 = arith.constant 0 : index
    %c0_46 = arith.constant 0 : index
    %127 = vector.load %arg9[%c0_45, %c0_46] : memref<32x64xbf16, #tpu.memory_space<vmem>>, vector<32x64xbf16>
    %cst_47 = arith.constant dense<0.000000e+00> : vector<32x64xf32>
    %128 = tpu.matmul %126, %127, %cst_47 {dimension_numbers = #tpu.dot_dimension_numbers<[1], [0], [0], [1], [0, 0, 1, 1], [], []>} : vector<32x32xbf16>, vector<32x64xbf16>, vector<32x64xf32> -> vector<32x64xf32>
    %c0_48 = arith.constant 0 : index
    %c0_49 = arith.constant 0 : index
    %129 = vector.load %arg10[%c0_48, %c0_49] : memref<1x64xf32, #tpu.memory_space<vmem>>, vector<1x64xf32>
    %130 = vector.broadcast %129 : vector<1x64xf32> to vector<32x64xf32>
    %131 = arith.addf %128, %130 : vector<32x64xf32>
    %cst_50 = arith.constant 0.000000e+00 : f32
    %132 = vector.broadcast %cst_50 : f32 to vector<32x64xf32>
    %133 = arith.maximumf %131, %132 : vector<32x64xf32>
    %134 = arith.truncf %133 : vector<32x64xf32> to vector<32x64xbf16>
    %c0_51 = arith.constant 0 : index
    %c0_52 = arith.constant 0 : index
    %135 = vector.load %arg11[%c0_51, %c0_52] : memref<64x32xbf16, #tpu.memory_space<vmem>>, vector<64x32xbf16>
    %cst_53 = arith.constant dense<0.000000e+00> : vector<32x32xf32>
    %136 = tpu.matmul %134, %135, %cst_53 {dimension_numbers = #tpu.dot_dimension_numbers<[1], [0], [0], [1], [0, 0, 1, 1], [], []>} : vector<32x64xbf16>, vector<64x32xbf16>, vector<32x32xf32> -> vector<32x32xf32>
    %c0_54 = arith.constant 0 : index
    %c0_55 = arith.constant 0 : index
    %137 = vector.load %arg12[%c0_54, %c0_55] : memref<1x32xf32, #tpu.memory_space<vmem>>, vector<1x32xf32>
    %138 = vector.broadcast %137 : vector<1x32xf32> to vector<32x32xf32>
    %139 = arith.addf %136, %138 : vector<32x32xf32>
    %140 = arith.addf %125, %139 : vector<32x32xf32>
    %cst_56 = arith.constant dense<0.000000e+00> : vector<32xf32>
    %141 = vector.multi_reduction <add>, %140, %cst_56 [1] : vector<32x32xf32> to vector<32xf32>
    %142 = vector.shape_cast %141 : vector<32xf32> to vector<32x1xf32>
    %cst_57 = arith.constant 3.200000e+01 : f32
    %143 = vector.broadcast %cst_57 : f32 to vector<32x1xf32>
    %144 = arith.divf %142, %143 : vector<32x1xf32>
    %145 = vector.broadcast %144 : vector<32x1xf32> to vector<32x32xf32>
    %146 = arith.subf %140, %145 : vector<32x32xf32>
    %147 = arith.mulf %146, %146 : vector<32x32xf32>
    %cst_58 = arith.constant dense<0.000000e+00> : vector<32xf32>
    %148 = vector.multi_reduction <add>, %147, %cst_58 [1] : vector<32x32xf32> to vector<32xf32>
    %149 = vector.shape_cast %148 : vector<32xf32> to vector<32x1xf32>
    %cst_59 = arith.constant 3.200000e+01 : f32
    %150 = vector.broadcast %cst_59 : f32 to vector<32x1xf32>
    %151 = arith.divf %149, %150 : vector<32x1xf32>
    %152 = vector.broadcast %144 : vector<32x1xf32> to vector<32x32xf32>
    %153 = arith.subf %140, %152 : vector<32x32xf32>
    %cst_60 = arith.constant 9.99999974E-6 : f32
    %154 = vector.broadcast %cst_60 : f32 to vector<32x1xf32>
    %155 = arith.addf %151, %154 : vector<32x1xf32>
    %156 = math.rsqrt %155 : vector<32x1xf32>
    %157 = vector.broadcast %156 : vector<32x1xf32> to vector<32x32xf32>
    %158 = arith.mulf %153, %157 : vector<32x32xf32>
    %c0_61 = arith.constant 0 : index
    %c0_62 = arith.constant 0 : index
    %159 = vector.load %arg13[%c0_61, %c0_62] : memref<1x32xf32, #tpu.memory_space<vmem>>, vector<1x32xf32>
    %160 = vector.broadcast %159 : vector<1x32xf32> to vector<32x32xf32>
    %161 = arith.mulf %158, %160 : vector<32x32xf32>
    %c0_63 = arith.constant 0 : index
    %c0_64 = arith.constant 0 : index
    %162 = vector.load %arg14[%c0_63, %c0_64] : memref<1x32xf32, #tpu.memory_space<vmem>>, vector<1x32xf32>
    %163 = vector.broadcast %162 : vector<1x32xf32> to vector<32x32xf32>
    %164 = arith.addf %161, %163 : vector<32x32xf32>
    %c0_65 = arith.constant 0 : index
    %c0_66 = arith.constant 0 : index
    %165 = vector.load %arg15[%c0_65, %c0_66] : memref<32x32xf32, #tpu.memory_space<vmem>>, vector<32x32xf32>
    tpu.vector_store %arg15[%c0_65, %c0_66], %164 {strides = array<i32>} : memref<32x32xf32, #tpu.memory_space<vmem>>, vector<32x32xf32>,
    return
  }
  func.func @transform_0(%arg0: i32) -> (i32, i32) {
    %c0_i32 = arith.constant 0 : i32
    %c0_i32_0 = arith.constant 0 : i32
    return %arg0, %c0_i32 : i32, i32
  }
  func.func @transform_1(%arg0: i32) -> (i32, i32) {
    %c0_i32 = arith.constant 0 : i32
    %c0_i32_0 = arith.constant 0 : i32
    %c0_i32_1 = arith.constant 0 : i32
    return %c0_i32, %c0_i32_0 : i32, i32
  }
  func.func @transform_2(%arg0: i32) -> (i32, i32) {
    %c0_i32 = arith.constant 0 : i32
    %c0_i32_0 = arith.constant 0 : i32
    %c0_i32_1 = arith.constant 0 : i32
    return %c0_i32, %c0_i32_0 : i32, i32
  }
  func.func @transform_3(%arg0: i32) -> (i32, i32) {
    %c0_i32 = arith.constant 0 : i32
    %c0_i32_0 = arith.constant 0 : i32
    %c0_i32_1 = arith.constant 0 : i32
    return %c0_i32, %c0_i32_0 : i32, i32
  }
  func.func @transform_4(%arg0: i32) -> (i32, i32) {
    %c0_i32 = arith.constant 0 : i32
    %c0_i32_0 = arith.constant 0 : i32
    %c0_i32_1 = arith.constant 0 : i32
    return %c0_i32, %c0_i32_0 : i32, i32
  }
  func.func @transform_5(%arg0: i32) -> (i32, i32) {
    %c0_i32 = arith.constant 0 : i32
    %c0_i32_0 = arith.constant 0 : i32
    %c0_i32_1 = arith.constant 0 : i32
    return %c0_i32, %c0_i32_0 : i32, i32
  }
  func.func @transform_6(%arg0: i32) -> (i32, i32) {
    %c0_i32 = arith.constant 0 : i32
    %c0_i32_0 = arith.constant 0 : i32
    %c0_i32_1 = arith.constant 0 : i32
    return %c0_i32, %c0_i32_0 : i32, i32
  }
  func.func @transform_7(%arg0: i32) -> (i32, i32) {
    %c0_i32 = arith.constant 0 : i32
    %c0_i32_0 = arith.constant 0 : i32
    %c0_i32_1 = arith.constant 0 : i32
    return %c0_i32, %c0_i32_0 : i32, i32
  }
  func.func @transform_8(%arg0: i32) -> (i32, i32) {
    %c0_i32 = arith.constant 0 : i32
    %c0_i32_0 = arith.constant 0 : i32
    %c0_i32_1 = arith.constant 0 : i32
    return %c0_i32, %c0_i32_0 : i32, i32
  }
  func.func @transform_9(%arg0: i32) -> (i32, i32) {
    %c0_i32 = arith.constant 0 : i32
    %c0_i32_0 = arith.constant 0 : i32
    %c0_i32_1 = arith.constant 0 : i32
    return %c0_i32, %c0_i32_0 : i32, i32
  }
  func.func @transform_10(%arg0: i32) -> (i32, i32) {
    %c0_i32 = arith.constant 0 : i32
    %c0_i32_0 = arith.constant 0 : i32
    %c0_i32_1 = arith.constant 0 : i32
    return %c0_i32, %c0_i32_0 : i32, i32
  }
  func.func @transform_11(%arg0: i32) -> (i32, i32) {
    %c0_i32 = arith.constant 0 : i32
    %c0_i32_0 = arith.constant 0 : i32
    %c0_i32_1 = arith.constant 0 : i32
    return %c0_i32, %c0_i32_0 : i32, i32
  }
  func.func @transform_12(%arg0: i32) -> (i32, i32) {
    %c0_i32 = arith.constant 0 : i32
    %c0_i32_0 = arith.constant 0 : i32
    %c0_i32_1 = arith.constant 0 : i32
    return %c0_i32, %c0_i32_0 : i32, i32
  }
  func.func @transform_13(%arg0: i32) -> (i32, i32) {
    %c0_i32 = arith.constant 0 : i32
    %c0_i32_0 = arith.constant 0 : i32
    %c0_i32_1 = arith.constant 0 : i32
    return %c0_i32, %c0_i32_0 : i32, i32
  }
  func.func @transform_14(%arg0: i32) -> (i32, i32) {
    %c0_i32 = arith.constant 0 : i32
    %c0_i32_0 = arith.constant 0 : i32
    return %arg0, %c0_i32 : i32, i32
  }
}

module attributes {stable_mosaic.version = 11 : i64} {
  func.func @_ln_linear_kernel(%arg0: i32, %arg1: memref<16x32xf32, #tpu.memory_space<vmem>>, %arg2: memref<1x32xf32, #tpu.memory_space<vmem>>, %arg3: memref<1x32xf32, #tpu.memory_space<vmem>>, %arg4: memref<32x32xbf16, #tpu.memory_space<vmem>>, %arg5: memref<1x32xf32, #tpu.memory_space<vmem>>, %arg6: memref<16x32xf32, #tpu.memory_space<vmem>>, %arg7: memref<16x32xf32, #tpu.memory_space<vmem>>) attributes {dimension_semantics = [#tpu.dimension_semantics<parallel>], iteration_bounds = array<i64: 2>, scalar_prefetch = 0 : i64, scratch_operands = 0 : i64, tpu.core_type = #tpu.core_type<tc>, window_params = [{transform_indices = @transform_0, window_bounds = array<i64: 16, 32>}, {pipeline_mode = #tpu.pipeline_mode<synchronous>, transform_indices = @transform_1, window_bounds = array<i64: 1, 32>}, {pipeline_mode = #tpu.pipeline_mode<synchronous>, transform_indices = @transform_2, window_bounds = array<i64: 1, 32>}, {pipeline_mode = #tpu.pipeline_mode<synchronous>, transform_indices = @transform_3, window_bounds = array<i64: 32, 32>}, {pipeline_mode = #tpu.pipeline_mode<synchronous>, transform_indices = @transform_4, window_bounds = array<i64: 1, 32>}, {pipeline_mode = #tpu.pipeline_mode<synchronous>, transform_indices = @transform_5, window_bounds = array<i64: 16, 32>}, {transform_indices = @transform_6, window_bounds = array<i64: 16, 32>}]} {
    %c0 = arith.constant 0 : index
    %c0_0 = arith.constant 0 : index
    %0 = vector.load %arg1[%c0, %c0_0] : memref<16x32xf32, #tpu.memory_space<vmem>>, vector<16x32xf32>
    %cst = arith.constant dense<0.000000e+00> : vector<16xf32>
    %1 = vector.multi_reduction <add>, %0, %cst [1] : vector<16x32xf32> to vector<16xf32>
    %2 = vector.shape_cast %1 : vector<16xf32> to vector<16x1xf32>
    %cst_1 = arith.constant 3.200000e+01 : f32
    %3 = vector.broadcast %cst_1 : f32 to vector<16x1xf32>
    %4 = arith.divf %2, %3 : vector<16x1xf32>
    %5 = vector.broadcast %4 : vector<16x1xf32> to vector<16x32xf32>
    %6 = arith.subf %0, %5 : vector<16x32xf32>
    %7 = arith.mulf %6, %6 : vector<16x32xf32>
    %cst_2 = arith.constant dense<0.000000e+00> : vector<16xf32>
    %8 = vector.multi_reduction <add>, %7, %cst_2 [1] : vector<16x32xf32> to vector<16xf32>
    %9 = vector.shape_cast %8 : vector<16xf32> to vector<16x1xf32>
    %cst_3 = arith.constant 3.200000e+01 : f32
    %10 = vector.broadcast %cst_3 : f32 to vector<16x1xf32>
    %11 = arith.divf %9, %10 : vector<16x1xf32>
    %12 = vector.broadcast %4 : vector<16x1xf32> to vector<16x32xf32>
    %13 = arith.subf %0, %12 : vector<16x32xf32>
    %cst_4 = arith.constant 9.99999974E-6 : f32
    %14 = vector.broadcast %cst_4 : f32 to vector<16x1xf32>
    %15 = arith.addf %11, %14 : vector<16x1xf32>
    %16 = math.rsqrt %15 : vector<16x1xf32>
    %17 = vector.broadcast %16 : vector<16x1xf32> to vector<16x32xf32>
    %18 = arith.mulf %13, %17 : vector<16x32xf32>
    %c0_5 = arith.constant 0 : index
    %c0_6 = arith.constant 0 : index
    %19 = vector.load %arg2[%c0_5, %c0_6] : memref<1x32xf32, #tpu.memory_space<vmem>>, vector<1x32xf32>
    %20 = vector.broadcast %19 : vector<1x32xf32> to vector<16x32xf32>
    %21 = arith.mulf %18, %20 : vector<16x32xf32>
    %c0_7 = arith.constant 0 : index
    %c0_8 = arith.constant 0 : index
    %22 = vector.load %arg3[%c0_7, %c0_8] : memref<1x32xf32, #tpu.memory_space<vmem>>, vector<1x32xf32>
    %23 = vector.broadcast %22 : vector<1x32xf32> to vector<16x32xf32>
    %24 = arith.addf %21, %23 : vector<16x32xf32>
    %25 = arith.truncf %24 : vector<16x32xf32> to vector<16x32xbf16>
    %c0_9 = arith.constant 0 : index
    %c0_10 = arith.constant 0 : index
    %26 = vector.load %arg4[%c0_9, %c0_10] : memref<32x32xbf16, #tpu.memory_space<vmem>>, vector<32x32xbf16>
    %cst_11 = arith.constant dense<0.000000e+00> : vector<16x32xf32>
    %27 = tpu.matmul %25, %26, %cst_11 {dimension_numbers = #tpu.dot_dimension_numbers<[1], [0], [0], [1], [0, 0, 1, 1], [], []>} : vector<16x32xbf16>, vector<32x32xbf16>, vector<16x32xf32> -> vector<16x32xf32>
    %c0_12 = arith.constant 0 : index
    %c0_13 = arith.constant 0 : index
    %28 = vector.load %arg5[%c0_12, %c0_13] : memref<1x32xf32, #tpu.memory_space<vmem>>, vector<1x32xf32>
    %29 = vector.broadcast %28 : vector<1x32xf32> to vector<16x32xf32>
    %30 = arith.addf %27, %29 : vector<16x32xf32>
    %c0_14 = arith.constant 0 : index
    %c0_15 = arith.constant 0 : index
    %31 = vector.load %arg6[%c0_14, %c0_15] : memref<16x32xf32, #tpu.memory_space<vmem>>, vector<16x32xf32>
    %32 = arith.addf %30, %31 : vector<16x32xf32>
    %c0_16 = arith.constant 0 : index
    %c0_17 = arith.constant 0 : index
    %33 = vector.load %arg7[%c0_16, %c0_17] : memref<16x32xf32, #tpu.memory_space<vmem>>, vector<16x32xf32>
    tpu.vector_store %arg7[%c0_16, %c0_17], %32 {strides = array<i32>} : memref<16x32xf32, #tpu.memory_space<vmem>>, vector<16x32xf32>,
    return
  }
  func.func @transform_0(%arg0: i32) -> (i32, i32) {
    %c0_i32 = arith.constant 0 : i32
    %c0_i32_0 = arith.constant 0 : i32
    return %arg0, %c0_i32 : i32, i32
  }
  func.func @transform_1(%arg0: i32) -> (i32, i32) {
    %c0_i32 = arith.constant 0 : i32
    %c0_i32_0 = arith.constant 0 : i32
    %c0_i32_1 = arith.constant 0 : i32
    return %c0_i32, %c0_i32_0 : i32, i32
  }
  func.func @transform_2(%arg0: i32) -> (i32, i32) {
    %c0_i32 = arith.constant 0 : i32
    %c0_i32_0 = arith.constant 0 : i32
    %c0_i32_1 = arith.constant 0 : i32
    return %c0_i32, %c0_i32_0 : i32, i32
  }
  func.func @transform_3(%arg0: i32) -> (i32, i32) {
    %c0_i32 = arith.constant 0 : i32
    %c0_i32_0 = arith.constant 0 : i32
    %c0_i32_1 = arith.constant 0 : i32
    return %c0_i32, %c0_i32_0 : i32, i32
  }
  func.func @transform_4(%arg0: i32) -> (i32, i32) {
    %c0_i32 = arith.constant 0 : i32
    %c0_i32_0 = arith.constant 0 : i32
    %c0_i32_1 = arith.constant 0 : i32
    return %c0_i32, %c0_i32_0 : i32, i32
  }
  func.func @transform_5(%arg0: i32) -> (i32, i32) {
    %c0_i32 = arith.constant 0 : i32
    %c0_i32_0 = arith.constant 0 : i32
    %c0_i32_1 = arith.constant 0 : i32
    return %c0_i32, %c0_i32_0 : i32, i32
  }
  func.func @transform_6(%arg0: i32) -> (i32, i32) {
    %c0_i32 = arith.constant 0 : i32
    %c0_i32_0 = arith.constant 0 : i32
    return %arg0, %c0_i32 : i32, i32
  }
}

module attributes {stable_mosaic.version = 11 : i64} {
  func.func @_fused_encoder_layer_kernel(%arg0: i32, %arg1: memref<32x32xf32, #tpu.memory_space<vmem>>, %arg2: memref<32x32xf32, #tpu.memory_space<vmem>>, %arg3: memref<32x96xbf16, #tpu.memory_space<vmem>>, %arg4: memref<1x96xf32, #tpu.memory_space<vmem>>, %arg5: memref<32x32xbf16, #tpu.memory_space<vmem>>, %arg6: memref<1x32xf32, #tpu.memory_space<vmem>>, %arg7: memref<1x32xf32, #tpu.memory_space<vmem>>, %arg8: memref<1x32xf32, #tpu.memory_space<vmem>>, %arg9: memref<32x64xbf16, #tpu.memory_space<vmem>>, %arg10: memref<1x64xf32, #tpu.memory_space<vmem>>, %arg11: memref<64x32xbf16, #tpu.memory_space<vmem>>, %arg12: memref<1x32xf32, #tpu.memory_space<vmem>>, %arg13: memref<1x32xf32, #tpu.memory_space<vmem>>, %arg14: memref<1x32xf32, #tpu.memory_space<vmem>>, %arg15: memref<32x32xf32, #tpu.memory_space<vmem>>) attributes {dimension_semantics = [#tpu.dimension_semantics<parallel>], iteration_bounds = array<i64: 1>, scalar_prefetch = 0 : i64, scratch_operands = 0 : i64, tpu.core_type = #tpu.core_type<tc>, window_params = [{transform_indices = @transform_0, window_bounds = array<i64: 32, 32>}, {pipeline_mode = #tpu.pipeline_mode<synchronous>, transform_indices = @transform_1, window_bounds = array<i64: 32, 32>}, {pipeline_mode = #tpu.pipeline_mode<synchronous>, transform_indices = @transform_2, window_bounds = array<i64: 32, 96>}, {pipeline_mode = #tpu.pipeline_mode<synchronous>, transform_indices = @transform_3, window_bounds = array<i64: 1, 96>}, {pipeline_mode = #tpu.pipeline_mode<synchronous>, transform_indices = @transform_4, window_bounds = array<i64: 32, 32>}, {pipeline_mode = #tpu.pipeline_mode<synchronous>, transform_indices = @transform_5, window_bounds = array<i64: 1, 32>}, {pipeline_mode = #tpu.pipeline_mode<synchronous>, transform_indices = @transform_6, window_bounds = array<i64: 1, 32>}, {pipeline_mode = #tpu.pipeline_mode<synchronous>, transform_indices = @transform_7, window_bounds = array<i64: 1, 32>}, {pipeline_mode = #tpu.pipeline_mode<synchronous>, transform_indices = @transform_8, window_bounds = array<i64: 32, 64>}, {pipeline_mode = #tpu.pipeline_mode<synchronous>, transform_indices = @transform_9, window_bounds = array<i64: 1, 64>}, {pipeline_mode = #tpu.pipeline_mode<synchronous>, transform_indices = @transform_10, window_bounds = array<i64: 64, 32>}, {pipeline_mode = #tpu.pipeline_mode<synchronous>, transform_indices = @transform_11, window_bounds = array<i64: 1, 32>}, {pipeline_mode = #tpu.pipeline_mode<synchronous>, transform_indices = @transform_12, window_bounds = array<i64: 1, 32>}, {pipeline_mode = #tpu.pipeline_mode<synchronous>, transform_indices = @transform_13, window_bounds = array<i64: 1, 32>}, {transform_indices = @transform_14, window_bounds = array<i64: 32, 32>}]} {
    %c0 = arith.constant 0 : index
    %c0_0 = arith.constant 0 : index
    %0 = vector.load %arg1[%c0, %c0_0] : memref<32x32xf32, #tpu.memory_space<vmem>>, vector<32x32xf32>
    %1 = arith.truncf %0 : vector<32x32xf32> to vector<32x32xbf16>
    %c0_1 = arith.constant 0 : index
    %c0_2 = arith.constant 0 : index
    %2 = vector.load %arg3[%c0_1, %c0_2] : memref<32x96xbf16, #tpu.memory_space<vmem>>, vector<32x96xbf16>
    %cst = arith.constant dense<0.000000e+00> : vector<32x96xf32>
    %3 = tpu.matmul %1, %2, %cst {dimension_numbers = #tpu.dot_dimension_numbers<[1], [0], [0], [1], [0, 0, 1, 1], [], []>} : vector<32x32xbf16>, vector<32x96xbf16>, vector<32x96xf32> -> vector<32x96xf32>
    %c0_3 = arith.constant 0 : index
    %c0_4 = arith.constant 0 : index
    %4 = vector.load %arg4[%c0_3, %c0_4] : memref<1x96xf32, #tpu.memory_space<vmem>>, vector<1x96xf32>
    %5 = vector.broadcast %4 : vector<1x96xf32> to vector<32x96xf32>
    %6 = arith.addf %3, %5 : vector<32x96xf32>
    %c0_5 = arith.constant 0 : index
    %c0_6 = arith.constant 0 : index
    %7 = vector.load %arg2[%c0_5, %c0_6] : memref<32x32xf32, #tpu.memory_space<vmem>>, vector<32x32xf32>
    %c0_7 = arith.constant 0 : index
    %c0_8 = arith.constant 0 : index
    %8 = vector.load %arg5[%c0_7, %c0_8] : memref<32x32xbf16, #tpu.memory_space<vmem>>, vector<32x32xbf16>
    %9 = vector.extract_strided_slice %6 {offsets = [0, 0], sizes = [32, 8], strides = [1, 1]} : vector<32x96xf32> to vector<32x8xf32>
    %cst_9 = arith.constant 0.353553385 : f32
    %10 = vector.broadcast %cst_9 : f32 to vector<32x8xf32>
    %11 = arith.mulf %9, %10 : vector<32x8xf32>
    %12 = vector.extract_strided_slice %6 {offsets = [0, 32], sizes = [32, 8], strides = [1, 1]} : vector<32x96xf32> to vector<32x8xf32>
    %13 = vector.extract_strided_slice %6 {offsets = [0, 64], sizes = [32, 8], strides = [1, 1]} : vector<32x96xf32> to vector<32x8xf32>
    %cst_10 = arith.constant dense<0.000000e+00> : vector<32x32xf32>
    %14 = tpu.matmul %11, %12, %cst_10 {dimension_numbers = #tpu.dot_dimension_numbers<[1], [1], [0], [0], [0, 0, 1, 0], [], []>} : vector<32x8xf32>, vector<32x8xf32>, vector<32x32xf32> -> vector<32x32xf32>
    %15 = arith.addf %14, %7 : vector<32x32xf32>
    %cst_11 = arith.constant dense<0xFF800000> : vector<32xf32>
    %16 = vector.multi_reduction <maximumf>, %15, %cst_11 [1] : vector<32x32xf32> to vector<32xf32>
    %17 = vector.shape_cast %16 : vector<32xf32> to vector<32x1xf32>
    %18 = vector.broadcast %17 : vector<32x1xf32> to vector<32x32xf32>
    %19 = arith.subf %15, %18 : vector<32x32xf32>
    %20 = math.exp %19 : vector<32x32xf32>
    %cst_12 = arith.constant dense<0.000000e+00> : vector<32xf32>
    %21 = vector.multi_reduction <add>, %20, %cst_12 [1] : vector<32x32xf32> to vector<32xf32>
    %22 = vector.shape_cast %21 : vector<32xf32> to vector<32x1xf32>
    %23 = tpu.reciprocal %22 {approx = true} : vector<32x1xf32> -> vector<32x1xf32>
    %24 = vector.broadcast %23 : vector<32x1xf32> to vector<32x32xf32>
    %25 = arith.mulf %20, %24 : vector<32x32xf32>
    %cst_13 = arith.constant dense<0.000000e+00> : vector<32x8xf32>
    %26 = tpu.matmul %25, %13, %cst_13 {dimension_numbers = #tpu.dot_dimension_numbers<[1], [0], [0], [1], [0, 0, 1, 1], [], []>} : vector<32x32xf32>, vector<32x8xf32>, vector<32x8xf32> -> vector<32x8xf32>
    %27 = arith.truncf %26 : vector<32x8xf32> to vector<32x8xbf16>
    %28 = vector.extract_strided_slice %8 {offsets = [0, 0], sizes = [8, 32], strides = [1, 1]} : vector<32x32xbf16> to vector<8x32xbf16>
    %cst_14 = arith.constant dense<0.000000e+00> : vector<32x32xf32>
    %29 = tpu.matmul %27, %28, %cst_14 {dimension_numbers = #tpu.dot_dimension_numbers<[1], [0], [0], [1], [0, 0, 1, 1], [], []>} : vector<32x8xbf16>, vector<8x32xbf16>, vector<32x32xf32> -> vector<32x32xf32>
    %30 = vector.extract_strided_slice %6 {offsets = [0, 8], sizes = [32, 8], strides = [1, 1]} : vector<32x96xf32> to vector<32x8xf32>
    %cst_15 = arith.constant 0.353553385 : f32
    %31 = vector.broadcast %cst_15 : f32 to vector<32x8xf32>
    %32 = arith.mulf %30, %31 : vector<32x8xf32>
    %33 = vector.extract_strided_slice %6 {offsets = [0, 40], sizes = [32, 8], strides = [1, 1]} : vector<32x96xf32> to vector<32x8xf32>
    %34 = vector.extract_strided_slice %6 {offsets = [0, 72], sizes = [32, 8], strides = [1, 1]} : vector<32x96xf32> to vector<32x8xf32>
    %cst_16 = arith.constant dense<0.000000e+00> : vector<32x32xf32>
    %35 = tpu.matmul %32, %33, %cst_16 {dimension_numbers = #tpu.dot_dimension_numbers<[1], [1], [0], [0], [0, 0, 1, 0], [], []>} : vector<32x8xf32>, vector<32x8xf32>, vector<32x32xf32> -> vector<32x32xf32>
    %36 = arith.addf %35, %7 : vector<32x32xf32>
    %cst_17 = arith.constant dense<0xFF800000> : vector<32xf32>
    %37 = vector.multi_reduction <maximumf>, %36, %cst_17 [1] : vector<32x32xf32> to vector<32xf32>
    %38 = vector.shape_cast %37 : vector<32xf32> to vector<32x1xf32>
    %39 = vector.broadcast %38 : vector<32x1xf32> to vector<32x32xf32>
    %40 = arith.subf %36, %39 : vector<32x32xf32>
    %41 = math.exp %40 : vector<32x32xf32>
    %cst_18 = arith.constant dense<0.000000e+00> : vector<32xf32>
    %42 = vector.multi_reduction <add>, %41, %cst_18 [1] : vector<32x32xf32> to vector<32xf32>
    %43 = vector.shape_cast %42 : vector<32xf32> to vector<32x1xf32>
    %44 = tpu.reciprocal %43 {approx = true} : vector<32x1xf32> -> vector<32x1xf32>
    %45 = vector.broadcast %44 : vector<32x1xf32> to vector<32x32xf32>
    %46 = arith.mulf %41, %45 : vector<32x32xf32>
    %cst_19 = arith.constant dense<0.000000e+00> : vector<32x8xf32>
    %47 = tpu.matmul %46, %34, %cst_19 {dimension_numbers = #tpu.dot_dimension_numbers<[1], [0], [0], [1], [0, 0, 1, 1], [], []>} : vector<32x32xf32>, vector<32x8xf32>, vector<32x8xf32> -> vector<32x8xf32>
    %48 = arith.truncf %47 : vector<32x8xf32> to vector<32x8xbf16>
    %49 = vector.extract_strided_slice %8 {offsets = [8, 0], sizes = [8, 32], strides = [1, 1]} : vector<32x32xbf16> to vector<8x32xbf16>
    %cst_20 = arith.constant dense<0.000000e+00> : vector<32x32xf32>
    %50 = tpu.matmul %48, %49, %cst_20 {dimension_numbers = #tpu.dot_dimension_numbers<[1], [0], [0], [1], [0, 0, 1, 1], [], []>} : vector<32x8xbf16>, vector<8x32xbf16>, vector<32x32xf32> -> vector<32x32xf32>
    %51 = arith.addf %29, %50 : vector<32x32xf32>
    %52 = vector.extract_strided_slice %6 {offsets = [0, 16], sizes = [32, 8], strides = [1, 1]} : vector<32x96xf32> to vector<32x8xf32>
    %cst_21 = arith.constant 0.353553385 : f32
    %53 = vector.broadcast %cst_21 : f32 to vector<32x8xf32>
    %54 = arith.mulf %52, %53 : vector<32x8xf32>
    %55 = vector.extract_strided_slice %6 {offsets = [0, 48], sizes = [32, 8], strides = [1, 1]} : vector<32x96xf32> to vector<32x8xf32>
    %56 = vector.extract_strided_slice %6 {offsets = [0, 80], sizes = [32, 8], strides = [1, 1]} : vector<32x96xf32> to vector<32x8xf32>
    %cst_22 = arith.constant dense<0.000000e+00> : vector<32x32xf32>
    %57 = tpu.matmul %54, %55, %cst_22 {dimension_numbers = #tpu.dot_dimension_numbers<[1], [1], [0], [0], [0, 0, 1, 0], [], []>} : vector<32x8xf32>, vector<32x8xf32>, vector<32x32xf32> -> vector<32x32xf32>
    %58 = arith.addf %57, %7 : vector<32x32xf32>
    %cst_23 = arith.constant dense<0xFF800000> : vector<32xf32>
    %59 = vector.multi_reduction <maximumf>, %58, %cst_23 [1] : vector<32x32xf32> to vector<32xf32>
    %60 = vector.shape_cast %59 : vector<32xf32> to vector<32x1xf32>
    %61 = vector.broadcast %60 : vector<32x1xf32> to vector<32x32xf32>
    %62 = arith.subf %58, %61 : vector<32x32xf32>
    %63 = math.exp %62 : vector<32x32xf32>
    %cst_24 = arith.constant dense<0.000000e+00> : vector<32xf32>
    %64 = vector.multi_reduction <add>, %63, %cst_24 [1] : vector<32x32xf32> to vector<32xf32>
    %65 = vector.shape_cast %64 : vector<32xf32> to vector<32x1xf32>
    %66 = tpu.reciprocal %65 {approx = true} : vector<32x1xf32> -> vector<32x1xf32>
    %67 = vector.broadcast %66 : vector<32x1xf32> to vector<32x32xf32>
    %68 = arith.mulf %63, %67 : vector<32x32xf32>
    %cst_25 = arith.constant dense<0.000000e+00> : vector<32x8xf32>
    %69 = tpu.matmul %68, %56, %cst_25 {dimension_numbers = #tpu.dot_dimension_numbers<[1], [0], [0], [1], [0, 0, 1, 1], [], []>} : vector<32x32xf32>, vector<32x8xf32>, vector<32x8xf32> -> vector<32x8xf32>
    %70 = arith.truncf %69 : vector<32x8xf32> to vector<32x8xbf16>
    %71 = vector.extract_strided_slice %8 {offsets = [16, 0], sizes = [8, 32], strides = [1, 1]} : vector<32x32xbf16> to vector<8x32xbf16>
    %cst_26 = arith.constant dense<0.000000e+00> : vector<32x32xf32>
    %72 = tpu.matmul %70, %71, %cst_26 {dimension_numbers = #tpu.dot_dimension_numbers<[1], [0], [0], [1], [0, 0, 1, 1], [], []>} : vector<32x8xbf16>, vector<8x32xbf16>, vector<32x32xf32> -> vector<32x32xf32>
    %73 = arith.addf %51, %72 : vector<32x32xf32>
    %74 = vector.extract_strided_slice %6 {offsets = [0, 24], sizes = [32, 8], strides = [1, 1]} : vector<32x96xf32> to vector<32x8xf32>
    %cst_27 = arith.constant 0.353553385 : f32
    %75 = vector.broadcast %cst_27 : f32 to vector<32x8xf32>
    %76 = arith.mulf %74, %75 : vector<32x8xf32>
    %77 = vector.extract_strided_slice %6 {offsets = [0, 56], sizes = [32, 8], strides = [1, 1]} : vector<32x96xf32> to vector<32x8xf32>
    %78 = vector.extract_strided_slice %6 {offsets = [0, 88], sizes = [32, 8], strides = [1, 1]} : vector<32x96xf32> to vector<32x8xf32>
    %cst_28 = arith.constant dense<0.000000e+00> : vector<32x32xf32>
    %79 = tpu.matmul %76, %77, %cst_28 {dimension_numbers = #tpu.dot_dimension_numbers<[1], [1], [0], [0], [0, 0, 1, 0], [], []>} : vector<32x8xf32>, vector<32x8xf32>, vector<32x32xf32> -> vector<32x32xf32>
    %80 = arith.addf %79, %7 : vector<32x32xf32>
    %cst_29 = arith.constant dense<0xFF800000> : vector<32xf32>
    %81 = vector.multi_reduction <maximumf>, %80, %cst_29 [1] : vector<32x32xf32> to vector<32xf32>
    %82 = vector.shape_cast %81 : vector<32xf32> to vector<32x1xf32>
    %83 = vector.broadcast %82 : vector<32x1xf32> to vector<32x32xf32>
    %84 = arith.subf %80, %83 : vector<32x32xf32>
    %85 = math.exp %84 : vector<32x32xf32>
    %cst_30 = arith.constant dense<0.000000e+00> : vector<32xf32>
    %86 = vector.multi_reduction <add>, %85, %cst_30 [1] : vector<32x32xf32> to vector<32xf32>
    %87 = vector.shape_cast %86 : vector<32xf32> to vector<32x1xf32>
    %88 = tpu.reciprocal %87 {approx = true} : vector<32x1xf32> -> vector<32x1xf32>
    %89 = vector.broadcast %88 : vector<32x1xf32> to vector<32x32xf32>
    %90 = arith.mulf %85, %89 : vector<32x32xf32>
    %cst_31 = arith.constant dense<0.000000e+00> : vector<32x8xf32>
    %91 = tpu.matmul %90, %78, %cst_31 {dimension_numbers = #tpu.dot_dimension_numbers<[1], [0], [0], [1], [0, 0, 1, 1], [], []>} : vector<32x32xf32>, vector<32x8xf32>, vector<32x8xf32> -> vector<32x8xf32>
    %92 = arith.truncf %91 : vector<32x8xf32> to vector<32x8xbf16>
    %93 = vector.extract_strided_slice %8 {offsets = [24, 0], sizes = [8, 32], strides = [1, 1]} : vector<32x32xbf16> to vector<8x32xbf16>
    %cst_32 = arith.constant dense<0.000000e+00> : vector<32x32xf32>
    %94 = tpu.matmul %92, %93, %cst_32 {dimension_numbers = #tpu.dot_dimension_numbers<[1], [0], [0], [1], [0, 0, 1, 1], [], []>} : vector<32x8xbf16>, vector<8x32xbf16>, vector<32x32xf32> -> vector<32x32xf32>
    %95 = arith.addf %73, %94 : vector<32x32xf32>
    %c0_33 = arith.constant 0 : index
    %c0_34 = arith.constant 0 : index
    %96 = vector.load %arg6[%c0_33, %c0_34] : memref<1x32xf32, #tpu.memory_space<vmem>>, vector<1x32xf32>
    %97 = vector.broadcast %96 : vector<1x32xf32> to vector<32x32xf32>
    %98 = arith.addf %95, %97 : vector<32x32xf32>
    %99 = arith.addf %0, %98 : vector<32x32xf32>
    %cst_35 = arith.constant dense<0.000000e+00> : vector<32xf32>
    %100 = vector.multi_reduction <add>, %99, %cst_35 [1] : vector<32x32xf32> to vector<32xf32>
    %101 = vector.shape_cast %100 : vector<32xf32> to vector<32x1xf32>
    %cst_36 = arith.constant 3.200000e+01 : f32
    %102 = vector.broadcast %cst_36 : f32 to vector<32x1xf32>
    %103 = arith.divf %101, %102 : vector<32x1xf32>
    %104 = vector.broadcast %103 : vector<32x1xf32> to vector<32x32xf32>
    %105 = arith.subf %99, %104 : vector<32x32xf32>
    %106 = arith.mulf %105, %105 : vector<32x32xf32>
    %cst_37 = arith.constant dense<0.000000e+00> : vector<32xf32>
    %107 = vector.multi_reduction <add>, %106, %cst_37 [1] : vector<32x32xf32> to vector<32xf32>
    %108 = vector.shape_cast %107 : vector<32xf32> to vector<32x1xf32>
    %cst_38 = arith.constant 3.200000e+01 : f32
    %109 = vector.broadcast %cst_38 : f32 to vector<32x1xf32>
    %110 = arith.divf %108, %109 : vector<32x1xf32>
    %111 = vector.broadcast %103 : vector<32x1xf32> to vector<32x32xf32>
    %112 = arith.subf %99, %111 : vector<32x32xf32>
    %cst_39 = arith.constant 9.99999974E-6 : f32
    %113 = vector.broadcast %cst_39 : f32 to vector<32x1xf32>
    %114 = arith.addf %110, %113 : vector<32x1xf32>
    %115 = math.rsqrt %114 : vector<32x1xf32>
    %116 = vector.broadcast %115 : vector<32x1xf32> to vector<32x32xf32>
    %117 = arith.mulf %112, %116 : vector<32x32xf32>
    %c0_40 = arith.constant 0 : index
    %c0_41 = arith.constant 0 : index
    %118 = vector.load %arg7[%c0_40, %c0_41] : memref<1x32xf32, #tpu.memory_space<vmem>>, vector<1x32xf32>
    %119 = vector.broadcast %118 : vector<1x32xf32> to vector<32x32xf32>
    %120 = arith.mulf %117, %119 : vector<32x32xf32>
    %c0_42 = arith.constant 0 : index
    %c0_43 = arith.constant 0 : index
    %121 = vector.load %arg8[%c0_42, %c0_43] : memref<1x32xf32, #tpu.memory_space<vmem>>, vector<1x32xf32>
    %122 = vector.broadcast %121 : vector<1x32xf32> to vector<32x32xf32>
    %123 = arith.addf %120, %122 : vector<32x32xf32>
    %124 = arith.truncf %123 : vector<32x32xf32> to vector<32x32xbf16>
    %c0_44 = arith.constant 0 : index
    %c0_45 = arith.constant 0 : index
    %125 = vector.load %arg9[%c0_44, %c0_45] : memref<32x64xbf16, #tpu.memory_space<vmem>>, vector<32x64xbf16>
    %cst_46 = arith.constant dense<0.000000e+00> : vector<32x64xf32>
    %126 = tpu.matmul %124, %125, %cst_46 {dimension_numbers = #tpu.dot_dimension_numbers<[1], [0], [0], [1], [0, 0, 1, 1], [], []>} : vector<32x32xbf16>, vector<32x64xbf16>, vector<32x64xf32> -> vector<32x64xf32>
    %c0_47 = arith.constant 0 : index
    %c0_48 = arith.constant 0 : index
    %127 = vector.load %arg10[%c0_47, %c0_48] : memref<1x64xf32, #tpu.memory_space<vmem>>, vector<1x64xf32>
    %128 = vector.broadcast %127 : vector<1x64xf32> to vector<32x64xf32>
    %129 = arith.addf %126, %128 : vector<32x64xf32>
    %cst_49 = arith.constant 0.000000e+00 : f32
    %130 = vector.broadcast %cst_49 : f32 to vector<32x64xf32>
    %131 = arith.maximumf %129, %130 : vector<32x64xf32>
    %132 = arith.truncf %131 : vector<32x64xf32> to vector<32x64xbf16>
    %c0_50 = arith.constant 0 : index
    %c0_51 = arith.constant 0 : index
    %133 = vector.load %arg11[%c0_50, %c0_51] : memref<64x32xbf16, #tpu.memory_space<vmem>>, vector<64x32xbf16>
    %cst_52 = arith.constant dense<0.000000e+00> : vector<32x32xf32>
    %134 = tpu.matmul %132, %133, %cst_52 {dimension_numbers = #tpu.dot_dimension_numbers<[1], [0], [0], [1], [0, 0, 1, 1], [], []>} : vector<32x64xbf16>, vector<64x32xbf16>, vector<32x32xf32> -> vector<32x32xf32>
    %c0_53 = arith.constant 0 : index
    %c0_54 = arith.constant 0 : index
    %135 = vector.load %arg12[%c0_53, %c0_54] : memref<1x32xf32, #tpu.memory_space<vmem>>, vector<1x32xf32>
    %136 = vector.broadcast %135 : vector<1x32xf32> to vector<32x32xf32>
    %137 = arith.addf %134, %136 : vector<32x32xf32>
    %138 = arith.addf %123, %137 : vector<32x32xf32>
    %cst_55 = arith.constant dense<0.000000e+00> : vector<32xf32>
    %139 = vector.multi_reduction <add>, %138, %cst_55 [1] : vector<32x32xf32> to vector<32xf32>
    %140 = vector.shape_cast %139 : vector<32xf32> to vector<32x1xf32>
    %cst_56 = arith.constant 3.200000e+01 : f32
    %141 = vector.broadcast %cst_56 : f32 to vector<32x1xf32>
    %142 = arith.divf %140, %141 : vector<32x1xf32>
    %143 = vector.broadcast %142 : vector<32x1xf32> to vector<32x32xf32>
    %144 = arith.subf %138, %143 : vector<32x32xf32>
    %145 = arith.mulf %144, %144 : vector<32x32xf32>
    %cst_57 = arith.constant dense<0.000000e+00> : vector<32xf32>
    %146 = vector.multi_reduction <add>, %145, %cst_57 [1] : vector<32x32xf32> to vector<32xf32>
    %147 = vector.shape_cast %146 : vector<32xf32> to vector<32x1xf32>
    %cst_58 = arith.constant 3.200000e+01 : f32
    %148 = vector.broadcast %cst_58 : f32 to vector<32x1xf32>
    %149 = arith.divf %147, %148 : vector<32x1xf32>
    %150 = vector.broadcast %142 : vector<32x1xf32> to vector<32x32xf32>
    %151 = arith.subf %138, %150 : vector<32x32xf32>
    %cst_59 = arith.constant 9.99999974E-6 : f32
    %152 = vector.broadcast %cst_59 : f32 to vector<32x1xf32>
    %153 = arith.addf %149, %152 : vector<32x1xf32>
    %154 = math.rsqrt %153 : vector<32x1xf32>
    %155 = vector.broadcast %154 : vector<32x1xf32> to vector<32x32xf32>
    %156 = arith.mulf %151, %155 : vector<32x32xf32>
    %c0_60 = arith.constant 0 : index
    %c0_61 = arith.constant 0 : index
    %157 = vector.load %arg13[%c0_60, %c0_61] : memref<1x32xf32, #tpu.memory_space<vmem>>, vector<1x32xf32>
    %158 = vector.broadcast %157 : vector<1x32xf32> to vector<32x32xf32>
    %159 = arith.mulf %156, %158 : vector<32x32xf32>
    %c0_62 = arith.constant 0 : index
    %c0_63 = arith.constant 0 : index
    %160 = vector.load %arg14[%c0_62, %c0_63] : memref<1x32xf32, #tpu.memory_space<vmem>>, vector<1x32xf32>
    %161 = vector.broadcast %160 : vector<1x32xf32> to vector<32x32xf32>
    %162 = arith.addf %159, %161 : vector<32x32xf32>
    %c0_64 = arith.constant 0 : index
    %c0_65 = arith.constant 0 : index
    %163 = vector.load %arg15[%c0_64, %c0_65] : memref<32x32xf32, #tpu.memory_space<vmem>>, vector<32x32xf32>
    tpu.vector_store %arg15[%c0_64, %c0_65], %162 {strides = array<i32>} : memref<32x32xf32, #tpu.memory_space<vmem>>, vector<32x32xf32>,
    return
  }
  func.func @transform_0(%arg0: i32) -> (i32, i32) {
    %c0_i32 = arith.constant 0 : i32
    %c0_i32_0 = arith.constant 0 : i32
    return %arg0, %c0_i32 : i32, i32
  }
  func.func @transform_1(%arg0: i32) -> (i32, i32) {
    %c0_i32 = arith.constant 0 : i32
    %c0_i32_0 = arith.constant 0 : i32
    %c0_i32_1 = arith.constant 0 : i32
    return %c0_i32, %c0_i32_0 : i32, i32
  }
  func.func @transform_2(%arg0: i32) -> (i32, i32) {
    %c0_i32 = arith.constant 0 : i32
    %c0_i32_0 = arith.constant 0 : i32
    %c0_i32_1 = arith.constant 0 : i32
    return %c0_i32, %c0_i32_0 : i32, i32
  }
  func.func @transform_3(%arg0: i32) -> (i32, i32) {
    %c0_i32 = arith.constant 0 : i32
    %c0_i32_0 = arith.constant 0 : i32
    %c0_i32_1 = arith.constant 0 : i32
    return %c0_i32, %c0_i32_0 : i32, i32
  }
  func.func @transform_4(%arg0: i32) -> (i32, i32) {
    %c0_i32 = arith.constant 0 : i32
    %c0_i32_0 = arith.constant 0 : i32
    %c0_i32_1 = arith.constant 0 : i32
    return %c0_i32, %c0_i32_0 : i32, i32
  }
  func.func @transform_5(%arg0: i32) -> (i32, i32) {
    %c0_i32 = arith.constant 0 : i32
    %c0_i32_0 = arith.constant 0 : i32
    %c0_i32_1 = arith.constant 0 : i32
    return %c0_i32, %c0_i32_0 : i32, i32
  }
  func.func @transform_6(%arg0: i32) -> (i32, i32) {
    %c0_i32 = arith.constant 0 : i32
    %c0_i32_0 = arith.constant 0 : i32
    %c0_i32_1 = arith.constant 0 : i32
    return %c0_i32, %c0_i32_0 : i32, i32
  }
  func.func @transform_7(%arg0: i32) -> (i32, i32) {
    %c0_i32 = arith.constant 0 : i32
    %c0_i32_0 = arith.constant 0 : i32
    %c0_i32_1 = arith.constant 0 : i32
    return %c0_i32, %c0_i32_0 : i32, i32
  }
  func.func @transform_8(%arg0: i32) -> (i32, i32) {
    %c0_i32 = arith.constant 0 : i32
    %c0_i32_0 = arith.constant 0 : i32
    %c0_i32_1 = arith.constant 0 : i32
    return %c0_i32, %c0_i32_0 : i32, i32
  }
  func.func @transform_9(%arg0: i32) -> (i32, i32) {
    %c0_i32 = arith.constant 0 : i32
    %c0_i32_0 = arith.constant 0 : i32
    %c0_i32_1 = arith.constant 0 : i32
    return %c0_i32, %c0_i32_0 : i32, i32
  }
  func.func @transform_10(%arg0: i32) -> (i32, i32) {
    %c0_i32 = arith.constant 0 : i32
    %c0_i32_0 = arith.constant 0 : i32
    %c0_i32_1 = arith.constant 0 : i32
    return %c0_i32, %c0_i32_0 : i32, i32
  }
  func.func @transform_11(%arg0: i32) -> (i32, i32) {
    %c0_i32 = arith.constant 0 : i32
    %c0_i32_0 = arith.constant 0 : i32
    %c0_i32_1 = arith.constant 0 : i32
    return %c0_i32, %c0_i32_0 : i32, i32
  }
  func.func @transform_12(%arg0: i32) -> (i32, i32) {
    %c0_i32 = arith.constant 0 : i32
    %c0_i32_0 = arith.constant 0 : i32
    %c0_i32_1 = arith.constant 0 : i32
    return %c0_i32, %c0_i32_0 : i32, i32
  }
  func.func @transform_13(%arg0: i32) -> (i32, i32) {
    %c0_i32 = arith.constant 0 : i32
    %c0_i32_0 = arith.constant 0 : i32
    %c0_i32_1 = arith.constant 0 : i32
    return %c0_i32, %c0_i32_0 : i32, i32
  }
  func.func @transform_14(%arg0: i32) -> (i32, i32) {
    %c0_i32 = arith.constant 0 : i32
    %c0_i32_0 = arith.constant 0 : i32
    return %arg0, %c0_i32 : i32, i32
  }
}

module attributes {stable_mosaic.version = 11 : i64} {
  func.func @_ln_linear_kernel(%arg0: i32, %arg1: memref<64x32xf32, #tpu.memory_space<vmem>>, %arg2: memref<1x32xf32, #tpu.memory_space<vmem>>, %arg3: memref<1x32xf32, #tpu.memory_space<vmem>>, %arg4: memref<32x4xbf16, #tpu.memory_space<vmem>>, %arg5: memref<1x4xf32, #tpu.memory_space<vmem>>, %arg6: memref<64x4xf32, #tpu.memory_space<vmem>>) attributes {dimension_semantics = [#tpu.dimension_semantics<parallel>], iteration_bounds = array<i64: 1>, scalar_prefetch = 0 : i64, scratch_operands = 0 : i64, tpu.core_type = #tpu.core_type<tc>, window_params = [{transform_indices = @transform_0, window_bounds = array<i64: 64, 32>}, {pipeline_mode = #tpu.pipeline_mode<synchronous>, transform_indices = @transform_1, window_bounds = array<i64: 1, 32>}, {pipeline_mode = #tpu.pipeline_mode<synchronous>, transform_indices = @transform_2, window_bounds = array<i64: 1, 32>}, {pipeline_mode = #tpu.pipeline_mode<synchronous>, transform_indices = @transform_3, window_bounds = array<i64: 32, 4>}, {pipeline_mode = #tpu.pipeline_mode<synchronous>, transform_indices = @transform_4, window_bounds = array<i64: 1, 4>}, {transform_indices = @transform_5, window_bounds = array<i64: 64, 4>}]} {
    %c0 = arith.constant 0 : index
    %c0_0 = arith.constant 0 : index
    %0 = vector.load %arg1[%c0, %c0_0] : memref<64x32xf32, #tpu.memory_space<vmem>>, vector<64x32xf32>
    %cst = arith.constant dense<0.000000e+00> : vector<64xf32>
    %1 = vector.multi_reduction <add>, %0, %cst [1] : vector<64x32xf32> to vector<64xf32>
    %2 = vector.shape_cast %1 : vector<64xf32> to vector<64x1xf32>
    %cst_1 = arith.constant 3.200000e+01 : f32
    %3 = vector.broadcast %cst_1 : f32 to vector<64x1xf32>
    %4 = arith.divf %2, %3 : vector<64x1xf32>
    %5 = vector.broadcast %4 : vector<64x1xf32> to vector<64x32xf32>
    %6 = arith.subf %0, %5 : vector<64x32xf32>
    %7 = arith.mulf %6, %6 : vector<64x32xf32>
    %cst_2 = arith.constant dense<0.000000e+00> : vector<64xf32>
    %8 = vector.multi_reduction <add>, %7, %cst_2 [1] : vector<64x32xf32> to vector<64xf32>
    %9 = vector.shape_cast %8 : vector<64xf32> to vector<64x1xf32>
    %cst_3 = arith.constant 3.200000e+01 : f32
    %10 = vector.broadcast %cst_3 : f32 to vector<64x1xf32>
    %11 = arith.divf %9, %10 : vector<64x1xf32>
    %12 = vector.broadcast %4 : vector<64x1xf32> to vector<64x32xf32>
    %13 = arith.subf %0, %12 : vector<64x32xf32>
    %cst_4 = arith.constant 9.99999974E-6 : f32
    %14 = vector.broadcast %cst_4 : f32 to vector<64x1xf32>
    %15 = arith.addf %11, %14 : vector<64x1xf32>
    %16 = math.rsqrt %15 : vector<64x1xf32>
    %17 = vector.broadcast %16 : vector<64x1xf32> to vector<64x32xf32>
    %18 = arith.mulf %13, %17 : vector<64x32xf32>
    %c0_5 = arith.constant 0 : index
    %c0_6 = arith.constant 0 : index
    %19 = vector.load %arg2[%c0_5, %c0_6] : memref<1x32xf32, #tpu.memory_space<vmem>>, vector<1x32xf32>
    %20 = vector.broadcast %19 : vector<1x32xf32> to vector<64x32xf32>
    %21 = arith.mulf %18, %20 : vector<64x32xf32>
    %c0_7 = arith.constant 0 : index
    %c0_8 = arith.constant 0 : index
    %22 = vector.load %arg3[%c0_7, %c0_8] : memref<1x32xf32, #tpu.memory_space<vmem>>, vector<1x32xf32>
    %23 = vector.broadcast %22 : vector<1x32xf32> to vector<64x32xf32>
    %24 = arith.addf %21, %23 : vector<64x32xf32>
    %25 = arith.truncf %24 : vector<64x32xf32> to vector<64x32xbf16>
    %c0_9 = arith.constant 0 : index
    %c0_10 = arith.constant 0 : index
    %26 = vector.load %arg4[%c0_9, %c0_10] : memref<32x4xbf16, #tpu.memory_space<vmem>>, vector<32x4xbf16>
    %cst_11 = arith.constant dense<0.000000e+00> : vector<64x4xf32>
    %27 = tpu.matmul %25, %26, %cst_11 {dimension_numbers = #tpu.dot_dimension_numbers<[1], [0], [0], [1], [0, 0, 1, 1], [], []>} : vector<64x32xbf16>, vector<32x4xbf16>, vector<64x4xf32> -> vector<64x4xf32>
    %c0_12 = arith.constant 0 : index
    %c0_13 = arith.constant 0 : index
    %28 = vector.load %arg5[%c0_12, %c0_13] : memref<1x4xf32, #tpu.memory_space<vmem>>, vector<1x4xf32>
    %29 = vector.broadcast %28 : vector<1x4xf32> to vector<64x4xf32>
    %30 = arith.addf %27, %29 : vector<64x4xf32>
    %c0_14 = arith.constant 0 : index
    %c0_15 = arith.constant 0 : index
    %31 = vector.load %arg6[%c0_14, %c0_15] : memref<64x4xf32, #tpu.memory_space<vmem>>, vector<64x4xf32>
    tpu.vector_store %arg6[%c0_14, %c0_15], %30 {strides = array<i32>} : memref<64x4xf32, #tpu.memory_space<vmem>>, vector<64x4xf32>,
    return
  }
  func.func @transform_0(%arg0: i32) -> (i32, i32) {
    %c0_i32 = arith.constant 0 : i32
    %c0_i32_0 = arith.constant 0 : i32
    return %arg0, %c0_i32 : i32, i32
  }
  func.func @transform_1(%arg0: i32) -> (i32, i32) {
    %c0_i32 = arith.constant 0 : i32
    %c0_i32_0 = arith.constant 0 : i32
    %c0_i32_1 = arith.constant 0 : i32
    return %c0_i32, %c0_i32_0 : i32, i32
  }
  func.func @transform_2(%arg0: i32) -> (i32, i32) {
    %c0_i32 = arith.constant 0 : i32
    %c0_i32_0 = arith.constant 0 : i32
    %c0_i32_1 = arith.constant 0 : i32
    return %c0_i32, %c0_i32_0 : i32, i32
  }
  func.func @transform_3(%arg0: i32) -> (i32, i32) {
    %c0_i32 = arith.constant 0 : i32
    %c0_i32_0 = arith.constant 0 : i32
    %c0_i32_1 = arith.constant 0 : i32
    return %c0_i32, %c0_i32_0 : i32, i32
  }
  func.func @transform_4(%arg0: i32) -> (i32, i32) {
    %c0_i32 = arith.constant 0 : i32
    %c0_i32_0 = arith.constant 0 : i32
    %c0_i32_1 = arith.constant 0 : i32
    return %c0_i32, %c0_i32_0 : i32, i32
  }
  func.func @transform_5(%arg0: i32) -> (i32, i32) {
    %c0_i32 = arith.constant 0 : i32
    %c0_i32_0 = arith.constant 0 : i32
    return %arg0, %c0_i32 : i32, i32
  }
}

module attributes {stable_mosaic.version = 11 : i64} {
  func.func @_fused_encoder_layer_kernel(%arg0: i32, %arg1: memref<64x32xf32, #tpu.memory_space<vmem>>, %arg2: memref<64x64xf32, #tpu.memory_space<vmem>>, %arg3: memref<32x96xbf16, #tpu.memory_space<vmem>>, %arg4: memref<1x96xf32, #tpu.memory_space<vmem>>, %arg5: memref<32x32xbf16, #tpu.memory_space<vmem>>, %arg6: memref<1x32xf32, #tpu.memory_space<vmem>>, %arg7: memref<1x32xf32, #tpu.memory_space<vmem>>, %arg8: memref<1x32xf32, #tpu.memory_space<vmem>>, %arg9: memref<32x64xbf16, #tpu.memory_space<vmem>>, %arg10: memref<1x64xf32, #tpu.memory_space<vmem>>, %arg11: memref<64x32xbf16, #tpu.memory_space<vmem>>, %arg12: memref<1x32xf32, #tpu.memory_space<vmem>>, %arg13: memref<1x32xf32, #tpu.memory_space<vmem>>, %arg14: memref<1x32xf32, #tpu.memory_space<vmem>>, %arg15: memref<64x32xf32, #tpu.memory_space<vmem>>) attributes {dimension_semantics = [#tpu.dimension_semantics<parallel>], iteration_bounds = array<i64: 1>, scalar_prefetch = 0 : i64, scratch_operands = 0 : i64, tpu.core_type = #tpu.core_type<tc>, window_params = [{transform_indices = @transform_0, window_bounds = array<i64: 64, 32>}, {pipeline_mode = #tpu.pipeline_mode<synchronous>, transform_indices = @transform_1, window_bounds = array<i64: 64, 64>}, {pipeline_mode = #tpu.pipeline_mode<synchronous>, transform_indices = @transform_2, window_bounds = array<i64: 32, 96>}, {pipeline_mode = #tpu.pipeline_mode<synchronous>, transform_indices = @transform_3, window_bounds = array<i64: 1, 96>}, {pipeline_mode = #tpu.pipeline_mode<synchronous>, transform_indices = @transform_4, window_bounds = array<i64: 32, 32>}, {pipeline_mode = #tpu.pipeline_mode<synchronous>, transform_indices = @transform_5, window_bounds = array<i64: 1, 32>}, {pipeline_mode = #tpu.pipeline_mode<synchronous>, transform_indices = @transform_6, window_bounds = array<i64: 1, 32>}, {pipeline_mode = #tpu.pipeline_mode<synchronous>, transform_indices = @transform_7, window_bounds = array<i64: 1, 32>}, {pipeline_mode = #tpu.pipeline_mode<synchronous>, transform_indices = @transform_8, window_bounds = array<i64: 32, 64>}, {pipeline_mode = #tpu.pipeline_mode<synchronous>, transform_indices = @transform_9, window_bounds = array<i64: 1, 64>}, {pipeline_mode = #tpu.pipeline_mode<synchronous>, transform_indices = @transform_10, window_bounds = array<i64: 64, 32>}, {pipeline_mode = #tpu.pipeline_mode<synchronous>, transform_indices = @transform_11, window_bounds = array<i64: 1, 32>}, {pipeline_mode = #tpu.pipeline_mode<synchronous>, transform_indices = @transform_12, window_bounds = array<i64: 1, 32>}, {pipeline_mode = #tpu.pipeline_mode<synchronous>, transform_indices = @transform_13, window_bounds = array<i64: 1, 32>}, {transform_indices = @transform_14, window_bounds = array<i64: 64, 32>}]} {
    %c0 = arith.constant 0 : index
    %c0_0 = arith.constant 0 : index
    %0 = vector.load %arg1[%c0, %c0_0] : memref<64x32xf32, #tpu.memory_space<vmem>>, vector<64x32xf32>
    %cst = arith.constant 5.65685415 : f32
    %1 = vector.broadcast %cst : f32 to vector<64x32xf32>
    %2 = arith.mulf %0, %1 : vector<64x32xf32>
    %3 = arith.truncf %2 : vector<64x32xf32> to vector<64x32xbf16>
    %c0_1 = arith.constant 0 : index
    %c0_2 = arith.constant 0 : index
    %4 = vector.load %arg3[%c0_1, %c0_2] : memref<32x96xbf16, #tpu.memory_space<vmem>>, vector<32x96xbf16>
    %cst_3 = arith.constant dense<0.000000e+00> : vector<64x96xf32>
    %5 = tpu.matmul %3, %4, %cst_3 {dimension_numbers = #tpu.dot_dimension_numbers<[1], [0], [0], [1], [0, 0, 1, 1], [], []>} : vector<64x32xbf16>, vector<32x96xbf16>, vector<64x96xf32> -> vector<64x96xf32>
    %c0_4 = arith.constant 0 : index
    %c0_5 = arith.constant 0 : index
    %6 = vector.load %arg4[%c0_4, %c0_5] : memref<1x96xf32, #tpu.memory_space<vmem>>, vector<1x96xf32>
    %7 = vector.broadcast %6 : vector<1x96xf32> to vector<64x96xf32>
    %8 = arith.addf %5, %7 : vector<64x96xf32>
    %c0_6 = arith.constant 0 : index
    %c0_7 = arith.constant 0 : index
    %9 = vector.load %arg2[%c0_6, %c0_7] : memref<64x64xf32, #tpu.memory_space<vmem>>, vector<64x64xf32>
    %c0_8 = arith.constant 0 : index
    %c0_9 = arith.constant 0 : index
    %10 = vector.load %arg5[%c0_8, %c0_9] : memref<32x32xbf16, #tpu.memory_space<vmem>>, vector<32x32xbf16>
    %11 = vector.extract_strided_slice %8 {offsets = [0, 0], sizes = [64, 8], strides = [1, 1]} : vector<64x96xf32> to vector<64x8xf32>
    %cst_10 = arith.constant 0.353553385 : f32
    %12 = vector.broadcast %cst_10 : f32 to vector<64x8xf32>
    %13 = arith.mulf %11, %12 : vector<64x8xf32>
    %14 = vector.extract_strided_slice %8 {offsets = [0, 32], sizes = [64, 8], strides = [1, 1]} : vector<64x96xf32> to vector<64x8xf32>
    %15 = vector.extract_strided_slice %8 {offsets = [0, 64], sizes = [64, 8], strides = [1, 1]} : vector<64x96xf32> to vector<64x8xf32>
    %cst_11 = arith.constant dense<0.000000e+00> : vector<64x64xf32>
    %16 = tpu.matmul %13, %14, %cst_11 {dimension_numbers = #tpu.dot_dimension_numbers<[1], [1], [0], [0], [0, 0, 1, 0], [], []>} : vector<64x8xf32>, vector<64x8xf32>, vector<64x64xf32> -> vector<64x64xf32>
    %17 = arith.addf %16, %9 : vector<64x64xf32>
    %cst_12 = arith.constant dense<0xFF800000> : vector<64xf32>
    %18 = vector.multi_reduction <maximumf>, %17, %cst_12 [1] : vector<64x64xf32> to vector<64xf32>
    %19 = vector.shape_cast %18 : vector<64xf32> to vector<64x1xf32>
    %20 = vector.broadcast %19 : vector<64x1xf32> to vector<64x64xf32>
    %21 = arith.subf %17, %20 : vector<64x64xf32>
    %22 = math.exp %21 : vector<64x64xf32>
    %cst_13 = arith.constant dense<0.000000e+00> : vector<64xf32>
    %23 = vector.multi_reduction <add>, %22, %cst_13 [1] : vector<64x64xf32> to vector<64xf32>
    %24 = vector.shape_cast %23 : vector<64xf32> to vector<64x1xf32>
    %25 = tpu.reciprocal %24 {approx = true} : vector<64x1xf32> -> vector<64x1xf32>
    %26 = vector.broadcast %25 : vector<64x1xf32> to vector<64x64xf32>
    %27 = arith.mulf %22, %26 : vector<64x64xf32>
    %cst_14 = arith.constant dense<0.000000e+00> : vector<64x8xf32>
    %28 = tpu.matmul %27, %15, %cst_14 {dimension_numbers = #tpu.dot_dimension_numbers<[1], [0], [0], [1], [0, 0, 1, 1], [], []>} : vector<64x64xf32>, vector<64x8xf32>, vector<64x8xf32> -> vector<64x8xf32>
    %29 = arith.truncf %28 : vector<64x8xf32> to vector<64x8xbf16>
    %30 = vector.extract_strided_slice %10 {offsets = [0, 0], sizes = [8, 32], strides = [1, 1]} : vector<32x32xbf16> to vector<8x32xbf16>
    %cst_15 = arith.constant dense<0.000000e+00> : vector<64x32xf32>
    %31 = tpu.matmul %29, %30, %cst_15 {dimension_numbers = #tpu.dot_dimension_numbers<[1], [0], [0], [1], [0, 0, 1, 1], [], []>} : vector<64x8xbf16>, vector<8x32xbf16>, vector<64x32xf32> -> vector<64x32xf32>
    %32 = vector.extract_strided_slice %8 {offsets = [0, 8], sizes = [64, 8], strides = [1, 1]} : vector<64x96xf32> to vector<64x8xf32>
    %cst_16 = arith.constant 0.353553385 : f32
    %33 = vector.broadcast %cst_16 : f32 to vector<64x8xf32>
    %34 = arith.mulf %32, %33 : vector<64x8xf32>
    %35 = vector.extract_strided_slice %8 {offsets = [0, 40], sizes = [64, 8], strides = [1, 1]} : vector<64x96xf32> to vector<64x8xf32>
    %36 = vector.extract_strided_slice %8 {offsets = [0, 72], sizes = [64, 8], strides = [1, 1]} : vector<64x96xf32> to vector<64x8xf32>
    %cst_17 = arith.constant dense<0.000000e+00> : vector<64x64xf32>
    %37 = tpu.matmul %34, %35, %cst_17 {dimension_numbers = #tpu.dot_dimension_numbers<[1], [1], [0], [0], [0, 0, 1, 0], [], []>} : vector<64x8xf32>, vector<64x8xf32>, vector<64x64xf32> -> vector<64x64xf32>
    %38 = arith.addf %37, %9 : vector<64x64xf32>
    %cst_18 = arith.constant dense<0xFF800000> : vector<64xf32>
    %39 = vector.multi_reduction <maximumf>, %38, %cst_18 [1] : vector<64x64xf32> to vector<64xf32>
    %40 = vector.shape_cast %39 : vector<64xf32> to vector<64x1xf32>
    %41 = vector.broadcast %40 : vector<64x1xf32> to vector<64x64xf32>
    %42 = arith.subf %38, %41 : vector<64x64xf32>
    %43 = math.exp %42 : vector<64x64xf32>
    %cst_19 = arith.constant dense<0.000000e+00> : vector<64xf32>
    %44 = vector.multi_reduction <add>, %43, %cst_19 [1] : vector<64x64xf32> to vector<64xf32>
    %45 = vector.shape_cast %44 : vector<64xf32> to vector<64x1xf32>
    %46 = tpu.reciprocal %45 {approx = true} : vector<64x1xf32> -> vector<64x1xf32>
    %47 = vector.broadcast %46 : vector<64x1xf32> to vector<64x64xf32>
    %48 = arith.mulf %43, %47 : vector<64x64xf32>
    %cst_20 = arith.constant dense<0.000000e+00> : vector<64x8xf32>
    %49 = tpu.matmul %48, %36, %cst_20 {dimension_numbers = #tpu.dot_dimension_numbers<[1], [0], [0], [1], [0, 0, 1, 1], [], []>} : vector<64x64xf32>, vector<64x8xf32>, vector<64x8xf32> -> vector<64x8xf32>
    %50 = arith.truncf %49 : vector<64x8xf32> to vector<64x8xbf16>
    %51 = vector.extract_strided_slice %10 {offsets = [8, 0], sizes = [8, 32], strides = [1, 1]} : vector<32x32xbf16> to vector<8x32xbf16>
    %cst_21 = arith.constant dense<0.000000e+00> : vector<64x32xf32>
    %52 = tpu.matmul %50, %51, %cst_21 {dimension_numbers = #tpu.dot_dimension_numbers<[1], [0], [0], [1], [0, 0, 1, 1], [], []>} : vector<64x8xbf16>, vector<8x32xbf16>, vector<64x32xf32> -> vector<64x32xf32>
    %53 = arith.addf %31, %52 : vector<64x32xf32>
    %54 = vector.extract_strided_slice %8 {offsets = [0, 16], sizes = [64, 8], strides = [1, 1]} : vector<64x96xf32> to vector<64x8xf32>
    %cst_22 = arith.constant 0.353553385 : f32
    %55 = vector.broadcast %cst_22 : f32 to vector<64x8xf32>
    %56 = arith.mulf %54, %55 : vector<64x8xf32>
    %57 = vector.extract_strided_slice %8 {offsets = [0, 48], sizes = [64, 8], strides = [1, 1]} : vector<64x96xf32> to vector<64x8xf32>
    %58 = vector.extract_strided_slice %8 {offsets = [0, 80], sizes = [64, 8], strides = [1, 1]} : vector<64x96xf32> to vector<64x8xf32>
    %cst_23 = arith.constant dense<0.000000e+00> : vector<64x64xf32>
    %59 = tpu.matmul %56, %57, %cst_23 {dimension_numbers = #tpu.dot_dimension_numbers<[1], [1], [0], [0], [0, 0, 1, 0], [], []>} : vector<64x8xf32>, vector<64x8xf32>, vector<64x64xf32> -> vector<64x64xf32>
    %60 = arith.addf %59, %9 : vector<64x64xf32>
    %cst_24 = arith.constant dense<0xFF800000> : vector<64xf32>
    %61 = vector.multi_reduction <maximumf>, %60, %cst_24 [1] : vector<64x64xf32> to vector<64xf32>
    %62 = vector.shape_cast %61 : vector<64xf32> to vector<64x1xf32>
    %63 = vector.broadcast %62 : vector<64x1xf32> to vector<64x64xf32>
    %64 = arith.subf %60, %63 : vector<64x64xf32>
    %65 = math.exp %64 : vector<64x64xf32>
    %cst_25 = arith.constant dense<0.000000e+00> : vector<64xf32>
    %66 = vector.multi_reduction <add>, %65, %cst_25 [1] : vector<64x64xf32> to vector<64xf32>
    %67 = vector.shape_cast %66 : vector<64xf32> to vector<64x1xf32>
    %68 = tpu.reciprocal %67 {approx = true} : vector<64x1xf32> -> vector<64x1xf32>
    %69 = vector.broadcast %68 : vector<64x1xf32> to vector<64x64xf32>
    %70 = arith.mulf %65, %69 : vector<64x64xf32>
    %cst_26 = arith.constant dense<0.000000e+00> : vector<64x8xf32>
    %71 = tpu.matmul %70, %58, %cst_26 {dimension_numbers = #tpu.dot_dimension_numbers<[1], [0], [0], [1], [0, 0, 1, 1], [], []>} : vector<64x64xf32>, vector<64x8xf32>, vector<64x8xf32> -> vector<64x8xf32>
    %72 = arith.truncf %71 : vector<64x8xf32> to vector<64x8xbf16>
    %73 = vector.extract_strided_slice %10 {offsets = [16, 0], sizes = [8, 32], strides = [1, 1]} : vector<32x32xbf16> to vector<8x32xbf16>
    %cst_27 = arith.constant dense<0.000000e+00> : vector<64x32xf32>
    %74 = tpu.matmul %72, %73, %cst_27 {dimension_numbers = #tpu.dot_dimension_numbers<[1], [0], [0], [1], [0, 0, 1, 1], [], []>} : vector<64x8xbf16>, vector<8x32xbf16>, vector<64x32xf32> -> vector<64x32xf32>
    %75 = arith.addf %53, %74 : vector<64x32xf32>
    %76 = vector.extract_strided_slice %8 {offsets = [0, 24], sizes = [64, 8], strides = [1, 1]} : vector<64x96xf32> to vector<64x8xf32>
    %cst_28 = arith.constant 0.353553385 : f32
    %77 = vector.broadcast %cst_28 : f32 to vector<64x8xf32>
    %78 = arith.mulf %76, %77 : vector<64x8xf32>
    %79 = vector.extract_strided_slice %8 {offsets = [0, 56], sizes = [64, 8], strides = [1, 1]} : vector<64x96xf32> to vector<64x8xf32>
    %80 = vector.extract_strided_slice %8 {offsets = [0, 88], sizes = [64, 8], strides = [1, 1]} : vector<64x96xf32> to vector<64x8xf32>
    %cst_29 = arith.constant dense<0.000000e+00> : vector<64x64xf32>
    %81 = tpu.matmul %78, %79, %cst_29 {dimension_numbers = #tpu.dot_dimension_numbers<[1], [1], [0], [0], [0, 0, 1, 0], [], []>} : vector<64x8xf32>, vector<64x8xf32>, vector<64x64xf32> -> vector<64x64xf32>
    %82 = arith.addf %81, %9 : vector<64x64xf32>
    %cst_30 = arith.constant dense<0xFF800000> : vector<64xf32>
    %83 = vector.multi_reduction <maximumf>, %82, %cst_30 [1] : vector<64x64xf32> to vector<64xf32>
    %84 = vector.shape_cast %83 : vector<64xf32> to vector<64x1xf32>
    %85 = vector.broadcast %84 : vector<64x1xf32> to vector<64x64xf32>
    %86 = arith.subf %82, %85 : vector<64x64xf32>
    %87 = math.exp %86 : vector<64x64xf32>
    %cst_31 = arith.constant dense<0.000000e+00> : vector<64xf32>
    %88 = vector.multi_reduction <add>, %87, %cst_31 [1] : vector<64x64xf32> to vector<64xf32>
    %89 = vector.shape_cast %88 : vector<64xf32> to vector<64x1xf32>
    %90 = tpu.reciprocal %89 {approx = true} : vector<64x1xf32> -> vector<64x1xf32>
    %91 = vector.broadcast %90 : vector<64x1xf32> to vector<64x64xf32>
    %92 = arith.mulf %87, %91 : vector<64x64xf32>
    %cst_32 = arith.constant dense<0.000000e+00> : vector<64x8xf32>
    %93 = tpu.matmul %92, %80, %cst_32 {dimension_numbers = #tpu.dot_dimension_numbers<[1], [0], [0], [1], [0, 0, 1, 1], [], []>} : vector<64x64xf32>, vector<64x8xf32>, vector<64x8xf32> -> vector<64x8xf32>
    %94 = arith.truncf %93 : vector<64x8xf32> to vector<64x8xbf16>
    %95 = vector.extract_strided_slice %10 {offsets = [24, 0], sizes = [8, 32], strides = [1, 1]} : vector<32x32xbf16> to vector<8x32xbf16>
    %cst_33 = arith.constant dense<0.000000e+00> : vector<64x32xf32>
    %96 = tpu.matmul %94, %95, %cst_33 {dimension_numbers = #tpu.dot_dimension_numbers<[1], [0], [0], [1], [0, 0, 1, 1], [], []>} : vector<64x8xbf16>, vector<8x32xbf16>, vector<64x32xf32> -> vector<64x32xf32>
    %97 = arith.addf %75, %96 : vector<64x32xf32>
    %c0_34 = arith.constant 0 : index
    %c0_35 = arith.constant 0 : index
    %98 = vector.load %arg6[%c0_34, %c0_35] : memref<1x32xf32, #tpu.memory_space<vmem>>, vector<1x32xf32>
    %99 = vector.broadcast %98 : vector<1x32xf32> to vector<64x32xf32>
    %100 = arith.addf %97, %99 : vector<64x32xf32>
    %101 = arith.addf %2, %100 : vector<64x32xf32>
    %cst_36 = arith.constant dense<0.000000e+00> : vector<64xf32>
    %102 = vector.multi_reduction <add>, %101, %cst_36 [1] : vector<64x32xf32> to vector<64xf32>
    %103 = vector.shape_cast %102 : vector<64xf32> to vector<64x1xf32>
    %cst_37 = arith.constant 3.200000e+01 : f32
    %104 = vector.broadcast %cst_37 : f32 to vector<64x1xf32>
    %105 = arith.divf %103, %104 : vector<64x1xf32>
    %106 = vector.broadcast %105 : vector<64x1xf32> to vector<64x32xf32>
    %107 = arith.subf %101, %106 : vector<64x32xf32>
    %108 = arith.mulf %107, %107 : vector<64x32xf32>
    %cst_38 = arith.constant dense<0.000000e+00> : vector<64xf32>
    %109 = vector.multi_reduction <add>, %108, %cst_38 [1] : vector<64x32xf32> to vector<64xf32>
    %110 = vector.shape_cast %109 : vector<64xf32> to vector<64x1xf32>
    %cst_39 = arith.constant 3.200000e+01 : f32
    %111 = vector.broadcast %cst_39 : f32 to vector<64x1xf32>
    %112 = arith.divf %110, %111 : vector<64x1xf32>
    %113 = vector.broadcast %105 : vector<64x1xf32> to vector<64x32xf32>
    %114 = arith.subf %101, %113 : vector<64x32xf32>
    %cst_40 = arith.constant 9.99999974E-6 : f32
    %115 = vector.broadcast %cst_40 : f32 to vector<64x1xf32>
    %116 = arith.addf %112, %115 : vector<64x1xf32>
    %117 = math.rsqrt %116 : vector<64x1xf32>
    %118 = vector.broadcast %117 : vector<64x1xf32> to vector<64x32xf32>
    %119 = arith.mulf %114, %118 : vector<64x32xf32>
    %c0_41 = arith.constant 0 : index
    %c0_42 = arith.constant 0 : index
    %120 = vector.load %arg7[%c0_41, %c0_42] : memref<1x32xf32, #tpu.memory_space<vmem>>, vector<1x32xf32>
    %121 = vector.broadcast %120 : vector<1x32xf32> to vector<64x32xf32>
    %122 = arith.mulf %119, %121 : vector<64x32xf32>
    %c0_43 = arith.constant 0 : index
    %c0_44 = arith.constant 0 : index
    %123 = vector.load %arg8[%c0_43, %c0_44] : memref<1x32xf32, #tpu.memory_space<vmem>>, vector<1x32xf32>
    %124 = vector.broadcast %123 : vector<1x32xf32> to vector<64x32xf32>
    %125 = arith.addf %122, %124 : vector<64x32xf32>
    %126 = arith.truncf %125 : vector<64x32xf32> to vector<64x32xbf16>
    %c0_45 = arith.constant 0 : index
    %c0_46 = arith.constant 0 : index
    %127 = vector.load %arg9[%c0_45, %c0_46] : memref<32x64xbf16, #tpu.memory_space<vmem>>, vector<32x64xbf16>
    %cst_47 = arith.constant dense<0.000000e+00> : vector<64x64xf32>
    %128 = tpu.matmul %126, %127, %cst_47 {dimension_numbers = #tpu.dot_dimension_numbers<[1], [0], [0], [1], [0, 0, 1, 1], [], []>} : vector<64x32xbf16>, vector<32x64xbf16>, vector<64x64xf32> -> vector<64x64xf32>
    %c0_48 = arith.constant 0 : index
    %c0_49 = arith.constant 0 : index
    %129 = vector.load %arg10[%c0_48, %c0_49] : memref<1x64xf32, #tpu.memory_space<vmem>>, vector<1x64xf32>
    %130 = vector.broadcast %129 : vector<1x64xf32> to vector<64x64xf32>
    %131 = arith.addf %128, %130 : vector<64x64xf32>
    %cst_50 = arith.constant 0.000000e+00 : f32
    %132 = vector.broadcast %cst_50 : f32 to vector<64x64xf32>
    %133 = arith.maximumf %131, %132 : vector<64x64xf32>
    %134 = arith.truncf %133 : vector<64x64xf32> to vector<64x64xbf16>
    %c0_51 = arith.constant 0 : index
    %c0_52 = arith.constant 0 : index
    %135 = vector.load %arg11[%c0_51, %c0_52] : memref<64x32xbf16, #tpu.memory_space<vmem>>, vector<64x32xbf16>
    %cst_53 = arith.constant dense<0.000000e+00> : vector<64x32xf32>
    %136 = tpu.matmul %134, %135, %cst_53 {dimension_numbers = #tpu.dot_dimension_numbers<[1], [0], [0], [1], [0, 0, 1, 1], [], []>} : vector<64x64xbf16>, vector<64x32xbf16>, vector<64x32xf32> -> vector<64x32xf32>
    %c0_54 = arith.constant 0 : index
    %c0_55 = arith.constant 0 : index
    %137 = vector.load %arg12[%c0_54, %c0_55] : memref<1x32xf32, #tpu.memory_space<vmem>>, vector<1x32xf32>
    %138 = vector.broadcast %137 : vector<1x32xf32> to vector<64x32xf32>
    %139 = arith.addf %136, %138 : vector<64x32xf32>
    %140 = arith.addf %125, %139 : vector<64x32xf32>
    %cst_56 = arith.constant dense<0.000000e+00> : vector<64xf32>
    %141 = vector.multi_reduction <add>, %140, %cst_56 [1] : vector<64x32xf32> to vector<64xf32>
    %142 = vector.shape_cast %141 : vector<64xf32> to vector<64x1xf32>
    %cst_57 = arith.constant 3.200000e+01 : f32
    %143 = vector.broadcast %cst_57 : f32 to vector<64x1xf32>
    %144 = arith.divf %142, %143 : vector<64x1xf32>
    %145 = vector.broadcast %144 : vector<64x1xf32> to vector<64x32xf32>
    %146 = arith.subf %140, %145 : vector<64x32xf32>
    %147 = arith.mulf %146, %146 : vector<64x32xf32>
    %cst_58 = arith.constant dense<0.000000e+00> : vector<64xf32>
    %148 = vector.multi_reduction <add>, %147, %cst_58 [1] : vector<64x32xf32> to vector<64xf32>
    %149 = vector.shape_cast %148 : vector<64xf32> to vector<64x1xf32>
    %cst_59 = arith.constant 3.200000e+01 : f32
    %150 = vector.broadcast %cst_59 : f32 to vector<64x1xf32>
    %151 = arith.divf %149, %150 : vector<64x1xf32>
    %152 = vector.broadcast %144 : vector<64x1xf32> to vector<64x32xf32>
    %153 = arith.subf %140, %152 : vector<64x32xf32>
    %cst_60 = arith.constant 9.99999974E-6 : f32
    %154 = vector.broadcast %cst_60 : f32 to vector<64x1xf32>
    %155 = arith.addf %151, %154 : vector<64x1xf32>
    %156 = math.rsqrt %155 : vector<64x1xf32>
    %157 = vector.broadcast %156 : vector<64x1xf32> to vector<64x32xf32>
    %158 = arith.mulf %153, %157 : vector<64x32xf32>
    %c0_61 = arith.constant 0 : index
    %c0_62 = arith.constant 0 : index
    %159 = vector.load %arg13[%c0_61, %c0_62] : memref<1x32xf32, #tpu.memory_space<vmem>>, vector<1x32xf32>
    %160 = vector.broadcast %159 : vector<1x32xf32> to vector<64x32xf32>
    %161 = arith.mulf %158, %160 : vector<64x32xf32>
    %c0_63 = arith.constant 0 : index
    %c0_64 = arith.constant 0 : index
    %162 = vector.load %arg14[%c0_63, %c0_64] : memref<1x32xf32, #tpu.memory_space<vmem>>, vector<1x32xf32>
    %163 = vector.broadcast %162 : vector<1x32xf32> to vector<64x32xf32>
    %164 = arith.addf %161, %163 : vector<64x32xf32>
    %c0_65 = arith.constant 0 : index
    %c0_66 = arith.constant 0 : index
    %165 = vector.load %arg15[%c0_65, %c0_66] : memref<64x32xf32, #tpu.memory_space<vmem>>, vector<64x32xf32>
    tpu.vector_store %arg15[%c0_65, %c0_66], %164 {strides = array<i32>} : memref<64x32xf32, #tpu.memory_space<vmem>>, vector<64x32xf32>,
    return
  }
  func.func @transform_0(%arg0: i32) -> (i32, i32) {
    %c0_i32 = arith.constant 0 : i32
    %c0_i32_0 = arith.constant 0 : i32
    return %arg0, %c0_i32 : i32, i32
  }
  func.func @transform_1(%arg0: i32) -> (i32, i32) {
    %c0_i32 = arith.constant 0 : i32
    %c0_i32_0 = arith.constant 0 : i32
    %c0_i32_1 = arith.constant 0 : i32
    return %c0_i32, %c0_i32_0 : i32, i32
  }
  func.func @transform_2(%arg0: i32) -> (i32, i32) {
    %c0_i32 = arith.constant 0 : i32
    %c0_i32_0 = arith.constant 0 : i32
    %c0_i32_1 = arith.constant 0 : i32
    return %c0_i32, %c0_i32_0 : i32, i32
  }
  func.func @transform_3(%arg0: i32) -> (i32, i32) {
    %c0_i32 = arith.constant 0 : i32
    %c0_i32_0 = arith.constant 0 : i32
    %c0_i32_1 = arith.constant 0 : i32
    return %c0_i32, %c0_i32_0 : i32, i32
  }
  func.func @transform_4(%arg0: i32) -> (i32, i32) {
    %c0_i32 = arith.constant 0 : i32
    %c0_i32_0 = arith.constant 0 : i32
    %c0_i32_1 = arith.constant 0 : i32
    return %c0_i32, %c0_i32_0 : i32, i32
  }
  func.func @transform_5(%arg0: i32) -> (i32, i32) {
    %c0_i32 = arith.constant 0 : i32
    %c0_i32_0 = arith.constant 0 : i32
    %c0_i32_1 = arith.constant 0 : i32
    return %c0_i32, %c0_i32_0 : i32, i32
  }
  func.func @transform_6(%arg0: i32) -> (i32, i32) {
    %c0_i32 = arith.constant 0 : i32
    %c0_i32_0 = arith.constant 0 : i32
    %c0_i32_1 = arith.constant 0 : i32
    return %c0_i32, %c0_i32_0 : i32, i32
  }
  func.func @transform_7(%arg0: i32) -> (i32, i32) {
    %c0_i32 = arith.constant 0 : i32
    %c0_i32_0 = arith.constant 0 : i32
    %c0_i32_1 = arith.constant 0 : i32
    return %c0_i32, %c0_i32_0 : i32, i32
  }
  func.func @transform_8(%arg0: i32) -> (i32, i32) {
    %c0_i32 = arith.constant 0 : i32
    %c0_i32_0 = arith.constant 0 : i32
    %c0_i32_1 = arith.constant 0 : i32
    return %c0_i32, %c0_i32_0 : i32, i32
  }
  func.func @transform_9(%arg0: i32) -> (i32, i32) {
    %c0_i32 = arith.constant 0 : i32
    %c0_i32_0 = arith.constant 0 : i32
    %c0_i32_1 = arith.constant 0 : i32
    return %c0_i32, %c0_i32_0 : i32, i32
  }
  func.func @transform_10(%arg0: i32) -> (i32, i32) {
    %c0_i32 = arith.constant 0 : i32
    %c0_i32_0 = arith.constant 0 : i32
    %c0_i32_1 = arith.constant 0 : i32
    return %c0_i32, %c0_i32_0 : i32, i32
  }
  func.func @transform_11(%arg0: i32) -> (i32, i32) {
    %c0_i32 = arith.constant 0 : i32
    %c0_i32_0 = arith.constant 0 : i32
    %c0_i32_1 = arith.constant 0 : i32
    return %c0_i32, %c0_i32_0 : i32, i32
  }
  func.func @transform_12(%arg0: i32) -> (i32, i32) {
    %c0_i32 = arith.constant 0 : i32
    %c0_i32_0 = arith.constant 0 : i32
    %c0_i32_1 = arith.constant 0 : i32
    return %c0_i32, %c0_i32_0 : i32, i32
  }
  func.func @transform_13(%arg0: i32) -> (i32, i32) {
    %c0_i32 = arith.constant 0 : i32
    %c0_i32_0 = arith.constant 0 : i32
    %c0_i32_1 = arith.constant 0 : i32
    return %c0_i32, %c0_i32_0 : i32, i32
  }
  func.func @transform_14(%arg0: i32) -> (i32, i32) {
    %c0_i32 = arith.constant 0 : i32
    %c0_i32_0 = arith.constant 0 : i32
    return %arg0, %c0_i32 : i32, i32
  }
}

</mosaic_0001>

<bundles_post_ra>
// kernel: sformer_forward.6
= control target key start
LH: loop header
LB: loop body
LE: loop exit
PB: predicated region body
PF: predicated region fallthrough
CT: control target
= control target key end

     0   :  { %s410_s15 = smov 0   ;;  %s445_s0 = inlined_call_operand.vmem [shape: f32[64,4], index: 0, kind: input, shape index: {}]   ;;  %s446_s1 = inlined_call_operand.vmem [shape: bf16[4,32], index: 1, kind: input, shape index: {}]   ;;  %s447_s2 = inlined_call_operand.vmem [shape: f32[1,32], index: 2, kind: input, shape index: {}]   ;;  %s448_s3 = inlined_call_operand.vmem [shape: f32[32,32], index: 3, kind: input, shape index: {}]   ;;  %s449_s4 = inlined_call_operand.vmem [shape: f32[64,32], index: 4, kind: output, shape index: {}]  }
   0x1 LB: > { %s345_s16 = sadd.s32 4294967295, %s383_s15   ;;  %p349_p0 = scmp.ge.s32.totalorder %s383_s15, 1  ;;  %s383_s15 = sphi %s410_s15, %s14_s15  }
   0x2   : > { %p163_p1 = scmp.lt.s32.totalorder %s383_s15, 3 }
   0x4   : > { %p164_p2 = pnand %p349_p0, %p163_p1 }
   0x5   : > { %v208_v0 = vld [vmem:[%s446_s1] sm:$0x3] (!%p164_p2)  ;;  %vm223_vm0 = vcmask (!%p164_p2), 1041408   ;;  %s350_s19 = sshll.u32 (!%p164_p2), %s345_s16, 2  ;;  %vm216_vm1 = vcmask (!%p164_p2), 31744   ;;  %vm284_vm2 = vcmask (!%p164_p2), 261120  }
   0x6   : > { %167 = sbr.rel (%p164_p2) target bundleno = 240 (0xf0), region = 36  ;;  %368 = vmatprep.subr.msk.bf16.mxu0 (!%p164_p2), %vm223_vm0, %v208_v0  ;;  %v225_v1 = vsel (!%p164_p2), %vm223_vm0, %v208_v0, 0  ;;  %p190_p3 = scmp.lt.s32.totalorder (!%p164_p2), %s350_s19, 7  ;;  %v354_v8 = vld [vmem:[%s447_s2] ss:$0 sm:$0xff] (!%p164_p2)  ;;  %v277_v16 = vld [vmem:[%s448_s3 + $0x8] sm:$0xff] (!%p164_p2) }
   0x7   : > { %363 = vmatpush3.bf16.msra.mxu0 (!%p164_p2), %v225_v1  ;;  %v276_v11 = vld [vmem:[%s448_s3] sm:$0xff] (!%p164_p2)  ;;  %v278_v17 = vld [vmem:[%s448_s3 + $0x10] sm:$0xff] (!%p164_p2)  ;;  %v279_v21 = vld [vmem:[%s448_s3 + $0x18] sm:$0xff] (!%p164_p2) }
   0xd   : > { %s451_s19 = smov (!%p190_p3, %s350_s19), 7 }
   0xe   : > { %s351_s20 = sshll.u32 %s451_s19, 3 }
   0xf   : > { %s193_s23 = scalar_lea.vmem %s445_s0, %s351_s20  ;;  %s199_s30 = scalar_lea.vmem %s449_s4, %s351_s20 }
  0x10   : > { %v202_v2 = vld [vmem:[%s193_s23] sm:$0xff]  ;;  %v203_v3 = vld [vmem:[%s193_s23 + $0x8] sm:$0xff]  ;;  %v204_v4 = vld [vmem:[%s193_s23 + $0x10] sm:$0xff] }
  0x11   : > { %v206_v5 = vpack.c.bf16 %v203_v3, %v202_v2  ;;  %v205_v6 = vld [vmem:[%s193_s23 + $0x18] sm:$0xff] }
  0x12   : > { %v207_v7 = vpack.c.bf16 %v205_v6, %v204_v4 }
  0x13   : > { %364 = vmatprep.mubr.msk.bf16.mxu0 %vm216_vm1, %v206_v5 }
  0x14   : > { %365 = vmatmul.mubr.msk.bf16.vlgmr.msra.gmra.mrb[0].mxu0 %vm216_vm1, %v207_v7 }
  0xe7   : > { %v366_v9 = vpop.f32.mrb[0].mxu0 }
  0xe8   : > { %v261_v10 = vpop.f32.mrb[1].mxu0  ;;  %v270_v14 = vadd.f32 %v366_v9, %v354_v8 }
  0xe9   : > { %v262_v12 = vadd.f32 %v354_v8, %v261_v10  ;;  %v367_v13 = vpop.f32.mrb[2].mxu0 }
  0xea   : > { %v264_v15 = vpop.f32.mrb[3].mxu0  ;;  %v273_v19 = vadd.f32 %v367_v13, %v354_v8  ;;  %v282_v23 = vadd.f32 %v278_v17, %v270_v14 }
  0xeb   : > { %v280_v18 = vadd.f32 %v276_v11, %v262_v12  ;;  %v265_v20 = vadd.f32 %v354_v8, %v264_v15 }
  0xec   : > { %v283_v24 = vadd.f32 %v279_v21, %v273_v19  ;;  %287 = vst.msk [vmem:[%s199_s30 + $0x10] sm:$0xff] %vm284_vm2, %v282_v23 }
  0xed   : > { %285 = vst.msk [vmem:[%s199_s30] sm:$0xff] %vm284_vm2, %v280_v18  ;;  %v281_v22 = vadd.f32 %v277_v16, %v265_v20 }
  0xee   : > { %288 = vst.msk [vmem:[%s199_s30 + $0x18] sm:$0xff] %vm284_vm2, %v283_v24 }
  0xef   : > { %286 = vst.msk [vmem:[%s199_s30 + $0x8] sm:$0xff] %vm284_vm2, %v281_v22 }
  0xf0 PF: > { %s14_s15 = sadd.s32 1, %s383_s15  }
  0xf1   : > { %p11_p4 = scmp.ge.s32.totalorder %s14_s15, 4  }
  0xf3   :  { %13 = sbr.rel (!%p11_p4) target bundleno = 1 (0x1), region = 66 }

// kernel: sformer_forward.9
= control target key start
LH: loop header
LB: loop body
LE: loop exit
PB: predicated region body
PF: predicated region fallthrough
CT: control target
= control target key end

     0   :  { %s523_s21 = smov 0   ;;  %s575_s0 = inlined_call_operand.vmem [shape: f32[32,32], index: 0, kind: input, shape index: {}]   ;;  %s576_s1 = inlined_call_operand.vmem [shape: f32[1,32], index: 1, kind: input, shape index: {}]   ;;  %s577_s2 = inlined_call_operand.vmem [shape: f32[1,32], index: 2, kind: input, shape index: {}]   ;;  %s578_s3 = inlined_call_operand.vmem [shape: bf16[32,32], index: 3, kind: input, shape index: {}]   ;;  %s579_s4 = inlined_call_operand.vmem [shape: f32[1,32], index: 4, kind: input, shape index: {}]   ;;  %s580_s5 = inlined_call_operand.vmem [shape: f32[16,32], index: 5, kind: input, shape index: {}]   ;;  %s581_s6 = inlined_call_operand.vmem [shape: f32[32,32], index: 6, kind: output, shape index: {}]  }
   0x1 LB: > { %s434_s22 = sadd.s32 4294967295, %s484_s21   ;;  %p438_p0 = scmp.ge.s32.totalorder %s484_s21, 1  ;;  %s484_s21 = sphi %s523_s21, %s16_s21  }
   0x2   : > { %p213_p1 = scmp.lt.s32.totalorder %s484_s21, 3 }
   0x4   : > { %p214_p2 = pnand %p438_p0, %p213_p1 }
   0x5   : > { %s439_s23 = sshll.u32 (!%p214_p2), %s434_s22, 1  ;;  %vm258_vm0 = vcmask (!%p214_p2), 261120   ;;  %v472_v14 = vld [vmem:[%s578_s3] sm:$0xff] (!%p214_p2)   ;;  %v486_v15 = vmov (!%p214_p2), 0.0   ;;  %v473_v16 = vld [vmem:[%s578_s3 + $0x8] sm:$0xff] (!%p214_p2)   ;;  %vm487_vm1 = vmmov (!%p214_p2), 0  }
   0x6   : > { %217 = sbr.rel (%p214_p2) target bundleno = 555 (0x22b), region = 44  ;;  %p244_p3 = scmp.lt.s32.totalorder (!%p214_p2), %s439_s23, 3  ;;  %454 = vmatprep.subr.bf16.mxu0 (!%p214_p2), %v486_v15  ;;  %458 = vmatprep.mubr.msk.bf16.mxu0 (!%p214_p2), %vm487_vm1, %v486_v15  ;;  %v443_v25 = vld [vmem:[%s576_s1] ss:$0 sm:$0xff] (!%p214_p2)  ;;  %v373_v40 = vld [vmem:[%s580_s5 + $0x8] sm:$0xff] (!%p214_p2) }
   0x7   : > { %455 = vmatpush3.bf16.msra.mxu0 (!%p214_p2), %v472_v14  ;;  %v444_v29 = vld [vmem:[%s577_s2] ss:$0 sm:$0xff] (!%p214_p2) }
   0x8   : > { %456 = vmatprep.subr.bf16.mxu0 (!%p214_p2), %v486_v15  ;;  %v445_v34 = vld [vmem:[%s579_s4] ss:$0 sm:$0xff] (!%p214_p2) }
   0x9   : > { %v372_v36 = vld [vmem:[%s580_s5] sm:$0xff] (!%p214_p2) }
   0xb   : > { %457 = vmatpush3.bf16.msra.mxu0 (!%p214_p2), %v473_v16 }
   0xd   : > { %s583_s23 = smov (!%p244_p3, %s439_s23), 3 }
   0xe   : > { %s440_s24 = sshll.u32 %s583_s23, 3 }
   0xf   : > { %s247_s27 = scalar_lea.vmem %s575_s0, %s440_s24  ;;  %s253_s18 = scalar_lea.vmem %s581_s6, %s440_s24 }
  0x10   : > { %v256_v0 = vld [vmem:[%s247_s27] sm:$0xff]  ;;  %v257_v1 = vld [vmem:[%s247_s27 + $0x8] sm:$0xff] }
  0x11   : > { %v259_v2 = vsel %vm258_vm0, %v256_v0, 0.0  ;;  %v262_v3 = vsel %vm258_vm0, %v257_v1, 0.0 }
  0x12   : > { %260 = vadd.xlane.f32.xlu0 %v259_v2 }
  0x16   : > { %263 = vadd.xlane.f32.xlu0 %v262_v3 }
  0x9f   : > { %v261_v4 = vpop.xlane.xlu0 %260 }
  0xa0   : > { %v266_v5 = vmul.f32 0.03125, %v261_v4 }
  0xa2   : > { %v268_v6 = vsub.f32 %v256_v0, %v266_v5 }
  0xa3   : > { %v264_v7 = vpop.xlane.xlu0 %263 }
  0xa4   : > { %v267_v8 = vmul.f32 0.03125, %v264_v7  ;;  %v270_v9 = vmul.f32 %v268_v6, %v268_v6 }
  0xa6   : > { %v269_v10 = vsub.f32 %v257_v1, %v267_v8  ;;  %v272_v11 = vsel %vm258_vm0, %v270_v9, 0.0 }
  0xa7   : > { %273 = vadd.xlane.f32.xlu1 %v272_v11 }
  0xa8   : > { %v271_v12 = vmul.f32 %v269_v10, %v269_v10 }
  0xaa   : > { %v275_v13 = vsel %vm258_vm0, %v271_v12, 0.0 }
  0xab   : > { %276 = vadd.xlane.f32.xlu1 %v275_v13 }
 0x134   : > { %v274_v17 = vpop.xlane.xlu1 %273 }
 0x135   : > { %v278_v18 = vmul.f32 0.03125, %v274_v17 }
 0x137   : > { %v280_v19 = vadd.f32 1e-05, %v278_v18 }
 0x138   : > { %v277_v20 = vpop.xlane.xlu1 %276 }
 0x139   : > { %474 = vrsqrt.f32 %v280_v19  ;;  %v279_v21 = vmul.f32 0.03125, %v277_v20 }
 0x13b   : > { %v281_v22 = vadd.f32 1e-05, %v279_v21 }
 0x13d   : > { %476 = vrsqrt.f32 %v281_v22 }
 0x143   : > { %v475_v23 = vpop.eup %474 }
 0x144   : > { %v284_v24 = vmul.f32 %v475_v23, %v268_v6 }
 0x146   : > { %v293_v28 = vmul.f32 %v443_v25, %v284_v24 }
 0x147   : > { %v477_v26 = vpop.eup %476 }
 0x148   : > { %v285_v27 = vmul.f32 %v477_v26, %v269_v10  ;;  %v302_v31 = vadd.f32 %v444_v29, %v293_v28 }
 0x14a   : > { %v294_v30 = vmul.f32 %v443_v25, %v285_v27 }
 0x14c   : > { %v303_v32 = vadd.f32 %v444_v29, %v294_v30 }
 0x14e   : > { %v304_v33 = vpack.c.bf16 %v303_v32, %v302_v31 }
 0x150   : > { %459 = vmatmul.mubr.msk.bf16.vlgmr.msra.gmra.mrb[0].mxu0 %vm258_vm0, %v304_v33 }
 0x223   : > { %v365_v35 = vpop.f32.mrb[0].mxu0 }
 0x224   : > { %v366_v37 = vadd.f32 %v445_v34, %v365_v35  ;;  %v460_v38 = vpop.f32.mrb[1].mxu0 }
 0x225   : > { %v368_v39 = vpop.f32.mrb[2].mxu0 }
 0x226   : > { %v374_v41 = vadd.f32 %v372_v36, %v366_v37  ;;  %v369_v42 = vadd.f32 %v445_v34, %v368_v39  ;;  %v461_v43 = vpop.f32.mrb[3].mxu0 }
 0x228   : > { %376 = vst.msk [vmem:[%s253_s18] sm:$0xff] %vm258_vm0, %v374_v41  ;;  %v375_v44 = vadd.f32 %v373_v40, %v369_v42 }
 0x22a   : > { %377 = vst.msk [vmem:[%s253_s18 + $0x8] sm:$0xff] %vm258_vm0, %v375_v44 }
 0x22b PF: > { %s16_s21 = sadd.s32 1, %s484_s21  }
 0x22c   : > { %p13_p4 = scmp.ge.s32.totalorder %s16_s21, 4  }
 0x22e   :  { %15 = sbr.rel (!%p13_p4) target bundleno = 1 (0x1), region = 74 }

// kernel: sformer_forward.7
= control target key start
LH: loop header
LB: loop body
LE: loop exit
PB: predicated region body
PF: predicated region fallthrough
CT: control target
= control target key end

     0   :  { %vm81_vm0 = vcmask 261120   ;;  %vm161_vm1 = vcmask 64512   ;;  %s2444_s17 = smov 64   ;;  %s2446_s18 = smov 120   ;;  %vm700_vm3 = vcmask 1043456   ;;  %vm1694_vm4 = vcmask 523264   ;;  %s2923_s2 = inlined_call_operand.vmem [shape: bf16[32,96], index: 2, kind: input, shape index: {}]   ;;  %s2924_s0 = inlined_call_operand.vmem [shape: f32[32,32], index: 0, kind: input, shape index: {}]   ;;  %s2925_s3 = inlined_call_operand.vmem [shape: f32[1,96], index: 3, kind: input, shape index: {}]   ;;  %s2926_s1 = inlined_call_operand.vmem [shape: f32[32,32], index: 1, kind: input, shape index: {}]   ;;  %s2927_s4 = inlined_call_operand.vmem [shape: bf16[32,32], index: 4, kind: input, shape index: {}]   ;;  %s2928_s5 = inlined_call_operand.vmem [shape: f32[1,32], index: 5, kind: input, shape index: {}]   ;;  %s2929_s8 = inlined_call_operand.vmem [shape: bf16[32,64], index: 8, kind: input, shape index: {}]   ;;  %s2930_s10 = inlined_call_operand.vmem [shape: bf16[64,32], index: 10, kind: input, shape index: {}]   ;;  %s2931_s6 = inlined_call_operand.vmem [shape: f32[1,32], index: 6, kind: input, shape index: {}]   ;;  %s2932_s7 = inlined_call_operand.vmem [shape: f32[1,32], index: 7, kind: input, shape index: {}]   ;;  %s2933_s9 = inlined_call_operand.vmem [shape: f32[1,64], index: 9, kind: input, shape index: {}]   ;;  %s2934_s11 = inlined_call_operand.vmem [shape: f32[1,32], index: 11, kind: input, shape index: {}]   ;;  %s2935_s12 = inlined_call_operand.vmem [shape: f32[1,32], index: 12, kind: input, shape index: {}]   ;;  %s2936_s13 = inlined_call_operand.vmem [shape: f32[1,32], index: 13, kind: input, shape index: {}]   ;;  %s2937_s14 = inlined_call_operand.vmem [shape: f32[32,32], index: 14, kind: output, shape index: {}]  }
   0x1   :  { %v2355_v0 = vld [vmem:[%s2923_s2] sm:$0xff]   ;;  %v2356_v1 = vld [vmem:[%s2923_s2 + $0x8] sm:$0xff]   ;;  %v50_v4 = vld [vmem:[%s2924_s0 + $0x10] sm:$0xff]  ;;  %s2447_s19 = smov 80   ;;  %s2448_s20 = smov 112  }
   0x2   :  { %2004 = vmatprep.subr.bf16.mxu1 %v2355_v0  ;;  %v48_v2 = vld [vmem:[%s2924_s0] sm:$0xff]  ;;  %v49_v3 = vld [vmem:[%s2924_s0 + $0x8] sm:$0xff]  ;;  %v51_v7 = vld [vmem:[%s2924_s0 + $0x18] sm:$0xff]  ;;  %v2551_v8 = vmul.f32 5.656854, %v50_v4  ;;  %s2443_s0 = smov 96  }
   0x3   :  { %2005 = vmatpush3.bf16.msra.mxu1 %v2355_v0  ;;  %v2544_v5 = vmul.f32 5.656854, %v48_v2  ;;  %v2546_v6 = vmul.f32 5.656854, %v49_v3  ;;  %v2553_v9 = vmul.f32 5.656854, %v51_v7  ;;  %vm2576_vm2 = vmpackc.low %vm161_vm1, %vm161_vm1 }
   0x4   :  { %2006 = vmatprep.subr.bf16.mxu1 %v2356_v1  ;;  %v1836_v12 = vld [vmem:[%s2925_s3] ss:$0 sm:$0xff]  ;;  %v2603_v36 = vld [vmem:[%s2926_s1 + $0x8] sm:$0xff]  ;;  %v2616_v43 = vld [vmem:[%s2926_s1 + $0x10] sm:$0xff]  ;;  %s2449_s21 = smov 56   ;;  %s2450_s22 = smov 72  }
   0x5   :  { %v56_v10 = vpack.c.bf16 %v2546_v6, %v2544_v5  ;;  %v57_v11 = vpack.c.bf16 %v2553_v9, %v2551_v8  ;;  %v2608_v38 = vld [vmem:[%s2926_s1] sm:$0xff]  ;;  %v2621_v44 = vld [vmem:[%s2926_s1 + $0x18] sm:$0xff]  ;;  %s2445_s1 = smov 88   ;;  %s2451_s23 = smov 104  }
   0x6   :  { %s2452_s2 = smov 48   ;;  %s2453_s28 = smov 40  }
   0x7   :  { %2007 = vmatpush3.bf16.msra.mxu1 %v2356_v1  ;;  %2008 = vmatprep.mubr.msk.bf16.mxu1 %vm81_vm0, %v56_v10 }
   0xa   :  { %2009 = vmatmul.mubr.msk.bf16.vlgmr.msra.gmra.mrb[0].mxu1 %vm81_vm0, %v57_v11 }
  0xdd   :  { %v2010_v13 = vpop.f32.mrb[0].mxu1 }
  0xde   :  { %v122_v14 = vpop.f32.mrb[1].mxu1  ;;  %v131_v17 = vadd.f32 %v2010_v13, %v1836_v12 }
  0xdf   :  { %v123_v15 = vadd.f32 %v1836_v12, %v122_v14  ;;  %v2011_v16 = vpop.f32.mrb[2].mxu1 }
  0xe0   :  { %v134_v18 = vadd.f32 %v2011_v16, %v1836_v12  ;;  %v125_v19 = vpop.f32.mrb[3].mxu1  ;;  %v2590_v34 = vmul.f32 0.35355338, %v131_v17 }
  0xe1   :  { %v126_v20 = vadd.f32 %v1836_v12, %v125_v19  ;;  %v2564_v21 = vmul.f32 0.35355338, %v123_v15 }
  0xe2   :  { %v2566_v22 = vpack.i.bf16 %v134_v18, %v131_v17  ;;  %v2596_v35 = vmul.f32 0.35355338, %v134_v18 }
  0xe3   :  { %2020 = vmatprep.mubr.msk.f32.mxu1 %vm161_vm1, %v2564_v21  ;;  %v2570_v23 = vpack.i.bf16 %v126_v20, %v123_v15  ;;  %v2588_v33 = vmul.f32 0.35355338, %v126_v20 }
  0xe5   :  { %2276 = vrot.lane.b32.xlu0 %v2570_v23, %s2443_s0 }
  0xe9   :  { %2281 = vrot.lane.b32.xlu0 %v2566_v22, %s2443_s0 }
 0x157   :  { %v2277_v24 = vpop.permute.xlu0 %2276 }
 0x158   :  { %v2279_v25 = vunpack.i.h.bf16 %v2277_v24  ;;  %v2278_v26 = vunpack.i.l.bf16 %v2277_v24 }
 0x15a   :  { %v2168_v28 = vpack.c.bf16 %v2279_v25, %v2278_v26 }
 0x15b   :  { %v2282_v29 = vpop.permute.xlu0 %2281 }
 0x15c   :  { %v2284_v30 = vunpack.i.h.bf16 %v2282_v29  ;;  %v2283_v31 = vunpack.i.l.bf16 %v2282_v29  ;;  %2170 = vmatprep.subr.msk.bf16.mxu1 %vm2576_vm2, %v2168_v28 }
 0x15d   :  { %2173 = vmatpush3.bf16.xpose.msk.msra.mxu1 %vm2576_vm2, %v2168_v28 }
 0x15e   :  { %v2174_v32 = vpack.c.bf16 %v2284_v30, %v2283_v31 }
 0x160   :  { %2176 = vmatprep.subr.msk.bf16.mxu1 %vm2576_vm2, %v2174_v32 }
 0x165   :  { %2179 = vmatpush3.bf16.xpose.msk.msra.mxu1 %vm2576_vm2, %v2174_v32 }
 0x16c   :  { %2021 = vmatmul.mubr.msk.f32.vlgmr.msra.gmra.mrb[4].mxu1 %vm161_vm1, %v2588_v33 }
 0x16d   :  { %2023 = vmatprep.mubr.msk.f32.mxu1 %vm161_vm1, %v2590_v34 }
 0x170   :  { %2024 = vmatmul.mubr.msk.f32.gmra.mrb[6].mxu1 %vm161_vm1, %v2596_v35 }
 0x23f   :  { %v2022_v37 = vpop.f32.mrb[4].mxu1 }
 0x240   :  { %v254_v39 = vadd.f32 %v2022_v37, %v2603_v36  ;;  %v248_v40 = vpop.f32.mrb[5].mxu1 }
 0x241   :  { %v249_v41 = vadd.f32 %v248_v40, %v2608_v38 }
 0x242   :  { %v270_v42 = vsel %vm81_vm0, %v254_v39, -inf }
 0x243   :  { %271 = vmax.xlane.f32.xlu1 %v270_v42  ;;  %v2025_v45 = vpop.f32.mrb[6].mxu1  ;;  %v267_v49 = vsel %vm81_vm0, %v249_v41, -inf }
 0x244   :  { %v258_v46 = vpop.f32.mrb[7].mxu1  ;;  %v264_v48 = vadd.f32 %v2025_v45, %v2621_v44 }
 0x245   :  { %v259_v47 = vadd.f32 %v258_v46, %v2616_v43 }
 0x246   :  { %v276_v51 = vsel %vm81_vm0, %v264_v48, -inf }
 0x247   :  { %268 = vmax.xlane.f32.xlu1 %v267_v49  ;;  %v273_v50 = vsel %vm81_vm0, %v259_v47, -inf }
 0x248   :  { %274 = vmax.xlane.f32.xlu0 %v273_v50 }
 0x24b   :  { %277 = vmax.xlane.f32.xlu1 %v276_v51 }
 0x25c   :  { %2286 = vrot.lane.b32.xlu1 %v2570_v23, %s2444_s17 }
 0x25e   :  { %2291 = vrot.lane.b32.xlu0 %v2566_v22, %s2444_s17 }
 0x260   :  { %2296 = vrot.lane.b32.xlu1 %v2570_v23, %s2445_s1 }
 0x262   :  { %426 = vrot.lane.b32.xlu0 %v2590_v34, %s2446_s18 }
 0x264   :  { %2301 = vrot.lane.b32.xlu1 %v2566_v22, %s2445_s1 }
 0x266   :  { %2306 = vrot.lane.b32.xlu0 %v2570_v23, %s2447_s19 }
 0x268   :  { %422 = vrot.lane.b32.xlu1 %v2564_v21, %s2446_s18 }
 0x26a   :  { %811 = vrot.lane.b32.xlu0 %v2564_v21, %s2448_s20 }
 0x26e   :  { %815 = vrot.lane.b32.xlu0 %v2590_v34, %s2448_s20 }
 0x2d0   :  { %v272_v52 = vpop.xlane.xlu1 %271 }
 0x2d1   :  { %v280_v53 = vsub.f32 %v254_v39, %v272_v52 }
 0x2d3   :  { %v285_v54 = vmul.f32 1.442695, %v280_v53 }
 0x2d4   :  { %v269_v55 = vpop.xlane.xlu1 %268 }
 0x2d5   :  { %2363 = vpow2.f32 %v285_v54  ;;  %v279_v56 = vsub.f32 %v249_v41, %v269_v55  ;;  %v275_v57 = vpop.xlane.xlu0 %274 }
 0x2d6   :  { %v281_v17 = vsub.f32 %v259_v47, %v275_v57 }
 0x2d7   :  { %v283_v58 = vmul.f32 1.442695, %v279_v56 }
 0x2d8   :  { %v278_v59 = vpop.xlane.xlu1 %277  ;;  %v287_v19 = vmul.f32 1.442695, %v281_v17 }
 0x2d9   :  { %2365 = vpow2.f32 %v283_v58  ;;  %v2292_v60 = vpop.permute.xlu0 %2291  ;;  %v282_v16 = vsub.f32 %v264_v48, %v278_v59 }
 0x2da   :  { %v2294_v62 = vunpack.i.h.bf16 %v2292_v60  ;;  %v2293_v63 = vunpack.i.l.bf16 %v2292_v60 }
 0x2db   :  { %v289_v18 = vmul.f32 1.442695, %v282_v16 }
 0x2dc   :  { %v2287_v61 = vpop.permute.xlu1 %2286  ;;  %v2184_v10 = vpack.c.bf16 %v2294_v62, %v2293_v63 }
 0x2dd   :  { %v2289_v0 = vunpack.i.h.bf16 %v2287_v61  ;;  %v2288_v1 = vunpack.i.l.bf16 %v2287_v61  ;;  %2367 = vpow2.f32 %v289_v18  ;;  %v427_v37 = vpop.permute.xlu0 %426 }
 0x2de   :  { %2369 = vpow2.f32 %v287_v19 }
 0x2df   :  { %v2364_v2 = vpop.eup %2363  ;;  %v2180_v3 = vpack.c.bf16 %v2289_v0, %v2288_v1 }
 0x2e0   :  { %v2297_v4 = vpop.permute.xlu1 %2296  ;;  %v294_v7 = vsel %vm81_vm0, %v2364_v2, 0.0 }
 0x2e1   :  { %v2299_v11 = vunpack.i.h.bf16 %v2297_v4  ;;  %v2298_v12 = vunpack.i.l.bf16 %v2297_v4  ;;  %295 = vadd.xlane.f32.xlu1 %v294_v7  ;;  %2181 = vmatprep.subr.bf16.mxu0 %v2180_v3  ;;  %v2307_v47 = vpop.permute.xlu0 %2306 }
 0x2e2   :  { %2183 = vmatpush3.bf16.msra.mxu0 %v2180_v3  ;;  %v2309_v48 = vunpack.i.h.bf16 %v2307_v47  ;;  %v2308_v49 = vunpack.i.l.bf16 %v2307_v47 }
 0x2e3   :  { %v2366_v13 = vpop.eup %2365  ;;  %2185 = vmatprep.subr.bf16.mxu0 %v2184_v10  ;;  %v2188_v15 = vpack.c.bf16 %v2299_v11, %v2298_v12 }
 0x2e4   :  { %v291_v14 = vsel %vm81_vm0, %v2366_v13, 0.0  ;;  %v2302_v28 = vpop.permute.xlu1 %2301  ;;  %v2208_v50 = vpack.c.bf16 %v2309_v48, %v2308_v49 }
 0x2e5   :  { %292 = vadd.xlane.f32.xlu1 %v291_v14  ;;  %v2304_v40 = vunpack.i.h.bf16 %v2302_v28  ;;  %v2303_v41 = vunpack.i.l.bf16 %v2302_v28  ;;  %v812_v63 = vpop.permute.xlu0 %811 }
 0x2e6   :  { %2187 = vmatpush3.bf16.msra.mxu0 %v2184_v10 }
 0x2e7   :  { %2190 = vmatprep.subr.msk.bf16.mxu0 %vm2576_vm2, %v2188_v15  ;;  %v2368_v20 = vpop.eup %2367  ;;  %v2194_v46 = vpack.c.bf16 %v2304_v40, %v2303_v41 }
 0x2e8   :  { %v300_v24 = vsel %vm81_vm0, %v2368_v20, 0.0  ;;  %v2370_v25 = vpop.eup %2369  ;;  %v423_v29 = vpop.permute.xlu1 %422 }
 0x2e9   :  { %v297_v26 = vsel %vm81_vm0, %v2370_v25, 0.0  ;;  %v816_v1 = vpop.permute.xlu0 %815 }
 0x2f6   :  { %424 = vrot.lane.b32.xlu1 %v2588_v33, %s2446_s18 }
 0x31a   :  { %301 = vadd.xlane.f32.xlu1 %v300_v24 }
 0x31e   :  { %298 = vadd.xlane.f32.xlu1 %v297_v26 }
 0x32f   :  { %428 = vrot.lane.b32.xlu1 %v2596_v35, %s2446_s18 }
 0x333   :  { %2311 = vrot.lane.b32.xlu1 %v2566_v22, %s2447_s19 }
 0x337   :  { %813 = vrot.lane.b32.xlu1 %v2588_v33, %s2448_s20 }
 0x33b   :  { %817 = vrot.lane.b32.xlu1 %v2596_v35, %s2448_s20 }
 0x36e   :  { %v296_v30 = vpop.xlane.xlu1 %295 }
 0x36f   :  { %2371 = vrcp.f32 %v296_v30 }
 0x372   :  { %v293_v31 = vpop.xlane.xlu1 %292 }
 0x373   :  { %2373 = vrcp.f32 %v293_v31 }
 0x376   :  { %v425_v51 = vpop.permute.xlu1 %424 }
 0x379   :  { %v2372_v32 = vpop.eup %2371 }
 0x37a   :  { %v308_v45 = vmul.f32 %v2372_v32, %v2364_v2 }
 0x37d   :  { %v2374_v39 = vpop.eup %2373 }
 0x37e   :  { %v307_v42 = vmul.f32 %v2374_v39, %v2366_v13 }
 0x380   :  { %2034 = vmatprep.mubr.msk.f32.mxu0 %vm81_vm0, %v307_v42 }
 0x381   :  { %2035 = vmatmul.mubr.msk.f32.vlgmr.msra.gmra.mrb[0].mxu0 %vm81_vm0, %v308_v45 }
 0x382   :  { %2193 = vmatpush3.bf16.xpose.msk.msra.mxu0 %vm2576_vm2, %v2188_v15 }
 0x383   :  { %2196 = vmatprep.subr.msk.bf16.mxu0 %vm2576_vm2, %v2194_v46 }
 0x38a   :  { %2199 = vmatpush3.bf16.xpose.msk.msra.mxu0 %vm2576_vm2, %v2194_v46 }
 0x38b   :  { %2210 = vmatprep.subr.msk.bf16.mxu0 %vm2576_vm2, %v2208_v50 }
 0x3a7   :  { %v302_v52 = vpop.xlane.xlu1 %301 }
 0x3a8   :  { %2375 = vrcp.f32 %v302_v52 }
 0x3ab   :  { %v299_v53 = vpop.xlane.xlu1 %298 }
 0x3ac   :  { %2377 = vrcp.f32 %v299_v53 }
 0x3af   :  { %v429_v54 = vpop.permute.xlu1 %428 }
 0x3b2   :  { %v2376_v55 = vpop.eup %2375 }
 0x3b3   :  { %v2312_v57 = vpop.permute.xlu1 %2311  ;;  %v310_v59 = vmul.f32 %v2376_v55, %v2368_v20 }
 0x3b4   :  { %v2314_v60 = vunpack.i.h.bf16 %v2312_v57  ;;  %v2313_v61 = vunpack.i.l.bf16 %v2312_v57 }
 0x3b6   :  { %v2378_v56 = vpop.eup %2377  ;;  %v2214_v62 = vpack.c.bf16 %v2314_v60, %v2313_v61 }
 0x3b7   :  { %v309_v58 = vmul.f32 %v2378_v56, %v2370_v25  ;;  %v814_v0 = vpop.permute.xlu1 %813 }
 0x3b9   :  { %2037 = vmatprep.mubr.msk.f32.mxu0 %vm81_vm0, %v309_v58 }
 0x3ba   :  { %2038 = vmatmul.mubr.msk.f32.gmra.mrb[2].mxu0 %vm81_vm0, %v310_v59 }
 0x3bb   :  { %2048 = vmatprep.mubr.msk.f32.mxu0 %vm161_vm1, %v423_v29  ;;  %v818_v2 = vpop.permute.xlu1 %817 }
 0x3be   :  { %2049 = vmatmul.mubr.msk.f32.vlgmr.msra.gmra.mrb[4].mxu0 %vm161_vm1, %v425_v51 }
 0x3bf   :  { %2213 = vmatpush3.bf16.xpose.msk.msra.mxu0 %vm2576_vm2, %v2208_v50  ;;  %2051 = vmatprep.mubr.msk.f32.mxu0 %vm161_vm1, %v427_v37 }
 0x3c0   :  { %2216 = vmatprep.subr.msk.bf16.mxu0 %vm2576_vm2, %v2214_v62 }
 0x3c2   :  { %2052 = vmatmul.mubr.msk.f32.gmra.mrb[6].mxu0 %vm161_vm1, %v429_v54 }
 0x3c3   :  { %2088 = vmatprep.mubr.msk.f32.mxu0 %vm161_vm1, %v812_v63 }
 0x3c7   :  { %2219 = vmatpush3.bf16.xpose.msk.msra.mxu0 %vm2576_vm2, %v2214_v62 }
 0x3ce   :  { %2089 = vmatmul.mubr.msk.f32.vlgmr.msra.gmra.mrb[8].mxu0 %vm161_vm1, %v814_v0 }
 0x3cf   :  { %2091 = vmatprep.mubr.msk.f32.mxu0 %vm161_vm1, %v816_v1 }
 0x3d2   :  { %2092 = vmatmul.mubr.msk.f32.gmra.mrb[10].mxu0 %vm161_vm1, %v818_v2 }
 0x454   :  { %v2684_v3 = vpop.f32.mrb[0].mxu0 }
 0x455   :  { %v2686_v4 = vpop.f32.mrb[1].mxu0 }
 0x456   :  { %v420_v7 = vpack.c.bf16 %v2684_v3, %v2686_v4 }
 0x48d   :  { %v2690_v10 = vpop.f32.mrb[2].mxu0 }
 0x48e   :  { %v2692_v11 = vpop.f32.mrb[3].mxu0 }
 0x48f   :  { %v421_v12 = vpack.c.bf16 %v2690_v10, %v2692_v11 }
 0x491   :  { %v2050_v13 = vpop.f32.mrb[4].mxu0 }
 0x492   :  { %v526_v14 = vadd.f32 %v2050_v13, %v2603_v36  ;;  %v520_v15 = vpop.f32.mrb[5].mxu0 }
 0x493   :  { %v521_v16 = vadd.f32 %v520_v15, %v2608_v38 }
 0x494   :  { %v542_v17 = vsel %vm81_vm0, %v526_v14, -inf }
 0x495   :  { %543 = vmax.xlane.f32.xlu1 %v542_v17  ;;  %v2053_v18 = vpop.f32.mrb[6].mxu0  ;;  %v539_v19 = vsel %vm81_vm0, %v521_v16, -inf }
 0x496   :  { %v530_v20 = vpop.f32.mrb[7].mxu0  ;;  %540 = vmax.xlane.f32.xlu0 %v539_v19  ;;  %v536_v25 = vadd.f32 %v2053_v18, %v2621_v44 }
 0x497   :  { %v531_v24 = vadd.f32 %v530_v20, %v2616_v43 }
 0x498   :  { %v548_v28 = vsel %vm81_vm0, %v536_v25, -inf }
 0x499   :  { %v545_v26 = vsel %vm81_vm0, %v531_v24, -inf }
 0x49a   :  { %546 = vmax.xlane.f32.xlu0 %v545_v26 }
 0x49e   :  { %549 = vmax.xlane.f32.xlu0 %v548_v28 }
 0x4a1   :  { %v2090_v29 = vpop.f32.mrb[8].mxu0 }
 0x4a2   :  { %v909_v30 = vpop.f32.mrb[9].mxu0  ;;  %v2729_v61 = vadd.f32 %v2090_v29, %v2603_v36 }
 0x4a3   :  { %v2726_v60 = vadd.f32 %v909_v30, %v2608_v38 }
 0x4a5   :  { %v2093_v31 = vpop.f32.mrb[10].mxu0  ;;  %v928_v63 = vsel %vm81_vm0, %v2726_v60, -inf }
 0x4a6   :  { %v919_v32 = vpop.f32.mrb[11].mxu0 }
 0x4a7   :  { %v2732_v62 = vadd.f32 %v919_v32, %v2616_v43 }
 0x522   :  { %v544_v37 = vpop.xlane.xlu1 %543 }
 0x523   :  { %v552_v39 = vsub.f32 %v526_v14, %v544_v37  ;;  %v541_v40 = vpop.xlane.xlu0 %540 }
 0x524   :  { %v551_v41 = vsub.f32 %v521_v16, %v541_v40 }
 0x525   :  { %v557_v42 = vmul.f32 1.442695, %v552_v39 }
 0x526   :  { %v555_v45 = vmul.f32 1.442695, %v551_v41 }
 0x527   :  { %2379 = vpow2.f32 %v557_v42  ;;  %v547_v46 = vpop.xlane.xlu0 %546 }
 0x528   :  { %2381 = vpow2.f32 %v555_v45  ;;  %v553_v47 = vsub.f32 %v531_v24, %v547_v46 }
 0x52a   :  { %v559_v48 = vmul.f32 1.442695, %v553_v47 }
 0x52b   :  { %v550_v49 = vpop.xlane.xlu0 %549 }
 0x52c   :  { %2383 = vpow2.f32 %v559_v48  ;;  %v554_v50 = vsub.f32 %v536_v25, %v550_v49 }
 0x52e   :  { %v561_v51 = vmul.f32 1.442695, %v554_v50 }
 0x530   :  { %2385 = vpow2.f32 %v561_v51 }
 0x531   :  { %v2704_v52 = vpop.eup %2379 }
 0x532   :  { %v2382_v53 = vpop.eup %2381  ;;  %v566_v54 = vsel %vm81_vm0, %v2704_v52, 0.0 }
 0x533   :  { %567 = vadd.xlane.f32.xlu0 %v566_v54  ;;  %v563_v55 = vsel %vm81_vm0, %v2382_v53, 0.0 }
 0x534   :  { %564 = vadd.xlane.f32.xlu1 %v563_v55 }
 0x536   :  { %v2709_v56 = vpop.eup %2383 }
 0x537   :  { %v569_v57 = vsel %vm81_vm0, %v2709_v56, 0.0 }
 0x538   :  { %570 = vadd.xlane.f32.xlu1 %v569_v57 }
 0x53a   :  { %v2713_v58 = vpop.eup %2385 }
 0x53b   :  { %v572_v59 = vsel %vm81_vm0, %v2713_v58, 0.0 }
 0x53c   :  { %573 = vadd.xlane.f32.xlu0 %v572_v59 }
 0x549   :  { %2316 = vrot.lane.b32.xlu1 %v2570_v23, %s2449_s21 }
 0x54d   :  { %2326 = vrot.lane.b32.xlu1 %v2570_v23, %s2450_s22 }
 0x551   :  { %2331 = vrot.lane.b32.xlu1 %v2566_v22, %s2450_s22 }
 0x552   :  { %2321 = vrot.lane.b32.xlu0 %v2566_v22, %s2449_s21 }
 0x555   :  { %1147 = vrot.lane.b32.xlu1 %v2588_v33, %s2451_s23  ;;  %v2737_v33 = vadd.f32 %v2093_v31, %v2621_v44 }
 0x556   :  { %1145 = vrot.lane.b32.xlu0 %v2564_v21, %s2451_s23  ;;  %v931_v21 = vsel %vm81_vm0, %v2729_v61, -inf }
 0x559   :  { %1151 = vrot.lane.b32.xlu1 %v2596_v35, %s2451_s23  ;;  %v937_v35 = vsel %vm81_vm0, %v2737_v33, -inf }
 0x55a   :  { %1149 = vrot.lane.b32.xlu0 %v2590_v34, %s2451_s23  ;;  %v934_v34 = vsel %vm81_vm0, %v2732_v62, -inf }
 0x579   :  { %929 = vmax.xlane.f32.xlu0 %v928_v63 }
 0x57d   :  { %932 = vmax.xlane.f32.xlu1 %v931_v21  ;;  %935 = vmax.xlane.f32.xlu0 %v934_v34 }
 0x581   :  { %938 = vmax.xlane.f32.xlu0 %v937_v35 }
 0x5c0   :  { %v568_v1 = vpop.xlane.xlu0 %567 }
 0x5c1   :  { %v565_v0 = vpop.xlane.xlu1 %564 }
 0x5c2   :  { %2387 = vrcp.f32 %v565_v0 }
 0x5c3   :  { %2389 = vrcp.f32 %v568_v1 }
 0x5c5   :  { %v571_v2 = vpop.xlane.xlu1 %570 }
 0x5c6   :  { %2391 = vrcp.f32 %v571_v2 }
 0x5c9   :  { %v2317_v13 = vpop.permute.xlu1 %2316  ;;  %v574_v14 = vpop.xlane.xlu0 %573 }
 0x5ca   :  { %v2319_v15 = vunpack.i.h.bf16 %v2317_v13  ;;  %v2318_v16 = vunpack.i.l.bf16 %v2317_v13  ;;  %2393 = vrcp.f32 %v574_v14  ;;  %v142_v14 = vld [vmem:[%s2927_s4 + $0x4] sm:$0xf] }
 0x5cc   :  { %v2388_v17 = vpop.eup %2387  ;;  %v2200_v18 = vpack.c.bf16 %v2319_v15, %v2318_v16  ;;  %v702_v15 = vsel %vm700_vm3, %v142_v14, 0  ;;  %v141_v16 = vld [vmem:[%s2927_s4] sm:$0xf] }
 0x5cd   :  { %v2327_v19 = vpop.permute.xlu1 %2326  ;;  %v2322_v20 = vpop.permute.xlu0 %2321  ;;  %v579_v24 = vmul.f32 %v2388_v17, %v2382_v53 }
 0x5ce   :  { %v2329_v25 = vunpack.i.h.bf16 %v2327_v19  ;;  %v2328_v26 = vunpack.i.l.bf16 %v2327_v19  ;;  %v2324_v28 = vunpack.i.h.bf16 %v2322_v20  ;;  %v2323_v29 = vunpack.i.l.bf16 %v2322_v20  ;;  %2201 = vmatprep.subr.bf16.mxu1 %v2200_v18  ;;  %v2390_v32 = vpop.eup %2389 }
 0x5cf   :  { %2203 = vmatpush3.bf16.msra.mxu1 %v2200_v18  ;;  %2062 = vmatprep.mubr.msk.f32.mxu1 %vm81_vm0, %v579_v24  ;;  %v580_v45 = vmul.f32 %v2390_v32, %v2704_v52 }
 0x5d0   :  { %v2228_v30 = vpack.c.bf16 %v2329_v25, %v2328_v26  ;;  %v2204_v31 = vpack.c.bf16 %v2324_v28, %v2323_v29  ;;  %v2392_v40 = vpop.eup %2391 }
 0x5d1   :  { %v2332_v37 = vpop.permute.xlu1 %2331  ;;  %v1146_v39 = vpop.permute.xlu0 %1145  ;;  %v581_v48 = vmul.f32 %v2392_v40, %v2709_v56 }
 0x5d2   :  { %v2334_v41 = vunpack.i.h.bf16 %v2332_v37  ;;  %v2333_v42 = vunpack.i.l.bf16 %v2332_v37  ;;  %2205 = vmatprep.subr.bf16.mxu1 %v2204_v31  ;;  %2230 = vmatprep.subr.msk.bf16.mxu0 %vm2576_vm2, %v2228_v30  ;;  %v760_v37 = vsel %vm700_vm3, %v141_v16, 0 }
 0x5d3   :  { %2122 = vmatprep.mubr.msk.f32.mxu0 %vm161_vm1, %v1146_v39  ;;  %2207 = vmatpush3.bf16.msra.mxu1 %v2204_v31 }
 0x5d4   :  { %v2234_v46 = vpack.c.bf16 %v2334_v41, %v2333_v42  ;;  %2233 = vmatpush3.bf16.xpose.msk.msra.mxu0 %vm2576_vm2, %v2228_v30  ;;  %v2394_v47 = vpop.eup %2393  ;;  %2260 = vmatprep.subr.msk.bf16.mxu1 %vm700_vm3, %v142_v14 }
 0x5d5   :  { %v582_v49 = vmul.f32 %v2394_v47, %v2713_v58  ;;  %v1148_v50 = vpop.permute.xlu1 %1147  ;;  %v1150_v51 = vpop.permute.xlu0 %1149 }
 0x5d6   :  { %2063 = vmatmul.mubr.msk.f32.vlgmr.msra.gmra.mrb[8].mxu1 %vm81_vm0, %v580_v45  ;;  %2236 = vmatprep.subr.msk.bf16.mxu0 %vm2576_vm2, %v2234_v46 }
 0x5d7   :  { %2065 = vmatprep.mubr.msk.f32.mxu1 %vm81_vm0, %v581_v48  ;;  %2069 = vmatpush3.bf16.msra.mxu1 %v702_v15 }
 0x5d8   :  { %2261 = vmatprep.subr.msk.bf16.mxu1 %vm700_vm3, %v141_v16 }
 0x5d9   :  { %v1152_v52 = vpop.permute.xlu1 %1151 }
 0x5da   :  { %2066 = vmatmul.mubr.msk.f32.gmra.mrb[10].mxu1 %vm81_vm0, %v582_v49 }
 0x5dc   :  { %2239 = vmatpush3.bf16.xpose.msk.msra.mxu0 %vm2576_vm2, %v2234_v46 }
 0x5e3   :  { %2123 = vmatmul.mubr.msk.f32.vlgmr.msra.gmra.mrb[12].mxu0 %vm161_vm1, %v1148_v50 }
 0x5e4   :  { %2125 = vmatprep.mubr.msk.f32.mxu0 %vm161_vm1, %v1150_v51 }
 0x5e7   :  { %2126 = vmatmul.mubr.msk.f32.gmra.mrb[14].mxu0 %vm161_vm1, %v1152_v52 }
 0x606   :  { %v930_v53 = vpop.xlane.xlu0 %929 }
 0x607   :  { %v940_v54 = vsub.f32 %v2726_v60, %v930_v53 }
 0x609   :  { %v944_v55 = vmul.f32 1.442695, %v940_v54 }
 0x60a   :  { %v933_v56 = vpop.xlane.xlu1 %932  ;;  %v936_v57 = vpop.xlane.xlu0 %935 }
 0x60b   :  { %2395 = vpow2.f32 %v944_v55  ;;  %v941_v58 = vsub.f32 %v2729_v61, %v933_v56  ;;  %v942_v27 = vsub.f32 %v2732_v62, %v936_v57 }
 0x60d   :  { %v946_v59 = vmul.f32 1.442695, %v941_v58  ;;  %v948_v63 = vmul.f32 1.442695, %v942_v27 }
 0x60e   :  { %v939_v21 = vpop.xlane.xlu0 %938 }
 0x60f   :  { %2397 = vpow2.f32 %v946_v59  ;;  %v943_v34 = vsub.f32 %v2737_v33, %v939_v21 }
 0x610   :  { %2399 = vpow2.f32 %v948_v63 }
 0x611   :  { %v950_v35 = vmul.f32 1.442695, %v943_v34 }
 0x613   :  { %2401 = vpow2.f32 %v950_v35 }
 0x615   :  { %v2768_v0 = vpop.eup %2395 }
 0x616   :  { %v952_v60 = vsel %vm81_vm0, %v2768_v0, 0.0 }
 0x617   :  { %953 = vadd.xlane.f32.xlu1 %v952_v60 }
 0x619   :  { %v2772_v1 = vpop.eup %2397 }
 0x61a   :  { %v2774_v61 = vpop.eup %2399  ;;  %v955_v62 = vsel %vm81_vm0, %v2772_v1, 0.0 }
 0x61b   :  { %956 = vadd.xlane.f32.xlu0 %v955_v62  ;;  %v958_v33 = vsel %vm81_vm0, %v2774_v61, 0.0 }
 0x61c   :  { %959 = vadd.xlane.f32.xlu1 %v958_v33 }
 0x61d   :  { %v2780_v2 = vpop.eup %2401 }
 0x61e   :  { %v961_v13 = vsel %vm81_vm0, %v2780_v2, 0.0 }
 0x61f   :  { %962 = vadd.xlane.f32.xlu0 %v961_v13 }
 0x62d   :  { %2336 = vrot.lane.b32.xlu1 %v2570_v23, %s2452_s2 }
 0x635   :  { %2341 = vrot.lane.b32.xlu0 %v2566_v22, %s2452_s2 }
 0x6a4   :  { %v954_v17 = vpop.xlane.xlu1 %953 }
 0x6a5   :  { %2403 = vrcp.f32 %v954_v17 }
 0x6a8   :  { %v957_v20 = vpop.xlane.xlu0 %956 }
 0x6a9   :  { %v960_v18 = vpop.xlane.xlu1 %959  ;;  %v2064_v19 = vpop.f32.mrb[8].mxu1  ;;  %2405 = vrcp.f32 %v957_v20 }
 0x6aa   :  { %v673_v24 = vpop.f32.mrb[9].mxu1  ;;  %2407 = vrcp.f32 %v960_v18 }
 0x6ab   :  { %v692_v25 = vpack.c.bf16 %v2064_v19, %v673_v24 }
 0x6ac   :  { %v963_v40 = vpop.xlane.xlu0 %962 }
 0x6ad   :  { %v2337_v26 = vpop.permute.xlu1 %2336  ;;  %v2067_v28 = vpop.f32.mrb[10].mxu1  ;;  %2070 = vmatprep.mubr.msk.bf16.mxu1 %vm161_vm1, %v692_v25  ;;  %2409 = vrcp.f32 %v963_v40 }
 0x6ae   :  { %v2339_v29 = vunpack.i.h.bf16 %v2337_v26  ;;  %v2338_v30 = vunpack.i.l.bf16 %v2337_v26  ;;  %v683_v31 = vpop.f32.mrb[11].mxu1 }
 0x6af   :  { %v693_v32 = vpack.c.bf16 %v2067_v28, %v683_v31  ;;  %v2404_v4 = vpop.eup %2403 }
 0x6b0   :  { %v2220_v39 = vpack.c.bf16 %v2339_v29, %v2338_v30  ;;  %v2342_v41 = vpop.permute.xlu0 %2341  ;;  %v968_v55 = vmul.f32 %v2404_v4, %v2768_v0 }
 0x6b1   :  { %2071 = vmatmul.mubr.msk.bf16.vlgmr.msra.gmra.mrb[12].mxu1 %vm161_vm1, %v693_v32  ;;  %v2344_v48 = vunpack.i.h.bf16 %v2342_v41  ;;  %v2343_v49 = vunpack.i.l.bf16 %v2342_v41 }
 0x6b2   :  { %2075 = vmatpush3.bf16.msra.mxu1 %v760_v37  ;;  %2076 = vmatprep.mubr.msk.bf16.mxu1 %vm161_vm1, %v420_v7 }
 0x6b3   :  { %2221 = vmatprep.subr.bf16.mxu1 %v2220_v39 }
 0x6b6   :  { %v2124_v42 = vpop.f32.mrb[12].mxu0 }
 0x6b7   :  { %v1249_v45 = vadd.f32 %v2124_v42, %v2603_v36  ;;  %v1243_v46 = vpop.f32.mrb[13].mxu0  ;;  %v2224_v36 = vpack.c.bf16 %v2344_v48, %v2343_v49 }
 0x6b8   :  { %v1244_v47 = vadd.f32 %v1243_v46, %v2608_v38 }
 0x6b9   :  { %v1265_v50 = vsel %vm81_vm0, %v1249_v45, -inf }
 0x6ba   :  { %v2127_v51 = vpop.f32.mrb[14].mxu0  ;;  %1266 = vmax.xlane.f32.xlu0 %v1265_v50  ;;  %v1262_v3 = vsel %vm81_vm0, %v1244_v47, -inf }
 0x6bb   :  { %v1259_v7 = vadd.f32 %v2127_v51, %v2621_v44  ;;  %v1253_v52 = vpop.f32.mrb[15].mxu0  ;;  %1263 = vmax.xlane.f32.xlu1 %v1262_v3  ;;  %v2406_v44 = vpop.eup %2405 }
 0x6bc   :  { %v1254_v53 = vadd.f32 %v1253_v52, %v2616_v43  ;;  %v2408_v43 = vpop.eup %2407  ;;  %v969_v56 = vmul.f32 %v2406_v44, %v2772_v1  ;;  %v144_v52 = vld [vmem:[%s2927_s4 + $0xc] sm:$0xf] }
 0x6bd   :  { %v1271_v54 = vsel %vm81_vm0, %v1259_v7, -inf  ;;  %2077 = vmatmul.mubr.msk.bf16.vlgmr.msra.gmra.mrb[12].mxu1 %vm161_vm1, %v421_v12  ;;  %v2410_v57 = vpop.eup %2409  ;;  %v970_v10 = vmul.f32 %v2408_v43, %v2774_v61  ;;  %v143_v12 = vld [vmem:[%s2927_s4 + $0x8] sm:$0xf] }
 0x6be   :  { %1272 = vmax.xlane.f32.xlu0 %v1271_v54  ;;  %2223 = vmatpush3.bf16.msra.mxu1 %v2220_v39  ;;  %v1268_v38 = vsel %vm81_vm0, %v1254_v53, -inf  ;;  %v971_v11 = vmul.f32 %v2410_v57, %v2780_v2  ;;  %v1090_v58 = vsel %vm700_vm3, %v143_v12, 0 }
 0x6bf   :  { %1269 = vmax.xlane.f32.xlu1 %v1268_v38  ;;  %2225 = vmatprep.subr.bf16.mxu1 %v2224_v36 }
 0x6c0   :  { %2102 = vmatprep.mubr.msk.f32.mxu1 %vm81_vm0, %v968_v55 }
 0x6c2   :  { %2227 = vmatpush3.bf16.msra.mxu1 %v2224_v36 }
 0x6c3   :  { %2262 = vmatprep.subr.msk.bf16.mxu1 %vm700_vm3, %v143_v12 }
 0x6c5   :  { %2103 = vmatmul.mubr.msk.f32.vlgmr.msra.gmra.mrb[16].mxu1 %vm81_vm0, %v969_v56  ;;  %v1897_v56 = vld [vmem:[%s2928_s5] ss:$0 sm:$0xff] }
 0x6c6   :  { %2105 = vmatprep.mubr.msk.f32.mxu1 %vm81_vm0, %v970_v10  ;;  %2109 = vmatpush3.bf16.msra.mxu1 %v1090_v58 }
 0x6c9   :  { %2106 = vmatmul.mubr.msk.f32.gmra.mrb[18].mxu1 %vm81_vm0, %v971_v11 }
 0x747   :  { %v1267_v27 = vpop.xlane.xlu0 %1266 }
 0x748   :  { %v1275_v59 = vsub.f32 %v1249_v45, %v1267_v27  ;;  %v1264_v63 = vpop.xlane.xlu1 %1263 }
 0x749   :  { %v1274_v21 = vsub.f32 %v1244_v47, %v1264_v63 }
 0x74a   :  { %v1280_v34 = vmul.f32 1.442695, %v1275_v59 }
 0x74b   :  { %v1278_v35 = vmul.f32 1.442695, %v1274_v21  ;;  %v1273_v0 = vpop.xlane.xlu0 %1272 }
 0x74c   :  { %2411 = vpow2.f32 %v1280_v34  ;;  %v1277_v60 = vsub.f32 %v1259_v7, %v1273_v0  ;;  %v1270_v1 = vpop.xlane.xlu1 %1269 }
 0x74d   :  { %2413 = vpow2.f32 %v1278_v35  ;;  %v1276_v61 = vsub.f32 %v1254_v53, %v1270_v1  ;;  %v1424_v53 = vsel %vm700_vm3, %v144_v52, 0 }
 0x74e   :  { %v1284_v62 = vmul.f32 1.442695, %v1277_v60 }
 0x74f   :  { %v1282_v33 = vmul.f32 1.442695, %v1276_v61 }
 0x750   :  { %2415 = vpow2.f32 %v1284_v62 }
 0x751   :  { %2417 = vpow2.f32 %v1282_v33 }
 0x756   :  { %v2412_v2 = vpop.eup %2411 }
 0x757   :  { %v2414_v13 = vpop.eup %2413  ;;  %v1289_v14 = vsel %vm81_vm0, %v2412_v2, 0.0 }
 0x758   :  { %1290 = vadd.xlane.f32.xlu0 %v1289_v14  ;;  %v1286_v15 = vsel %vm81_vm0, %v2414_v13, 0.0 }
 0x759   :  { %1287 = vadd.xlane.f32.xlu1 %v1286_v15 }
 0x75a   :  { %v2416_v16 = vpop.eup %2415 }
 0x75b   :  { %v2418_v17 = vpop.eup %2417  ;;  %v1295_v18 = vsel %vm81_vm0, %v2416_v16, 0.0 }
 0x75c   :  { %1296 = vadd.xlane.f32.xlu0 %v1295_v18  ;;  %v1292_v19 = vsel %vm81_vm0, %v2418_v17, 0.0 }
 0x75d   :  { %1293 = vadd.xlane.f32.xlu1 %v1292_v19 }
 0x76e   :  { %2346 = vrot.lane.b32.xlu1 %v2570_v23, %s2453_s28 }
 0x772   :  { %2351 = vrot.lane.b32.xlu0 %v2566_v22, %s2453_s28 }
 0x798   :  { %v2104_v20 = vpop.f32.mrb[16].mxu1 }
 0x799   :  { %v1062_v24 = vpop.f32.mrb[17].mxu1 }
 0x79a   :  { %v1081_v25 = vpack.c.bf16 %v2104_v20, %v1062_v24 }
 0x79c   :  { %v2107_v26 = vpop.f32.mrb[18].mxu1  ;;  %2110 = vmatprep.mubr.msk.bf16.mxu1 %vm161_vm1, %v1081_v25 }
 0x79d   :  { %v1072_v28 = vpop.f32.mrb[19].mxu1 }
 0x79e   :  { %v1082_v29 = vpack.c.bf16 %v2107_v26, %v1072_v28 }
 0x7a0   :  { %2111 = vmatmul.mubr.msk.bf16.vlgmr.msra.gmra.mrb[12].mxu1 %vm161_vm1, %v1082_v29 }
 0x7e5   :  { %v1291_v30 = vpop.xlane.xlu0 %1290 }
 0x7e6   :  { %v1288_v31 = vpop.xlane.xlu1 %1287 }
 0x7e7   :  { %2419 = vrcp.f32 %v1288_v31  ;;  %v2357_v31 = vld [vmem:[%s2929_s8] sm:$0xff]  }
 0x7e8   :  { %2421 = vrcp.f32 %v1291_v30  ;;  %2148 = vmatprep.subr.bf16.mxu0 %v2357_v31 }
 0x7e9   :  { %v1297_v32 = vpop.xlane.xlu0 %1296  ;;  %2149 = vmatpush3.bf16.msra.mxu0 %v2357_v31 }
 0x7ea   :  { %v1294_v37 = vpop.xlane.xlu1 %1293 }
 0x7eb   :  { %2423 = vrcp.f32 %v1294_v37  ;;  %v2359_v37 = vld [vmem:[%s2930_s10] sm:$0xff]  }
 0x7ec   :  { %2425 = vrcp.f32 %v1297_v32  ;;  %v2358_v32 = vld [vmem:[%s2929_s8 + $0x8] sm:$0xff]  }
 0x7ed   :  { %v2352_v23 = vpop.permute.xlu0 %2351  ;;  %2150 = vmatprep.subr.bf16.mxu0 %v2358_v32 }
 0x7ee   :  { %v2347_v39 = vpop.permute.xlu1 %2346  ;;  %v2354_v22 = vunpack.i.h.bf16 %v2352_v23  ;;  %v2353_v40 = vunpack.i.l.bf16 %v2352_v23  ;;  %2151 = vmatpush3.bf16.msra.mxu0 %v2358_v32 }
 0x7ef   :  { %v2349_v41 = vunpack.i.h.bf16 %v2347_v39  ;;  %v2348_v42 = vunpack.i.l.bf16 %v2347_v39  ;;  %2156 = vmatprep.subr.bf16.mxu0 %v2359_v37 }
 0x7f0   :  { %v2244_v48 = vpack.c.bf16 %v2354_v22, %v2353_v40 }
 0x7f1   :  { %v2420_v45 = vpop.eup %2419  ;;  %v2240_v46 = vpack.c.bf16 %v2349_v41, %v2348_v42 }
 0x7f2   :  { %v1302_v47 = vmul.f32 %v2420_v45, %v2414_v13  ;;  %v2422_v49 = vpop.eup %2421 }
 0x7f3   :  { %2241 = vmatprep.subr.bf16.mxu1 %v2240_v46  ;;  %v1303_v51 = vmul.f32 %v2422_v49, %v2412_v2 }
 0x7f4   :  { %2243 = vmatpush3.bf16.msra.mxu1 %v2240_v46  ;;  %2136 = vmatprep.mubr.msk.f32.mxu1 %vm81_vm0, %v1302_v47 }
 0x7f5   :  { %2245 = vmatprep.subr.bf16.mxu1 %v2244_v48  ;;  %v2424_v50 = vpop.eup %2423 }
 0x7f6   :  { %v2426_v3 = vpop.eup %2425  ;;  %v1304_v4 = vmul.f32 %v2424_v50, %v2418_v17 }
 0x7f7   :  { %v1305_v7 = vmul.f32 %v2426_v3, %v2416_v16  ;;  %v1898_v3 = vld [vmem:[%s2931_s6] ss:$0 sm:$0xff] }
 0x7f8   :  { %2247 = vmatpush3.bf16.msra.mxu1 %v2244_v48 }
 0x7f9   :  { %2263 = vmatprep.subr.msk.bf16.mxu1 %vm700_vm3, %v144_v52 }
 0x7fb   :  { %2137 = vmatmul.mubr.msk.f32.vlgmr.msra.gmra.mrb[20].mxu1 %vm81_vm0, %v1303_v51 }
 0x7fc   :  { %2139 = vmatprep.mubr.msk.f32.mxu1 %vm81_vm0, %v1304_v4  ;;  %2143 = vmatpush3.bf16.msra.mxu1 %v1424_v53 }
 0x7ff   :  { %2140 = vmatmul.mubr.msk.f32.gmra.mrb[22].mxu1 %vm81_vm0, %v1305_v7 }
 0x8ce   :  { %v2138_v36 = vpop.f32.mrb[20].mxu1 }
 0x8cf   :  { %v1396_v54 = vpop.f32.mrb[21].mxu1 }
 0x8d0   :  { %v1415_v38 = vpack.c.bf16 %v2138_v36, %v1396_v54  ;;  %v1899_v54 = vld [vmem:[%s2932_s7] ss:$0 sm:$0xff] }
 0x8d2   :  { %v2141_v55 = vpop.f32.mrb[22].mxu1  ;;  %2144 = vmatprep.mubr.msk.bf16.mxu1 %vm161_vm1, %v1415_v38 }
 0x8d3   :  { %v1406_v44 = vpop.f32.mrb[23].mxu1 }
 0x8d4   :  { %v1416_v43 = vpack.c.bf16 %v2141_v55, %v1406_v44 }
 0x8d6   :  { %2145 = vmatmul.mubr.msk.bf16.vlgmr.msra.gmra.mrb[12].mxu1 %vm161_vm1, %v1416_v43 }
 0x9a9   :  { %v2146_v57 = vpop.f32.mrb[12].mxu1 }
 0x9aa   :  { %v1460_v10 = vpop.f32.mrb[13].mxu1  ;;  %v1488_v11 = vadd.f32 %v2146_v57, %v1897_v56 }
 0x9ab   :  { %v1486_v12 = vadd.f32 %v1897_v56, %v1460_v10  ;;  %v2147_v58 = vpop.f32.mrb[14].mxu1 }
 0x9ac   :  { %v1463_v27 = vpop.f32.mrb[15].mxu1  ;;  %v1489_v59 = vadd.f32 %v2147_v58, %v1897_v56  ;;  %v1492_v0 = vadd.f32 %v1488_v11, %v2551_v8 }
 0x9ad   :  { %v1487_v63 = vadd.f32 %v1897_v56, %v1463_v27  ;;  %v1490_v21 = vadd.f32 %v1486_v12, %v2544_v5 }
 0x9ae   :  { %v1493_v1 = vadd.f32 %v1489_v59, %v2553_v9  ;;  %v1500_v61 = vsel %vm81_vm0, %v1492_v0, 0.0 }
 0x9af   :  { %v1494_v34 = vsel %vm81_vm0, %v1490_v21, 0.0  ;;  %v1491_v35 = vadd.f32 %v1487_v63, %v2546_v6  ;;  %v2360_v63 = vld [vmem:[%s2930_s10 + $0x8] sm:$0xff]  }
 0x9b0   :  { %1495 = vadd.xlane.f32.xlu1 %v1494_v34  ;;  %v1503_v62 = vsel %vm81_vm0, %v1493_v1, 0.0  ;;  %v2362_v34 = vld [vmem:[%s2930_s10 + $0x18] sm:$0xff]  }
 0x9b1   :  { %v1497_v60 = vsel %vm81_vm0, %v1491_v35, 0.0 }
 0x9b2   :  { %1498 = vadd.xlane.f32.xlu0 %v1497_v60 }
 0x9b4   :  { %1501 = vadd.xlane.f32.xlu1 %v1500_v61 }
 0x9b6   :  { %1504 = vadd.xlane.f32.xlu0 %v1503_v62 }
 0xa3d   :  { %v1496_v33 = vpop.xlane.xlu1 %1495 }
 0xa3e   :  { %v1507_v5 = vmul.f32 0.03125, %v1496_v33 }
 0xa3f   :  { %v1499_v2 = vpop.xlane.xlu0 %1498 }
 0xa40   :  { %v1511_v13 = vsub.f32 %v1490_v21, %v1507_v5  ;;  %v1508_v14 = vmul.f32 0.03125, %v1499_v2  ;;  %v2361_v21 = vld [vmem:[%s2930_s10 + $0x10] sm:$0xff]  }
 0xa41   :  { %v1502_v6 = vpop.xlane.xlu1 %1501 }
 0xa42   :  { %v1512_v15 = vsub.f32 %v1491_v35, %v1508_v14  ;;  %v1509_v8 = vmul.f32 0.03125, %v1502_v6  ;;  %v1515_v16 = vmul.f32 %v1511_v13, %v1511_v13  ;;  %v1900_v35 = vld [vmem:[%s2933_s9] ss:$0 sm:$0xff] }
 0xa43   :  { %v1505_v17 = vpop.xlane.xlu0 %1504 }
 0xa44   :  { %v1513_v18 = vsub.f32 %v1492_v0, %v1509_v8  ;;  %v1510_v19 = vmul.f32 0.03125, %v1505_v17  ;;  %v1519_v9 = vsel %vm81_vm0, %v1515_v16, 0.0  ;;  %v1516_v20 = vmul.f32 %v1512_v15, %v1512_v15  ;;  %v1905_v17 = vld [vmem:[%s2934_s11] ss:$0 sm:$0xff] }
 0xa45   :  { %1520 = vadd.xlane.f32.xlu1 %v1519_v9 }
 0xa46   :  { %v1514_v24 = vsub.f32 %v1493_v1, %v1510_v19  ;;  %v1522_v25 = vsel %vm81_vm0, %v1516_v20, 0.0  ;;  %v1517_v26 = vmul.f32 %v1513_v18, %v1513_v18 }
 0xa47   :  { %1523 = vadd.xlane.f32.xlu0 %v1522_v25 }
 0xa48   :  { %v1525_v28 = vsel %vm81_vm0, %v1517_v26, 0.0  ;;  %v1518_v29 = vmul.f32 %v1514_v24, %v1514_v24 }
 0xa49   :  { %1526 = vadd.xlane.f32.xlu1 %v1525_v28 }
 0xa4a   :  { %v1528_v30 = vsel %vm81_vm0, %v1518_v29, 0.0 }
 0xa4b   :  { %1529 = vadd.xlane.f32.xlu0 %v1528_v30 }
 0xad2   :  { %v1521_v23 = vpop.xlane.xlu1 %1520 }
 0xad3   :  { %v1531_v39 = vmul.f32 0.03125, %v1521_v23 }
 0xad4   :  { %v1524_v22 = vpop.xlane.xlu0 %1523 }
 0xad5   :  { %v1535_v40 = vadd.f32 1e-05, %v1531_v39  ;;  %v1532_v41 = vmul.f32 0.03125, %v1524_v22 }
 0xad6   :  { %v1527_v42 = vpop.xlane.xlu1 %1526 }
 0xad7   :  { %2427 = vrsqrt.f32 %v1535_v40  ;;  %v1536_v45 = vadd.f32 1e-05, %v1532_v41  ;;  %v1533_v46 = vmul.f32 0.03125, %v1527_v42 }
 0xad8   :  { %v1530_v47 = vpop.xlane.xlu0 %1529 }
 0xad9   :  { %2429 = vrsqrt.f32 %v1536_v45  ;;  %v1537_v48 = vadd.f32 1e-05, %v1533_v46  ;;  %v1534_v49 = vmul.f32 0.03125, %v1530_v47 }
 0xadb   :  { %2431 = vrsqrt.f32 %v1537_v48  ;;  %v1538_v50 = vadd.f32 1e-05, %v1534_v49 }
 0xadd   :  { %2433 = vrsqrt.f32 %v1538_v50 }
 0xae1   :  { %v2428_v51 = vpop.eup %2427 }
 0xae2   :  { %v1543_v4 = vmul.f32 %v2428_v51, %v1511_v13 }
 0xae3   :  { %v2430_v7 = vpop.eup %2429 }
 0xae4   :  { %v1544_v52 = vmul.f32 %v2430_v7, %v1512_v15  ;;  %v1554_v53 = vmul.f32 %v1898_v3, %v1543_v4 }
 0xae5   :  { %v2432_v36 = vpop.eup %2431 }
 0xae6   :  { %v1545_v38 = vmul.f32 %v2432_v36, %v1513_v18  ;;  %v1555_v55 = vmul.f32 %v1898_v3, %v1544_v52  ;;  %v1565_v57 = vadd.f32 %v1899_v54, %v1554_v53 }
 0xae7   :  { %v2434_v44 = vpop.eup %2433 }
 0xae8   :  { %v1556_v43 = vmul.f32 %v1898_v3, %v1545_v38  ;;  %v1546_v56 = vmul.f32 %v2434_v44, %v1514_v24  ;;  %v1566_v10 = vadd.f32 %v1899_v54, %v1555_v55 }
 0xaea   :  { %v1557_v11 = vmul.f32 %v1898_v3, %v1546_v56  ;;  %v1569_v12 = vpack.c.bf16 %v1566_v10, %v1565_v57  ;;  %v1567_v58 = vadd.f32 %v1899_v54, %v1556_v43 }
 0xaec   :  { %v1568_v27 = vadd.f32 %v1899_v54, %v1557_v11  ;;  %2152 = vmatprep.mubr.msk.bf16.mxu0 %vm81_vm0, %v1569_v12 }
 0xaee   :  { %v1570_v59 = vpack.c.bf16 %v1568_v27, %v1567_v58 }
 0xaf0   :  { %2153 = vmatmul.mubr.msk.bf16.vlgmr.msra.gmra.mrb[16].mxu0 %vm81_vm0, %v1570_v59 }
 0xaf1   :  { %2157 = vmatpush3.bf16.msra.mxu0 %v2359_v37 }
 0xaf2   :  { %2158 = vmatprep.subr.bf16.mxu0 %v2360_v63 }
 0xaf5   :  { %2159 = vmatpush3.bf16.msra.mxu0 %v2360_v63 }
 0xaf6   :  { %2160 = vmatprep.subr.bf16.mxu0 %v2361_v21 }
 0xaf9   :  { %2161 = vmatpush3.bf16.msra.mxu0 %v2361_v21 }
 0xafa   :  { %2162 = vmatprep.subr.bf16.mxu0 %v2362_v34 }
 0xafd   :  { %2163 = vmatpush3.bf16.msra.mxu0 %v2362_v34 }
 0xbc3   :  { %v2154_v0 = vpop.f32.mrb[16].mxu0 }
 0xbc4   :  { %v1643_v60 = vadd.f32 %v2154_v0, %v1900_v35  ;;  %v1634_v1 = vpop.f32.mrb[17].mxu0  ;;  %v1912_v0 = vld [vmem:[%s2935_s12] ss:$0 sm:$0xff] }
 0xbc5   :  { %v1635_v61 = vadd.f32 %v1900_v35, %v1634_v1  ;;  %v2155_v62 = vpop.f32.mrb[18].mxu0 }
 0xbc6   :  { %v1646_v33 = vadd.f32 %v2155_v62, %v1900_v35  ;;  %v1637_v5 = vpop.f32.mrb[19].mxu0  ;;  %v1651_v13 = vmax.f32 %v1643_v60, 0.0 }
 0xbc7   :  { %v1638_v2 = vadd.f32 %v1900_v35, %v1637_v5  ;;  %v1649_v6 = vmax.f32 %v1635_v61, 0.0  ;;  %v1913_v61 = vld [vmem:[%s2936_s13] ss:$0 sm:$0xff] }
 0xbc8   :  { %v1652_v14 = vmax.f32 %v1646_v33, 0.0 }
 0xbc9   :  { %v1650_v15 = vmax.f32 %v1638_v2, 0.0 }
 0xbca   :  { %v1654_v8 = vpack.c.bf16 %v1652_v14, %v1651_v13 }
 0xbcb   :  { %v1653_v16 = vpack.c.bf16 %v1650_v15, %v1649_v6 }
 0xbcd   :  { %2164 = vmatprep.mubr.msk.bf16.mxu0 %vm1694_vm4, %v1653_v16 }
 0xbce   :  { %2165 = vmatmul.mubr.msk.bf16.vlgmr.msra.gmra.mrb[20].mxu0 %vm1694_vm4, %v1654_v8 }
 0xca1   :  { %v2166_v18 = vpop.f32.mrb[20].mxu0 }
 0xca2   :  { %v1735_v19 = vpop.f32.mrb[21].mxu0  ;;  %v1744_v9 = vadd.f32 %v2166_v18, %v1905_v17 }
 0xca3   :  { %v1736_v20 = vadd.f32 %v1905_v17, %v1735_v19  ;;  %v2167_v24 = vpop.f32.mrb[22].mxu0 }
 0xca4   :  { %v1738_v25 = vpop.f32.mrb[23].mxu0  ;;  %v1747_v26 = vadd.f32 %v2167_v24, %v1905_v17  ;;  %v1752_v32 = vadd.f32 %v1744_v9, %v1567_v58 }
 0xca5   :  { %v1739_v28 = vadd.f32 %v1905_v17, %v1738_v25  ;;  %v1750_v29 = vadd.f32 %v1736_v20, %v1565_v57 }
 0xca6   :  { %v1753_v23 = vadd.f32 %v1747_v26, %v1568_v27  ;;  %v1760_v39 = vsel %vm81_vm0, %v1752_v32, 0.0 }
 0xca7   :  { %v1754_v30 = vsel %vm81_vm0, %v1750_v29, 0.0  ;;  %v1751_v31 = vadd.f32 %v1739_v28, %v1566_v10 }
 0xca8   :  { %1755 = vadd.xlane.f32.xlu1 %v1754_v30  ;;  %v1763_v22 = vsel %vm81_vm0, %v1753_v23, 0.0 }
 0xca9   :  { %v1757_v37 = vsel %vm81_vm0, %v1751_v31, 0.0 }
 0xcaa   :  { %1758 = vadd.xlane.f32.xlu0 %v1757_v37 }
 0xcac   :  { %1761 = vadd.xlane.f32.xlu1 %v1760_v39 }
 0xcae   :  { %1764 = vadd.xlane.f32.xlu0 %v1763_v22 }
 0xd35   :  { %v1756_v40 = vpop.xlane.xlu1 %1755 }
 0xd36   :  { %v1766_v41 = vmul.f32 0.03125, %v1756_v40 }
 0xd37   :  { %v1759_v42 = vpop.xlane.xlu0 %1758 }
 0xd38   :  { %v1770_v45 = vsub.f32 %v1750_v29, %v1766_v41  ;;  %v1767_v46 = vmul.f32 0.03125, %v1759_v42 }
 0xd39   :  { %v1762_v47 = vpop.xlane.xlu1 %1761 }
 0xd3a   :  { %v1771_v48 = vsub.f32 %v1751_v31, %v1767_v46  ;;  %v1768_v49 = vmul.f32 0.03125, %v1762_v47  ;;  %v1774_v50 = vmul.f32 %v1770_v45, %v1770_v45 }
 0xd3b   :  { %v1765_v51 = vpop.xlane.xlu0 %1764 }
 0xd3c   :  { %v1772_v3 = vsub.f32 %v1752_v32, %v1768_v49  ;;  %v1769_v4 = vmul.f32 0.03125, %v1765_v51  ;;  %v1778_v7 = vsel %vm81_vm0, %v1774_v50, 0.0  ;;  %v1775_v52 = vmul.f32 %v1771_v48, %v1771_v48 }
 0xd3d   :  { %1779 = vadd.xlane.f32.xlu1 %v1778_v7 }
 0xd3e   :  { %v1773_v53 = vsub.f32 %v1753_v23, %v1769_v4  ;;  %v1781_v36 = vsel %vm81_vm0, %v1775_v52, 0.0  ;;  %v1776_v54 = vmul.f32 %v1772_v3, %v1772_v3 }
 0xd3f   :  { %1782 = vadd.xlane.f32.xlu0 %v1781_v36 }
 0xd40   :  { %v1784_v38 = vsel %vm81_vm0, %v1776_v54, 0.0  ;;  %v1777_v55 = vmul.f32 %v1773_v53, %v1773_v53 }
 0xd41   :  { %1785 = vadd.xlane.f32.xlu1 %v1784_v38 }
 0xd42   :  { %v1787_v44 = vsel %vm81_vm0, %v1777_v55, 0.0 }
 0xd43   :  { %1788 = vadd.xlane.f32.xlu0 %v1787_v44 }
 0xdca   :  { %v1780_v43 = vpop.xlane.xlu1 %1779 }
 0xdcb   :  { %v1790_v56 = vmul.f32 0.03125, %v1780_v43 }
 0xdcc   :  { %v1783_v57 = vpop.xlane.xlu0 %1782 }
 0xdcd   :  { %v1794_v10 = vadd.f32 1e-05, %v1790_v56  ;;  %v1791_v11 = vmul.f32 0.03125, %v1783_v57 }
 0xdce   :  { %v1786_v12 = vpop.xlane.xlu1 %1785 }
 0xdcf   :  { %2435 = vrsqrt.f32 %v1794_v10  ;;  %v1795_v58 = vadd.f32 1e-05, %v1791_v11  ;;  %v1792_v27 = vmul.f32 0.03125, %v1786_v12 }
 0xdd0   :  { %v1789_v59 = vpop.xlane.xlu0 %1788 }
 0xdd1   :  { %2437 = vrsqrt.f32 %v1795_v58  ;;  %v1796_v63 = vadd.f32 1e-05, %v1792_v27  ;;  %v1793_v21 = vmul.f32 0.03125, %v1789_v59 }
 0xdd3   :  { %2439 = vrsqrt.f32 %v1796_v63  ;;  %v1797_v34 = vadd.f32 1e-05, %v1793_v21 }
 0xdd5   :  { %2441 = vrsqrt.f32 %v1797_v34 }
 0xdd9   :  { %v2436_v35 = vpop.eup %2435 }
 0xdda   :  { %v1802_v60 = vmul.f32 %v2436_v35, %v1770_v45 }
 0xddb   :  { %v2438_v1 = vpop.eup %2437 }
 0xddc   :  { %v1813_v62 = vmul.f32 %v1912_v0, %v1802_v60  ;;  %v1803_v33 = vmul.f32 %v2438_v1, %v1771_v48 }
 0xddd   :  { %v2440_v5 = vpop.eup %2439 }
 0xdde   :  { %v1824_v2 = vadd.f32 %v1913_v61, %v1813_v62  ;;  %v1814_v13 = vmul.f32 %v1912_v0, %v1803_v33  ;;  %v1804_v14 = vmul.f32 %v2440_v5, %v1772_v3 }
 0xddf   :  { %v2442_v6 = vpop.eup %2441 }
 0xde0   :  { %1828 = vst.msk [vmem:[%s2937_s14] sm:$0xff] %vm81_vm0, %v1824_v2  ;;  %v1825_v15 = vadd.f32 %v1913_v61, %v1814_v13  ;;  %v1815_v8 = vmul.f32 %v1912_v0, %v1804_v14  ;;  %v1805_v16 = vmul.f32 %v2442_v6, %v1773_v53 }
 0xde2   :  { %1829 = vst.msk [vmem:[%s2937_s14 + $0x8] sm:$0xff] %vm81_vm0, %v1825_v15  ;;  %v1826_v17 = vadd.f32 %v1913_v61, %v1815_v8  ;;  %v1816_v18 = vmul.f32 %v1912_v0, %v1805_v16 }
 0xde4   :  { %1830 = vst.msk [vmem:[%s2937_s14 + $0x10] sm:$0xff] %vm81_vm0, %v1826_v17  ;;  %v1827_v19 = vadd.f32 %v1913_v61, %v1816_v18 }
 0xde6   :  { %1831 = vst.msk [vmem:[%s2937_s14 + $0x18] sm:$0xff] %vm81_vm0, %v1827_v19 }

// kernel: sformer_forward.8
= control target key start
LH: loop header
LB: loop body
LE: loop exit
PB: predicated region body
PF: predicated region fallthrough
CT: control target
= control target key end

     0   :  { %vm77_vm0 = vcmask 261120   ;;  %vm157_vm1 = vcmask 64512   ;;  %s2443_s26 = smov 96   ;;  %s2444_s18 = smov 64   ;;  %vm696_vm3 = vcmask 1043456   ;;  %vm1690_vm4 = vcmask 523264   ;;  %s2919_s2 = inlined_call_operand.vmem [shape: bf16[32,96], index: 2, kind: input, shape index: {}]   ;;  %s2920_s0 = inlined_call_operand.vmem [shape: f32[32,32], index: 0, kind: input, shape index: {}]   ;;  %s2921_s3 = inlined_call_operand.vmem [shape: f32[1,96], index: 3, kind: input, shape index: {}]   ;;  %s2922_s1 = inlined_call_operand.vmem [shape: f32[32,32], index: 1, kind: input, shape index: {}]   ;;  %s2923_s4 = inlined_call_operand.vmem [shape: bf16[32,32], index: 4, kind: input, shape index: {}]   ;;  %s2924_s5 = inlined_call_operand.vmem [shape: f32[1,32], index: 5, kind: input, shape index: {}]   ;;  %s2925_s8 = inlined_call_operand.vmem [shape: bf16[32,64], index: 8, kind: input, shape index: {}]   ;;  %s2926_s10 = inlined_call_operand.vmem [shape: bf16[64,32], index: 10, kind: input, shape index: {}]   ;;  %s2927_s6 = inlined_call_operand.vmem [shape: f32[1,32], index: 6, kind: input, shape index: {}]   ;;  %s2928_s7 = inlined_call_operand.vmem [shape: f32[1,32], index: 7, kind: input, shape index: {}]   ;;  %s2929_s9 = inlined_call_operand.vmem [shape: f32[1,64], index: 9, kind: input, shape index: {}]   ;;  %s2930_s11 = inlined_call_operand.vmem [shape: f32[1,32], index: 11, kind: input, shape index: {}]   ;;  %s2931_s12 = inlined_call_operand.vmem [shape: f32[1,32], index: 12, kind: input, shape index: {}]   ;;  %s2932_s13 = inlined_call_operand.vmem [shape: f32[1,32], index: 13, kind: input, shape index: {}]   ;;  %s2933_s14 = inlined_call_operand.vmem [shape: f32[32,32], index: 14, kind: output, shape index: {}]  }
   0x1   :  { %v2351_v0 = vld [vmem:[%s2919_s2] sm:$0xff]   ;;  %v2352_v1 = vld [vmem:[%s2919_s2 + $0x8] sm:$0xff]   ;;  %v50_v5 = vld [vmem:[%s2920_s0 + $0x10] sm:$0xff]  ;;  %s2446_s19 = smov 120   ;;  %s2447_s20 = smov 80  }
   0x2   :  { %2000 = vmatprep.subr.bf16.mxu1 %v2351_v0  ;;  %v48_v2 = vld [vmem:[%s2920_s0] sm:$0xff]  ;;  %v49_v3 = vld [vmem:[%s2920_s0 + $0x8] sm:$0xff]  ;;  %v51_v6 = vld [vmem:[%s2920_s0 + $0x18] sm:$0xff]  ;;  %s2448_s21 = smov 112   ;;  %s2449_s22 = smov 56  }
   0x3   :  { %2001 = vmatpush3.bf16.msra.mxu1 %v2351_v0  ;;  %v52_v4 = vpack.c.bf16 %v49_v3, %v48_v2  ;;  %v53_v7 = vpack.c.bf16 %v51_v6, %v50_v5  ;;  %v1832_v8 = vld [vmem:[%s2921_s3] ss:$0 sm:$0xff]  ;;  %vm2564_vm2 = vmpackc.low %vm157_vm1, %vm157_vm1  ;;  %v2591_v32 = vld [vmem:[%s2922_s1 + $0x8] sm:$0xff]  ;;  %s2450_s23 = smov 72   ;;  %s2451_s24 = smov 104  }
   0x4   :  { %2002 = vmatprep.subr.bf16.mxu1 %v2352_v1  ;;  %v2596_v34 = vld [vmem:[%s2922_s1] sm:$0xff]  ;;  %v2604_v39 = vld [vmem:[%s2922_s1 + $0x10] sm:$0xff]  ;;  %v2609_v40 = vld [vmem:[%s2922_s1 + $0x18] sm:$0xff]  ;;  %s2445_s1 = smov 88   ;;  %s2452_s2 = smov 48  }
   0x5   :  { %2004 = vmatprep.mubr.msk.bf16.mxu1 %vm77_vm0, %v52_v4  ;;  %s2453_s30 = smov 40  }
   0x7   :  { %2003 = vmatpush3.bf16.msra.mxu1 %v2352_v1 }
   0xa   :  { %2005 = vmatmul.mubr.msk.bf16.vlgmr.msra.gmra.mrb[0].mxu1 %vm77_vm0, %v53_v7 }
  0xdd   :  { %v2006_v9 = vpop.f32.mrb[0].mxu1 }
  0xde   :  { %v118_v10 = vpop.f32.mrb[1].mxu1  ;;  %v127_v13 = vadd.f32 %v2006_v9, %v1832_v8 }
  0xdf   :  { %v119_v11 = vadd.f32 %v1832_v8, %v118_v10  ;;  %v2007_v12 = vpop.f32.mrb[2].mxu1 }
  0xe0   :  { %v130_v14 = vadd.f32 %v2007_v12, %v1832_v8  ;;  %v121_v15 = vpop.f32.mrb[3].mxu1  ;;  %v2578_v30 = vmul.f32 0.35355338, %v127_v13 }
  0xe1   :  { %v122_v16 = vadd.f32 %v1832_v8, %v121_v15  ;;  %v2552_v17 = vmul.f32 0.35355338, %v119_v11 }
  0xe2   :  { %v2554_v18 = vpack.i.bf16 %v130_v14, %v127_v13  ;;  %v2584_v31 = vmul.f32 0.35355338, %v130_v14 }
  0xe3   :  { %2016 = vmatprep.mubr.msk.f32.mxu1 %vm157_vm1, %v2552_v17  ;;  %v2558_v19 = vpack.i.bf16 %v122_v16, %v119_v11  ;;  %v2576_v29 = vmul.f32 0.35355338, %v122_v16 }
  0xe5   :  { %2272 = vrot.lane.b32.xlu0 %v2558_v19, %s2443_s26 }
  0xe9   :  { %2277 = vrot.lane.b32.xlu0 %v2554_v18, %s2443_s26 }
 0x157   :  { %v2273_v20 = vpop.permute.xlu0 %2272 }
 0x158   :  { %v2275_v21 = vunpack.i.h.bf16 %v2273_v20  ;;  %v2274_v22 = vunpack.i.l.bf16 %v2273_v20 }
 0x15a   :  { %v2164_v24 = vpack.c.bf16 %v2275_v21, %v2274_v22 }
 0x15b   :  { %v2278_v25 = vpop.permute.xlu0 %2277 }
 0x15c   :  { %v2280_v26 = vunpack.i.h.bf16 %v2278_v25  ;;  %v2279_v27 = vunpack.i.l.bf16 %v2278_v25  ;;  %2166 = vmatprep.subr.msk.bf16.mxu1 %vm2564_vm2, %v2164_v24 }
 0x15d   :  { %2169 = vmatpush3.bf16.xpose.msk.msra.mxu1 %vm2564_vm2, %v2164_v24 }
 0x15e   :  { %v2170_v28 = vpack.c.bf16 %v2280_v26, %v2279_v27 }
 0x160   :  { %2172 = vmatprep.subr.msk.bf16.mxu1 %vm2564_vm2, %v2170_v28 }
 0x165   :  { %2175 = vmatpush3.bf16.xpose.msk.msra.mxu1 %vm2564_vm2, %v2170_v28 }
 0x16c   :  { %2017 = vmatmul.mubr.msk.f32.vlgmr.msra.gmra.mrb[4].mxu1 %vm157_vm1, %v2576_v29 }
 0x16d   :  { %2019 = vmatprep.mubr.msk.f32.mxu1 %vm157_vm1, %v2578_v30 }
 0x170   :  { %2020 = vmatmul.mubr.msk.f32.gmra.mrb[6].mxu1 %vm157_vm1, %v2584_v31 }
 0x23f   :  { %v2018_v33 = vpop.f32.mrb[4].mxu1 }
 0x240   :  { %v250_v35 = vadd.f32 %v2018_v33, %v2591_v32  ;;  %v244_v36 = vpop.f32.mrb[5].mxu1 }
 0x241   :  { %v245_v37 = vadd.f32 %v244_v36, %v2596_v34 }
 0x242   :  { %v266_v38 = vsel %vm77_vm0, %v250_v35, -inf }
 0x243   :  { %267 = vmax.xlane.f32.xlu1 %v266_v38  ;;  %v2021_v41 = vpop.f32.mrb[6].mxu1  ;;  %v263_v45 = vsel %vm77_vm0, %v245_v37, -inf }
 0x244   :  { %v254_v42 = vpop.f32.mrb[7].mxu1  ;;  %v260_v44 = vadd.f32 %v2021_v41, %v2609_v40 }
 0x245   :  { %v255_v43 = vadd.f32 %v254_v42, %v2604_v39 }
 0x246   :  { %v272_v47 = vsel %vm77_vm0, %v260_v44, -inf }
 0x247   :  { %264 = vmax.xlane.f32.xlu1 %v263_v45  ;;  %v269_v46 = vsel %vm77_vm0, %v255_v43, -inf }
 0x248   :  { %270 = vmax.xlane.f32.xlu0 %v269_v46 }
 0x24b   :  { %273 = vmax.xlane.f32.xlu1 %v272_v47 }
 0x25c   :  { %2282 = vrot.lane.b32.xlu1 %v2558_v19, %s2444_s18 }
 0x25e   :  { %2287 = vrot.lane.b32.xlu0 %v2554_v18, %s2444_s18 }
 0x260   :  { %2292 = vrot.lane.b32.xlu1 %v2558_v19, %s2445_s1 }
 0x262   :  { %422 = vrot.lane.b32.xlu0 %v2578_v30, %s2446_s19 }
 0x264   :  { %2297 = vrot.lane.b32.xlu1 %v2554_v18, %s2445_s1 }
 0x266   :  { %2302 = vrot.lane.b32.xlu0 %v2558_v19, %s2447_s20 }
 0x268   :  { %418 = vrot.lane.b32.xlu1 %v2552_v17, %s2446_s19 }
 0x26a   :  { %807 = vrot.lane.b32.xlu0 %v2552_v17, %s2448_s21 }
 0x26e   :  { %811 = vrot.lane.b32.xlu0 %v2578_v30, %s2448_s21 }
 0x2d0   :  { %v268_v48 = vpop.xlane.xlu1 %267 }
 0x2d1   :  { %v276_v49 = vsub.f32 %v250_v35, %v268_v48 }
 0x2d3   :  { %v281_v50 = vmul.f32 1.442695, %v276_v49 }
 0x2d4   :  { %v265_v51 = vpop.xlane.xlu1 %264 }
 0x2d5   :  { %2359 = vpow2.f32 %v281_v50  ;;  %v275_v52 = vsub.f32 %v245_v37, %v265_v51  ;;  %v271_v53 = vpop.xlane.xlu0 %270 }
 0x2d6   :  { %v277_v9 = vsub.f32 %v255_v43, %v271_v53 }
 0x2d7   :  { %v279_v54 = vmul.f32 1.442695, %v275_v52 }
 0x2d8   :  { %v274_v55 = vpop.xlane.xlu1 %273  ;;  %v283_v11 = vmul.f32 1.442695, %v277_v9 }
 0x2d9   :  { %2361 = vpow2.f32 %v279_v54  ;;  %v2288_v56 = vpop.permute.xlu0 %2287  ;;  %v278_v8 = vsub.f32 %v260_v44, %v274_v55 }
 0x2da   :  { %v2290_v58 = vunpack.i.h.bf16 %v2288_v56  ;;  %v2289_v59 = vunpack.i.l.bf16 %v2288_v56 }
 0x2db   :  { %v285_v10 = vmul.f32 1.442695, %v278_v8 }
 0x2dc   :  { %v2283_v57 = vpop.permute.xlu1 %2282  ;;  %v2180_v2 = vpack.c.bf16 %v2290_v58, %v2289_v59 }
 0x2dd   :  { %v2285_v60 = vunpack.i.h.bf16 %v2283_v57  ;;  %v2284_v61 = vunpack.i.l.bf16 %v2283_v57  ;;  %2363 = vpow2.f32 %v285_v10  ;;  %v423_v25 = vpop.permute.xlu0 %422 }
 0x2de   :  { %2365 = vpow2.f32 %v283_v11 }
 0x2df   :  { %v2360_v62 = vpop.eup %2359  ;;  %v2176_v63 = vpack.c.bf16 %v2285_v60, %v2284_v61 }
 0x2e0   :  { %v2293_v0 = vpop.permute.xlu1 %2292  ;;  %v290_v1 = vsel %vm77_vm0, %v2360_v62, 0.0 }
 0x2e1   :  { %v2295_v3 = vunpack.i.h.bf16 %v2293_v0  ;;  %v2294_v4 = vunpack.i.l.bf16 %v2293_v0  ;;  %291 = vadd.xlane.f32.xlu1 %v290_v1  ;;  %2177 = vmatprep.subr.bf16.mxu0 %v2176_v63  ;;  %v2303_v37 = vpop.permute.xlu0 %2302 }
 0x2e2   :  { %2179 = vmatpush3.bf16.msra.mxu0 %v2176_v63  ;;  %v2305_v38 = vunpack.i.h.bf16 %v2303_v37  ;;  %v2304_v41 = vunpack.i.l.bf16 %v2303_v37 }
 0x2e3   :  { %v2362_v5 = vpop.eup %2361  ;;  %2181 = vmatprep.subr.bf16.mxu0 %v2180_v2  ;;  %v2184_v7 = vpack.c.bf16 %v2295_v3, %v2294_v4 }
 0x2e4   :  { %v287_v6 = vsel %vm77_vm0, %v2362_v5, 0.0  ;;  %v2298_v16 = vpop.permute.xlu1 %2297  ;;  %v2204_v42 = vpack.c.bf16 %v2305_v38, %v2304_v41 }
 0x2e5   :  { %288 = vadd.xlane.f32.xlu1 %v287_v6  ;;  %v2300_v27 = vunpack.i.h.bf16 %v2298_v16  ;;  %v2299_v28 = vunpack.i.l.bf16 %v2298_v16  ;;  %v808_v55 = vpop.permute.xlu0 %807 }
 0x2e6   :  { %2183 = vmatpush3.bf16.msra.mxu0 %v2180_v2 }
 0x2e7   :  { %2186 = vmatprep.subr.msk.bf16.mxu0 %vm2564_vm2, %v2184_v7  ;;  %v2364_v12 = vpop.eup %2363  ;;  %v2190_v36 = vpack.c.bf16 %v2300_v27, %v2299_v28 }
 0x2e8   :  { %v296_v13 = vsel %vm77_vm0, %v2364_v12, 0.0  ;;  %v2366_v14 = vpop.eup %2365  ;;  %v419_v20 = vpop.permute.xlu1 %418 }
 0x2e9   :  { %v293_v15 = vsel %vm77_vm0, %v2366_v14, 0.0  ;;  %v812_v57 = vpop.permute.xlu0 %811 }
 0x2f6   :  { %420 = vrot.lane.b32.xlu1 %v2576_v29, %s2446_s19 }
 0x31a   :  { %297 = vadd.xlane.f32.xlu1 %v296_v13 }
 0x31e   :  { %294 = vadd.xlane.f32.xlu1 %v293_v15 }
 0x32f   :  { %424 = vrot.lane.b32.xlu1 %v2584_v31, %s2446_s19 }
 0x333   :  { %2307 = vrot.lane.b32.xlu1 %v2554_v18, %s2447_s20 }
 0x337   :  { %809 = vrot.lane.b32.xlu1 %v2576_v29, %s2448_s21 }
 0x33b   :  { %813 = vrot.lane.b32.xlu1 %v2584_v31, %s2448_s21 }
 0x36e   :  { %v292_v21 = vpop.xlane.xlu1 %291 }
 0x36f   :  { %2367 = vrcp.f32 %v292_v21 }
 0x372   :  { %v289_v22 = vpop.xlane.xlu1 %288 }
 0x373   :  { %2369 = vrcp.f32 %v289_v22 }
 0x376   :  { %v421_v43 = vpop.permute.xlu1 %420 }
 0x379   :  { %v2368_v24 = vpop.eup %2367 }
 0x37a   :  { %v304_v35 = vmul.f32 %v2368_v24, %v2360_v62 }
 0x37d   :  { %v2370_v26 = vpop.eup %2369 }
 0x37e   :  { %v303_v33 = vmul.f32 %v2370_v26, %v2362_v5 }
 0x380   :  { %2030 = vmatprep.mubr.msk.f32.mxu0 %vm77_vm0, %v303_v33 }
 0x381   :  { %2031 = vmatmul.mubr.msk.f32.vlgmr.msra.gmra.mrb[0].mxu0 %vm77_vm0, %v304_v35 }
 0x382   :  { %2189 = vmatpush3.bf16.xpose.msk.msra.mxu0 %vm2564_vm2, %v2184_v7 }
 0x383   :  { %2192 = vmatprep.subr.msk.bf16.mxu0 %vm2564_vm2, %v2190_v36 }
 0x38a   :  { %2195 = vmatpush3.bf16.xpose.msk.msra.mxu0 %vm2564_vm2, %v2190_v36 }
 0x38b   :  { %2206 = vmatprep.subr.msk.bf16.mxu0 %vm2564_vm2, %v2204_v42 }
 0x3a7   :  { %v298_v44 = vpop.xlane.xlu1 %297 }
 0x3a8   :  { %2371 = vrcp.f32 %v298_v44 }
 0x3ab   :  { %v295_v45 = vpop.xlane.xlu1 %294 }
 0x3ac   :  { %2373 = vrcp.f32 %v295_v45 }
 0x3af   :  { %v425_v46 = vpop.permute.xlu1 %424 }
 0x3b2   :  { %v2372_v47 = vpop.eup %2371 }
 0x3b3   :  { %v2308_v49 = vpop.permute.xlu1 %2307  ;;  %v306_v51 = vmul.f32 %v2372_v47, %v2364_v12 }
 0x3b4   :  { %v2310_v52 = vunpack.i.h.bf16 %v2308_v49  ;;  %v2309_v53 = vunpack.i.l.bf16 %v2308_v49 }
 0x3b6   :  { %v2374_v48 = vpop.eup %2373  ;;  %v2210_v54 = vpack.c.bf16 %v2310_v52, %v2309_v53 }
 0x3b7   :  { %v305_v50 = vmul.f32 %v2374_v48, %v2366_v14  ;;  %v810_v56 = vpop.permute.xlu1 %809 }
 0x3b9   :  { %2033 = vmatprep.mubr.msk.f32.mxu0 %vm77_vm0, %v305_v50 }
 0x3ba   :  { %2034 = vmatmul.mubr.msk.f32.gmra.mrb[2].mxu0 %vm77_vm0, %v306_v51 }
 0x3bb   :  { %2044 = vmatprep.mubr.msk.f32.mxu0 %vm157_vm1, %v419_v20  ;;  %v814_v58 = vpop.permute.xlu1 %813 }
 0x3be   :  { %2045 = vmatmul.mubr.msk.f32.vlgmr.msra.gmra.mrb[4].mxu0 %vm157_vm1, %v421_v43 }
 0x3bf   :  { %2209 = vmatpush3.bf16.xpose.msk.msra.mxu0 %vm2564_vm2, %v2204_v42  ;;  %2047 = vmatprep.mubr.msk.f32.mxu0 %vm157_vm1, %v423_v25 }
 0x3c0   :  { %2212 = vmatprep.subr.msk.bf16.mxu0 %vm2564_vm2, %v2210_v54 }
 0x3c2   :  { %2048 = vmatmul.mubr.msk.f32.gmra.mrb[6].mxu0 %vm157_vm1, %v425_v46 }
 0x3c3   :  { %2084 = vmatprep.mubr.msk.f32.mxu0 %vm157_vm1, %v808_v55 }
 0x3c7   :  { %2215 = vmatpush3.bf16.xpose.msk.msra.mxu0 %vm2564_vm2, %v2210_v54 }
 0x3ce   :  { %2085 = vmatmul.mubr.msk.f32.vlgmr.msra.gmra.mrb[8].mxu0 %vm157_vm1, %v810_v56 }
 0x3cf   :  { %2087 = vmatprep.mubr.msk.f32.mxu0 %vm157_vm1, %v812_v57 }
 0x3d2   :  { %2088 = vmatmul.mubr.msk.f32.gmra.mrb[10].mxu0 %vm157_vm1, %v814_v58 }
 0x454   :  { %v2672_v59 = vpop.f32.mrb[0].mxu0 }
 0x455   :  { %v2674_v60 = vpop.f32.mrb[1].mxu0 }
 0x456   :  { %v416_v61 = vpack.c.bf16 %v2672_v59, %v2674_v60 }
 0x48d   :  { %v2678_v62 = vpop.f32.mrb[2].mxu0 }
 0x48e   :  { %v2680_v63 = vpop.f32.mrb[3].mxu0 }
 0x48f   :  { %v417_v0 = vpack.c.bf16 %v2678_v62, %v2680_v63 }
 0x491   :  { %v2046_v1 = vpop.f32.mrb[4].mxu0 }
 0x492   :  { %v522_v2 = vadd.f32 %v2046_v1, %v2591_v32  ;;  %v516_v3 = vpop.f32.mrb[5].mxu0 }
 0x493   :  { %v517_v4 = vadd.f32 %v516_v3, %v2596_v34 }
 0x494   :  { %v538_v5 = vsel %vm77_vm0, %v522_v2, -inf }
 0x495   :  { %539 = vmax.xlane.f32.xlu1 %v538_v5  ;;  %v2049_v6 = vpop.f32.mrb[6].mxu0  ;;  %v535_v7 = vsel %vm77_vm0, %v517_v4, -inf }
 0x496   :  { %v526_v8 = vpop.f32.mrb[7].mxu0  ;;  %536 = vmax.xlane.f32.xlu0 %v535_v7  ;;  %v532_v10 = vadd.f32 %v2049_v6, %v2609_v40 }
 0x497   :  { %v527_v9 = vadd.f32 %v526_v8, %v2604_v39 }
 0x498   :  { %v544_v12 = vsel %vm77_vm0, %v532_v10, -inf }
 0x499   :  { %v541_v11 = vsel %vm77_vm0, %v527_v9, -inf }
 0x49a   :  { %542 = vmax.xlane.f32.xlu0 %v541_v11 }
 0x49e   :  { %545 = vmax.xlane.f32.xlu0 %v544_v12 }
 0x4a1   :  { %v2086_v13 = vpop.f32.mrb[8].mxu0 }
 0x4a2   :  { %v905_v14 = vpop.f32.mrb[9].mxu0  ;;  %v2717_v49 = vadd.f32 %v2086_v13, %v2591_v32 }
 0x4a3   :  { %v2714_v48 = vadd.f32 %v905_v14, %v2596_v34 }
 0x4a5   :  { %v2089_v15 = vpop.f32.mrb[10].mxu0  ;;  %v924_v51 = vsel %vm77_vm0, %v2714_v48, -inf }
 0x4a6   :  { %v915_v16 = vpop.f32.mrb[11].mxu0 }
 0x4a7   :  { %v2720_v50 = vadd.f32 %v915_v16, %v2604_v39 }
 0x522   :  { %v540_v20 = vpop.xlane.xlu1 %539 }
 0x523   :  { %v548_v21 = vsub.f32 %v522_v2, %v540_v20  ;;  %v537_v22 = vpop.xlane.xlu0 %536 }
 0x524   :  { %v547_v24 = vsub.f32 %v517_v4, %v537_v22 }
 0x525   :  { %v553_v25 = vmul.f32 1.442695, %v548_v21 }
 0x526   :  { %v551_v26 = vmul.f32 1.442695, %v547_v24 }
 0x527   :  { %2375 = vpow2.f32 %v553_v25  ;;  %v543_v27 = vpop.xlane.xlu0 %542 }
 0x528   :  { %2377 = vpow2.f32 %v551_v26  ;;  %v549_v28 = vsub.f32 %v527_v9, %v543_v27 }
 0x52a   :  { %v555_v33 = vmul.f32 1.442695, %v549_v28 }
 0x52b   :  { %v546_v35 = vpop.xlane.xlu0 %545 }
 0x52c   :  { %2379 = vpow2.f32 %v555_v33  ;;  %v550_v36 = vsub.f32 %v532_v10, %v546_v35 }
 0x52e   :  { %v557_v37 = vmul.f32 1.442695, %v550_v36 }
 0x530   :  { %2381 = vpow2.f32 %v557_v37 }
 0x531   :  { %v2692_v38 = vpop.eup %2375 }
 0x532   :  { %v2378_v41 = vpop.eup %2377  ;;  %v562_v42 = vsel %vm77_vm0, %v2692_v38, 0.0 }
 0x533   :  { %563 = vadd.xlane.f32.xlu0 %v562_v42  ;;  %v559_v43 = vsel %vm77_vm0, %v2378_v41, 0.0 }
 0x534   :  { %560 = vadd.xlane.f32.xlu1 %v559_v43 }
 0x536   :  { %v2697_v44 = vpop.eup %2379 }
 0x537   :  { %v565_v45 = vsel %vm77_vm0, %v2697_v44, 0.0 }
 0x538   :  { %566 = vadd.xlane.f32.xlu1 %v565_v45 }
 0x53a   :  { %v2701_v46 = vpop.eup %2381 }
 0x53b   :  { %v568_v47 = vsel %vm77_vm0, %v2701_v46, 0.0 }
 0x53c   :  { %569 = vadd.xlane.f32.xlu0 %v568_v47 }
 0x549   :  { %2312 = vrot.lane.b32.xlu1 %v2558_v19, %s2449_s22 }
 0x54d   :  { %2322 = vrot.lane.b32.xlu1 %v2558_v19, %s2450_s23 }
 0x551   :  { %2327 = vrot.lane.b32.xlu1 %v2554_v18, %s2450_s23 }
 0x552   :  { %2317 = vrot.lane.b32.xlu0 %v2554_v18, %s2449_s22 }
 0x555   :  { %1143 = vrot.lane.b32.xlu1 %v2576_v29, %s2451_s24  ;;  %v2725_v29 = vadd.f32 %v2089_v15, %v2609_v40 }
 0x556   :  { %1141 = vrot.lane.b32.xlu0 %v2552_v17, %s2451_s24  ;;  %v927_v17 = vsel %vm77_vm0, %v2717_v49, -inf }
 0x559   :  { %1147 = vrot.lane.b32.xlu1 %v2584_v31, %s2451_s24  ;;  %v933_v31 = vsel %vm77_vm0, %v2725_v29, -inf }
 0x55a   :  { %1145 = vrot.lane.b32.xlu0 %v2578_v30, %s2451_s24  ;;  %v930_v30 = vsel %vm77_vm0, %v2720_v50, -inf }
 0x579   :  { %925 = vmax.xlane.f32.xlu0 %v924_v51 }
 0x57d   :  { %928 = vmax.xlane.f32.xlu1 %v927_v17  ;;  %931 = vmax.xlane.f32.xlu0 %v930_v30 }
 0x581   :  { %934 = vmax.xlane.f32.xlu0 %v933_v31 }
 0x5c0   :  { %v564_v53 = vpop.xlane.xlu0 %563 }
 0x5c1   :  { %v561_v52 = vpop.xlane.xlu1 %560 }
 0x5c2   :  { %2383 = vrcp.f32 %v561_v52  ;;  %v138_v52 = vld [vmem:[%s2923_s4 + $0x4] sm:$0xf] }
 0x5c3   :  { %2385 = vrcp.f32 %v564_v53  ;;  %v698_v53 = vsel %vm696_vm3, %v138_v52, 0 }
 0x5c5   :  { %v567_v54 = vpop.xlane.xlu1 %566 }
 0x5c6   :  { %2387 = vrcp.f32 %v567_v54  ;;  %v137_v54 = vld [vmem:[%s2923_s4] sm:$0xf] }
 0x5c9   :  { %v2313_v55 = vpop.permute.xlu1 %2312  ;;  %v570_v56 = vpop.xlane.xlu0 %569 }
 0x5ca   :  { %v2315_v57 = vunpack.i.h.bf16 %v2313_v55  ;;  %v2314_v58 = vunpack.i.l.bf16 %v2313_v55  ;;  %2389 = vrcp.f32 %v570_v56 }
 0x5cc   :  { %v2384_v1 = vpop.eup %2383  ;;  %v2196_v2 = vpack.c.bf16 %v2315_v57, %v2314_v58 }
 0x5cd   :  { %v2323_v3 = vpop.permute.xlu1 %2322  ;;  %v2318_v4 = vpop.permute.xlu0 %2317  ;;  %v575_v5 = vmul.f32 %v2384_v1, %v2378_v41 }
 0x5ce   :  { %v2325_v6 = vunpack.i.h.bf16 %v2323_v3  ;;  %v2324_v7 = vunpack.i.l.bf16 %v2323_v3  ;;  %v2320_v8 = vunpack.i.h.bf16 %v2318_v4  ;;  %v2319_v9 = vunpack.i.l.bf16 %v2318_v4  ;;  %2197 = vmatprep.subr.bf16.mxu1 %v2196_v2  ;;  %v2386_v12 = vpop.eup %2385 }
 0x5cf   :  { %2199 = vmatpush3.bf16.msra.mxu1 %v2196_v2  ;;  %2058 = vmatprep.mubr.msk.f32.mxu1 %vm77_vm0, %v575_v5  ;;  %v576_v21 = vmul.f32 %v2386_v12, %v2692_v38 }
 0x5d0   :  { %v2224_v10 = vpack.c.bf16 %v2325_v6, %v2324_v7  ;;  %v2200_v11 = vpack.c.bf16 %v2320_v8, %v2319_v9  ;;  %v2388_v15 = vpop.eup %2387  ;;  %v756_v9 = vsel %vm696_vm3, %v137_v54, 0 }
 0x5d1   :  { %v2328_v13 = vpop.permute.xlu1 %2327  ;;  %v1142_v14 = vpop.permute.xlu0 %1141  ;;  %v577_v25 = vmul.f32 %v2388_v15, %v2697_v44 }
 0x5d2   :  { %v2330_v16 = vunpack.i.h.bf16 %v2328_v13  ;;  %v2329_v20 = vunpack.i.l.bf16 %v2328_v13  ;;  %2201 = vmatprep.subr.bf16.mxu1 %v2200_v11  ;;  %2226 = vmatprep.subr.msk.bf16.mxu0 %vm2564_vm2, %v2224_v10 }
 0x5d3   :  { %2118 = vmatprep.mubr.msk.f32.mxu0 %vm157_vm1, %v1142_v14  ;;  %2203 = vmatpush3.bf16.msra.mxu1 %v2200_v11 }
 0x5d4   :  { %v2230_v22 = vpack.c.bf16 %v2330_v16, %v2329_v20  ;;  %2229 = vmatpush3.bf16.xpose.msk.msra.mxu0 %vm2564_vm2, %v2224_v10  ;;  %v2390_v24 = vpop.eup %2389  ;;  %2256 = vmatprep.subr.msk.bf16.mxu1 %vm696_vm3, %v138_v52 }
 0x5d5   :  { %v578_v26 = vmul.f32 %v2390_v24, %v2701_v46  ;;  %v1144_v27 = vpop.permute.xlu1 %1143  ;;  %v1146_v28 = vpop.permute.xlu0 %1145 }
 0x5d6   :  { %2059 = vmatmul.mubr.msk.f32.vlgmr.msra.gmra.mrb[8].mxu1 %vm77_vm0, %v576_v21  ;;  %2232 = vmatprep.subr.msk.bf16.mxu0 %vm2564_vm2, %v2230_v22 }
 0x5d7   :  { %2061 = vmatprep.mubr.msk.f32.mxu1 %vm77_vm0, %v577_v25  ;;  %2065 = vmatpush3.bf16.msra.mxu1 %v698_v53 }
 0x5d8   :  { %2257 = vmatprep.subr.msk.bf16.mxu1 %vm696_vm3, %v137_v54 }
 0x5d9   :  { %v1148_v33 = vpop.permute.xlu1 %1147 }
 0x5da   :  { %2062 = vmatmul.mubr.msk.f32.gmra.mrb[10].mxu1 %vm77_vm0, %v578_v26 }
 0x5dc   :  { %2235 = vmatpush3.bf16.xpose.msk.msra.mxu0 %vm2564_vm2, %v2230_v22 }
 0x5e3   :  { %2119 = vmatmul.mubr.msk.f32.vlgmr.msra.gmra.mrb[12].mxu0 %vm157_vm1, %v1144_v27 }
 0x5e4   :  { %2121 = vmatprep.mubr.msk.f32.mxu0 %vm157_vm1, %v1146_v28 }
 0x5e7   :  { %2122 = vmatmul.mubr.msk.f32.gmra.mrb[14].mxu0 %vm157_vm1, %v1148_v33 }
 0x606   :  { %v926_v35 = vpop.xlane.xlu0 %925 }
 0x607   :  { %v936_v36 = vsub.f32 %v2714_v48, %v926_v35 }
 0x609   :  { %v940_v37 = vmul.f32 1.442695, %v936_v36 }
 0x60a   :  { %v929_v38 = vpop.xlane.xlu1 %928  ;;  %v932_v41 = vpop.xlane.xlu0 %931 }
 0x60b   :  { %2391 = vpow2.f32 %v940_v37  ;;  %v937_v42 = vsub.f32 %v2717_v49, %v929_v38  ;;  %v938_v23 = vsub.f32 %v2720_v50, %v932_v41 }
 0x60d   :  { %v942_v43 = vmul.f32 1.442695, %v937_v42  ;;  %v944_v44 = vmul.f32 1.442695, %v938_v23 }
 0x60e   :  { %v935_v45 = vpop.xlane.xlu0 %934 }
 0x60f   :  { %2393 = vpow2.f32 %v942_v43  ;;  %v939_v46 = vsub.f32 %v2725_v29, %v935_v45 }
 0x610   :  { %2395 = vpow2.f32 %v944_v44 }
 0x611   :  { %v946_v47 = vmul.f32 1.442695, %v939_v46 }
 0x613   :  { %2397 = vpow2.f32 %v946_v47 }
 0x615   :  { %v2756_v51 = vpop.eup %2391 }
 0x616   :  { %v948_v48 = vsel %vm77_vm0, %v2756_v51, 0.0 }
 0x617   :  { %949 = vadd.xlane.f32.xlu1 %v948_v48 }
 0x619   :  { %v2760_v17 = vpop.eup %2393 }
 0x61a   :  { %v2762_v49 = vpop.eup %2395  ;;  %v951_v50 = vsel %vm77_vm0, %v2760_v17, 0.0 }
 0x61b   :  { %952 = vadd.xlane.f32.xlu0 %v951_v50  ;;  %v954_v29 = vsel %vm77_vm0, %v2762_v49, 0.0 }
 0x61c   :  { %955 = vadd.xlane.f32.xlu1 %v954_v29 }
 0x61d   :  { %v2768_v30 = vpop.eup %2397 }
 0x61e   :  { %v957_v31 = vsel %vm77_vm0, %v2768_v30, 0.0 }
 0x61f   :  { %958 = vadd.xlane.f32.xlu0 %v957_v31 }
 0x62d   :  { %2332 = vrot.lane.b32.xlu1 %v2558_v19, %s2452_s2 }
 0x635   :  { %2337 = vrot.lane.b32.xlu0 %v2554_v18, %s2452_s2 }
 0x6a4   :  { %v950_v55 = vpop.xlane.xlu1 %949 }
 0x6a5   :  { %2399 = vrcp.f32 %v950_v55 }
 0x6a8   :  { %v953_v58 = vpop.xlane.xlu0 %952 }
 0x6a9   :  { %v956_v56 = vpop.xlane.xlu1 %955  ;;  %v2060_v57 = vpop.f32.mrb[8].mxu1  ;;  %2401 = vrcp.f32 %v953_v58 }
 0x6aa   :  { %v669_v1 = vpop.f32.mrb[9].mxu1  ;;  %2403 = vrcp.f32 %v956_v56 }
 0x6ab   :  { %v688_v2 = vpack.c.bf16 %v2060_v57, %v669_v1 }
 0x6ac   :  { %v959_v11 = vpop.xlane.xlu0 %958 }
 0x6ad   :  { %v2333_v3 = vpop.permute.xlu1 %2332  ;;  %v2063_v4 = vpop.f32.mrb[10].mxu1  ;;  %2066 = vmatprep.mubr.msk.bf16.mxu1 %vm157_vm1, %v688_v2  ;;  %2405 = vrcp.f32 %v959_v11 }
 0x6ae   :  { %v2335_v5 = vunpack.i.h.bf16 %v2333_v3  ;;  %v2334_v6 = vunpack.i.l.bf16 %v2333_v3  ;;  %v679_v7 = vpop.f32.mrb[11].mxu1 }
 0x6af   :  { %v689_v8 = vpack.c.bf16 %v2063_v4, %v679_v7  ;;  %v2400_v60 = vpop.eup %2399 }
 0x6b0   :  { %v2216_v10 = vpack.c.bf16 %v2335_v5, %v2334_v6  ;;  %v2338_v12 = vpop.permute.xlu0 %2337  ;;  %v964_v28 = vmul.f32 %v2400_v60, %v2756_v51 }
 0x6b1   :  { %2067 = vmatmul.mubr.msk.bf16.vlgmr.msra.gmra.mrb[12].mxu1 %vm157_vm1, %v689_v8  ;;  %v2340_v20 = vunpack.i.h.bf16 %v2338_v12  ;;  %v2339_v21 = vunpack.i.l.bf16 %v2338_v12 }
 0x6b2   :  { %2071 = vmatpush3.bf16.msra.mxu1 %v756_v9  ;;  %2072 = vmatprep.mubr.msk.bf16.mxu1 %vm157_vm1, %v416_v61 }
 0x6b3   :  { %2217 = vmatprep.subr.bf16.mxu1 %v2216_v10 }
 0x6b6   :  { %v2120_v13 = vpop.f32.mrb[12].mxu0 }
 0x6b7   :  { %v1245_v14 = vadd.f32 %v2120_v13, %v2591_v32  ;;  %v1239_v15 = vpop.f32.mrb[13].mxu0  ;;  %v2220_v32 = vpack.c.bf16 %v2340_v20, %v2339_v21 }
 0x6b8   :  { %v1240_v16 = vadd.f32 %v1239_v15, %v2596_v34 }
 0x6b9   :  { %v1261_v22 = vsel %vm77_vm0, %v1245_v14, -inf }
 0x6ba   :  { %v2123_v24 = vpop.f32.mrb[14].mxu0  ;;  %1262 = vmax.xlane.f32.xlu0 %v1261_v22  ;;  %v1258_v59 = vsel %vm77_vm0, %v1240_v16, -inf }
 0x6bb   :  { %v1255_v61 = vadd.f32 %v2123_v24, %v2609_v40  ;;  %v1249_v25 = vpop.f32.mrb[15].mxu0  ;;  %1259 = vmax.xlane.f32.xlu1 %v1258_v59  ;;  %v2402_v40 = vpop.eup %2401  ;;  %v140_v24 = vld [vmem:[%s2923_s4 + $0xc] sm:$0xf] }
 0x6bc   :  { %v1250_v26 = vadd.f32 %v1249_v25, %v2604_v39  ;;  %v2404_v39 = vpop.eup %2403  ;;  %v965_v33 = vmul.f32 %v2402_v40, %v2760_v17  ;;  %v1420_v59 = vsel %vm696_vm3, %v140_v24, 0 }
 0x6bd   :  { %v1267_v27 = vsel %vm77_vm0, %v1255_v61, -inf  ;;  %2073 = vmatmul.mubr.msk.bf16.vlgmr.msra.gmra.mrb[12].mxu1 %vm157_vm1, %v417_v0  ;;  %v2406_v35 = vpop.eup %2405  ;;  %v966_v62 = vmul.f32 %v2404_v39, %v2762_v49  ;;  %v139_v0 = vld [vmem:[%s2923_s4 + $0x8] sm:$0xf] }
 0x6be   :  { %1268 = vmax.xlane.f32.xlu0 %v1267_v27  ;;  %2219 = vmatpush3.bf16.msra.mxu1 %v2216_v10  ;;  %v1264_v34 = vsel %vm77_vm0, %v1250_v26, -inf  ;;  %v967_v63 = vmul.f32 %v2406_v35, %v2768_v30  ;;  %v1086_v36 = vsel %vm696_vm3, %v139_v0, 0 }
 0x6bf   :  { %1265 = vmax.xlane.f32.xlu1 %v1264_v34  ;;  %2221 = vmatprep.subr.bf16.mxu1 %v2220_v32  ;;  %v1893_v34 = vld [vmem:[%s2924_s5] ss:$0 sm:$0xff] }
 0x6c0   :  { %2098 = vmatprep.mubr.msk.f32.mxu1 %vm77_vm0, %v964_v28 }
 0x6c2   :  { %2223 = vmatpush3.bf16.msra.mxu1 %v2220_v32 }
 0x6c3   :  { %2258 = vmatprep.subr.msk.bf16.mxu1 %vm696_vm3, %v139_v0 }
 0x6c5   :  { %2099 = vmatmul.mubr.msk.f32.vlgmr.msra.gmra.mrb[16].mxu1 %vm77_vm0, %v965_v33 }
 0x6c6   :  { %2101 = vmatprep.mubr.msk.f32.mxu1 %vm77_vm0, %v966_v62  ;;  %2105 = vmatpush3.bf16.msra.mxu1 %v1086_v36  ;;  %v2439_v36 = vld [vmem:[%s2920_s0] sm:$0xff] }
 0x6c9   :  { %2102 = vmatmul.mubr.msk.f32.gmra.mrb[18].mxu1 %vm77_vm0, %v967_v63 }
 0x747   :  { %v1263_v37 = vpop.xlane.xlu0 %1262 }
 0x748   :  { %v1271_v38 = vsub.f32 %v1245_v14, %v1263_v37  ;;  %v1260_v41 = vpop.xlane.xlu1 %1259 }
 0x749   :  { %v1270_v42 = vsub.f32 %v1240_v16, %v1260_v41  ;;  %v2440_v41 = vld [vmem:[%s2920_s0 + $0x8] sm:$0xff] }
 0x74a   :  { %v1276_v23 = vmul.f32 1.442695, %v1271_v38 }
 0x74b   :  { %v1274_v43 = vmul.f32 1.442695, %v1270_v42  ;;  %v1269_v44 = vpop.xlane.xlu0 %1268 }
 0x74c   :  { %2407 = vpow2.f32 %v1276_v23  ;;  %v1273_v45 = vsub.f32 %v1255_v61, %v1269_v44  ;;  %v1266_v46 = vpop.xlane.xlu1 %1265  ;;  %v2441_v23 = vld [vmem:[%s2920_s0 + $0x10] sm:$0xff] }
 0x74d   :  { %2409 = vpow2.f32 %v1274_v43  ;;  %v1272_v47 = vsub.f32 %v1250_v26, %v1266_v46 }
 0x74e   :  { %v1280_v51 = vmul.f32 1.442695, %v1273_v45  ;;  %v2442_v45 = vld [vmem:[%s2920_s0 + $0x18] sm:$0xff] }
 0x74f   :  { %v1278_v48 = vmul.f32 1.442695, %v1272_v47 }
 0x750   :  { %2411 = vpow2.f32 %v1280_v51 }
 0x751   :  { %2413 = vpow2.f32 %v1278_v48 }
 0x756   :  { %v2408_v17 = vpop.eup %2407 }
 0x757   :  { %v2410_v49 = vpop.eup %2409  ;;  %v1285_v50 = vsel %vm77_vm0, %v2408_v17, 0.0 }
 0x758   :  { %1286 = vadd.xlane.f32.xlu0 %v1285_v50  ;;  %v1282_v29 = vsel %vm77_vm0, %v2410_v49, 0.0 }
 0x759   :  { %1283 = vadd.xlane.f32.xlu1 %v1282_v29 }
 0x75a   :  { %v2412_v30 = vpop.eup %2411 }
 0x75b   :  { %v2414_v31 = vpop.eup %2413  ;;  %v1291_v52 = vsel %vm77_vm0, %v2412_v30, 0.0 }
 0x75c   :  { %1292 = vadd.xlane.f32.xlu0 %v1291_v52  ;;  %v1288_v53 = vsel %vm77_vm0, %v2414_v31, 0.0 }
 0x75d   :  { %1289 = vadd.xlane.f32.xlu1 %v1288_v53 }
 0x76e   :  { %2342 = vrot.lane.b32.xlu1 %v2558_v19, %s2453_s30 }
 0x772   :  { %2347 = vrot.lane.b32.xlu0 %v2554_v18, %s2453_s30 }
 0x798   :  { %v2100_v54 = vpop.f32.mrb[16].mxu1 }
 0x799   :  { %v1058_v55 = vpop.f32.mrb[17].mxu1 }
 0x79a   :  { %v1077_v56 = vpack.c.bf16 %v2100_v54, %v1058_v55 }
 0x79c   :  { %v2103_v57 = vpop.f32.mrb[18].mxu1  ;;  %2106 = vmatprep.mubr.msk.bf16.mxu1 %vm157_vm1, %v1077_v56 }
 0x79d   :  { %v1068_v58 = vpop.f32.mrb[19].mxu1 }
 0x79e   :  { %v1078_v1 = vpack.c.bf16 %v2103_v57, %v1068_v58 }
 0x7a0   :  { %2107 = vmatmul.mubr.msk.bf16.vlgmr.msra.gmra.mrb[12].mxu1 %vm157_vm1, %v1078_v1 }
 0x7e5   :  { %v1287_v2 = vpop.xlane.xlu0 %1286 }
 0x7e6   :  { %v1284_v3 = vpop.xlane.xlu1 %1283 }
 0x7e7   :  { %2415 = vrcp.f32 %v1284_v3 }
 0x7e8   :  { %2417 = vrcp.f32 %v1287_v2 }
 0x7e9   :  { %v1293_v4 = vpop.xlane.xlu0 %1292 }
 0x7ea   :  { %v1290_v5 = vpop.xlane.xlu1 %1289 }
 0x7eb   :  { %2419 = vrcp.f32 %v1290_v5 }
 0x7ec   :  { %2421 = vrcp.f32 %v1293_v4 }
 0x7ed   :  { %v2348_v19 = vpop.permute.xlu0 %2347 }
 0x7ee   :  { %v2343_v6 = vpop.permute.xlu1 %2342  ;;  %v2350_v18 = vunpack.i.h.bf16 %v2348_v19  ;;  %v2349_v7 = vunpack.i.l.bf16 %v2348_v19 }
 0x7ef   :  { %v2345_v8 = vunpack.i.h.bf16 %v2343_v6  ;;  %v2344_v9 = vunpack.i.l.bf16 %v2343_v6  ;;  %v2353_v6 = vld [vmem:[%s2925_s8] sm:$0xff]  }
 0x7f0   :  { %v2240_v13 = vpack.c.bf16 %v2350_v18, %v2349_v7  ;;  %v2354_v18 = vld [vmem:[%s2925_s8 + $0x8] sm:$0xff]   ;;  %2144 = vmatprep.subr.bf16.mxu0 %v2353_v6  ;;  %v2355_v7 = vld [vmem:[%s2926_s10] sm:$0xff]  }
 0x7f1   :  { %v2416_v10 = vpop.eup %2415  ;;  %v2236_v11 = vpack.c.bf16 %v2345_v8, %v2344_v9  ;;  %2145 = vmatpush3.bf16.msra.mxu0 %v2353_v6 }
 0x7f2   :  { %v1298_v12 = vmul.f32 %v2416_v10, %v2410_v49  ;;  %v2418_v14 = vpop.eup %2417  ;;  %2146 = vmatprep.subr.bf16.mxu0 %v2354_v18 }
 0x7f3   :  { %2237 = vmatprep.subr.bf16.mxu1 %v2236_v11  ;;  %v1299_v16 = vmul.f32 %v2418_v14, %v2408_v17 }
 0x7f4   :  { %2239 = vmatpush3.bf16.msra.mxu1 %v2236_v11  ;;  %2132 = vmatprep.mubr.msk.f32.mxu1 %vm77_vm0, %v1298_v12 }
 0x7f5   :  { %2241 = vmatprep.subr.bf16.mxu1 %v2240_v13  ;;  %v2420_v15 = vpop.eup %2419  ;;  %2147 = vmatpush3.bf16.msra.mxu0 %v2354_v18 }
 0x7f6   :  { %v2422_v20 = vpop.eup %2421  ;;  %v1300_v21 = vmul.f32 %v2420_v15, %v2414_v31  ;;  %2152 = vmatprep.subr.bf16.mxu0 %v2355_v7 }
 0x7f7   :  { %v1301_v22 = vmul.f32 %v2422_v20, %v2412_v30 }
 0x7f8   :  { %2243 = vmatpush3.bf16.msra.mxu1 %v2240_v13 }
 0x7f9   :  { %2259 = vmatprep.subr.msk.bf16.mxu1 %vm696_vm3, %v140_v24 }
 0x7fb   :  { %2133 = vmatmul.mubr.msk.f32.vlgmr.msra.gmra.mrb[20].mxu1 %vm77_vm0, %v1299_v16 }
 0x7fc   :  { %2135 = vmatprep.mubr.msk.f32.mxu1 %vm77_vm0, %v1300_v21  ;;  %2139 = vmatpush3.bf16.msra.mxu1 %v1420_v59  ;;  %v1894_v59 = vld [vmem:[%s2927_s6] ss:$0 sm:$0xff] }
 0x7ff   :  { %2136 = vmatmul.mubr.msk.f32.gmra.mrb[22].mxu1 %vm77_vm0, %v1301_v22 }
 0x8ce   :  { %v2134_v60 = vpop.f32.mrb[20].mxu1 }
 0x8cf   :  { %v1392_v61 = vpop.f32.mrb[21].mxu1 }
 0x8d0   :  { %v1411_v25 = vpack.c.bf16 %v2134_v60, %v1392_v61 }
 0x8d2   :  { %v2137_v26 = vpop.f32.mrb[22].mxu1  ;;  %2140 = vmatprep.mubr.msk.bf16.mxu1 %vm157_vm1, %v1411_v25 }
 0x8d3   :  { %v1402_v32 = vpop.f32.mrb[23].mxu1 }
 0x8d4   :  { %v1412_v27 = vpack.c.bf16 %v2137_v26, %v1402_v32 }
 0x8d6   :  { %2141 = vmatmul.mubr.msk.bf16.vlgmr.msra.gmra.mrb[12].mxu1 %vm157_vm1, %v1412_v27  ;;  %v1895_v27 = vld [vmem:[%s2928_s7] ss:$0 sm:$0xff] }
 0x9a9   :  { %v2142_v28 = vpop.f32.mrb[12].mxu1 }
 0x9aa   :  { %v1456_v40 = vpop.f32.mrb[13].mxu1  ;;  %v1484_v39 = vadd.f32 %v2142_v28, %v1893_v34 }
 0x9ab   :  { %v1482_v33 = vadd.f32 %v1893_v34, %v1456_v40  ;;  %v2143_v35 = vpop.f32.mrb[14].mxu1 }
 0x9ac   :  { %v1459_v62 = vpop.f32.mrb[15].mxu1  ;;  %v1485_v63 = vadd.f32 %v2143_v35, %v1893_v34  ;;  %v1488_v43 = vadd.f32 %v2441_v23, %v1484_v39  ;;  %v2358_v23 = vld [vmem:[%s2926_s10 + $0x18] sm:$0xff]  }
 0x9ad   :  { %v1483_v0 = vadd.f32 %v1893_v34, %v1459_v62  ;;  %v1486_v37 = vadd.f32 %v2439_v36, %v1482_v33 }
 0x9ae   :  { %v1489_v46 = vadd.f32 %v2442_v45, %v1485_v63  ;;  %v1496_v47 = vsel %vm77_vm0, %v1488_v43, 0.0 }
 0x9af   :  { %v1490_v38 = vsel %vm77_vm0, %v1486_v37, 0.0  ;;  %v1487_v42 = vadd.f32 %v2440_v41, %v1483_v0  ;;  %v2356_v41 = vld [vmem:[%s2926_s10 + $0x8] sm:$0xff]  }
 0x9b0   :  { %1491 = vadd.xlane.f32.xlu1 %v1490_v38  ;;  %v1499_v51 = vsel %vm77_vm0, %v1489_v46, 0.0 }
 0x9b1   :  { %v1493_v44 = vsel %vm77_vm0, %v1487_v42, 0.0 }
 0x9b2   :  { %1494 = vadd.xlane.f32.xlu0 %v1493_v44 }
 0x9b4   :  { %1497 = vadd.xlane.f32.xlu1 %v1496_v47 }
 0x9b6   :  { %1500 = vadd.xlane.f32.xlu0 %v1499_v51 }
 0xa3d   :  { %v1492_v48 = vpop.xlane.xlu1 %1491 }
 0xa3e   :  { %v1503_v17 = vmul.f32 0.03125, %v1492_v48 }
 0xa3f   :  { %v1495_v49 = vpop.xlane.xlu0 %1494 }
 0xa40   :  { %v1507_v50 = vsub.f32 %v1486_v37, %v1503_v17  ;;  %v1504_v29 = vmul.f32 0.03125, %v1495_v49 }
 0xa41   :  { %v1498_v30 = vpop.xlane.xlu1 %1497 }
 0xa42   :  { %v1508_v31 = vsub.f32 %v1487_v42, %v1504_v29  ;;  %v1505_v52 = vmul.f32 0.03125, %v1498_v30  ;;  %v1511_v53 = vmul.f32 %v1507_v50, %v1507_v50  ;;  %v2357_v42 = vld [vmem:[%s2926_s10 + $0x10] sm:$0xff]  }
 0xa43   :  { %v1501_v54 = vpop.xlane.xlu0 %1500 }
 0xa44   :  { %v1509_v55 = vsub.f32 %v1488_v43, %v1505_v52  ;;  %v1506_v56 = vmul.f32 0.03125, %v1501_v54  ;;  %v1515_v57 = vsel %vm77_vm0, %v1511_v53, 0.0  ;;  %v1512_v58 = vmul.f32 %v1508_v31, %v1508_v31  ;;  %v1896_v43 = vld [vmem:[%s2929_s9] ss:$0 sm:$0xff] }
 0xa45   :  { %1516 = vadd.xlane.f32.xlu1 %v1515_v57  ;;  %v1901_v54 = vld [vmem:[%s2930_s11] ss:$0 sm:$0xff] }
 0xa46   :  { %v1510_v1 = vsub.f32 %v1489_v46, %v1506_v56  ;;  %v1518_v2 = vsel %vm77_vm0, %v1512_v58, 0.0  ;;  %v1513_v3 = vmul.f32 %v1509_v55, %v1509_v55 }
 0xa47   :  { %1519 = vadd.xlane.f32.xlu0 %v1518_v2 }
 0xa48   :  { %v1521_v4 = vsel %vm77_vm0, %v1513_v3, 0.0  ;;  %v1514_v5 = vmul.f32 %v1510_v1, %v1510_v1 }
 0xa49   :  { %1522 = vadd.xlane.f32.xlu1 %v1521_v4 }
 0xa4a   :  { %v1524_v19 = vsel %vm77_vm0, %v1514_v5, 0.0 }
 0xa4b   :  { %1525 = vadd.xlane.f32.xlu0 %v1524_v19 }
 0xad2   :  { %v1517_v8 = vpop.xlane.xlu1 %1516 }
 0xad3   :  { %v1527_v9 = vmul.f32 0.03125, %v1517_v8 }
 0xad4   :  { %v1520_v10 = vpop.xlane.xlu0 %1519 }
 0xad5   :  { %v1531_v11 = vadd.f32 1e-05, %v1527_v9  ;;  %v1528_v12 = vmul.f32 0.03125, %v1520_v10 }
 0xad6   :  { %v1523_v13 = vpop.xlane.xlu1 %1522 }
 0xad7   :  { %2423 = vrsqrt.f32 %v1531_v11  ;;  %v1532_v14 = vadd.f32 1e-05, %v1528_v12  ;;  %v1529_v15 = vmul.f32 0.03125, %v1523_v13 }
 0xad8   :  { %v1526_v16 = vpop.xlane.xlu0 %1525 }
 0xad9   :  { %2425 = vrsqrt.f32 %v1532_v14  ;;  %v1533_v20 = vadd.f32 1e-05, %v1529_v15  ;;  %v1530_v21 = vmul.f32 0.03125, %v1526_v16 }
 0xadb   :  { %2427 = vrsqrt.f32 %v1533_v20  ;;  %v1534_v22 = vadd.f32 1e-05, %v1530_v21 }
 0xadd   :  { %2429 = vrsqrt.f32 %v1534_v22 }
 0xae1   :  { %v2424_v24 = vpop.eup %2423 }
 0xae2   :  { %v1539_v60 = vmul.f32 %v2424_v24, %v1507_v50 }
 0xae3   :  { %v2426_v61 = vpop.eup %2425 }
 0xae4   :  { %v1540_v25 = vmul.f32 %v2426_v61, %v1508_v31  ;;  %v1550_v26 = vmul.f32 %v1894_v59, %v1539_v60 }
 0xae5   :  { %v2428_v32 = vpop.eup %2427 }
 0xae6   :  { %v1541_v34 = vmul.f32 %v2428_v32, %v1509_v55  ;;  %v1551_v28 = vmul.f32 %v1894_v59, %v1540_v25  ;;  %v1561_v35 = vadd.f32 %v1895_v27, %v1550_v26 }
 0xae7   :  { %v2430_v40 = vpop.eup %2429 }
 0xae8   :  { %v1552_v39 = vmul.f32 %v1894_v59, %v1541_v34  ;;  %v1542_v33 = vmul.f32 %v2430_v40, %v1510_v1  ;;  %v1562_v62 = vadd.f32 %v1895_v27, %v1551_v28 }
 0xaea   :  { %v1553_v63 = vmul.f32 %v1894_v59, %v1542_v33  ;;  %v1565_v0 = vpack.c.bf16 %v1562_v62, %v1561_v35  ;;  %v1563_v36 = vadd.f32 %v1895_v27, %v1552_v39 }
 0xaec   :  { %v1564_v37 = vadd.f32 %v1895_v27, %v1553_v63  ;;  %2148 = vmatprep.mubr.msk.bf16.mxu0 %vm77_vm0, %v1565_v0 }
 0xaee   :  { %v1566_v38 = vpack.c.bf16 %v1564_v37, %v1563_v36 }
 0xaf0   :  { %2149 = vmatmul.mubr.msk.bf16.vlgmr.msra.gmra.mrb[16].mxu0 %vm77_vm0, %v1566_v38 }
 0xaf1   :  { %2153 = vmatpush3.bf16.msra.mxu0 %v2355_v7 }
 0xaf2   :  { %2154 = vmatprep.subr.bf16.mxu0 %v2356_v41 }
 0xaf5   :  { %2155 = vmatpush3.bf16.msra.mxu0 %v2356_v41 }
 0xaf6   :  { %2156 = vmatprep.subr.bf16.mxu0 %v2357_v42 }
 0xaf9   :  { %2157 = vmatpush3.bf16.msra.mxu0 %v2357_v42 }
 0xafa   :  { %2158 = vmatprep.subr.bf16.mxu0 %v2358_v23 }
 0xafd   :  { %2159 = vmatpush3.bf16.msra.mxu0 %v2358_v23 }
 0xbc3   :  { %v2150_v44 = vpop.f32.mrb[16].mxu0 }
 0xbc4   :  { %v1639_v45 = vadd.f32 %v2150_v44, %v1896_v43  ;;  %v1630_v46 = vpop.f32.mrb[17].mxu0  ;;  %v1908_v44 = vld [vmem:[%s2931_s12] ss:$0 sm:$0xff] }
 0xbc5   :  { %v1631_v47 = vadd.f32 %v1896_v43, %v1630_v46  ;;  %v2151_v51 = vpop.f32.mrb[18].mxu0 }
 0xbc6   :  { %v1642_v48 = vadd.f32 %v2151_v51, %v1896_v43  ;;  %v1633_v17 = vpop.f32.mrb[19].mxu0  ;;  %v1647_v50 = vmax.f32 %v1639_v45, 0.0 }
 0xbc7   :  { %v1634_v49 = vadd.f32 %v1896_v43, %v1633_v17  ;;  %v1645_v30 = vmax.f32 %v1631_v47, 0.0  ;;  %v1909_v47 = vld [vmem:[%s2932_s13] ss:$0 sm:$0xff] }
 0xbc8   :  { %v1648_v29 = vmax.f32 %v1642_v48, 0.0 }
 0xbc9   :  { %v1646_v31 = vmax.f32 %v1634_v49, 0.0 }
 0xbca   :  { %v1650_v52 = vpack.c.bf16 %v1648_v29, %v1647_v50 }
 0xbcb   :  { %v1649_v53 = vpack.c.bf16 %v1646_v31, %v1645_v30 }
 0xbcd   :  { %2160 = vmatprep.mubr.msk.bf16.mxu0 %vm1690_vm4, %v1649_v53 }
 0xbce   :  { %2161 = vmatmul.mubr.msk.bf16.vlgmr.msra.gmra.mrb[20].mxu0 %vm1690_vm4, %v1650_v52 }
 0xca1   :  { %v2162_v55 = vpop.f32.mrb[20].mxu0 }
 0xca2   :  { %v1731_v56 = vpop.f32.mrb[21].mxu0  ;;  %v1740_v57 = vadd.f32 %v2162_v55, %v1901_v54 }
 0xca3   :  { %v1732_v58 = vadd.f32 %v1901_v54, %v1731_v56  ;;  %v2163_v1 = vpop.f32.mrb[22].mxu0 }
 0xca4   :  { %v1734_v2 = vpop.f32.mrb[23].mxu0  ;;  %v1743_v3 = vadd.f32 %v2163_v1, %v1901_v54  ;;  %v1748_v18 = vadd.f32 %v1740_v57, %v1563_v36 }
 0xca5   :  { %v1735_v4 = vadd.f32 %v1901_v54, %v1734_v2  ;;  %v1746_v5 = vadd.f32 %v1732_v58, %v1561_v35 }
 0xca6   :  { %v1749_v8 = vadd.f32 %v1743_v3, %v1564_v37  ;;  %v1756_v9 = vsel %vm77_vm0, %v1748_v18, 0.0 }
 0xca7   :  { %v1750_v19 = vsel %vm77_vm0, %v1746_v5, 0.0  ;;  %v1747_v6 = vadd.f32 %v1735_v4, %v1562_v62 }
 0xca8   :  { %1751 = vadd.xlane.f32.xlu1 %v1750_v19  ;;  %v1759_v10 = vsel %vm77_vm0, %v1749_v8, 0.0 }
 0xca9   :  { %v1753_v7 = vsel %vm77_vm0, %v1747_v6, 0.0 }
 0xcaa   :  { %1754 = vadd.xlane.f32.xlu0 %v1753_v7 }
 0xcac   :  { %1757 = vadd.xlane.f32.xlu1 %v1756_v9 }
 0xcae   :  { %1760 = vadd.xlane.f32.xlu0 %v1759_v10 }
 0xd35   :  { %v1752_v11 = vpop.xlane.xlu1 %1751 }
 0xd36   :  { %v1762_v12 = vmul.f32 0.03125, %v1752_v11 }
 0xd37   :  { %v1755_v13 = vpop.xlane.xlu0 %1754 }
 0xd38   :  { %v1766_v14 = vsub.f32 %v1746_v5, %v1762_v12  ;;  %v1763_v15 = vmul.f32 0.03125, %v1755_v13 }
 0xd39   :  { %v1758_v16 = vpop.xlane.xlu1 %1757 }
 0xd3a   :  { %v1767_v20 = vsub.f32 %v1747_v6, %v1763_v15  ;;  %v1764_v21 = vmul.f32 0.03125, %v1758_v16  ;;  %v1770_v22 = vmul.f32 %v1766_v14, %v1766_v14 }
 0xd3b   :  { %v1761_v24 = vpop.xlane.xlu0 %1760 }
 0xd3c   :  { %v1768_v59 = vsub.f32 %v1748_v18, %v1764_v21  ;;  %v1765_v60 = vmul.f32 0.03125, %v1761_v24  ;;  %v1774_v61 = vsel %vm77_vm0, %v1770_v22, 0.0  ;;  %v1771_v25 = vmul.f32 %v1767_v20, %v1767_v20 }
 0xd3d   :  { %1775 = vadd.xlane.f32.xlu1 %v1774_v61 }
 0xd3e   :  { %v1769_v26 = vsub.f32 %v1749_v8, %v1765_v60  ;;  %v1777_v32 = vsel %vm77_vm0, %v1771_v25, 0.0  ;;  %v1772_v27 = vmul.f32 %v1768_v59, %v1768_v59 }
 0xd3f   :  { %1778 = vadd.xlane.f32.xlu0 %v1777_v32 }
 0xd40   :  { %v1780_v34 = vsel %vm77_vm0, %v1772_v27, 0.0  ;;  %v1773_v28 = vmul.f32 %v1769_v26, %v1769_v26 }
 0xd41   :  { %1781 = vadd.xlane.f32.xlu1 %v1780_v34 }
 0xd42   :  { %v1783_v40 = vsel %vm77_vm0, %v1773_v28, 0.0 }
 0xd43   :  { %1784 = vadd.xlane.f32.xlu0 %v1783_v40 }
 0xdca   :  { %v1776_v39 = vpop.xlane.xlu1 %1775 }
 0xdcb   :  { %v1786_v33 = vmul.f32 0.03125, %v1776_v39 }
 0xdcc   :  { %v1779_v35 = vpop.xlane.xlu0 %1778 }
 0xdcd   :  { %v1790_v62 = vadd.f32 1e-05, %v1786_v33  ;;  %v1787_v63 = vmul.f32 0.03125, %v1779_v35 }
 0xdce   :  { %v1782_v0 = vpop.xlane.xlu1 %1781 }
 0xdcf   :  { %2431 = vrsqrt.f32 %v1790_v62  ;;  %v1791_v36 = vadd.f32 1e-05, %v1787_v63  ;;  %v1788_v37 = vmul.f32 0.03125, %v1782_v0 }
 0xdd0   :  { %v1785_v38 = vpop.xlane.xlu0 %1784 }
 0xdd1   :  { %2433 = vrsqrt.f32 %v1791_v36  ;;  %v1792_v41 = vadd.f32 1e-05, %v1788_v37  ;;  %v1789_v42 = vmul.f32 0.03125, %v1785_v38 }
 0xdd3   :  { %2435 = vrsqrt.f32 %v1792_v41  ;;  %v1793_v23 = vadd.f32 1e-05, %v1789_v42 }
 0xdd5   :  { %2437 = vrsqrt.f32 %v1793_v23 }
 0xdd9   :  { %v2432_v43 = vpop.eup %2431 }
 0xdda   :  { %v1798_v45 = vmul.f32 %v2432_v43, %v1766_v14 }
 0xddb   :  { %v2434_v46 = vpop.eup %2433 }
 0xddc   :  { %v1809_v51 = vmul.f32 %v1908_v44, %v1798_v45  ;;  %v1799_v48 = vmul.f32 %v2434_v46, %v1767_v20 }
 0xddd   :  { %v2436_v17 = vpop.eup %2435 }
 0xdde   :  { %v1820_v49 = vadd.f32 %v1909_v47, %v1809_v51  ;;  %v1810_v50 = vmul.f32 %v1908_v44, %v1799_v48  ;;  %v1800_v29 = vmul.f32 %v2436_v17, %v1768_v59 }
 0xddf   :  { %v2438_v30 = vpop.eup %2437 }
 0xde0   :  { %1824 = vst.msk [vmem:[%s2933_s14] sm:$0xff] %vm77_vm0, %v1820_v49  ;;  %v1821_v31 = vadd.f32 %v1909_v47, %v1810_v50  ;;  %v1811_v52 = vmul.f32 %v1908_v44, %v1800_v29  ;;  %v1801_v53 = vmul.f32 %v2438_v30, %v1769_v26 }
 0xde2   :  { %1825 = vst.msk [vmem:[%s2933_s14 + $0x8] sm:$0xff] %vm77_vm0, %v1821_v31  ;;  %v1822_v54 = vadd.f32 %v1909_v47, %v1811_v52  ;;  %v1812_v55 = vmul.f32 %v1908_v44, %v1801_v53 }
 0xde4   :  { %1826 = vst.msk [vmem:[%s2933_s14 + $0x10] sm:$0xff] %vm77_vm0, %v1822_v54  ;;  %v1823_v56 = vadd.f32 %v1909_v47, %v1812_v55 }
 0xde6   :  { %1827 = vst.msk [vmem:[%s2933_s14 + $0x18] sm:$0xff] %vm77_vm0, %v1823_v56 }

// kernel: sformer_forward.11
= control target key start
LH: loop header
LB: loop body
LE: loop exit
PB: predicated region body
PF: predicated region fallthrough
CT: control target
= control target key end

     0   :  { %vm29_vm0 = vcmask 261120   ;;  %vm269_vm1 = vcmask 31744   ;;  %s492_s0 = inlined_call_operand.vmem [shape: f32[64,32], index: 0, kind: input, shape index: {}]   ;;  %s493_s3 = inlined_call_operand.vmem [shape: bf16[32,4], index: 3, kind: input, shape index: {}]   ;;  %s494_s1 = inlined_call_operand.vmem [shape: f32[1,32], index: 1, kind: input, shape index: {}]   ;;  %s495_s2 = inlined_call_operand.vmem [shape: f32[1,32], index: 2, kind: input, shape index: {}]   ;;  %s496_s4 = inlined_call_operand.vmem [shape: f32[1,4], index: 4, kind: input, shape index: {}]   ;;  %s497_s5 = inlined_call_operand.vmem [shape: f32[64,4], index: 5, kind: output, shape index: {}]  }
   0x1   :  { %v21_v0 = vld [vmem:[%s492_s0] sm:$0xff]  ;;  %v22_v2 = vld [vmem:[%s492_s0 + $0x8] sm:$0xff]  ;;  %v23_v8 = vld [vmem:[%s492_s0 + $0x10] sm:$0xff] }
   0x2   :  { %v25_v1 = vld [vmem:[%s492_s0 + $0x20] sm:$0xff]  ;;  %v30_v3 = vsel %vm29_vm0, %v21_v0, 0.0  ;;  %v26_v5 = vld [vmem:[%s492_s0 + $0x28] sm:$0xff]  ;;  %v33_v6 = vsel %vm29_vm0, %v22_v2, 0.0  ;;  %v24_v9 = vld [vmem:[%s492_s0 + $0x18] sm:$0xff]  ;;  %v36_v10 = vsel %vm29_vm0, %v23_v8, 0.0 }
   0x3   :  { %v42_v4 = vsel %vm29_vm0, %v25_v1, 0.0  ;;  %31 = vadd.xlane.f32.xlu0 %v30_v3  ;;  %v45_v7 = vsel %vm29_vm0, %v26_v5, 0.0  ;;  %v39_v11 = vsel %vm29_vm0, %v24_v9, 0.0  ;;  %v27_v12 = vld [vmem:[%s492_s0 + $0x30] sm:$0xff]  ;;  %v28_v13 = vld [vmem:[%s492_s0 + $0x38] sm:$0xff]  ;;  %v313_v56 = vld [vmem:[%s493_s3] sm:$0xff]  }
   0x4   :  { %43 = vadd.xlane.f32.xlu1 %v42_v4  ;;  %v48_v14 = vsel %vm29_vm0, %v27_v12, 0.0  ;;  %v51_v15 = vsel %vm29_vm0, %v28_v13, 0.0  ;;  %297 = vmatprep.subr.bf16.mxu0 %v313_v56  ;;  %v314_v57 = vld [vmem:[%s493_s3 + $0x8] sm:$0xff]  }
   0x5   :  { %309 = vmatprep.subr.bf16.mxu1 %v313_v56  ;;  %298 = vmatpush3.bf16.msra.mxu0 %v313_v56 }
   0x6   :  { %311 = vmatpush3.bf16.msra.mxu1 %v313_v56  ;;  %299 = vmatprep.subr.bf16.mxu0 %v314_v57 }
   0x7   :  { %34 = vadd.xlane.f32.xlu0 %v33_v6  ;;  %310 = vmatprep.subr.bf16.mxu1 %v314_v57 }
   0x8   :  { %46 = vadd.xlane.f32.xlu1 %v45_v7 }
   0x9   :  { %300 = vmatpush3.bf16.msra.mxu0 %v314_v57 }
   0xa   :  { %312 = vmatpush3.bf16.msra.mxu1 %v314_v57 }
   0xb   :  { %37 = vadd.xlane.f32.xlu0 %v36_v10 }
   0xc   :  { %40 = vadd.xlane.f32.xlu1 %v39_v11 }
   0xf   :  { %49 = vadd.xlane.f32.xlu0 %v48_v14 }
  0x10   :  { %52 = vadd.xlane.f32.xlu1 %v51_v15 }
  0x90   :  { %v32_v16 = vpop.xlane.xlu0 %31 }
  0x91   :  { %v44_v17 = vpop.xlane.xlu1 %43  ;;  %v55_v18 = vmul.f32 0.03125, %v32_v16 }
  0x92   :  { %v59_v19 = vmul.f32 0.03125, %v44_v17 }
  0x93   :  { %v393_v20 = vsub.f32 %v21_v0, %v55_v18 }
  0x94   :  { %v395_v21 = vsub.f32 %v25_v1, %v59_v19  ;;  %v35_v22 = vpop.xlane.xlu0 %34  ;;  %v282_v19 = vld [vmem:[%s494_s1] ss:$0 sm:$0xff] }
  0x95   :  { %v47_v23 = vpop.xlane.xlu1 %46  ;;  %v56_v24 = vmul.f32 0.03125, %v35_v22  ;;  %v71_v26 = vmul.f32 %v393_v20, %v393_v20 }
  0x96   :  { %v60_v25 = vmul.f32 0.03125, %v47_v23  ;;  %v75_v27 = vmul.f32 %v395_v21, %v395_v21 }
  0x97   :  { %v401_v28 = vsub.f32 %v22_v2, %v56_v24  ;;  %v79_v30 = vsel %vm29_vm0, %v71_v26, 0.0 }
  0x98   :  { %v403_v29 = vsub.f32 %v26_v5, %v60_v25  ;;  %80 = vadd.xlane.f32.xlu0 %v79_v30  ;;  %v38_v31 = vpop.xlane.xlu0 %37  ;;  %v91_v33 = vsel %vm29_vm0, %v75_v27, 0.0  ;;  %v283_v27 = vld [vmem:[%s495_s2] ss:$0 sm:$0xff] }
  0x99   :  { %v41_v32 = vpop.xlane.xlu1 %40  ;;  %v57_v34 = vmul.f32 0.03125, %v38_v31  ;;  %v72_v36 = vmul.f32 %v401_v28, %v401_v28 }
  0x9a   :  { %v58_v35 = vmul.f32 0.03125, %v41_v32  ;;  %v76_v37 = vmul.f32 %v403_v29, %v403_v29 }
  0x9b   :  { %v411_v38 = vsub.f32 %v23_v8, %v57_v34  ;;  %v82_v40 = vsel %vm29_vm0, %v72_v36, 0.0 }
  0x9c   :  { %v413_v39 = vsub.f32 %v24_v9, %v58_v35  ;;  %92 = vadd.xlane.f32.xlu0 %v91_v33  ;;  %83 = vadd.xlane.f32.xlu1 %v82_v40  ;;  %v50_v41 = vpop.xlane.xlu0 %49  ;;  %v94_v43 = vsel %vm29_vm0, %v76_v37, 0.0 }
  0x9d   :  { %v53_v42 = vpop.xlane.xlu1 %52  ;;  %v61_v44 = vmul.f32 0.03125, %v50_v41  ;;  %v73_v46 = vmul.f32 %v411_v38, %v411_v38 }
  0x9e   :  { %v62_v45 = vmul.f32 0.03125, %v53_v42  ;;  %v74_v47 = vmul.f32 %v413_v39, %v413_v39 }
  0x9f   :  { %v421_v48 = vsub.f32 %v27_v12, %v61_v44  ;;  %v85_v50 = vsel %vm29_vm0, %v73_v46, 0.0 }
  0xa0   :  { %v423_v49 = vsub.f32 %v28_v13, %v62_v45  ;;  %95 = vadd.xlane.f32.xlu1 %v94_v43  ;;  %86 = vadd.xlane.f32.xlu0 %v85_v50  ;;  %v88_v51 = vsel %vm29_vm0, %v74_v47, 0.0 }
  0xa1   :  { %v77_v52 = vmul.f32 %v421_v48, %v421_v48 }
  0xa2   :  { %v78_v53 = vmul.f32 %v423_v49, %v423_v49 }
  0xa3   :  { %v97_v54 = vsel %vm29_vm0, %v77_v52, 0.0 }
  0xa4   :  { %89 = vadd.xlane.f32.xlu1 %v88_v51  ;;  %98 = vadd.xlane.f32.xlu0 %v97_v54  ;;  %v100_v55 = vsel %vm29_vm0, %v78_v53, 0.0 }
  0xa8   :  { %101 = vadd.xlane.f32.xlu1 %v100_v55 }
 0x125   :  { %v81_v58 = vpop.xlane.xlu0 %80 }
 0x126   :  { %v103_v59 = vmul.f32 0.03125, %v81_v58 }
 0x128   :  { %v111_v60 = vadd.f32 1e-05, %v103_v59 }
 0x129   :  { %v84_v61 = vpop.xlane.xlu1 %83  ;;  %v93_v62 = vpop.xlane.xlu0 %92 }
 0x12a   :  { %315 = vrsqrt.f32 %v111_v60  ;;  %v104_v63 = vmul.f32 0.03125, %v84_v61  ;;  %v107_v0 = vmul.f32 0.03125, %v93_v62 }
 0x12c   :  { %v112_v1 = vadd.f32 1e-05, %v104_v63  ;;  %v115_v2 = vadd.f32 1e-05, %v107_v0 }
 0x12d   :  { %v96_v3 = vpop.xlane.xlu1 %95  ;;  %v87_v4 = vpop.xlane.xlu0 %86 }
 0x12e   :  { %317 = vrsqrt.f32 %v112_v1  ;;  %v108_v5 = vmul.f32 0.03125, %v96_v3  ;;  %v105_v6 = vmul.f32 0.03125, %v87_v4 }
 0x12f   :  { %319 = vrsqrt.f32 %v115_v2 }
 0x130   :  { %v116_v7 = vadd.f32 1e-05, %v108_v5  ;;  %v113_v8 = vadd.f32 1e-05, %v105_v6 }
 0x131   :  { %v90_v9 = vpop.xlane.xlu1 %89  ;;  %v99_v10 = vpop.xlane.xlu0 %98 }
 0x132   :  { %321 = vrsqrt.f32 %v116_v7  ;;  %v106_v11 = vmul.f32 0.03125, %v90_v9  ;;  %v109_v12 = vmul.f32 0.03125, %v99_v10 }
 0x133   :  { %323 = vrsqrt.f32 %v113_v8 }
 0x134   :  { %v316_v13 = vpop.eup %315  ;;  %v114_v14 = vadd.f32 1e-05, %v106_v11  ;;  %v117_v15 = vadd.f32 1e-05, %v109_v12 }
 0x135   :  { %v102_v16 = vpop.xlane.xlu1 %101  ;;  %v127_v17 = vmul.f32 %v316_v13, %v393_v20 }
 0x136   :  { %325 = vrsqrt.f32 %v114_v14  ;;  %v110_v18 = vmul.f32 0.03125, %v102_v16 }
 0x137   :  { %327 = vrsqrt.f32 %v117_v15  ;;  %v142_v26 = vmul.f32 %v282_v19, %v127_v17 }
 0x138   :  { %v318_v22 = vpop.eup %317  ;;  %v118_v23 = vadd.f32 1e-05, %v110_v18 }
 0x139   :  { %v320_v24 = vpop.eup %319  ;;  %v128_v25 = vmul.f32 %v318_v22, %v401_v28  ;;  %v157_v33 = vadd.f32 %v283_v27, %v142_v26 }
 0x13a   :  { %329 = vrsqrt.f32 %v118_v23  ;;  %v131_v20 = vmul.f32 %v320_v24, %v395_v21 }
 0x13b   :  { %v143_v30 = vmul.f32 %v282_v19, %v128_v25 }
 0x13c   :  { %v322_v31 = vpop.eup %321  ;;  %v146_v36 = vmul.f32 %v282_v19, %v131_v20 }
 0x13d   :  { %v324_v32 = vpop.eup %323  ;;  %v158_v34 = vadd.f32 %v283_v27, %v143_v30  ;;  %v132_v35 = vmul.f32 %v322_v31, %v403_v29 }
 0x13e   :  { %v129_v37 = vmul.f32 %v324_v32, %v411_v38  ;;  %v161_v44 = vadd.f32 %v283_v27, %v146_v36 }
 0x13f   :  { %v165_v40 = vpack.c.bf16 %v158_v34, %v157_v33  ;;  %v147_v28 = vmul.f32 %v282_v19, %v132_v35 }
 0x140   :  { %v326_v41 = vpop.eup %325  ;;  %v144_v45 = vmul.f32 %v282_v19, %v129_v37 }
 0x141   :  { %v328_v42 = vpop.eup %327  ;;  %v130_v43 = vmul.f32 %v326_v41, %v413_v39  ;;  %301 = vmatprep.mubr.msk.bf16.mxu0 %vm29_vm0, %v165_v40  ;;  %v162_v21 = vadd.f32 %v283_v27, %v147_v28 }
 0x142   :  { %v133_v46 = vmul.f32 %v328_v42, %v421_v48  ;;  %v159_v38 = vadd.f32 %v283_v27, %v144_v45  ;;  %v284_v48 = vld [vmem:[%s496_s4] ss:$0 sm:$0xff] }
 0x143   :  { %v167_v47 = vpack.c.bf16 %v162_v21, %v161_v44  ;;  %v145_v50 = vmul.f32 %v282_v19, %v130_v43 }
 0x144   :  { %v330_v51 = vpop.eup %329  ;;  %v148_v53 = vmul.f32 %v282_v19, %v133_v46 }
 0x145   :  { %v134_v29 = vmul.f32 %v330_v51, %v423_v49  ;;  %305 = vmatprep.mubr.msk.bf16.mxu1 %vm29_vm0, %v167_v47  ;;  %v160_v52 = vadd.f32 %v283_v27, %v145_v50 }
 0x146   :  { %v163_v39 = vadd.f32 %v283_v27, %v148_v53 }
 0x147   :  { %v166_v54 = vpack.c.bf16 %v160_v52, %v159_v38  ;;  %v149_v55 = vmul.f32 %v282_v19, %v134_v29 }
 0x149   :  { %302 = vmatmul.mubr.msk.bf16.vlgmr.msra.gmra.mrb[0].mxu0 %vm29_vm0, %v166_v54  ;;  %v164_v56 = vadd.f32 %v283_v27, %v149_v55 }
 0x14b   :  { %v168_v57 = vpack.c.bf16 %v164_v56, %v163_v39 }
 0x14d   :  { %306 = vmatmul.mubr.msk.bf16.vlgmr.msra.gmra.mrb[0].mxu1 %vm29_vm0, %v168_v57 }
 0x21c   :  { %v303_v58 = vpop.f32.mrb[0].mxu0 }
 0x21d   :  { %v247_v49 = vadd.f32 %v303_v58, %v284_v48  ;;  %v238_v59 = vpop.f32.mrb[1].mxu0 }
 0x21e   :  { %v239_v60 = vadd.f32 %v284_v48, %v238_v59  ;;  %v304_v61 = vpop.f32.mrb[2].mxu0 }
 0x21f   :  { %272 = vst.msk [vmem:[%s497_s5 + $0x10] sm:$0xff] %vm269_vm1, %v247_v49  ;;  %v250_v62 = vadd.f32 %v304_v61, %v284_v48  ;;  %v241_v63 = vpop.f32.mrb[3].mxu0 }
 0x220   :  { %270 = vst.msk [vmem:[%s497_s5] sm:$0xff] %vm269_vm1, %v239_v60  ;;  %v242_v0 = vadd.f32 %v284_v48, %v241_v63  ;;  %v307_v1 = vpop.f32.mrb[0].mxu1 }
 0x221   :  { %273 = vst.msk [vmem:[%s497_s5 + $0x18] sm:$0xff] %vm269_vm1, %v250_v62  ;;  %v263_v2 = vadd.f32 %v307_v1, %v284_v48  ;;  %v254_v3 = vpop.f32.mrb[1].mxu1 }
 0x222   :  { %271 = vst.msk [vmem:[%s497_s5 + $0x8] sm:$0xff] %vm269_vm1, %v242_v0  ;;  %v255_v4 = vadd.f32 %v284_v48, %v254_v3  ;;  %v308_v5 = vpop.f32.mrb[2].mxu1 }
 0x223   :  { %276 = vst.msk [vmem:[%s497_s5 + $0x30] sm:$0xff] %vm269_vm1, %v263_v2  ;;  %v266_v6 = vadd.f32 %v308_v5, %v284_v48  ;;  %v257_v7 = vpop.f32.mrb[3].mxu1 }
 0x224   :  { %274 = vst.msk [vmem:[%s497_s5 + $0x20] sm:$0xff] %vm269_vm1, %v255_v4  ;;  %v258_v8 = vadd.f32 %v284_v48, %v257_v7 }
 0x225   :  { %277 = vst.msk [vmem:[%s497_s5 + $0x38] sm:$0xff] %vm269_vm1, %v266_v6 }
 0x226   :  { %275 = vst.msk [vmem:[%s497_s5 + $0x28] sm:$0xff] %vm269_vm1, %v258_v8 }

// kernel: sformer_forward.10
= control target key start
LH: loop header
LB: loop body
LE: loop exit
PB: predicated region body
PF: predicated region fallthrough
CT: control target
= control target key end

     0   :  { %vm91_vm0 = vcmask 261120   ;;  %vm213_vm1 = vcmask 64512   ;;  %vm359_vm3 = vcmask 523264   ;;  %s3876_s28 = smov 64   ;;  %s3877_s17 = smov 88   ;;  %vm1031_vm4 = vcmask 1043456   ;;  %s4963_s2 = inlined_call_operand.vmem [shape: bf16[32,96], index: 2, kind: input, shape index: {}]   ;;  %s4964_s0 = inlined_call_operand.vmem [shape: f32[64,32], index: 0, kind: input, shape index: {}]   ;;  %s4965_s3 = inlined_call_operand.vmem [shape: f32[1,96], index: 3, kind: input, shape index: {}]   ;;  %s4966_s1 = inlined_call_operand.vmem [shape: f32[64,64], index: 1, kind: input, shape index: {}]   ;;  %s4967_s4 = inlined_call_operand.vmem [shape: bf16[32,32], index: 4, kind: input, shape index: {}]   ;;  %s4968_s5 = inlined_call_operand.vmem [shape: f32[1,32], index: 5, kind: input, shape index: {}]   ;;  %s4969_s8 = inlined_call_operand.vmem [shape: bf16[32,64], index: 8, kind: input, shape index: {}]   ;;  %s4970_s10 = inlined_call_operand.vmem [shape: bf16[64,32], index: 10, kind: input, shape index: {}]   ;;  %s4971_s6 = inlined_call_operand.vmem [shape: f32[1,32], index: 6, kind: input, shape index: {}]   ;;  %s4972_s7 = inlined_call_operand.vmem [shape: f32[1,32], index: 7, kind: input, shape index: {}]   ;;  %s4973_s9 = inlined_call_operand.vmem [shape: f32[1,64], index: 9, kind: input, shape index: {}]   ;;  %s4974_s11 = inlined_call_operand.vmem [shape: f32[1,32], index: 11, kind: input, shape index: {}]   ;;  %s4975_s12 = inlined_call_operand.vmem [shape: f32[1,32], index: 12, kind: input, shape index: {}]   ;;  %s4976_s13 = inlined_call_operand.vmem [shape: f32[1,32], index: 13, kind: input, shape index: {}]   ;;  %s4977_s14 = inlined_call_operand.vmem [shape: f32[64,32], index: 14, kind: output, shape index: {}]  }
   0x1   :  { %v3699_v0 = vld [vmem:[%s4963_s2] sm:$0xff]   ;;  %v3700_v1 = vld [vmem:[%s4963_s2 + $0x8] sm:$0xff]   ;;  %v50_v4 = vld [vmem:[%s4964_s0 + $0x10] sm:$0xff]  ;;  %s3880_s18 = smov 112   ;;  %s3881_s19 = smov 56  }
   0x2   :  { %3036 = vmatprep.subr.bf16.mxu0 %v3699_v0  ;;  %v48_v2 = vld [vmem:[%s4964_s0] sm:$0xff]  ;;  %v49_v3 = vld [vmem:[%s4964_s0 + $0x8] sm:$0xff]  ;;  %v51_v7 = vld [vmem:[%s4964_s0 + $0x18] sm:$0xff]  ;;  %v3986_v9 = vmul.f32 5.656854, %v50_v4  ;;  %s3882_s20 = smov 72  }
   0x3   :  { %3037 = vmatpush3.bf16.msra.mxu0 %v3699_v0  ;;  %v3976_v5 = vmul.f32 5.656854, %v48_v2  ;;  %v3978_v6 = vmul.f32 5.656854, %v49_v3  ;;  %v52_v8 = vld [vmem:[%s4964_s0 + $0x20] sm:$0xff]  ;;  %v53_v11 = vld [vmem:[%s4964_s0 + $0x28] sm:$0xff]  ;;  %vm4040_vm2 = vmpackc.low %vm213_vm1, %vm213_vm1 }
   0x4   :  { %3038 = vmatprep.subr.bf16.mxu0 %v3700_v1  ;;  %v3988_v10 = vmul.f32 5.656854, %v51_v7  ;;  %v3995_v13 = vmul.f32 5.656854, %v52_v8  ;;  %v3997_v14 = vmul.f32 5.656854, %v53_v11 }
   0x5   :  { %4984 = vst [vmem:[#allocation2_spill] sm:$0xff] %v3978_v6  ;;  %v64_v12 = vpack.c.bf16 %v3978_v6, %v3976_v5  ;;  %v54_v17 = vld [vmem:[%s4964_s0 + $0x30] sm:$0xff]  ;;  %v55_v18 = vld [vmem:[%s4964_s0 + $0x38] sm:$0xff]  ;;  %v2728_v22 = vld [vmem:[%s4965_s3] ss:$0 sm:$0xff]  ;;  %s3875_s0 = smov 96  }
   0x6   :  { %4985 = vst [vmem:[#allocation3_spill] sm:$0xff] %v3988_v10  ;;  %4986 = vst [vmem:[#allocation4_spill] sm:$0xff] %v3995_v13  ;;  %v65_v15 = vpack.c.bf16 %v3988_v10, %v3986_v9  ;;  %v66_v16 = vpack.c.bf16 %v3997_v14, %v3995_v13  ;;  %v4011_v19 = vmul.f32 5.656854, %v54_v17  ;;  %v4013_v20 = vmul.f32 5.656854, %v55_v18 }
   0x7   :  { %4987 = vst [vmem:[#allocation5_spill] sm:$0xff] %v3997_v14  ;;  %3039 = vmatpush3.bf16.msra.mxu0 %v3700_v1  ;;  %3040 = vmatprep.mubr.msk.bf16.mxu0 %vm91_vm0, %v64_v12  ;;  %v4091_v4 = vld [vmem:[%s4966_s1 + $0x8] sm:$0xff]  ;;  %v4096_v7 = vld [vmem:[%s4966_s1] sm:$0xff]  ;;  %s3879_s3 = smov 80   ;;  %s3883_s21 = smov 104  }
   0x8   :  { %4988 = vst [vmem:[#allocation6_spill] sm:$0xff] %v4011_v19  ;;  %4989 = vst [vmem:[#allocation7_spill] sm:$0xff] %v4013_v20  ;;  %v67_v21 = vpack.c.bf16 %v4013_v20, %v4011_v19  ;;  %s3884_s22 = smov 48  }
   0xa   :  { %3041 = vmatmul.mubr.msk.bf16.vlgmr.msra.gmra.mrb[0].mxu0 %vm91_vm0, %v65_v15 }
   0xb   :  { %3044 = vmatprep.mubr.msk.bf16.mxu0 %vm91_vm0, %v66_v16  ;;  %v4103_v16 = vld [vmem:[%s4966_s1 + $0x18] sm:$0xff] }
  0x12   :  { %3045 = vmatmul.mubr.msk.bf16.gmra.mrb[4].mxu0 %vm91_vm0, %v67_v21 }
  0xdd   :  { %v3042_v23 = vpop.f32.mrb[0].mxu0 }
  0xde   :  { %v138_v24 = vpop.f32.mrb[1].mxu0  ;;  %v147_v27 = vadd.f32 %v3042_v23, %v2728_v22 }
  0xdf   :  { %v139_v25 = vadd.f32 %v2728_v22, %v138_v24  ;;  %v3043_v26 = vpop.f32.mrb[2].mxu0  ;;  %v4113_v24 = vld [vmem:[%s4966_s1 + $0x10] sm:$0xff] }
  0xe0   :  { %v150_v28 = vadd.f32 %v3043_v26, %v2728_v22  ;;  %v141_v29 = vpop.f32.mrb[3].mxu0  ;;  %v4062_v62 = vmul.f32 0.35355338, %v147_v27 }
  0xe1   :  { %v142_v30 = vadd.f32 %v2728_v22, %v141_v29  ;;  %v4022_v31 = vmul.f32 0.35355338, %v139_v25 }
  0xe2   :  { %v4024_v32 = vpack.i.bf16 %v150_v28, %v147_v27  ;;  %v4068_v63 = vmul.f32 0.35355338, %v150_v28  ;;  %v4121_v28 = vld [vmem:[%s4966_s1 + $0x28] sm:$0xff] }
  0xe3   :  { %3064 = vmatprep.mubr.msk.f32.mxu1 %vm213_vm1, %v4022_v31  ;;  %v4028_v33 = vpack.i.bf16 %v142_v30, %v139_v25  ;;  %v4060_v61 = vmul.f32 0.35355338, %v142_v30 }
  0xe5   :  { %3540 = vrot.lane.b32.xlu0 %v4028_v33, %s3875_s0  ;;  %v3046_v34 = vpop.f32.mrb[4].mxu0 }
  0xe6   :  { %v163_v35 = vadd.f32 %v3046_v34, %v2728_v22  ;;  %v154_v36 = vpop.f32.mrb[5].mxu0 }
  0xe7   :  { %v155_v37 = vadd.f32 %v2728_v22, %v154_v36  ;;  %v3047_v38 = vpop.f32.mrb[6].mxu0  ;;  %v4128_v36 = vld [vmem:[%s4966_s1 + $0x38] sm:$0xff] }
  0xe8   :  { %v166_v39 = vadd.f32 %v3047_v38, %v2728_v22  ;;  %v157_v40 = vpop.f32.mrb[7].mxu0  ;;  %v4078_v2 = vmul.f32 0.35355338, %v163_v35 }
  0xe9   :  { %v158_v41 = vadd.f32 %v2728_v22, %v157_v40  ;;  %3545 = vrot.lane.b32.xlu0 %v4024_v32, %s3875_s0  ;;  %v4070_v0 = vmul.f32 0.35355338, %v155_v37 }
  0xea   :  { %v4032_v42 = vpack.i.bf16 %v166_v39, %v163_v35  ;;  %v4084_v3 = vmul.f32 0.35355338, %v166_v39 }
  0xeb   :  { %v4034_v43 = vpack.i.bf16 %v158_v41, %v155_v37  ;;  %v4076_v1 = vmul.f32 0.35355338, %v158_v41  ;;  %v4141_v41 = vld [vmem:[%s4966_s1 + $0x20] sm:$0xff] }
  0xed   :  { %3550 = vrot.lane.b32.xlu1 %v4034_v43, %s3875_s0 }
  0xf1   :  { %3555 = vrot.lane.b32.xlu1 %v4032_v42, %s3875_s0  ;;  %s3878_s0 = smov 120  }
 0x157   :  { %v3541_v44 = vpop.permute.xlu0 %3540 }
 0x158   :  { %v3543_v45 = vunpack.i.h.bf16 %v3541_v44  ;;  %v3542_v46 = vunpack.i.l.bf16 %v3541_v44 }
 0x15a   :  { %v3340_v48 = vpack.c.bf16 %v3543_v45, %v3542_v46  ;;  %v4149_v46 = vld [vmem:[%s4966_s1 + $0x30] sm:$0xff] }
 0x15b   :  { %v3546_v49 = vpop.permute.xlu0 %3545 }
 0x15c   :  { %v3548_v50 = vunpack.i.h.bf16 %v3546_v49  ;;  %v3547_v51 = vunpack.i.l.bf16 %v3546_v49  ;;  %3342 = vmatprep.subr.msk.bf16.mxu1 %vm4040_vm2, %v3340_v48 }
 0x15d   :  { %3345 = vmatpush3.bf16.xpose.msk.msra.mxu1 %vm4040_vm2, %v3340_v48 }
 0x15e   :  { %v3346_v52 = vpack.c.bf16 %v3548_v50, %v3547_v51 }
 0x15f   :  { %v3551_v53 = vpop.permute.xlu1 %3550 }
 0x160   :  { %v3553_v54 = vunpack.i.h.bf16 %v3551_v53  ;;  %v3552_v55 = vunpack.i.l.bf16 %v3551_v53  ;;  %3348 = vmatprep.subr.msk.bf16.mxu1 %vm4040_vm2, %v3346_v52 }
 0x162   :  { %v3352_v56 = vpack.c.bf16 %v3553_v54, %v3552_v55 }
 0x163   :  { %v3556_v57 = vpop.permute.xlu1 %3555 }
 0x164   :  { %v3558_v58 = vunpack.i.h.bf16 %v3556_v57  ;;  %v3557_v59 = vunpack.i.l.bf16 %v3556_v57 }
 0x165   :  { %3351 = vmatpush3.bf16.xpose.msk.msra.mxu1 %vm4040_vm2, %v3346_v52 }
 0x166   :  { %3354 = vmatprep.subr.msk.bf16.mxu1 %vm4040_vm2, %v3352_v56  ;;  %v3358_v60 = vpack.c.bf16 %v3558_v58, %v3557_v59 }
 0x16d   :  { %3357 = vmatpush3.bf16.xpose.msk.msra.mxu1 %vm4040_vm2, %v3352_v56 }
 0x16e   :  { %3360 = vmatprep.subr.msk.bf16.mxu1 %vm4040_vm2, %v3358_v60 }
 0x175   :  { %3363 = vmatpush3.bf16.xpose.msk.msra.mxu1 %vm4040_vm2, %v3358_v60 }
 0x17c   :  { %3065 = vmatmul.mubr.msk.f32.vlgmr.msra.gmra.mrb[0].mxu1 %vm213_vm1, %v4060_v61 }
 0x17d   :  { %3067 = vmatprep.mubr.msk.f32.mxu1 %vm213_vm1, %v4062_v62 }
 0x180   :  { %3068 = vmatmul.mubr.msk.f32.gmra.mrb[2].mxu1 %vm213_vm1, %v4068_v63 }
 0x181   :  { %3070 = vmatprep.mubr.msk.f32.mxu1 %vm213_vm1, %v4070_v0 }
 0x184   :  { %3071 = vmatmul.mubr.msk.f32.gmra.mrb[4].mxu1 %vm213_vm1, %v4076_v1 }
 0x185   :  { %3073 = vmatprep.mubr.msk.f32.mxu1 %vm213_vm1, %v4078_v2 }
 0x188   :  { %3074 = vmatmul.mubr.msk.f32.gmra.mrb[6].mxu1 %vm213_vm1, %v4084_v3 }
 0x24f   :  { %v3066_v8 = vpop.f32.mrb[0].mxu1 }
 0x250   :  { %v326_v11 = vadd.f32 %v3066_v8, %v4091_v4  ;;  %v320_v12 = vpop.f32.mrb[1].mxu1 }
 0x251   :  { %v321_v15 = vadd.f32 %v320_v12, %v4096_v7 }
 0x252   :  { %v363_v17 = vsel %vm359_vm3, %v326_v11, -inf }
 0x253   :  { %364 = vmax.xlane.f32.xlu1 %v363_v17  ;;  %v3069_v18 = vpop.f32.mrb[2].mxu1  ;;  %v360_v21 = vsel %vm359_vm3, %v321_v15, -inf }
 0x254   :  { %v4108_v22 = vadd.f32 %v3069_v18, %v4103_v16  ;;  %v330_v23 = vpop.f32.mrb[3].mxu1  ;;  %361 = vmax.xlane.f32.xlu0 %v360_v21 }
 0x255   :  { %v331_v26 = vadd.f32 %v330_v23, %v4113_v24 }
 0x256   :  { %v369_v25 = vsel %vm359_vm3, %v4108_v22, -inf }
 0x257   :  { %v3072_v27 = vpop.f32.mrb[4].mxu1  ;;  %v366_v35 = vsel %vm359_vm3, %v331_v26, -inf }
 0x258   :  { %v340_v29 = vpop.f32.mrb[5].mxu1  ;;  %370 = vmax.xlane.f32.xlu0 %v369_v25  ;;  %v346_v30 = vadd.f32 %v3072_v27, %v4121_v28 }
 0x259   :  { %v341_v44 = vadd.f32 %v340_v29, %v4141_v41 }
 0x25a   :  { %v375_v39 = vsel %vm359_vm3, %v346_v30, -inf }
 0x25b   :  { %v3075_v34 = vpop.f32.mrb[6].mxu1  ;;  %v372_v45 = vsel %vm359_vm3, %v341_v44, -inf }
 0x25c   :  { %v350_v37 = vpop.f32.mrb[7].mxu1  ;;  %367 = vmax.xlane.f32.xlu0 %v366_v35  ;;  %v4131_v38 = vadd.f32 %v3075_v34, %v4128_v36 }
 0x25d   :  { %v4152_v48 = vadd.f32 %v350_v37, %v4149_v46 }
 0x25e   :  { %v381_v40 = vsel %vm359_vm3, %v4131_v38, -inf }
 0x25f   :  { %v378_v49 = vsel %vm359_vm3, %v4152_v48, -inf }
 0x260   :  { %376 = vmax.xlane.f32.xlu0 %v375_v39 }
 0x264   :  { %3560 = vrot.lane.b32.xlu1 %v4028_v33, %s3876_s28  ;;  %382 = vmax.xlane.f32.xlu0 %v381_v40 }
 0x27a   :  { %3565 = vrot.lane.b32.xlu0 %v4024_v32, %s3876_s28 }
 0x288   :  { %373 = vmax.xlane.f32.xlu1 %v372_v45 }
 0x299   :  { %3570 = vrot.lane.b32.xlu1 %v4034_v43, %s3876_s28 }
 0x2bd   :  { %379 = vmax.xlane.f32.xlu1 %v378_v49 }
 0x2ce   :  { %3575 = vrot.lane.b32.xlu1 %v4032_v42, %s3876_s28 }
 0x2e0   :  { %v365_v50 = vpop.xlane.xlu1 %364 }
 0x2e1   :  { %v385_v51 = vsub.f32 %v326_v11, %v365_v50  ;;  %v362_v52 = vpop.xlane.xlu0 %361 }
 0x2e2   :  { %v384_v53 = vsub.f32 %v321_v15, %v362_v52 }
 0x2e3   :  { %v394_v54 = vmul.f32 1.442695, %v385_v51 }
 0x2e4   :  { %v392_v55 = vmul.f32 1.442695, %v384_v53  ;;  %v3561_v56 = vpop.permute.xlu1 %3560 }
 0x2e5   :  { %3707 = vpow2.f32 %v394_v54  ;;  %v3563_v57 = vunpack.i.h.bf16 %v3561_v56  ;;  %v3562_v58 = vunpack.i.l.bf16 %v3561_v56  ;;  %v371_v59 = vpop.xlane.xlu0 %370 }
 0x2e6   :  { %3709 = vpow2.f32 %v392_v55  ;;  %v387_v49 = vsub.f32 %v4108_v22, %v371_v59 }
 0x2e7   :  { %v3364_v60 = vpack.c.bf16 %v3563_v57, %v3562_v58 }
 0x2e8   :  { %v398_v51 = vmul.f32 1.442695, %v387_v49 }
 0x2e9   :  { %3365 = vmatprep.subr.bf16.mxu0 %v3364_v60  ;;  %v368_v8 = vpop.xlane.xlu0 %367 }
 0x2ea   :  { %v386_v12 = vsub.f32 %v331_v26, %v368_v8  ;;  %3367 = vmatpush3.bf16.msra.mxu0 %v3364_v60 }
 0x2ec   :  { %v396_v17 = vmul.f32 1.442695, %v386_v12 }
 0x2ed   :  { %v377_v18 = vpop.xlane.xlu0 %376 }
 0x2ee   :  { %3711 = vpow2.f32 %v396_v17  ;;  %v389_v21 = vsub.f32 %v346_v30, %v377_v18 }
 0x2ef   :  { %v4157_v11 = vpop.eup %3707 }
 0x2f0   :  { %v4159_v15 = vpop.eup %3709  ;;  %v402_v23 = vmul.f32 1.442695, %v389_v21  ;;  %v411_v25 = vsel %vm359_vm3, %v4157_v11, 0.0 }
 0x2f1   :  { %412 = vadd.xlane.f32.xlu0 %v411_v25  ;;  %v383_v27 = vpop.xlane.xlu0 %382  ;;  %v408_v29 = vsel %vm359_vm3, %v4159_v15, 0.0 }
 0x2f2   :  { %3713 = vpow2.f32 %v402_v23  ;;  %409 = vadd.xlane.f32.xlu1 %v408_v29  ;;  %v391_v50 = vsub.f32 %v4131_v38, %v383_v27 }
 0x2f3   :  { %3715 = vpow2.f32 %v398_v51 }
 0x2f4   :  { %v406_v54 = vmul.f32 1.442695, %v391_v50 }
 0x2f5   :  { %v3566_v26 = vpop.permute.xlu0 %3565 }
 0x2f6   :  { %v3568_v34 = vunpack.i.h.bf16 %v3566_v26  ;;  %v3567_v35 = vunpack.i.l.bf16 %v3566_v26 }
 0x2f8   :  { %v4165_v37 = vpop.eup %3711  ;;  %v3368_v30 = vpack.c.bf16 %v3568_v34, %v3567_v35 }
 0x2f9   :  { %v414_v39 = vsel %vm359_vm3, %v4165_v37, 0.0 }
 0x2fa   :  { %415 = vadd.xlane.f32.xlu0 %v414_v39  ;;  %3369 = vmatprep.subr.bf16.mxu0 %v3368_v30 }
 0x2fb   :  { %3371 = vmatpush3.bf16.msra.mxu0 %v3368_v30 }
 0x2fc   :  { %v4169_v40 = vpop.eup %3713 }
 0x2fd   :  { %v423_v45 = vsel %vm359_vm3, %v4169_v40, 0.0  ;;  %v4177_v8 = vpop.eup %3715 }
 0x2fe   :  { %424 = vadd.xlane.f32.xlu0 %v423_v45 }
 0x303   :  { %3580 = vrot.lane.b32.xlu1 %v4028_v33, %s3877_s17 }
 0x315   :  { %v374_v52 = vpop.xlane.xlu1 %373 }
 0x316   :  { %v388_v53 = vsub.f32 %v341_v44, %v374_v52  ;;  %v417_v44 = vsel %vm359_vm3, %v4177_v8, 0.0 }
 0x318   :  { %v400_v55 = vmul.f32 1.442695, %v388_v53 }
 0x319   :  { %v3571_v56 = vpop.permute.xlu1 %3570 }
 0x31a   :  { %3717 = vpow2.f32 %v400_v55  ;;  %v3573_v57 = vunpack.i.h.bf16 %v3571_v56  ;;  %v3572_v58 = vunpack.i.l.bf16 %v3571_v56 }
 0x31b   :  { %3719 = vpow2.f32 %v406_v54 }
 0x31c   :  { %v3372_v60 = vpack.c.bf16 %v3573_v57, %v3572_v58 }
 0x31e   :  { %3373 = vmatprep.subr.bf16.mxu0 %v3372_v60 }
 0x31f   :  { %3375 = vmatpush3.bf16.msra.mxu0 %v3372_v60 }
 0x324   :  { %v4179_v12 = vpop.eup %3717 }
 0x325   :  { %v420_v22 = vsel %vm359_vm3, %v4179_v12, 0.0  ;;  %v4183_v38 = vpop.eup %3719 }
 0x326   :  { %421 = vadd.xlane.f32.xlu0 %v420_v22  ;;  %v429_v59 = vsel %vm359_vm3, %v4183_v38, 0.0 }
 0x327   :  { %418 = vadd.xlane.f32.xlu1 %v417_v44 }
 0x32a   :  { %430 = vadd.xlane.f32.xlu0 %v429_v59 }
 0x338   :  { %3590 = vrot.lane.b32.xlu1 %v4034_v43, %s3877_s17 }
 0x33c   :  { %3595 = vrot.lane.b32.xlu1 %v4032_v42, %s3877_s17 }
 0x340   :  { %605 = vrot.lane.b32.xlu1 %v4022_v31, %s3878_s0 }
 0x344   :  { %607 = vrot.lane.b32.xlu1 %v4060_v61, %s3878_s0 }
 0x348   :  { %611 = vrot.lane.b32.xlu1 %v4068_v63, %s3878_s0 }
 0x34a   :  { %v380_v17 = vpop.xlane.xlu1 %379 }
 0x34b   :  { %v390_v18 = vsub.f32 %v4152_v48, %v380_v17 }
 0x34c   :  { %615 = vrot.lane.b32.xlu1 %v4076_v1, %s3878_s0 }
 0x34d   :  { %v404_v21 = vmul.f32 1.442695, %v390_v18 }
 0x34e   :  { %v3576_v23 = vpop.permute.xlu1 %3575 }
 0x34f   :  { %3721 = vpow2.f32 %v404_v21  ;;  %v3578_v25 = vunpack.i.h.bf16 %v3576_v23  ;;  %v3577_v27 = vunpack.i.l.bf16 %v3576_v23 }
 0x350   :  { %619 = vrot.lane.b32.xlu1 %v4084_v3, %s3878_s0 }
 0x351   :  { %v3376_v29 = vpack.c.bf16 %v3578_v25, %v3577_v27 }
 0x353   :  { %3377 = vmatprep.subr.bf16.mxu0 %v3376_v29 }
 0x354   :  { %3605 = vrot.lane.b32.xlu1 %v4024_v32, %s3879_s3  ;;  %3379 = vmatpush3.bf16.msra.mxu0 %v3376_v29 }
 0x358   :  { %3615 = vrot.lane.b32.xlu1 %v4032_v42, %s3879_s3 }
 0x359   :  { %v4201_v26 = vpop.eup %3721 }
 0x35a   :  { %v426_v48 = vsel %vm359_vm3, %v4201_v26, 0.0 }
 0x35b   :  { %427 = vadd.xlane.f32.xlu0 %v426_v48 }
 0x35c   :  { %1182 = vrot.lane.b32.xlu1 %v4060_v61, %s3880_s18 }
 0x360   :  { %1186 = vrot.lane.b32.xlu1 %v4068_v63, %s3880_s18 }
 0x364   :  { %1190 = vrot.lane.b32.xlu1 %v4076_v1, %s3880_s18 }
 0x368   :  { %1194 = vrot.lane.b32.xlu1 %v4084_v3, %s3880_s18 }
 0x371   :  { %3585 = vrot.lane.b32.xlu0 %v4024_v32, %s3877_s17 }
 0x375   :  { %609 = vrot.lane.b32.xlu0 %v4062_v62, %s3878_s0 }
 0x379   :  { %613 = vrot.lane.b32.xlu0 %v4070_v0, %s3878_s0 }
 0x37d   :  { %617 = vrot.lane.b32.xlu0 %v4078_v2, %s3878_s0 }
 0x37e   :  { %v413_v34 = vpop.xlane.xlu0 %412 }
 0x37f   :  { %3723 = vrcp.f32 %v413_v34  ;;  %v410_v35 = vpop.xlane.xlu1 %409 }
 0x380   :  { %3725 = vrcp.f32 %v410_v35 }
 0x381   :  { %3600 = vrot.lane.b32.xlu0 %v4028_v33, %s3879_s3 }
 0x383   :  { %v3581_v30 = vpop.permute.xlu1 %3580 }
 0x384   :  { %v3583_v39 = vunpack.i.h.bf16 %v3581_v30  ;;  %v3582_v45 = vunpack.i.l.bf16 %v3581_v30 }
 0x385   :  { %3610 = vrot.lane.b32.xlu0 %v4034_v43, %s3879_s3 }
 0x386   :  { %v3380_v49 = vpack.c.bf16 %v3583_v39, %v3582_v45 }
 0x387   :  { %v416_v50 = vpop.xlane.xlu0 %415 }
 0x388   :  { %3727 = vrcp.f32 %v416_v50  ;;  %3382 = vmatprep.subr.msk.bf16.mxu0 %vm4040_vm2, %v3380_v49 }
 0x389   :  { %v3724_v51 = vpop.eup %3723  ;;  %1180 = vrot.lane.b32.xlu0 %v4022_v31, %s3880_s18 }
 0x38a   :  { %v3726_v52 = vpop.eup %3725  ;;  %v441_v54 = vmul.f32 %v3724_v51, %v4157_v11 }
 0x38b   :  { %v440_v53 = vmul.f32 %v3726_v52, %v4159_v15  ;;  %v425_v11 = vpop.xlane.xlu0 %424 }
 0x38d   :  { %3092 = vmatprep.mubr.msk.f32.mxu0 %vm359_vm3, %v440_v53  ;;  %1184 = vrot.lane.b32.xlu0 %v4062_v62, %s3880_s18 }
 0x38e   :  { %3093 = vmatmul.mubr.msk.f32.vlgmr.msra.gmra.mrb[8].mxu0 %vm359_vm3, %v441_v54 }
 0x38f   :  { %3385 = vmatpush3.bf16.xpose.msk.msra.mxu0 %vm4040_vm2, %v3380_v49 }
 0x391   :  { %1188 = vrot.lane.b32.xlu0 %v4070_v0, %s3880_s18 }
 0x392   :  { %v3728_v55 = vpop.eup %3727 }
 0x393   :  { %v442_v56 = vmul.f32 %v3728_v55, %v4165_v37 }
 0x395   :  { %1192 = vrot.lane.b32.xlu0 %v4078_v2, %s3880_s18  ;;  %3095 = vmatprep.mubr.msk.f32.mxu0 %vm359_vm3, %v442_v56 }
 0x3b3   :  { %v422_v15 = vpop.xlane.xlu0 %421 }
 0x3b4   :  { %3729 = vrcp.f32 %v422_v15  ;;  %v419_v57 = vpop.xlane.xlu1 %418 }
 0x3b5   :  { %3731 = vrcp.f32 %v419_v57 }
 0x3b6   :  { %3733 = vrcp.f32 %v425_v11 }
 0x3b7   :  { %v431_v21 = vpop.xlane.xlu0 %430 }
 0x3b8   :  { %v3591_v17 = vpop.permute.xlu1 %3590  ;;  %3735 = vrcp.f32 %v431_v21 }
 0x3b9   :  { %v3593_v29 = vunpack.i.h.bf16 %v3591_v17  ;;  %v3592_v48 = vunpack.i.l.bf16 %v3591_v17 }
 0x3bb   :  { %v3392_v45 = vpack.c.bf16 %v3593_v29, %v3592_v48 }
 0x3bc   :  { %v3596_v18 = vpop.permute.xlu1 %3595 }
 0x3bd   :  { %v3598_v52 = vunpack.i.h.bf16 %v3596_v18  ;;  %v3597_v53 = vunpack.i.l.bf16 %v3596_v18 }
 0x3be   :  { %v3730_v58 = vpop.eup %3729 }
 0x3bf   :  { %v3732_v60 = vpop.eup %3731  ;;  %v444_v59 = vmul.f32 %v3730_v58, %v4179_v12  ;;  %v3398_v11 = vpack.c.bf16 %v3598_v52, %v3597_v53 }
 0x3c0   :  { %v443_v22 = vmul.f32 %v3732_v60, %v4177_v8  ;;  %v3734_v44 = vpop.eup %3733  ;;  %v606_v23 = vpop.permute.xlu1 %605 }
 0x3c1   :  { %v445_v37 = vmul.f32 %v3734_v44, %v4169_v40 }
 0x3c2   :  { %3096 = vmatmul.mubr.msk.f32.gmra.mrb[10].mxu0 %vm359_vm3, %v443_v22  ;;  %v3736_v40 = vpop.eup %3735 }
 0x3c3   :  { %3098 = vmatprep.mubr.msk.f32.mxu0 %vm359_vm3, %v444_v59  ;;  %v447_v54 = vmul.f32 %v3736_v40, %v4183_v38 }
 0x3c4   :  { %v608_v27 = vpop.permute.xlu1 %607 }
 0x3c6   :  { %3099 = vmatmul.mubr.msk.f32.gmra.mrb[12].mxu0 %vm359_vm3, %v445_v37 }
 0x3c8   :  { %v612_v30 = vpop.permute.xlu1 %611 }
 0x3cc   :  { %v616_v55 = vpop.permute.xlu1 %615 }
 0x3e8   :  { %v428_v25 = vpop.xlane.xlu0 %427 }
 0x3e9   :  { %3737 = vrcp.f32 %v428_v25 }
 0x3ec   :  { %v3586_v8 = vpop.permute.xlu0 %3585 }
 0x3ed   :  { %v3588_v12 = vunpack.i.h.bf16 %v3586_v8  ;;  %v3587_v34 = vunpack.i.l.bf16 %v3586_v8 }
 0x3ef   :  { %v3386_v35 = vpack.c.bf16 %v3588_v12, %v3587_v34 }
 0x3f0   :  { %v610_v39 = vpop.permute.xlu0 %609 }
 0x3f1   :  { %3388 = vmatprep.subr.msk.bf16.mxu0 %vm4040_vm2, %v3386_v35 }
 0x3f2   :  { %3391 = vmatpush3.bf16.xpose.msk.msra.mxu0 %vm4040_vm2, %v3386_v35 }
 0x3f3   :  { %v3738_v49 = vpop.eup %3737  ;;  %3394 = vmatprep.subr.msk.bf16.mxu0 %vm4040_vm2, %v3392_v45 }
 0x3f4   :  { %v614_v50 = vpop.permute.xlu0 %613  ;;  %v446_v51 = vmul.f32 %v3738_v49, %v4201_v26  ;;  %v620_v26 = vpop.permute.xlu1 %619 }
 0x3f6   :  { %3101 = vmatprep.mubr.msk.f32.mxu0 %vm359_vm3, %v446_v51 }
 0x3f7   :  { %3102 = vmatmul.mubr.msk.f32.gmra.mrb[14].mxu0 %vm359_vm3, %v447_v54 }
 0x3f8   :  { %v618_v56 = vpop.permute.xlu0 %617  ;;  %3120 = vmatprep.mubr.msk.f32.mxu0 %vm213_vm1, %v606_v23  ;;  %v3606_v60 = vpop.permute.xlu1 %3605 }
 0x3f9   :  { %v3608_v22 = vunpack.i.h.bf16 %v3606_v60  ;;  %v3607_v44 = vunpack.i.l.bf16 %v3606_v60 }
 0x3fa   :  { %3397 = vmatpush3.bf16.xpose.msk.msra.mxu0 %vm4040_vm2, %v3392_v45 }
 0x3fb   :  { %3400 = vmatprep.subr.msk.bf16.mxu0 %vm4040_vm2, %v3398_v11  ;;  %v3426_v59 = vpack.c.bf16 %v3608_v22, %v3607_v44 }
 0x3fc   :  { %v3601_v15 = vpop.permute.xlu0 %3600  ;;  %v3616_v23 = vpop.permute.xlu1 %3615 }
 0x3fd   :  { %v3603_v57 = vunpack.i.h.bf16 %v3601_v15  ;;  %v3602_v58 = vunpack.i.l.bf16 %v3601_v15  ;;  %v3618_v25 = vunpack.i.h.bf16 %v3616_v23 }
 0x3ff   :  { %v3420_v38 = vpack.c.bf16 %v3603_v57, %v3602_v58 }
 0x400   :  { %v3611_v37 = vpop.permute.xlu0 %3610  ;;  %v1183_v48 = vpop.permute.xlu1 %1182 }
 0x401   :  { %v3613_v17 = vunpack.i.h.bf16 %v3611_v37  ;;  %v3612_v18 = vunpack.i.l.bf16 %v3611_v37 }
 0x402   :  { %3403 = vmatpush3.bf16.xpose.msk.msra.mxu0 %vm4040_vm2, %v3398_v11 }
 0x403   :  { %3422 = vmatprep.subr.msk.bf16.mxu0 %vm4040_vm2, %v3420_v38  ;;  %v3432_v21 = vpack.c.bf16 %v3613_v17, %v3612_v18 }
 0x404   :  { %v1181_v8 = vpop.permute.xlu0 %1180  ;;  %v1187_v34 = vpop.permute.xlu1 %1186 }
 0x408   :  { %v1185_v12 = vpop.permute.xlu0 %1184 }
 0x409   :  { %3121 = vmatmul.mubr.msk.f32.vlgmr.msra.gmra.mrb[16].mxu0 %vm213_vm1, %v608_v27  ;;  %v3617_v27 = vunpack.i.l.bf16 %v3616_v23 }
 0x40a   :  { %3123 = vmatprep.mubr.msk.f32.mxu0 %vm213_vm1, %v610_v39  ;;  %3425 = vmatpush3.bf16.xpose.msk.msra.mxu0 %vm4040_vm2, %v3420_v38 }
 0x40b   :  { %3428 = vmatprep.subr.msk.bf16.mxu0 %vm4040_vm2, %v3426_v59  ;;  %v3438_v29 = vpack.c.bf16 %v3618_v25, %v3617_v27 }
 0x40c   :  { %v1189_v35 = vpop.permute.xlu0 %1188 }
 0x40d   :  { %3124 = vmatmul.mubr.msk.f32.gmra.mrb[18].mxu0 %vm213_vm1, %v612_v30  ;;  %v1191_v30 = vpop.permute.xlu1 %1190 }
 0x40e   :  { %3126 = vmatprep.mubr.msk.f32.mxu0 %vm213_vm1, %v614_v50 }
 0x410   :  { %v1193_v39 = vpop.permute.xlu0 %1192 }
 0x411   :  { %3127 = vmatmul.mubr.msk.f32.gmra.mrb[20].mxu0 %vm213_vm1, %v616_v55  ;;  %v1195_v45 = vpop.permute.xlu1 %1194 }
 0x412   :  { %3129 = vmatprep.mubr.msk.f32.mxu0 %vm213_vm1, %v618_v56  ;;  %3431 = vmatpush3.bf16.xpose.msk.msra.mxu0 %vm4040_vm2, %v3426_v59 }
 0x413   :  { %3434 = vmatprep.subr.msk.bf16.mxu0 %vm4040_vm2, %v3432_v21 }
 0x415   :  { %3130 = vmatmul.mubr.msk.f32.gmra.mrb[22].mxu0 %vm213_vm1, %v620_v26 }
 0x416   :  { %3196 = vmatprep.mubr.msk.f32.mxu0 %vm213_vm1, %v1181_v8 }
 0x41a   :  { %3437 = vmatpush3.bf16.xpose.msk.msra.mxu0 %vm4040_vm2, %v3432_v21 }
 0x41b   :  { %3440 = vmatprep.subr.msk.bf16.mxu0 %vm4040_vm2, %v3438_v29 }
 0x422   :  { %3443 = vmatpush3.bf16.xpose.msk.msra.mxu0 %vm4040_vm2, %v3438_v29 }
 0x429   :  { %3197 = vmatmul.mubr.msk.f32.vlgmr.msra.gmra.mrb[24].mxu0 %vm213_vm1, %v1183_v48 }
 0x42a   :  { %3199 = vmatprep.mubr.msk.f32.mxu0 %vm213_vm1, %v1185_v12 }
 0x42d   :  { %3200 = vmatmul.mubr.msk.f32.gmra.mrb[26].mxu0 %vm213_vm1, %v1187_v34 }
 0x42e   :  { %3202 = vmatprep.mubr.msk.f32.mxu0 %vm213_vm1, %v1189_v35 }
 0x431   :  { %3203 = vmatmul.mubr.msk.f32.gmra.mrb[28].mxu0 %vm213_vm1, %v1191_v30 }
 0x432   :  { %3205 = vmatprep.mubr.msk.f32.mxu0 %vm213_vm1, %v1193_v39 }
 0x435   :  { %3206 = vmatmul.mubr.msk.f32.gmra.mrb[30].mxu0 %vm213_vm1, %v1195_v45 }
 0x461   :  { %v4292_v40 = vpop.f32.mrb[8].mxu0 }
 0x462   :  { %v4294_v49 = vpop.f32.mrb[9].mxu0 }
 0x495   :  { %v4298_v51 = vpop.f32.mrb[10].mxu0 }
 0x496   :  { %v4300_v52 = vpop.f32.mrb[11].mxu0 }
 0x499   :  { %v4304_v54 = vpop.f32.mrb[12].mxu0 }
 0x49a   :  { %v4306_v55 = vpop.f32.mrb[13].mxu0 }
 0x4ca   :  { %v4310_v11 = vpop.f32.mrb[14].mxu0 }
 0x4cb   :  { %v4312_v26 = vpop.f32.mrb[15].mxu0 }
 0x4dc   :  { %v3122_v57 = vpop.f32.mrb[16].mxu0 }
 0x4dd   :  { %v741_v58 = vadd.f32 %v3122_v57, %v4091_v4  ;;  %v735_v38 = vpop.f32.mrb[17].mxu0 }
 0x4de   :  { %v736_v60 = vadd.f32 %v735_v38, %v4096_v7 }
 0x4df   :  { %v777_v22 = vsel %vm359_vm3, %v741_v58, -inf }
 0x4e0   :  { %778 = vmax.xlane.f32.xlu1 %v777_v22  ;;  %v3125_v44 = vpop.f32.mrb[18].mxu0  ;;  %v774_v59 = vsel %vm359_vm3, %v736_v60, -inf }
 0x4e1   :  { %v745_v37 = vpop.f32.mrb[19].mxu0  ;;  %775 = vmax.xlane.f32.xlu0 %v774_v59  ;;  %v751_v18 = vadd.f32 %v3125_v44, %v4103_v16 }
 0x4e2   :  { %v746_v17 = vadd.f32 %v745_v37, %v4113_v24 }
 0x4e3   :  { %v783_v12 = vsel %vm359_vm3, %v751_v18, -inf }
 0x4e4   :  { %v3128_v21 = vpop.f32.mrb[20].mxu0  ;;  %v780_v23 = vsel %vm359_vm3, %v746_v17, -inf }
 0x4e5   :  { %v755_v25 = vpop.f32.mrb[21].mxu0  ;;  %781 = vmax.xlane.f32.xlu0 %v780_v23  ;;  %v761_v8 = vadd.f32 %v3128_v21, %v4121_v28 }
 0x4e6   :  { %v756_v27 = vadd.f32 %v755_v25, %v4141_v41 }
 0x4e7   :  { %v789_v45 = vsel %vm359_vm3, %v761_v8, -inf }
 0x4e8   :  { %v3131_v29 = vpop.f32.mrb[22].mxu0  ;;  %v786_v48 = vsel %vm359_vm3, %v756_v27, -inf }
 0x4e9   :  { %v765_v34 = vpop.f32.mrb[23].mxu0  ;;  %787 = vmax.xlane.f32.xlu1 %v786_v48  ;;  %784 = vmax.xlane.f32.xlu0 %v783_v12  ;;  %v771_v30 = vadd.f32 %v3131_v29, %v4128_v36 }
 0x4ea   :  { %v766_v35 = vadd.f32 %v765_v34, %v4149_v46 }
 0x4eb   :  { %v795_v57 = vsel %vm359_vm3, %v771_v30, -inf }
 0x4ec   :  { %v792_v39 = vsel %vm359_vm3, %v766_v35, -inf }
 0x4ed   :  { %793 = vmax.xlane.f32.xlu1 %v792_v39  ;;  %790 = vmax.xlane.f32.xlu0 %v789_v45 }
 0x4f1   :  { %796 = vmax.xlane.f32.xlu0 %v795_v57 }
 0x4fc   :  { %v4332_v38 = vpop.f32.mrb[24].mxu0 }
 0x4fd   :  { %v4334_v22 = vpop.f32.mrb[25].mxu0 }
 0x4fe   :  { %3620 = vrot.lane.b32.xlu1 %v4028_v33, %s3881_s19 }
 0x500   :  { %v4338_v44 = vpop.f32.mrb[26].mxu0 }
 0x501   :  { %v4340_v59 = vpop.f32.mrb[27].mxu0 }
 0x504   :  { %v4342_v37 = vpop.f32.mrb[28].mxu0 }
 0x505   :  { %v4344_v21 = vpop.f32.mrb[29].mxu0 }
 0x508   :  { %v4346_v23 = vpop.f32.mrb[30].mxu0 }
 0x509   :  { %v4348_v25 = vpop.f32.mrb[31].mxu0 }
 0x56d   :  { %v779_v29 = vpop.xlane.xlu1 %778 }
 0x56e   :  { %v799_v48 = vsub.f32 %v741_v58, %v779_v29  ;;  %v776_v12 = vpop.xlane.xlu0 %775 }
 0x56f   :  { %v798_v34 = vsub.f32 %v736_v60, %v776_v12 }
 0x570   :  { %v808_v39 = vmul.f32 1.442695, %v799_v48 }
 0x571   :  { %v806_v45 = vmul.f32 1.442695, %v798_v34 }
 0x572   :  { %3739 = vpow2.f32 %v808_v39  ;;  %v782_v57 = vpop.xlane.xlu0 %781 }
 0x573   :  { %3741 = vpow2.f32 %v806_v45  ;;  %v800_v15 = vsub.f32 %v746_v17, %v782_v57 }
 0x575   :  { %v810_v56 = vmul.f32 1.442695, %v800_v15 }
 0x576   :  { %v788_v53 = vpop.xlane.xlu1 %787  ;;  %v785_v50 = vpop.xlane.xlu0 %784 }
 0x577   :  { %3743 = vpow2.f32 %v810_v56  ;;  %v802_v20 = vsub.f32 %v756_v27, %v788_v53  ;;  %v801_v14 = vsub.f32 %v751_v18, %v785_v50 }
 0x579   :  { %v814_v19 = vmul.f32 1.442695, %v802_v20  ;;  %v812_v13 = vmul.f32 1.442695, %v801_v14 }
 0x57a   :  { %v794_v10 = vpop.xlane.xlu1 %793  ;;  %v791_v6 = vpop.xlane.xlu0 %790 }
 0x57b   :  { %3745 = vpow2.f32 %v814_v19  ;;  %v803_v58 = vsub.f32 %v761_v8, %v791_v6  ;;  %v804_v17 = vsub.f32 %v766_v35, %v794_v10 }
 0x57c   :  { %v4350_v29 = vpop.eup %3739  ;;  %3747 = vpow2.f32 %v812_v13 }
 0x57d   :  { %v4352_v60 = vpop.eup %3741  ;;  %v816_v48 = vmul.f32 1.442695, %v803_v58  ;;  %v825_v15 = vsel %vm359_vm3, %v4350_v29, 0.0  ;;  %v818_v18 = vmul.f32 1.442695, %v804_v17 }
 0x57e   :  { %v3621_v12 = vpop.permute.xlu1 %3620  ;;  %826 = vadd.xlane.f32.xlu0 %v825_v15  ;;  %v797_v53 = vpop.xlane.xlu0 %796  ;;  %v822_v14 = vsel %vm359_vm3, %v4352_v60, 0.0  ;;  %v4402_v15 = vadd.f32 %v4332_v38, %v4091_v4 }
 0x57f   :  { %v3623_v20 = vunpack.i.h.bf16 %v3621_v12  ;;  %v3622_v50 = vunpack.i.l.bf16 %v3621_v12  ;;  %v805_v19 = vsub.f32 %v771_v30, %v797_v53  ;;  %823 = vadd.xlane.f32.xlu1 %v822_v14  ;;  %3749 = vpow2.f32 %v816_v48 }
 0x581   :  { %v4358_v6 = vpop.eup %3743  ;;  %v3404_v13 = vpack.c.bf16 %v3623_v20, %v3622_v50  ;;  %v820_v56 = vmul.f32 1.442695, %v805_v19 }
 0x582   :  { %v828_v27 = vsel %vm359_vm3, %v4358_v6, 0.0 }
 0x583   :  { %3751 = vpow2.f32 %v820_v56  ;;  %3405 = vmatprep.subr.bf16.mxu1 %v3404_v13  ;;  %829 = vadd.xlane.f32.xlu1 %v828_v27 }
 0x584   :  { %3407 = vmatpush3.bf16.msra.mxu1 %v3404_v13  ;;  %3753 = vpow2.f32 %v818_v18 }
 0x585   :  { %v4362_v10 = vpop.eup %3745 }
 0x586   :  { %v4364_v8 = vpop.eup %3747  ;;  %v834_v35 = vsel %vm359_vm3, %v4362_v10, 0.0 }
 0x587   :  { %835 = vadd.xlane.f32.xlu1 %v834_v35  ;;  %v831_v30 = vsel %vm359_vm3, %v4364_v8, 0.0 }
 0x588   :  { %832 = vadd.xlane.f32.xlu0 %v831_v30 }
 0x589   :  { %v4370_v34 = vpop.eup %3749 }
 0x58a   :  { %v837_v39 = vsel %vm359_vm3, %v4370_v34, 0.0 }
 0x58c   :  { %838 = vadd.xlane.f32.xlu0 %v837_v39 }
 0x58d   :  { %v4374_v45 = vpop.eup %3751 }
 0x58e   :  { %v843_v57 = vsel %vm359_vm3, %v4374_v45, 0.0  ;;  %v4378_v58 = vpop.eup %3753 }
 0x58f   :  { %v840_v48 = vsel %vm359_vm3, %v4378_v58, 0.0 }
 0x590   :  { %844 = vadd.xlane.f32.xlu0 %v843_v57 }
 0x594   :  { %841 = vadd.xlane.f32.xlu0 %v840_v48 }
 0x598   :  { %3630 = vrot.lane.b32.xlu1 %v4034_v43, %s3881_s19 }
 0x59c   :  { %3635 = vrot.lane.b32.xlu1 %v4032_v42, %s3881_s19 }
 0x5a0   :  { %3640 = vrot.lane.b32.xlu1 %v4028_v33, %s3882_s20 }
 0x5a4   :  { %3645 = vrot.lane.b32.xlu1 %v4024_v32, %s3882_s20 }
 0x5a8   :  { %3655 = vrot.lane.b32.xlu1 %v4032_v42, %s3882_s20 }
 0x5aa   :  { %3625 = vrot.lane.b32.xlu0 %v4024_v32, %s3881_s19 }
 0x5ac   :  { %1684 = vrot.lane.b32.xlu1 %v4060_v61, %s3883_s21  ;;  %v4406_v61 = vadd.f32 %v4334_v22, %v4096_v7 }
 0x5ae   :  { %3650 = vrot.lane.b32.xlu0 %v4034_v43, %s3882_s20 }
 0x5b0   :  { %1688 = vrot.lane.b32.xlu1 %v4068_v63, %s3883_s21  ;;  %v4416_v63 = vadd.f32 %v4340_v59, %v4113_v24  ;;  %v4436_v24 = vadd.f32 %v4342_v37, %v4121_v28 }
 0x5b2   :  { %1682 = vrot.lane.b32.xlu0 %v4022_v31, %s3883_s21  ;;  %v4410_v31 = vadd.f32 %v4344_v21, %v4141_v41  ;;  %v1355_v4 = vsel %vm359_vm3, %v4416_v63, -inf }
 0x5b4   :  { %1692 = vrot.lane.b32.xlu1 %v4076_v1, %s3883_s21  ;;  %v4422_v1 = vadd.f32 %v4348_v25, %v4149_v46  ;;  %v1364_v46 = vsel %vm359_vm3, %v4436_v24, -inf }
 0x5b6   :  { %1686 = vrot.lane.b32.xlu0 %v4062_v62, %s3883_s21  ;;  %v1352_v62 = vsel %vm359_vm3, %v4402_v15, -inf  ;;  %v1367_v7 = vsel %vm359_vm3, %v4422_v1, -inf }
 0x5b8   :  { %1696 = vrot.lane.b32.xlu1 %v4084_v3, %s3883_s21  ;;  %v4428_v3 = vadd.f32 %v4338_v44, %v4103_v16  ;;  %v4442_v16 = vadd.f32 %v4346_v23, %v4128_v36 }
 0x5ba   :  { %1690 = vrot.lane.b32.xlu0 %v4070_v0, %s3883_s21  ;;  %v1349_v0 = vsel %vm359_vm3, %v4406_v61, -inf  ;;  %v1358_v41 = vsel %vm359_vm3, %v4428_v3, -inf  ;;  %v1370_v38 = vsel %vm359_vm3, %v4442_v16, -inf }
 0x5be   :  { %1694 = vrot.lane.b32.xlu0 %v4078_v2, %s3883_s21  ;;  %v1361_v2 = vsel %vm359_vm3, %v4410_v31, -inf }
 0x5dc   :  { %1353 = vmax.xlane.f32.xlu1 %v1352_v62 }
 0x5dd   :  { %1350 = vmax.xlane.f32.xlu0 %v1349_v0 }
 0x5e0   :  { %1362 = vmax.xlane.f32.xlu1 %v1361_v2 }
 0x5e1   :  { %1356 = vmax.xlane.f32.xlu0 %v1355_v4 }
 0x5e4   :  { %1368 = vmax.xlane.f32.xlu1 %v1367_v7 }
 0x5e5   :  { %1359 = vmax.xlane.f32.xlu0 %v1358_v41 }
 0x5e9   :  { %1365 = vmax.xlane.f32.xlu0 %v1364_v46 }
 0x5ed   :  { %1371 = vmax.xlane.f32.xlu0 %v1370_v38 }
 0x5f5   :  { %3660 = vrot.lane.b32.xlu1 %v4028_v33, %s3884_s22 }
 0x60b   :  { %v827_v44 = vpop.xlane.xlu0 %826 }
 0x60c   :  { %v824_v28 = vpop.xlane.xlu1 %823 }
 0x60d   :  { %3755 = vrcp.f32 %v824_v28 }
 0x60e   :  { %3757 = vrcp.f32 %v827_v44 }
 0x610   :  { %v830_v22 = vpop.xlane.xlu1 %829 }
 0x611   :  { %3759 = vrcp.f32 %v830_v22 }
 0x614   :  { %v836_v59 = vpop.xlane.xlu1 %835 }
 0x615   :  { %v833_v37 = vpop.xlane.xlu0 %832 }
 0x616   :  { %3761 = vrcp.f32 %v833_v37 }
 0x617   :  { %v3756_v36 = vpop.eup %3755  ;;  %3763 = vrcp.f32 %v836_v59 }
 0x618   :  { %v3631_v21 = vpop.permute.xlu1 %3630  ;;  %v854_v23 = vmul.f32 %v3756_v36, %v4352_v60  ;;  %v3758_v22 = vpop.eup %3757 }
 0x619   :  { %v839_v25 = vpop.xlane.xlu0 %838  ;;  %v3633_v56 = vunpack.i.h.bf16 %v3631_v21  ;;  %v3632_v18 = vunpack.i.l.bf16 %v3631_v21  ;;  %v855_v21 = vmul.f32 %v3758_v22, %v4350_v29 }
 0x61a   :  { %3148 = vmatprep.mubr.msk.f32.mxu1 %vm359_vm3, %v854_v23  ;;  %3765 = vrcp.f32 %v839_v25 }
 0x61b   :  { %v3412_v62 = vpack.c.bf16 %v3633_v56, %v3632_v18  ;;  %v3760_v36 = vpop.eup %3759 }
 0x61c   :  { %v3636_v17 = vpop.permute.xlu1 %3635 }
 0x61d   :  { %v845_v12 = vpop.xlane.xlu0 %844  ;;  %v3638_v2 = vunpack.i.h.bf16 %v3636_v17  ;;  %v3637_v4 = vunpack.i.l.bf16 %v3636_v17 }
 0x61f   :  { %v3416_v28 = vpack.c.bf16 %v3638_v2, %v3637_v4 }
 0x620   :  { %v3641_v53 = vpop.permute.xlu1 %3640  ;;  %v3762_v23 = vpop.eup %3761 }
 0x621   :  { %v3643_v14 = vunpack.i.h.bf16 %v3641_v53  ;;  %v3642_v20 = vunpack.i.l.bf16 %v3641_v53  ;;  %v842_v50 = vpop.xlane.xlu0 %841  ;;  %v856_v53 = vmul.f32 %v3760_v36, %v4358_v6  ;;  %v857_v25 = vmul.f32 %v3762_v23, %v4364_v8 }
 0x622   :  { %3767 = vrcp.f32 %v842_v50 }
 0x623   :  { %v3460_v19 = vpack.c.bf16 %v3643_v14, %v3642_v20  ;;  %3769 = vrcp.f32 %v845_v12  ;;  %v3764_v14 = vpop.eup %3763 }
 0x624   :  { %v3646_v13 = vpop.permute.xlu1 %3645  ;;  %v3766_v12 = vpop.eup %3765  ;;  %v858_v29 = vmul.f32 %v3764_v14, %v4362_v10 }
 0x625   :  { %v3648_v27 = vunpack.i.h.bf16 %v3646_v13  ;;  %v3647_v35 = vunpack.i.l.bf16 %v3646_v13  ;;  %v3626_v30 = vpop.permute.xlu0 %3625  ;;  %3462 = vmatprep.subr.msk.bf16.mxu0 %vm4040_vm2, %v3460_v19  ;;  %v859_v6 = vmul.f32 %v3766_v12, %v4370_v34 }
 0x626   :  { %v3628_v60 = vunpack.i.h.bf16 %v3626_v30  ;;  %v3627_v39 = vunpack.i.l.bf16 %v3626_v30  ;;  %3465 = vmatpush3.bf16.xpose.msk.msra.mxu0 %vm4040_vm2, %v3460_v19 }
 0x627   :  { %v3466_v57 = vpack.c.bf16 %v3648_v27, %v3647_v35 }
 0x628   :  { %v3408_v48 = vpack.c.bf16 %v3628_v60, %v3627_v39  ;;  %v3656_v44 = vpop.permute.xlu1 %3655 }
 0x629   :  { %v3651_v0 = vpop.permute.xlu0 %3650  ;;  %3468 = vmatprep.subr.msk.bf16.mxu0 %vm4040_vm2, %v3466_v57  ;;  %v3658_v37 = vunpack.i.h.bf16 %v3656_v44  ;;  %v3657_v59 = vunpack.i.l.bf16 %v3656_v44 }
 0x62a   :  { %v3653_v7 = vunpack.i.h.bf16 %v3651_v0  ;;  %v3652_v41 = vunpack.i.l.bf16 %v3651_v0  ;;  %3409 = vmatprep.subr.bf16.mxu1 %v3408_v48 }
 0x62b   :  { %3411 = vmatpush3.bf16.msra.mxu1 %v3408_v48  ;;  %v3478_v17 = vpack.c.bf16 %v3658_v37, %v3657_v59 }
 0x62c   :  { %3413 = vmatprep.subr.bf16.mxu1 %v3412_v62  ;;  %v3472_v46 = vpack.c.bf16 %v3653_v7, %v3652_v41  ;;  %v3768_v20 = vpop.eup %3767  ;;  %v1685_v13 = vpop.permute.xlu1 %1684 }
 0x62d   :  { %v1683_v38 = vpop.permute.xlu0 %1682  ;;  %v3770_v50 = vpop.eup %3769  ;;  %v860_v19 = vmul.f32 %v3768_v20, %v4378_v58 }
 0x62e   :  { %3262 = vmatprep.mubr.msk.f32.mxu0 %vm213_vm1, %v1683_v38  ;;  %3471 = vmatpush3.bf16.xpose.msk.msra.mxu0 %vm4040_vm2, %v3466_v57  ;;  %v861_v10 = vmul.f32 %v3770_v50, %v4374_v45 }
 0x62f   :  { %3415 = vmatpush3.bf16.msra.mxu1 %v3412_v62  ;;  %3474 = vmatprep.subr.msk.bf16.mxu0 %vm4040_vm2, %v3472_v46 }
 0x630   :  { %3417 = vmatprep.subr.bf16.mxu1 %v3416_v28  ;;  %v1689_v56 = vpop.permute.xlu1 %1688 }
 0x631   :  { %v1687_v8 = vpop.permute.xlu0 %1686 }
 0x633   :  { %3419 = vmatpush3.bf16.msra.mxu1 %v3416_v28 }
 0x634   :  { %v1693_v58 = vpop.permute.xlu1 %1692 }
 0x635   :  { %v1691_v34 = vpop.permute.xlu0 %1690 }
 0x636   :  { %3149 = vmatmul.mubr.msk.f32.vlgmr.msra.gmra.mrb[8].mxu1 %vm359_vm3, %v855_v21  ;;  %3477 = vmatpush3.bf16.xpose.msk.msra.mxu0 %vm4040_vm2, %v3472_v46 }
 0x637   :  { %3151 = vmatprep.mubr.msk.f32.mxu1 %vm359_vm3, %v856_v53  ;;  %3480 = vmatprep.subr.msk.bf16.mxu0 %vm4040_vm2, %v3478_v17 }
 0x638   :  { %v1697_v45 = vpop.permute.xlu1 %1696 }
 0x639   :  { %v1695_v47 = vpop.permute.xlu0 %1694 }
 0x63a   :  { %3152 = vmatmul.mubr.msk.f32.gmra.mrb[10].mxu1 %vm359_vm3, %v857_v25 }
 0x63b   :  { %3154 = vmatprep.mubr.msk.f32.mxu1 %vm359_vm3, %v858_v29 }
 0x63e   :  { %3155 = vmatmul.mubr.msk.f32.gmra.mrb[12].mxu1 %vm359_vm3, %v859_v6  ;;  %3483 = vmatpush3.bf16.xpose.msk.msra.mxu0 %vm4040_vm2, %v3478_v17  ;;  %v178_v6 = vld [vmem:[%s4967_s4 + $0x4] sm:$0xf] }
 0x63f   :  { %3157 = vmatprep.mubr.msk.f32.mxu1 %vm359_vm3, %v860_v19  ;;  %3524 = vmatprep.subr.msk.bf16.mxu1 %vm1031_vm4, %v178_v6  ;;  %v1033_v19 = vsel %vm1031_vm4, %v178_v6, 0 }
 0x640   :  { %3161 = vmatpush3.bf16.msra.mxu1 %v1033_v19 }
 0x642   :  { %3158 = vmatmul.mubr.msk.f32.gmra.mrb[14].mxu1 %vm359_vm3, %v861_v10 }
 0x645   :  { %3263 = vmatmul.mubr.msk.f32.vlgmr.msra.gmra.mrb[32].mxu0 %vm213_vm1, %v1685_v13  ;;  %v177_v13 = vld [vmem:[%s4967_s4] sm:$0xf] }
 0x646   :  { %3265 = vmatprep.mubr.msk.f32.mxu0 %vm213_vm1, %v1687_v8  ;;  %3525 = vmatprep.subr.msk.bf16.mxu1 %vm1031_vm4, %v177_v13 }
 0x649   :  { %3266 = vmatmul.mubr.msk.f32.gmra.mrb[34].mxu0 %vm213_vm1, %v1689_v56 }
 0x64a   :  { %3268 = vmatprep.mubr.msk.f32.mxu0 %vm213_vm1, %v1691_v34 }
 0x64d   :  { %3269 = vmatmul.mubr.msk.f32.gmra.mrb[36].mxu0 %vm213_vm1, %v1693_v58 }
 0x64e   :  { %3271 = vmatprep.mubr.msk.f32.mxu0 %vm213_vm1, %v1695_v47 }
 0x651   :  { %3272 = vmatmul.mubr.msk.f32.gmra.mrb[38].mxu0 %vm213_vm1, %v1697_v45 }
 0x669   :  { %v1354_v18 = vpop.xlane.xlu1 %1353 }
 0x66a   :  { %v1374_v27 = vsub.f32 %v4402_v15, %v1354_v18  ;;  %v1351_v35 = vpop.xlane.xlu0 %1350 }
 0x66b   :  { %v1373_v30 = vsub.f32 %v4406_v61, %v1351_v35 }
 0x66c   :  { %v1383_v60 = vmul.f32 1.442695, %v1374_v27 }
 0x66d   :  { %v1381_v39 = vmul.f32 1.442695, %v1373_v30  ;;  %v1363_v57 = vpop.xlane.xlu1 %1362 }
 0x66e   :  { %3771 = vpow2.f32 %v1383_v60  ;;  %v1377_v48 = vsub.f32 %v4410_v31, %v1363_v57  ;;  %v1357_v62 = vpop.xlane.xlu0 %1356 }
 0x66f   :  { %3773 = vpow2.f32 %v1381_v39  ;;  %v1375_v0 = vsub.f32 %v4416_v63, %v1357_v62  ;;  %v1113_v39 = vsel %vm1031_vm4, %v177_v13, 0 }
 0x670   :  { %v1389_v2 = vmul.f32 1.442695, %v1377_v48 }
 0x671   :  { %v1385_v4 = vmul.f32 1.442695, %v1375_v0  ;;  %v1369_v46 = vpop.xlane.xlu1 %1368 }
 0x672   :  { %v1360_v7 = vpop.xlane.xlu0 %1359  ;;  %v1379_v44 = vsub.f32 %v4422_v1, %v1369_v46 }
 0x673   :  { %3775 = vpow2.f32 %v1385_v4  ;;  %v1376_v41 = vsub.f32 %v4428_v3, %v1360_v7 }
 0x674   :  { %3777 = vpow2.f32 %v1389_v2  ;;  %v1393_v36 = vmul.f32 1.442695, %v1379_v44  ;;  %v3867_v44 = vld [vmem:[%s4966_s1 + $0x8] sm:$0xff] }
 0x675   :  { %v1387_v15 = vmul.f32 1.442695, %v1376_v41  ;;  %v3661_v10 = vpop.permute.xlu1 %3660 }
 0x676   :  { %v1366_v61 = vpop.xlane.xlu0 %1365  ;;  %v3663_v45 = vunpack.i.h.bf16 %v3661_v10  ;;  %v3662_v18 = vunpack.i.l.bf16 %v3661_v10 }
 0x677   :  { %3779 = vpow2.f32 %v1387_v15  ;;  %v1378_v38 = vsub.f32 %v4436_v24, %v1366_v61 }
 0x678   :  { %v4496_v28 = vpop.eup %3771  ;;  %v3444_v48 = vpack.c.bf16 %v3663_v45, %v3662_v18  ;;  %v4993_v45 = vpack.c.bf16 %v4298_v51, %v4300_v52  ;;  %v3871_v18 = vld [vmem:[%s4966_s1 + $0x28] sm:$0xff]  ;;  %v4994_v52 = vpack.c.bf16 %v4304_v54, %v4306_v55 }
 0x679   :  { %v4498_v31 = vpop.eup %3773  ;;  %v1391_v63 = vmul.f32 1.442695, %v1378_v38  ;;  %v1400_v22 = vsel %vm359_vm3, %v4496_v28, 0.0 }
 0x67a   :  { %v1372_v37 = vpop.xlane.xlu0 %1371  ;;  %1401 = vadd.xlane.f32.xlu0 %v1400_v22  ;;  %v1397_v3 = vsel %vm359_vm3, %v4498_v31, 0.0  ;;  %v4992_v22 = vpack.c.bf16 %v4292_v40, %v4294_v49  ;;  %v3869_v40 = vld [vmem:[%s4966_s1 + $0x18] sm:$0xff] }
 0x67b   :  { %3781 = vpow2.f32 %v1391_v63  ;;  %v1380_v59 = vsub.f32 %v4442_v16, %v1372_v37  ;;  %1398 = vadd.xlane.f32.xlu1 %v1397_v3 }
 0x67d   :  { %v4506_v24 = vpop.eup %3775  ;;  %v1395_v21 = vmul.f32 1.442695, %v1380_v59  ;;  %v3868_v59 = vld [vmem:[%s4966_s1] sm:$0xff] }
 0x67e   :  { %v1403_v1 = vsel %vm359_vm3, %v4506_v24, 0.0  ;;  %v4510_v23 = vpop.eup %3777 }
 0x67f   :  { %3783 = vpow2.f32 %v1395_v21  ;;  %1404 = vadd.xlane.f32.xlu1 %v1403_v1  ;;  %v1409_v53 = vsel %vm359_vm3, %v4510_v23, 0.0 }
 0x680   :  { %3785 = vpow2.f32 %v1393_v36 }
 0x681   :  { %v4512_v17 = vpop.eup %3779 }
 0x682   :  { %v1406_v16 = vsel %vm359_vm3, %v4512_v17, 0.0 }
 0x683   :  { %1410 = vadd.xlane.f32.xlu1 %v1409_v53  ;;  %1407 = vadd.xlane.f32.xlu0 %v1406_v16 }
 0x685   :  { %v4518_v14 = vpop.eup %3781 }
 0x686   :  { %v1412_v25 = vsel %vm359_vm3, %v4518_v14, 0.0 }
 0x687   :  { %1413 = vadd.xlane.f32.xlu0 %v1412_v25 }
 0x689   :  { %v4522_v12 = vpop.eup %3783 }
 0x68a   :  { %v1418_v29 = vsel %vm359_vm3, %v4522_v12, 0.0  ;;  %v4526_v20 = vpop.eup %3785 }
 0x68b   :  { %1419 = vadd.xlane.f32.xlu0 %v1418_v29  ;;  %v1415_v50 = vsel %vm359_vm3, %v4526_v20, 0.0  ;;  %v3870_v29 = vld [vmem:[%s4966_s1 + $0x10] sm:$0xff] }
 0x68f   :  { %1416 = vadd.xlane.f32.xlu0 %v1415_v50 }
 0x694   :  { %3670 = vrot.lane.b32.xlu1 %v4034_v43, %s3884_s22 }
 0x698   :  { %3675 = vrot.lane.b32.xlu1 %v4032_v42, %s3884_s22 }
 0x6a5   :  { %3665 = vrot.lane.b32.xlu0 %v4024_v32, %s3884_s22 }
 0x707   :  { %v1402_v47 = vpop.xlane.xlu0 %1401 }
 0x708   :  { %v1399_v8 = vpop.xlane.xlu1 %1398 }
 0x709   :  { %v3150_v56 = vpop.f32.mrb[8].mxu1  ;;  %3787 = vrcp.f32 %v1399_v8 }
 0x70a   :  { %v976_v34 = vpop.f32.mrb[9].mxu1  ;;  %3789 = vrcp.f32 %v1402_v47 }
 0x70b   :  { %v1015_v58 = vpack.c.bf16 %v3150_v56, %v976_v34 }
 0x70c   :  { %v1405_v30 = vpop.xlane.xlu1 %1404 }
 0x70d   :  { %v3153_v27 = vpop.f32.mrb[10].mxu1  ;;  %3162 = vmatprep.mubr.msk.bf16.mxu1 %vm213_vm1, %v1015_v58  ;;  %3791 = vrcp.f32 %v1405_v30  ;;  %v3873_v30 = vld [vmem:[%s4966_s1 + $0x38] sm:$0xff] }
 0x70e   :  { %v986_v35 = vpop.f32.mrb[11].mxu1 }
 0x70f   :  { %v1016_v60 = vpack.c.bf16 %v3153_v27, %v986_v35 }
 0x710   :  { %v4547_v57 = vpop.xlane.xlu0 %1407  ;;  %v4552_v7 = vpop.xlane.xlu1 %1410 }
 0x711   :  { %v3156_v62 = vpop.f32.mrb[12].mxu1  ;;  %3163 = vmatmul.mubr.msk.bf16.vlgmr.msra.gmra.mrb[16].mxu1 %vm213_vm1, %v1016_v60  ;;  %3793 = vrcp.f32 %v4547_v57  ;;  %v4995_v57 = vpack.c.bf16 %v4310_v11, %v4312_v26 }
 0x712   :  { %3171 = vmatpush3.bf16.msra.mxu1 %v1113_v39  ;;  %v996_v0 = vpop.f32.mrb[13].mxu1  ;;  %v3872_v39 = vld [vmem:[%s4966_s1 + $0x20] sm:$0xff]  ;;  %3795 = vrcp.f32 %v4552_v7 }
 0x713   :  { %v1017_v2 = vpack.c.bf16 %v3156_v62, %v996_v0  ;;  %3445 = vmatprep.subr.bf16.mxu1 %v3444_v48  ;;  %v3788_v55 = vpop.eup %3787 }
 0x714   :  { %v4550_v4 = vpop.xlane.xlu0 %1413  ;;  %v3671_v3 = vpop.permute.xlu1 %3670 }
 0x715   :  { %v3159_v41 = vpop.f32.mrb[14].mxu1  ;;  %3166 = vmatprep.mubr.msk.bf16.mxu1 %vm213_vm1, %v1017_v2  ;;  %v3673_v19 = vunpack.i.h.bf16 %v3671_v3  ;;  %v3672_v56 = vunpack.i.l.bf16 %v3671_v3  ;;  %3797 = vrcp.f32 %v4550_v4  ;;  %v3790_v7 = vpop.eup %3789 }
 0x716   :  { %v1006_v15 = vpop.f32.mrb[15].mxu1 }
 0x717   :  { %v1018_v46 = vpack.c.bf16 %v3159_v41, %v1006_v15  ;;  %v3452_v2 = vpack.c.bf16 %v3673_v19, %v3672_v56 }
 0x718   :  { %v4555_v61 = vpop.xlane.xlu0 %1419  ;;  %v3264_v38 = vpop.f32.mrb[32].mxu0 }
 0x719   :  { %3167 = vmatmul.mubr.msk.bf16.gmra.mrb[20].mxu1 %vm213_vm1, %v1018_v46  ;;  %v4561_v63 = vadd.f32 %v3867_v44, %v3264_v38  ;;  %v1812_v37 = vpop.f32.mrb[33].mxu0  ;;  %v3676_v60 = vpop.permute.xlu1 %3675  ;;  %v3874_v38 = vld [vmem:[%s4966_s1 + $0x30] sm:$0xff]  ;;  %s3885_s1 = smov 40  }
 0x71a   :  { %3172 = vmatprep.mubr.msk.bf16.mxu1 %vm213_vm1, %v4992_v22  ;;  %v4570_v36 = vadd.f32 %v3868_v59, %v1812_v37  ;;  %v3678_v41 = vunpack.i.h.bf16 %v3676_v60  ;;  %v3677_v15 = vunpack.i.l.bf16 %v3676_v60  ;;  %v1429_v59 = vmul.f32 %v3788_v55, %v4498_v31 }
 0x71b   :  { %v1854_v1 = vsel %vm359_vm3, %v4561_v63, -inf }
 0x71c   :  { %v1417_v21 = vpop.xlane.xlu0 %1416  ;;  %v3267_v53 = vpop.f32.mrb[34].mxu0  ;;  %1855 = vmax.xlane.f32.xlu0 %v1854_v1  ;;  %v1851_v25 = vsel %vm359_vm3, %v4570_v36, -inf  ;;  %v3456_v3 = vpack.c.bf16 %v3678_v41, %v3677_v15 }
 0x71d   :  { %v4577_v49 = vadd.f32 %v3869_v40, %v3267_v53  ;;  %v1822_v16 = vpop.f32.mrb[35].mxu0  ;;  %1852 = vmax.xlane.f32.xlu1 %v1851_v25  ;;  %3799 = vrcp.f32 %v1417_v21  ;;  %v3792_v1 = vpop.eup %3791  ;;  %v1430_v53 = vmul.f32 %v3790_v7, %v4496_v28 }
 0x71e   :  { %v4584_v6 = vadd.f32 %v3870_v29, %v1822_v16  ;;  %3801 = vrcp.f32 %v4555_v61  ;;  %v3794_v11 = vpop.eup %3793  ;;  %v1431_v26 = vmul.f32 %v3792_v1, %v4506_v24 }
 0x71f   :  { %v1860_v50 = vsel %vm359_vm3, %v4577_v49, -inf  ;;  %v3796_v40 = vpop.eup %3795  ;;  %v1432_v31 = vmul.f32 %v3794_v11, %v4512_v17  ;;  %v179_v17 = vld [vmem:[%s4967_s4 + $0x8] sm:$0xf] }
 0x720   :  { %v3666_v13 = vpop.permute.xlu0 %3665  ;;  %v3270_v10 = vpop.f32.mrb[36].mxu0  ;;  %v1857_v8 = vsel %vm359_vm3, %v4584_v6, -inf  ;;  %1861 = vmax.xlane.f32.xlu0 %v1860_v50  ;;  %v1433_v21 = vmul.f32 %v3796_v40, %v4510_v23 }
 0x721   :  { %v3668_v34 = vunpack.i.h.bf16 %v3666_v13  ;;  %v3667_v58 = vunpack.i.l.bf16 %v3666_v13  ;;  %3173 = vmatmul.mubr.msk.bf16.vlgmr.msra.gmra.mrb[16].mxu1 %vm213_vm1, %v4993_v45  ;;  %v4597_v27 = vadd.f32 %v3871_v18, %v3270_v10  ;;  %v1832_v35 = vpop.f32.mrb[37].mxu0  ;;  %1858 = vmax.xlane.f32.xlu1 %v1857_v8  ;;  %v3798_v4 = vpop.eup %3797 }
 0x722   :  { %3447 = vmatpush3.bf16.msra.mxu1 %v3444_v48  ;;  %v4602_v62 = vadd.f32 %v3872_v39, %v1832_v35  ;;  %3176 = vmatprep.mubr.msk.bf16.mxu1 %vm213_vm1, %v4994_v52  ;;  %v1434_v28 = vmul.f32 %v3798_v4, %v4518_v14  ;;  %v1607_v14 = vsel %vm1031_vm4, %v179_v17, 0 }
 0x723   :  { %v3448_v51 = vpack.c.bf16 %v3668_v34, %v3667_v58  ;;  %v1866_v0 = vsel %vm359_vm3, %v4597_v27, -inf }
 0x724   :  { %v3273_v47 = vpop.f32.mrb[38].mxu0  ;;  %v1863_v48 = vsel %vm359_vm3, %v4602_v62, -inf  ;;  %1867 = vmax.xlane.f32.xlu0 %v1866_v0 }
 0x725   :  { %3449 = vmatprep.subr.bf16.mxu1 %v3448_v51  ;;  %v4615_v46 = vadd.f32 %v3873_v30, %v3273_v47  ;;  %v1842_v54 = vpop.f32.mrb[39].mxu0  ;;  %1864 = vmax.xlane.f32.xlu1 %v1863_v48 }
 0x726   :  { %v4621_v44 = vadd.f32 %v3874_v38, %v1842_v54  ;;  %3451 = vmatpush3.bf16.msra.mxu1 %v3448_v51 }
 0x727   :  { %3453 = vmatprep.subr.bf16.mxu1 %v3452_v2  ;;  %v1872_v22 = vsel %vm359_vm3, %v4615_v46, -inf  ;;  %v3800_v16 = vpop.eup %3799 }
 0x728   :  { %v1869_v37 = vsel %vm359_vm3, %v4621_v44, -inf  ;;  %1873 = vmax.xlane.f32.xlu0 %v1872_v22  ;;  %v3802_v61 = vpop.eup %3801  ;;  %v1435_v24 = vmul.f32 %v3800_v16, %v4526_v20 }
 0x729   :  { %3177 = vmatmul.mubr.msk.bf16.gmra.mrb[20].mxu1 %vm213_vm1, %v4995_v57  ;;  %1870 = vmax.xlane.f32.xlu1 %v1869_v37  ;;  %v1436_v23 = vmul.f32 %v3802_v61, %v4522_v12 }
 0x72a   :  { %3455 = vmatpush3.bf16.msra.mxu1 %v3452_v2  ;;  %3224 = vmatprep.mubr.msk.f32.mxu1 %vm359_vm3, %v1429_v59 }
 0x72b   :  { %3457 = vmatprep.subr.bf16.mxu1 %v3456_v3 }
 0x72e   :  { %3459 = vmatpush3.bf16.msra.mxu1 %v3456_v3 }
 0x72f   :  { %3526 = vmatprep.subr.msk.bf16.mxu1 %vm1031_vm4, %v179_v17 }
 0x731   :  { %3225 = vmatmul.mubr.msk.f32.vlgmr.msra.gmra.mrb[24].mxu1 %vm359_vm3, %v1430_v53 }
 0x732   :  { %3227 = vmatprep.mubr.msk.f32.mxu1 %vm359_vm3, %v1431_v26  ;;  %3237 = vmatpush3.bf16.msra.mxu1 %v1607_v14 }
 0x735   :  { %3228 = vmatmul.mubr.msk.f32.gmra.mrb[26].mxu1 %vm359_vm3, %v1432_v31 }
 0x736   :  { %3230 = vmatprep.mubr.msk.f32.mxu1 %vm359_vm3, %v1433_v21 }
 0x739   :  { %3231 = vmatmul.mubr.msk.f32.gmra.mrb[28].mxu1 %vm359_vm3, %v1434_v28 }
 0x73a   :  { %3233 = vmatprep.mubr.msk.f32.mxu1 %vm359_vm3, %v1435_v24  ;;  %3680 = vrot.lane.b32.xlu1 %v4028_v33, %s3885_s1 }
 0x73d   :  { %3234 = vmatmul.mubr.msk.f32.gmra.mrb[30].mxu1 %vm359_vm3, %v1436_v23 }
 0x7a9   :  { %v1856_v20 = vpop.xlane.xlu0 %1855 }
 0x7aa   :  { %v1876_v25 = vsub.f32 %v4561_v63, %v1856_v20  ;;  %v1853_v29 = vpop.xlane.xlu1 %1852 }
 0x7ab   :  { %v1875_v50 = vsub.f32 %v4570_v36, %v1853_v29 }
 0x7ac   :  { %v1885_v33 = vmul.f32 1.442695, %v1876_v25 }
 0x7ad   :  { %v1883_v19 = vmul.f32 1.442695, %v1875_v50  ;;  %v1862_v12 = vpop.xlane.xlu0 %1861 }
 0x7ae   :  { %3803 = vpow2.f32 %v1885_v33  ;;  %v1878_v13 = vsub.f32 %v4577_v49, %v1862_v12  ;;  %v1859_v10 = vpop.xlane.xlu1 %1858 }
 0x7af   :  { %3805 = vpow2.f32 %v1883_v19  ;;  %v1877_v8 = vsub.f32 %v4584_v6, %v1859_v10 }
 0x7b0   :  { %v1889_v56 = vmul.f32 1.442695, %v1878_v13 }
 0x7b1   :  { %v1887_v34 = vmul.f32 1.442695, %v1877_v8  ;;  %v1868_v58 = vpop.xlane.xlu0 %1867 }
 0x7b2   :  { %3807 = vpow2.f32 %v1889_v56  ;;  %v1880_v45 = vsub.f32 %v4597_v27, %v1868_v58  ;;  %v1865_v63 = vpop.xlane.xlu1 %1864 }
 0x7b3   :  { %3809 = vpow2.f32 %v1887_v34  ;;  %v1879_v36 = vsub.f32 %v4602_v62, %v1865_v63 }
 0x7b4   :  { %v1893_v18 = vmul.f32 1.442695, %v1880_v45 }
 0x7b5   :  { %v1891_v35 = vmul.f32 1.442695, %v1879_v36  ;;  %v1874_v60 = vpop.xlane.xlu0 %1873 }
 0x7b6   :  { %3811 = vpow2.f32 %v1893_v18  ;;  %v1882_v49 = vsub.f32 %v4615_v46, %v1874_v60  ;;  %v1871_v39 = vpop.xlane.xlu1 %1870 }
 0x7b7   :  { %3813 = vpow2.f32 %v1891_v35  ;;  %v1881_v6 = vsub.f32 %v4621_v44, %v1871_v39  ;;  %v180_v35 = vld [vmem:[%s4967_s4 + $0xc] sm:$0xf] }
 0x7b8   :  { %v4665_v51 = vpop.eup %3803  ;;  %v1897_v52 = vmul.f32 1.442695, %v1882_v49  ;;  %v2109_v39 = vsel %vm1031_vm4, %v180_v35, 0 }
 0x7b9   :  { %v3806_v0 = vpop.eup %3805  ;;  %v1895_v47 = vmul.f32 1.442695, %v1881_v6  ;;  %v1902_v27 = vsel %vm359_vm3, %v4665_v51, 0.0 }
 0x7ba   :  { %3815 = vpow2.f32 %v1897_v52  ;;  %1903 = vadd.xlane.f32.xlu0 %v1902_v27  ;;  %v3681_v62 = vpop.permute.xlu1 %3680  ;;  %v1899_v48 = vsel %vm359_vm3, %v3806_v0, 0.0 }
 0x7bb   :  { %v3683_v2 = vunpack.i.h.bf16 %v3681_v62  ;;  %v3682_v41 = vunpack.i.l.bf16 %v3681_v62  ;;  %1900 = vadd.xlane.f32.xlu1 %v1899_v48  ;;  %3817 = vpow2.f32 %v1895_v47 }
 0x7bc   :  { %v4670_v15 = vpop.eup %3807 }
 0x7bd   :  { %v4672_v30 = vpop.eup %3809  ;;  %v3484_v46 = vpack.c.bf16 %v3683_v2, %v3682_v41  ;;  %v1908_v54 = vsel %vm359_vm3, %v4670_v15, 0.0 }
 0x7be   :  { %1909 = vadd.xlane.f32.xlu0 %v1908_v54  ;;  %v1905_v55 = vsel %vm359_vm3, %v4672_v30, 0.0 }
 0x7bf   :  { %1906 = vadd.xlane.f32.xlu1 %v1905_v55  ;;  %3485 = vmatprep.subr.bf16.mxu1 %v3484_v46 }
 0x7c0   :  { %v4678_v38 = vpop.eup %3811 }
 0x7c1   :  { %v4680_v44 = vpop.eup %3813  ;;  %v1914_v22 = vsel %vm359_vm3, %v4678_v38, 0.0 }
 0x7c2   :  { %1915 = vadd.xlane.f32.xlu0 %v1914_v22  ;;  %v1911_v37 = vsel %vm359_vm3, %v4680_v44, 0.0 }
 0x7c3   :  { %1912 = vadd.xlane.f32.xlu1 %v1911_v37 }
 0x7c4   :  { %v4686_v3 = vpop.eup %3815 }
 0x7c5   :  { %v1920_v57 = vsel %vm359_vm3, %v4686_v3, 0.0  ;;  %v4690_v59 = vpop.eup %3817 }
 0x7c6   :  { %1921 = vadd.xlane.f32.xlu0 %v1920_v57  ;;  %v1917_v7 = vsel %vm359_vm3, %v4690_v59, 0.0 }
 0x7ca   :  { %1918 = vadd.xlane.f32.xlu0 %v1917_v7 }
 0x7d4   :  { %3690 = vrot.lane.b32.xlu1 %v4034_v43, %s3885_s1 }
 0x7d8   :  { %3695 = vrot.lane.b32.xlu1 %v4032_v42, %s3885_s1 }
 0x7e0   :  { %3685 = vrot.lane.b32.xlu0 %v4024_v32, %s3885_s1 }
 0x804   :  { %v3226_v1 = vpop.f32.mrb[24].mxu1 }
 0x805   :  { %v1551_v53 = vpop.f32.mrb[25].mxu1 }
 0x806   :  { %v1590_v11 = vpack.c.bf16 %v3226_v1, %v1551_v53  ;;  %v2847_v1 = vld [vmem:[%s4968_s5] ss:$0 sm:$0xff] }
 0x808   :  { %v3229_v26 = vpop.f32.mrb[26].mxu1  ;;  %3238 = vmatprep.mubr.msk.bf16.mxu1 %vm213_vm1, %v1590_v11 }
 0x809   :  { %v1561_v40 = vpop.f32.mrb[27].mxu1 }
 0x80a   :  { %v1591_v31 = vpack.c.bf16 %v3229_v26, %v1561_v40 }
 0x80c   :  { %v3232_v4 = vpop.f32.mrb[28].mxu1  ;;  %3239 = vmatmul.mubr.msk.bf16.vlgmr.msra.gmra.mrb[16].mxu1 %vm213_vm1, %v1591_v31 }
 0x80d   :  { %3487 = vmatpush3.bf16.msra.mxu1 %v3484_v46  ;;  %v1571_v21 = vpop.f32.mrb[29].mxu1 }
 0x80e   :  { %v1592_v43 = vpack.c.bf16 %v3232_v4, %v1571_v21 }
 0x810   :  { %v3235_v16 = vpop.f32.mrb[30].mxu1  ;;  %3242 = vmatprep.mubr.msk.bf16.mxu1 %vm213_vm1, %v1592_v43 }
 0x811   :  { %v1581_v42 = vpop.f32.mrb[31].mxu1 }
 0x812   :  { %v1593_v28 = vpack.c.bf16 %v3235_v16, %v1581_v42 }
 0x814   :  { %3243 = vmatmul.mubr.msk.bf16.gmra.mrb[20].mxu1 %vm213_vm1, %v1593_v28  ;;  %v4996_v28 = vld [vmem:[#allocation2_spill] sm:$0xff] }
 0x847   :  { %v1904_v32 = vpop.xlane.xlu0 %1903 }
 0x848   :  { %v1901_v61 = vpop.xlane.xlu1 %1900 }
 0x849   :  { %3819 = vrcp.f32 %v1901_v61 }
 0x84a   :  { %3821 = vrcp.f32 %v1904_v32 }
 0x84b   :  { %v1910_v24 = vpop.xlane.xlu0 %1909 }
 0x84c   :  { %v1907_v23 = vpop.xlane.xlu1 %1906 }
 0x84d   :  { %3823 = vrcp.f32 %v1907_v23 }
 0x84e   :  { %3825 = vrcp.f32 %v1910_v24  ;;  %v4997_v24 = vld [vmem:[#allocation3_spill] sm:$0xff] }
 0x84f   :  { %v1916_v17 = vpop.xlane.xlu0 %1915 }
 0x850   :  { %v1913_v14 = vpop.xlane.xlu1 %1912 }
 0x851   :  { %3827 = vrcp.f32 %v1913_v14 }
 0x852   :  { %3829 = vrcp.f32 %v1916_v17 }
 0x853   :  { %v3820_v20 = vpop.eup %3819  ;;  %v1922_v25 = vpop.xlane.xlu0 %1921 }
 0x854   :  { %v1931_v29 = vmul.f32 %v3820_v20, %v3806_v0  ;;  %v3691_v50 = vpop.permute.xlu1 %3690  ;;  %v3822_v18 = vpop.eup %3821 }
 0x855   :  { %v3693_v12 = vunpack.i.h.bf16 %v3691_v50  ;;  %v3692_v13 = vunpack.i.l.bf16 %v3691_v50  ;;  %v1932_v49 = vmul.f32 %v3822_v18, %v4665_v51 }
 0x856   :  { %3290 = vmatprep.mubr.msk.f32.mxu1 %vm359_vm3, %v1931_v29 }
 0x857   :  { %v1919_v33 = vpop.xlane.xlu0 %1918  ;;  %v3492_v58 = vpack.c.bf16 %v3693_v12, %v3692_v13  ;;  %v3824_v60 = vpop.eup %3823 }
 0x858   :  { %v3696_v56 = vpop.permute.xlu1 %3695  ;;  %3831 = vrcp.f32 %v1919_v33  ;;  %v3826_v6 = vpop.eup %3825  ;;  %v1933_v52 = vmul.f32 %v3824_v60, %v4672_v30 }
 0x859   :  { %v3698_v45 = vunpack.i.h.bf16 %v3696_v56  ;;  %v3697_v63 = vunpack.i.l.bf16 %v3696_v56  ;;  %3833 = vrcp.f32 %v1922_v25  ;;  %v1934_v47 = vmul.f32 %v3826_v6, %v4670_v15 }
 0x85b   :  { %v3686_v19 = vpop.permute.xlu0 %3685  ;;  %v3496_v36 = vpack.c.bf16 %v3698_v45, %v3697_v63  ;;  %v3828_v0 = vpop.eup %3827  ;;  %v5001_v63 = vld [vmem:[#allocation7_spill] sm:$0xff] }
 0x85c   :  { %v3688_v10 = vunpack.i.h.bf16 %v3686_v19  ;;  %v3687_v8 = vunpack.i.l.bf16 %v3686_v19  ;;  %v3830_v27 = vpop.eup %3829  ;;  %v1935_v62 = vmul.f32 %v3828_v0, %v4680_v44 }
 0x85d   :  { %v1936_v51 = vmul.f32 %v3830_v27, %v4678_v38 }
 0x85e   :  { %v3488_v34 = vpack.c.bf16 %v3688_v10, %v3687_v8  ;;  %v4999_v8 = vld [vmem:[#allocation6_spill] sm:$0xff] }
 0x860   :  { %3489 = vmatprep.subr.bf16.mxu1 %v3488_v34 }
 0x861   :  { %3491 = vmatpush3.bf16.msra.mxu1 %v3488_v34  ;;  %v5000_v34 = vld [vmem:[#allocation5_spill] sm:$0xff] }
 0x862   :  { %3493 = vmatprep.subr.bf16.mxu1 %v3492_v58  ;;  %v3832_v48 = vpop.eup %3831 }
 0x863   :  { %v3834_v2 = vpop.eup %3833  ;;  %v1937_v41 = vmul.f32 %v3832_v48, %v4690_v59 }
 0x864   :  { %v1938_v30 = vmul.f32 %v3834_v2, %v4686_v3 }
 0x865   :  { %3495 = vmatpush3.bf16.msra.mxu1 %v3492_v58 }
 0x866   :  { %3497 = vmatprep.subr.bf16.mxu1 %v3496_v36 }
 0x869   :  { %3499 = vmatpush3.bf16.msra.mxu1 %v3496_v36 }
 0x86a   :  { %3527 = vmatprep.subr.msk.bf16.mxu1 %vm1031_vm4, %v180_v35 }
 0x86c   :  { %3291 = vmatmul.mubr.msk.f32.vlgmr.msra.gmra.mrb[32].mxu1 %vm359_vm3, %v1932_v49 }
 0x86d   :  { %3293 = vmatprep.mubr.msk.f32.mxu1 %vm359_vm3, %v1933_v52  ;;  %3303 = vmatpush3.bf16.msra.mxu1 %v2109_v39 }
 0x870   :  { %3294 = vmatmul.mubr.msk.f32.gmra.mrb[34].mxu1 %vm359_vm3, %v1934_v47 }
 0x871   :  { %3296 = vmatprep.mubr.msk.f32.mxu1 %vm359_vm3, %v1935_v62 }
 0x874   :  { %3297 = vmatmul.mubr.msk.f32.gmra.mrb[36].mxu1 %vm359_vm3, %v1936_v51 }
 0x875   :  { %3299 = vmatprep.mubr.msk.f32.mxu1 %vm359_vm3, %v1937_v41 }
 0x878   :  { %3300 = vmatmul.mubr.msk.f32.gmra.mrb[38].mxu1 %vm359_vm3, %v1938_v30 }
 0x93f   :  { %v3292_v15 = vpop.f32.mrb[32].mxu1 }
 0x940   :  { %v2053_v46 = vpop.f32.mrb[33].mxu1 }
 0x941   :  { %v2092_v54 = vpack.c.bf16 %v3292_v15, %v2053_v46 }
 0x943   :  { %v3295_v55 = vpop.f32.mrb[34].mxu1  ;;  %3304 = vmatprep.mubr.msk.bf16.mxu1 %vm213_vm1, %v2092_v54 }
 0x944   :  { %v2063_v44 = vpop.f32.mrb[35].mxu1 }
 0x945   :  { %v2093_v22 = vpack.c.bf16 %v3295_v55, %v2063_v44 }
 0x947   :  { %v3298_v38 = vpop.f32.mrb[36].mxu1  ;;  %3305 = vmatmul.mubr.msk.bf16.vlgmr.msra.gmra.mrb[16].mxu1 %vm213_vm1, %v2093_v22 }
 0x948   :  { %v2073_v37 = vpop.f32.mrb[37].mxu1 }
 0x949   :  { %v2094_v57 = vpack.c.bf16 %v3298_v38, %v2073_v37 }
 0x94b   :  { %v3301_v59 = vpop.f32.mrb[38].mxu1  ;;  %3308 = vmatprep.mubr.msk.bf16.mxu1 %vm213_vm1, %v2094_v57 }
 0x94c   :  { %v2083_v7 = vpop.f32.mrb[39].mxu1 }
 0x94d   :  { %v2095_v3 = vpack.c.bf16 %v3301_v59, %v2083_v7 }
 0x94f   :  { %3309 = vmatmul.mubr.msk.bf16.gmra.mrb[20].mxu1 %vm213_vm1, %v2095_v3 }
 0xa1a   :  { %v3306_v53 = vpop.f32.mrb[16].mxu1 }
 0xa1b   :  { %v2145_v11 = vpop.f32.mrb[17].mxu1  ;;  %v2193_v26 = vadd.f32 %v3306_v53, %v2847_v1 }
 0xa1c   :  { %v2191_v40 = vadd.f32 %v2847_v1, %v2145_v11  ;;  %v3307_v31 = vpop.f32.mrb[18].mxu1 }
 0xa1d   :  { %v2148_v4 = vpop.f32.mrb[19].mxu1  ;;  %v2194_v43 = vadd.f32 %v3307_v31, %v2847_v1  ;;  %v2201_v42 = vadd.f32 %v2193_v26, %v3986_v9  ;;  %v4998_v9 = vld [vmem:[#allocation4_spill] sm:$0xff] }
 0xa1e   :  { %v2199_v21 = vadd.f32 %v2191_v40, %v3976_v5  ;;  %v2192_v16 = vadd.f32 %v2847_v1, %v2148_v4 }
 0xa1f   :  { %v2202_v23 = vadd.f32 %v2194_v43, %v4997_v24  ;;  %v2213_v5 = vsel %vm91_vm0, %v2201_v42, 0.0 }
 0xa20   :  { %v2200_v32 = vadd.f32 %v2192_v16, %v4996_v28  ;;  %v2207_v61 = vsel %vm91_vm0, %v2199_v21, 0.0 }
 0xa21   :  { %2208 = vadd.xlane.f32.xlu1 %v2207_v61  ;;  %v2216_v10 = vsel %vm91_vm0, %v2202_v23, 0.0 }
 0xa22   :  { %v3310_v17 = vpop.f32.mrb[20].mxu1  ;;  %v2210_v14 = vsel %vm91_vm0, %v2200_v32, 0.0 }
 0xa23   :  { %2211 = vadd.xlane.f32.xlu0 %v2210_v14  ;;  %v2161_v20 = vpop.f32.mrb[21].mxu1  ;;  %v2197_v25 = vadd.f32 %v3310_v17, %v2847_v1  ;;  %v3702_v17 = vld [vmem:[%s4969_s8 + $0x8] sm:$0xff]   ;;  %v4796_v14 = vld [vmem:[%s4970_s10] sm:$0xff]  }
 0xa24   :  { %v2195_v29 = vadd.f32 %v2847_v1, %v2161_v20  ;;  %v3311_v50 = vpop.f32.mrb[22].mxu1 }
 0xa25   :  { %2214 = vadd.xlane.f32.xlu1 %v2213_v5  ;;  %v2164_v33 = vpop.f32.mrb[23].mxu1  ;;  %v2198_v12 = vadd.f32 %v3311_v50, %v2847_v1  ;;  %v2205_v56 = vadd.f32 %v2197_v25, %v4999_v8 }
 0xa26   :  { %v2203_v19 = vadd.f32 %v2195_v29, %v4998_v9  ;;  %v2196_v13 = vadd.f32 %v2847_v1, %v2164_v33 }
 0xa27   :  { %2217 = vadd.xlane.f32.xlu0 %v2216_v10  ;;  %v2206_v36 = vadd.f32 %v2198_v12, %v5001_v63  ;;  %v2225_v35 = vsel %vm91_vm0, %v2205_v56, 0.0 }
 0xa28   :  { %v2204_v58 = vadd.f32 %v2196_v13, %v5000_v34  ;;  %v2219_v45 = vsel %vm91_vm0, %v2203_v19, 0.0 }
 0xa29   :  { %2220 = vadd.xlane.f32.xlu1 %v2219_v45  ;;  %v2228_v60 = vsel %vm91_vm0, %v2206_v36, 0.0 }
 0xa2a   :  { %v2222_v18 = vsel %vm91_vm0, %v2204_v58, 0.0 }
 0xa2b   :  { %2223 = vadd.xlane.f32.xlu0 %v2222_v18 }
 0xa2d   :  { %2226 = vadd.xlane.f32.xlu1 %v2225_v35 }
 0xa2f   :  { %2229 = vadd.xlane.f32.xlu0 %v2228_v60 }
 0xaae   :  { %v2209_v49 = vpop.xlane.xlu1 %2208 }
 0xaaf   :  { %v2232_v39 = vmul.f32 0.03125, %v2209_v49 }
 0xab0   :  { %v2212_v6 = vpop.xlane.xlu0 %2211 }
 0xab1   :  { %v4747_v52 = vsub.f32 %v2199_v21, %v2232_v39  ;;  %v2233_v0 = vmul.f32 0.03125, %v2212_v6  ;;  %v2848_v39 = vld [vmem:[%s4971_s6] ss:$0 sm:$0xff] }
 0xab2   :  { %v2215_v47 = vpop.xlane.xlu1 %2214 }
 0xab3   :  { %v4749_v27 = vsub.f32 %v2200_v32, %v2233_v0  ;;  %v2234_v62 = vmul.f32 0.03125, %v2215_v47  ;;  %v2248_v48 = vmul.f32 %v4747_v52, %v4747_v52 }
 0xab4   :  { %v2218_v51 = vpop.xlane.xlu0 %2217 }
 0xab5   :  { %v4753_v2 = vsub.f32 %v2201_v42, %v2234_v62  ;;  %v2235_v41 = vmul.f32 0.03125, %v2218_v51  ;;  %v2256_v30 = vsel %vm91_vm0, %v2248_v48, 0.0  ;;  %v2249_v15 = vmul.f32 %v4749_v27, %v4749_v27 }
 0xab6   :  { %2257 = vadd.xlane.f32.xlu1 %v2256_v30  ;;  %v2221_v46 = vpop.xlane.xlu1 %2220 }
 0xab7   :  { %v4758_v54 = vsub.f32 %v2202_v23, %v2235_v41  ;;  %v2236_v55 = vmul.f32 0.03125, %v2221_v46  ;;  %v2259_v44 = vsel %vm91_vm0, %v2249_v15, 0.0  ;;  %v2250_v22 = vmul.f32 %v4753_v2, %v4753_v2  ;;  %v3701_v23 = vld [vmem:[%s4969_s8] sm:$0xff]  }
 0xab8   :  { %2260 = vadd.xlane.f32.xlu0 %v2259_v44  ;;  %v2224_v38 = vpop.xlane.xlu0 %2223  ;;  %3312 = vmatprep.subr.bf16.mxu0 %v3701_v23  ;;  %v2849_v15 = vld [vmem:[%s4972_s7] ss:$0 sm:$0xff] }
 0xab9   :  { %v4763_v37 = vsub.f32 %v2203_v19, %v2236_v55  ;;  %v2237_v57 = vmul.f32 0.03125, %v2224_v38  ;;  %v2262_v59 = vsel %vm91_vm0, %v2250_v22, 0.0  ;;  %v2251_v7 = vmul.f32 %v4758_v54, %v4758_v54  ;;  %3313 = vmatpush3.bf16.msra.mxu0 %v3701_v23 }
 0xaba   :  { %2263 = vadd.xlane.f32.xlu1 %v2262_v59  ;;  %v2227_v3 = vpop.xlane.xlu1 %2226  ;;  %3314 = vmatprep.subr.bf16.mxu0 %v3702_v17 }
 0xabb   :  { %v4768_v1 = vsub.f32 %v2204_v58, %v2237_v57  ;;  %v2238_v53 = vmul.f32 0.03125, %v2227_v3  ;;  %v2265_v11 = vsel %vm91_vm0, %v2251_v7, 0.0  ;;  %v2252_v26 = vmul.f32 %v4763_v37, %v4763_v37 }
 0xabc   :  { %2266 = vadd.xlane.f32.xlu0 %v2265_v11  ;;  %v2230_v40 = vpop.xlane.xlu0 %2229 }
 0xabd   :  { %v4773_v31 = vsub.f32 %v2205_v56, %v2238_v53  ;;  %v2239_v4 = vmul.f32 0.03125, %v2230_v40  ;;  %v2268_v21 = vsel %vm91_vm0, %v2252_v26, 0.0  ;;  %v2253_v43 = vmul.f32 %v4768_v1, %v4768_v1  ;;  %3315 = vmatpush3.bf16.msra.mxu0 %v3702_v17 }
 0xabe   :  { %2269 = vadd.xlane.f32.xlu1 %v2268_v21  ;;  %3324 = vmatprep.subr.bf16.mxu0 %v4796_v14 }
 0xabf   :  { %v4778_v16 = vsub.f32 %v2206_v36, %v2239_v4  ;;  %v2271_v42 = vsel %vm91_vm0, %v2253_v43, 0.0  ;;  %v2254_v28 = vmul.f32 %v4773_v31, %v4773_v31  ;;  %v3704_v43 = vld [vmem:[%s4970_s10 + $0x8] sm:$0xff]  }
 0xac0   :  { %2272 = vadd.xlane.f32.xlu0 %v2271_v42 }
 0xac1   :  { %v2274_v32 = vsel %vm91_vm0, %v2254_v28, 0.0  ;;  %v2255_v61 = vmul.f32 %v4778_v16, %v4778_v16 }
 0xac2   :  { %2275 = vadd.xlane.f32.xlu1 %v2274_v32 }
 0xac3   :  { %v2277_v24 = vsel %vm91_vm0, %v2255_v61, 0.0 }
 0xac4   :  { %2278 = vadd.xlane.f32.xlu0 %v2277_v24 }
 0xb43   :  { %v2258_v20 = vpop.xlane.xlu1 %2257 }
 0xb44   :  { %v2280_v25 = vmul.f32 0.03125, %v2258_v20  ;;  %v3706_v20 = vld [vmem:[%s4970_s10 + $0x18] sm:$0xff]  }
 0xb45   :  { %v2261_v29 = vpop.xlane.xlu0 %2260 }
 0xb46   :  { %v2288_v50 = vadd.f32 1e-05, %v2280_v25  ;;  %v2281_v5 = vmul.f32 0.03125, %v2261_v29  ;;  %v2850_v25 = vld [vmem:[%s4973_s9] ss:$0 sm:$0xff] }
 0xb47   :  { %v2264_v33 = vpop.xlane.xlu1 %2263 }
 0xb48   :  { %3835 = vrsqrt.f32 %v2288_v50  ;;  %v2289_v9 = vadd.f32 1e-05, %v2281_v5  ;;  %v2282_v19 = vmul.f32 0.03125, %v2264_v33 }
 0xb49   :  { %v2267_v12 = vpop.xlane.xlu0 %2266 }
 0xb4a   :  { %3837 = vrsqrt.f32 %v2289_v9  ;;  %v2290_v13 = vadd.f32 1e-05, %v2282_v19  ;;  %v2283_v10 = vmul.f32 0.03125, %v2267_v12 }
 0xb4b   :  { %v2270_v8 = vpop.xlane.xlu1 %2269 }
 0xb4c   :  { %3839 = vrsqrt.f32 %v2290_v13  ;;  %v2291_v56 = vadd.f32 1e-05, %v2283_v10  ;;  %v2284_v34 = vmul.f32 0.03125, %v2270_v8 }
 0xb4d   :  { %v2273_v58 = vpop.xlane.xlu0 %2272 }
 0xb4e   :  { %3841 = vrsqrt.f32 %v2291_v56  ;;  %v2292_v45 = vadd.f32 1e-05, %v2284_v34  ;;  %v2285_v63 = vmul.f32 0.03125, %v2273_v58 }
 0xb4f   :  { %v2276_v36 = vpop.xlane.xlu1 %2275 }
 0xb50   :  { %3843 = vrsqrt.f32 %v2292_v45  ;;  %v2293_v18 = vadd.f32 1e-05, %v2285_v63  ;;  %v2286_v35 = vmul.f32 0.03125, %v2276_v36 }
 0xb51   :  { %v2279_v60 = vpop.xlane.xlu0 %2278 }
 0xb52   :  { %v3836_v49 = vpop.eup %3835  ;;  %3845 = vrsqrt.f32 %v2293_v18  ;;  %v2294_v6 = vadd.f32 1e-05, %v2286_v35  ;;  %v2287_v0 = vmul.f32 0.03125, %v2279_v60 }
 0xb53   :  { %v2304_v47 = vmul.f32 %v3836_v49, %v4747_v52 }
 0xb54   :  { %v3838_v62 = vpop.eup %3837  ;;  %3847 = vrsqrt.f32 %v2294_v6  ;;  %v2295_v48 = vadd.f32 1e-05, %v2287_v0 }
 0xb55   :  { %v2305_v51 = vmul.f32 %v3838_v62, %v4749_v27  ;;  %v2319_v41 = vmul.f32 %v2848_v39, %v2304_v47 }
 0xb56   :  { %v3840_v30 = vpop.eup %3839  ;;  %3849 = vrsqrt.f32 %v2295_v48 }
 0xb57   :  { %v2306_v46 = vmul.f32 %v3840_v30, %v4753_v2  ;;  %v2320_v55 = vmul.f32 %v2848_v39, %v2305_v51  ;;  %v4809_v52 = vadd.f32 %v2849_v15, %v2319_v41  ;;  %v2857_v30 = vld [vmem:[%s4974_s11] ss:$0 sm:$0xff] }
 0xb58   :  { %v3842_v44 = vpop.eup %3841 }
 0xb59   :  { %v2321_v22 = vmul.f32 %v2848_v39, %v2306_v46  ;;  %v2307_v38 = vmul.f32 %v3842_v44, %v4758_v54  ;;  %v4811_v57 = vadd.f32 %v2849_v15, %v2320_v55 }
 0xb5a   :  { %v3844_v59 = vpop.eup %3843 }
 0xb5b   :  { %v2322_v27 = vmul.f32 %v2848_v39, %v2307_v38  ;;  %v2308_v7 = vmul.f32 %v3844_v59, %v4763_v37  ;;  %v2342_v3 = vpack.c.bf16 %v4811_v57, %v4809_v52  ;;  %v4816_v11 = vadd.f32 %v2849_v15, %v2321_v22 }
 0xb5c   :  { %v3846_v53 = vpop.eup %3845 }
 0xb5d   :  { %v4818_v2 = vadd.f32 %v2849_v15, %v2322_v27  ;;  %v2309_v26 = vmul.f32 %v3846_v53, %v4768_v1  ;;  %3316 = vmatprep.mubr.msk.bf16.mxu0 %vm91_vm0, %v2342_v3  ;;  %v2323_v54 = vmul.f32 %v2848_v39, %v2308_v7 }
 0xb5e   :  { %v3848_v40 = vpop.eup %3847 }
 0xb5f   :  { %v2310_v4 = vmul.f32 %v3848_v40, %v4773_v31  ;;  %v2343_v21 = vpack.c.bf16 %v4818_v2, %v4816_v11  ;;  %v2324_v37 = vmul.f32 %v2848_v39, %v2309_v26  ;;  %v4830_v1 = vadd.f32 %v2849_v15, %v2323_v54 }
 0xb60   :  { %v3850_v42 = vpop.eup %3849 }
 0xb61   :  { %v2311_v28 = vmul.f32 %v3850_v42, %v4778_v16  ;;  %3317 = vmatmul.mubr.msk.bf16.vlgmr.msra.gmra.mrb[40].mxu0 %vm91_vm0, %v2343_v21  ;;  %v4832_v32 = vadd.f32 %v2849_v15, %v2324_v37  ;;  %v2325_v61 = vmul.f32 %v2848_v39, %v2310_v4 }
 0xb62   :  { %3325 = vmatpush3.bf16.msra.mxu0 %v4796_v14  ;;  %v3705_v14 = vld [vmem:[%s4970_s10 + $0x10] sm:$0xff]  }
 0xb63   :  { %v2344_v31 = vpack.c.bf16 %v4832_v32, %v4830_v1  ;;  %v2326_v24 = vmul.f32 %v2848_v39, %v2311_v28  ;;  %3326 = vmatprep.subr.bf16.mxu0 %v3704_v43  ;;  %v4838_v23 = vadd.f32 %v2849_v15, %v2325_v61 }
 0xb65   :  { %3320 = vmatprep.mubr.msk.bf16.mxu0 %vm91_vm0, %v2344_v31  ;;  %v4840_v17 = vadd.f32 %v2849_v15, %v2326_v24 }
 0xb66   :  { %3327 = vmatpush3.bf16.msra.mxu0 %v3704_v43 }
 0xb67   :  { %v2345_v16 = vpack.c.bf16 %v4840_v17, %v4838_v23  ;;  %3328 = vmatprep.subr.bf16.mxu0 %v3705_v14 }
 0xb69   :  { %3321 = vmatmul.mubr.msk.bf16.gmra.mrb[44].mxu0 %vm91_vm0, %v2345_v16 }
 0xb6a   :  { %3329 = vmatpush3.bf16.msra.mxu0 %v3705_v14 }
 0xb6b   :  { %3330 = vmatprep.subr.bf16.mxu0 %v3706_v20 }
 0xb6e   :  { %3331 = vmatpush3.bf16.msra.mxu0 %v3706_v20 }
 0xc34   :  { %v3318_v29 = vpop.f32.mrb[40].mxu0 }
 0xc35   :  { %v2424_v50 = vadd.f32 %v3318_v29, %v2850_v25  ;;  %v2415_v5 = vpop.f32.mrb[41].mxu0 }
 0xc36   :  { %v2416_v33 = vadd.f32 %v2850_v25, %v2415_v5  ;;  %v3319_v9 = vpop.f32.mrb[42].mxu0 }
 0xc37   :  { %v2427_v19 = vadd.f32 %v3319_v9, %v2850_v25  ;;  %v2418_v12 = vpop.f32.mrb[43].mxu0  ;;  %v2448_v10 = vmax.f32 %v2424_v50, 0.0 }
 0xc38   :  { %v2419_v13 = vadd.f32 %v2850_v25, %v2418_v12  ;;  %v2446_v56 = vmax.f32 %v2416_v33, 0.0 }
 0xc39   :  { %v2449_v8 = vmax.f32 %v2427_v19, 0.0 }
 0xc3a   :  { %v2447_v34 = vmax.f32 %v2419_v13, 0.0 }
 0xc3b   :  { %v2455_v58 = vpack.c.bf16 %v2449_v8, %v2448_v10 }
 0xc3c   :  { %v2454_v45 = vpack.c.bf16 %v2447_v34, %v2446_v56  ;;  %v3322_v63 = vpop.f32.mrb[44].mxu0 }
 0xc3d   :  { %v2440_v36 = vadd.f32 %v3322_v63, %v2850_v25  ;;  %v2431_v18 = vpop.f32.mrb[45].mxu0 }
 0xc3e   :  { %v2432_v35 = vadd.f32 %v2850_v25, %v2431_v18  ;;  %v3323_v60 = vpop.f32.mrb[46].mxu0  ;;  %3332 = vmatprep.mubr.msk.bf16.mxu0 %vm359_vm3, %v2454_v45 }
 0xc3f   :  { %v2443_v49 = vadd.f32 %v3323_v60, %v2850_v25  ;;  %v2434_v39 = vpop.f32.mrb[47].mxu0  ;;  %3333 = vmatmul.mubr.msk.bf16.vlgmr.msra.gmra.mrb[48].mxu0 %vm359_vm3, %v2455_v58  ;;  %v2452_v0 = vmax.f32 %v2440_v36, 0.0 }
 0xc40   :  { %v2435_v6 = vadd.f32 %v2850_v25, %v2434_v39  ;;  %v2450_v62 = vmax.f32 %v2432_v35, 0.0 }
 0xc41   :  { %v2453_v47 = vmax.f32 %v2443_v49, 0.0 }
 0xc42   :  { %v2451_v48 = vmax.f32 %v2435_v6, 0.0 }
 0xc43   :  { %v2457_v51 = vpack.c.bf16 %v2453_v47, %v2452_v0 }
 0xc44   :  { %v2456_v41 = vpack.c.bf16 %v2451_v48, %v2450_v62 }
 0xc46   :  { %3336 = vmatprep.mubr.msk.bf16.mxu0 %vm359_vm3, %v2456_v41 }
 0xc47   :  { %3337 = vmatmul.mubr.msk.bf16.gmra.mrb[52].mxu0 %vm359_vm3, %v2457_v51 }
 0xd12   :  { %v3334_v15 = vpop.f32.mrb[48].mxu0 }
 0xd13   :  { %v2552_v46 = vadd.f32 %v3334_v15, %v2857_v30  ;;  %v2543_v55 = vpop.f32.mrb[49].mxu0 }
 0xd14   :  { %v2544_v44 = vadd.f32 %v2857_v30, %v2543_v55  ;;  %v3335_v22 = vpop.f32.mrb[50].mxu0 }
 0xd15   :  { %v2576_v38 = vadd.f32 %v2552_v46, %v4816_v11  ;;  %v2555_v59 = vadd.f32 %v3335_v22, %v2857_v30  ;;  %v2546_v27 = vpop.f32.mrb[51].mxu0 }
 0xd16   :  { %v2547_v7 = vadd.f32 %v2857_v30, %v2546_v27  ;;  %v2574_v3 = vadd.f32 %v2544_v44, %v4809_v52 }
 0xd17   :  { %v2577_v53 = vadd.f32 %v2555_v59, %v4818_v2  ;;  %v2588_v26 = vsel %vm91_vm0, %v2576_v38, 0.0 }
 0xd18   :  { %2589 = vadd.xlane.f32.xlu1 %v2588_v26  ;;  %v2575_v54 = vadd.f32 %v2547_v7, %v4811_v57  ;;  %v2582_v37 = vsel %vm91_vm0, %v2574_v3, 0.0 }
 0xd19   :  { %v2591_v40 = vsel %vm91_vm0, %v2577_v53, 0.0 }
 0xd1a   :  { %2592 = vadd.xlane.f32.xlu0 %v2591_v40  ;;  %v3338_v4 = vpop.f32.mrb[52].mxu0  ;;  %v2585_v52 = vsel %vm91_vm0, %v2575_v54, 0.0 }
 0xd1b   :  { %v2559_v21 = vpop.f32.mrb[53].mxu0  ;;  %v2568_v11 = vadd.f32 %v3338_v4, %v2857_v30 }
 0xd1c   :  { %v2560_v43 = vadd.f32 %v2857_v30, %v2559_v21  ;;  %2583 = vadd.xlane.f32.xlu1 %v2582_v37  ;;  %v3339_v42 = vpop.f32.mrb[54].mxu0 }
 0xd1d   :  { %v2562_v28 = vpop.f32.mrb[55].mxu0  ;;  %v2571_v61 = vadd.f32 %v3339_v42, %v2857_v30  ;;  %v2580_v57 = vadd.f32 %v2568_v11, %v4838_v23 }
 0xd1e   :  { %v2578_v2 = vadd.f32 %v2560_v43, %v4830_v1  ;;  %v2563_v31 = vadd.f32 %v2857_v30, %v2562_v28  ;;  %2586 = vadd.xlane.f32.xlu0 %v2585_v52 }
 0xd1f   :  { %v2581_v14 = vadd.f32 %v2571_v61, %v4840_v17  ;;  %v2600_v25 = vsel %vm91_vm0, %v2580_v57, 0.0 }
 0xd20   :  { %v2579_v24 = vadd.f32 %v2563_v31, %v4832_v32  ;;  %v2594_v16 = vsel %vm91_vm0, %v2578_v2, 0.0 }
 0xd21   :  { %2595 = vadd.xlane.f32.xlu1 %v2594_v16  ;;  %v2603_v1 = vsel %vm91_vm0, %v2581_v14, 0.0 }
 0xd22   :  { %v2597_v20 = vsel %vm91_vm0, %v2579_v24, 0.0 }
 0xd23   :  { %2598 = vadd.xlane.f32.xlu0 %v2597_v20  ;;  %v2866_v20 = vld [vmem:[%s4975_s12] ss:$0 sm:$0xff] }
 0xd25   :  { %2601 = vadd.xlane.f32.xlu1 %v2600_v25 }
 0xd27   :  { %2604 = vadd.xlane.f32.xlu0 %v2603_v1 }
 0xda5   :  { %v2590_v29 = vpop.xlane.xlu1 %2589 }
 0xda6   :  { %v2608_v50 = vmul.f32 0.03125, %v2590_v29 }
 0xda7   :  { %v2593_v5 = vpop.xlane.xlu0 %2592 }
 0xda8   :  { %v4877_v23 = vsub.f32 %v2576_v38, %v2608_v50  ;;  %v2609_v32 = vmul.f32 0.03125, %v2593_v5 }
 0xda9   :  { %v2584_v33 = vpop.xlane.xlu1 %2583 }
 0xdaa   :  { %v4879_v9 = vsub.f32 %v2577_v53, %v2609_v32  ;;  %v2606_v19 = vmul.f32 0.03125, %v2584_v33  ;;  %v2624_v17 = vmul.f32 %v4877_v23, %v4877_v23  ;;  %v2867_v32 = vld [vmem:[%s4976_s13] ss:$0 sm:$0xff] }
 0xdab   :  { %v2587_v12 = vpop.xlane.xlu0 %2586 }
 0xdac   :  { %v4883_v13 = vsub.f32 %v2574_v3, %v2606_v19  ;;  %v2607_v10 = vmul.f32 0.03125, %v2587_v12  ;;  %v2636_v8 = vsel %vm91_vm0, %v2624_v17, 0.0  ;;  %v2625_v56 = vmul.f32 %v4879_v9, %v4879_v9 }
 0xdad   :  { %2637 = vadd.xlane.f32.xlu1 %v2636_v8 }
 0xdae   :  { %v4888_v34 = vsub.f32 %v2575_v54, %v2607_v10  ;;  %v2596_v58 = vpop.xlane.xlu1 %2595  ;;  %v2639_v45 = vsel %vm91_vm0, %v2625_v56, 0.0  ;;  %v2622_v63 = vmul.f32 %v4883_v13, %v4883_v13 }
 0xdaf   :  { %v2610_v36 = vmul.f32 0.03125, %v2596_v58  ;;  %2640 = vadd.xlane.f32.xlu0 %v2639_v45 }
 0xdb0   :  { %v2599_v18 = vpop.xlane.xlu0 %2598  ;;  %v2630_v35 = vsel %vm91_vm0, %v2622_v63, 0.0  ;;  %v2623_v60 = vmul.f32 %v4888_v34, %v4888_v34 }
 0xdb1   :  { %v4896_v49 = vsub.f32 %v2578_v2, %v2610_v36  ;;  %v2611_v39 = vmul.f32 0.03125, %v2599_v18  ;;  %2631 = vadd.xlane.f32.xlu1 %v2630_v35 }
 0xdb2   :  { %v2602_v6 = vpop.xlane.xlu1 %2601  ;;  %v2633_v0 = vsel %vm91_vm0, %v2623_v60, 0.0 }
 0xdb3   :  { %v4899_v47 = vsub.f32 %v2579_v24, %v2611_v39  ;;  %v2612_v62 = vmul.f32 0.03125, %v2602_v6  ;;  %2634 = vadd.xlane.f32.xlu0 %v2633_v0  ;;  %v2626_v48 = vmul.f32 %v4896_v49, %v4896_v49 }
 0xdb4   :  { %v2605_v51 = vpop.xlane.xlu0 %2604 }
 0xdb5   :  { %v4903_v41 = vsub.f32 %v2580_v57, %v2612_v62  ;;  %v2613_v30 = vmul.f32 0.03125, %v2605_v51  ;;  %v2642_v15 = vsel %vm91_vm0, %v2626_v48, 0.0  ;;  %v2627_v46 = vmul.f32 %v4899_v47, %v4899_v47 }
 0xdb6   :  { %2643 = vadd.xlane.f32.xlu1 %v2642_v15 }
 0xdb7   :  { %v4908_v55 = vsub.f32 %v2581_v14, %v2613_v30  ;;  %v2645_v44 = vsel %vm91_vm0, %v2627_v46, 0.0  ;;  %v2628_v22 = vmul.f32 %v4903_v41, %v4903_v41 }
 0xdb8   :  { %2646 = vadd.xlane.f32.xlu0 %v2645_v44 }
 0xdb9   :  { %v2648_v38 = vsel %vm91_vm0, %v2628_v22, 0.0  ;;  %v2629_v59 = vmul.f32 %v4908_v55, %v4908_v55 }
 0xdba   :  { %2649 = vadd.xlane.f32.xlu1 %v2648_v38 }
 0xdbb   :  { %v2651_v27 = vsel %vm91_vm0, %v2629_v59, 0.0 }
 0xdbc   :  { %2652 = vadd.xlane.f32.xlu0 %v2651_v27 }
 0xe3a   :  { %v2638_v7 = vpop.xlane.xlu1 %2637 }
 0xe3b   :  { %v2656_v3 = vmul.f32 0.03125, %v2638_v7 }
 0xe3c   :  { %v2641_v53 = vpop.xlane.xlu0 %2640 }
 0xe3d   :  { %v2664_v26 = vadd.f32 1e-05, %v2656_v3  ;;  %v2657_v54 = vmul.f32 0.03125, %v2641_v53 }
 0xe3e   :  { %v2632_v40 = vpop.xlane.xlu1 %2631 }
 0xe3f   :  { %3851 = vrsqrt.f32 %v2664_v26  ;;  %v2665_v4 = vadd.f32 1e-05, %v2657_v54  ;;  %v2654_v21 = vmul.f32 0.03125, %v2632_v40 }
 0xe40   :  { %v2635_v37 = vpop.xlane.xlu0 %2634 }
 0xe41   :  { %3853 = vrsqrt.f32 %v2665_v4  ;;  %v2662_v11 = vadd.f32 1e-05, %v2654_v21  ;;  %v2655_v43 = vmul.f32 0.03125, %v2635_v37 }
 0xe43   :  { %3855 = vrsqrt.f32 %v2662_v11  ;;  %v2663_v42 = vadd.f32 1e-05, %v2655_v43  ;;  %v2644_v28 = vpop.xlane.xlu1 %2643 }
 0xe44   :  { %v2658_v52 = vmul.f32 0.03125, %v2644_v28 }
 0xe45   :  { %3857 = vrsqrt.f32 %v2663_v42  ;;  %v2647_v2 = vpop.xlane.xlu0 %2646 }
 0xe46   :  { %v2666_v61 = vadd.f32 1e-05, %v2658_v52  ;;  %v2659_v31 = vmul.f32 0.03125, %v2647_v2 }
 0xe47   :  { %v2650_v57 = vpop.xlane.xlu1 %2649 }
 0xe48   :  { %3859 = vrsqrt.f32 %v2666_v61  ;;  %v2667_v24 = vadd.f32 1e-05, %v2659_v31  ;;  %v2660_v16 = vmul.f32 0.03125, %v2650_v57 }
 0xe49   :  { %v3852_v14 = vpop.eup %3851  ;;  %v2653_v25 = vpop.xlane.xlu0 %2652 }
 0xe4a   :  { %v2680_v1 = vmul.f32 %v3852_v14, %v4877_v23  ;;  %3861 = vrsqrt.f32 %v2667_v24  ;;  %v2668_v29 = vadd.f32 1e-05, %v2660_v16  ;;  %v2661_v50 = vmul.f32 0.03125, %v2653_v25 }
 0xe4b   :  { %v3854_v5 = vpop.eup %3853 }
 0xe4c   :  { %v2695_v33 = vmul.f32 %v2866_v20, %v2680_v1  ;;  %v2681_v19 = vmul.f32 %v3854_v5, %v4879_v9  ;;  %3863 = vrsqrt.f32 %v2668_v29  ;;  %v2669_v17 = vadd.f32 1e-05, %v2661_v50 }
 0xe4d   :  { %v3856_v12 = vpop.eup %3855 }
 0xe4e   :  { %v2710_v10 = vadd.f32 %v2867_v32, %v2695_v33  ;;  %v2696_v8 = vmul.f32 %v2866_v20, %v2681_v19  ;;  %v2678_v56 = vmul.f32 %v3856_v12, %v4883_v13  ;;  %3865 = vrsqrt.f32 %v2669_v17 }
 0xe4f   :  { %v3858_v23 = vpop.eup %3857 }
 0xe50   :  { %2718 = vst.msk [vmem:[%s4977_s14 + $0x10] sm:$0xff] %vm91_vm0, %v2710_v10  ;;  %v2711_v58 = vadd.f32 %v2867_v32, %v2696_v8  ;;  %v2693_v45 = vmul.f32 %v2866_v20, %v2678_v56  ;;  %v2679_v63 = vmul.f32 %v3858_v23, %v4888_v34 }
 0xe52   :  { %v3860_v36 = vpop.eup %3859  ;;  %2719 = vst.msk [vmem:[%s4977_s14 + $0x18] sm:$0xff] %vm91_vm0, %v2711_v58  ;;  %v2708_v9 = vadd.f32 %v2867_v32, %v2693_v45  ;;  %v2694_v18 = vmul.f32 %v2866_v20, %v2679_v63 }
 0xe53   :  { %v2682_v13 = vmul.f32 %v3860_v36, %v4896_v49 }
 0xe54   :  { %v3862_v35 = vpop.eup %3861  ;;  %2716 = vst.msk [vmem:[%s4977_s14] sm:$0xff] %vm91_vm0, %v2708_v9  ;;  %v2709_v60 = vadd.f32 %v2867_v32, %v2694_v18 }
 0xe55   :  { %v2697_v39 = vmul.f32 %v2866_v20, %v2682_v13  ;;  %v2683_v34 = vmul.f32 %v3862_v35, %v4899_v47 }
 0xe56   :  { %v3864_v6 = vpop.eup %3863  ;;  %2717 = vst.msk [vmem:[%s4977_s14 + $0x8] sm:$0xff] %vm91_vm0, %v2709_v60 }
 0xe57   :  { %v2712_v0 = vadd.f32 %v2867_v32, %v2697_v39  ;;  %v2698_v62 = vmul.f32 %v2866_v20, %v2683_v34  ;;  %v2684_v49 = vmul.f32 %v3864_v6, %v4903_v41 }
 0xe58   :  { %v3866_v48 = vpop.eup %3865 }
 0xe59   :  { %2720 = vst.msk [vmem:[%s4977_s14 + $0x20] sm:$0xff] %vm91_vm0, %v2712_v0  ;;  %v2713_v51 = vadd.f32 %v2867_v32, %v2698_v62  ;;  %v2699_v30 = vmul.f32 %v2866_v20, %v2684_v49  ;;  %v2685_v47 = vmul.f32 %v3866_v48, %v4908_v55 }
 0xe5b   :  { %2721 = vst.msk [vmem:[%s4977_s14 + $0x28] sm:$0xff] %vm91_vm0, %v2713_v51  ;;  %v2714_v15 = vadd.f32 %v2867_v32, %v2699_v30  ;;  %v2700_v46 = vmul.f32 %v2866_v20, %v2685_v47 }
 0xe5d   :  { %2722 = vst.msk [vmem:[%s4977_s14 + $0x30] sm:$0xff] %vm91_vm0, %v2714_v15  ;;  %v2715_v41 = vadd.f32 %v2867_v32, %v2700_v46 }
 0xe5f   :  { %2723 = vst.msk [vmem:[%s4977_s14 + $0x38] sm:$0xff] %vm91_vm0, %v2715_v41 }

</bundles_post_ra>
